<compile_context>
chip_gen: v6e
topology: v6e:2x2x1
jax: 0.10.0
libtpu: 0.0.40
codegen_flags: <defaults>
</compile_context>

<pallas_src>
import functools

import jax
import jax.numpy as jnp
from jax.experimental import pallas as pl
from jax.experimental.pallas import tpu as pltpu


def _round_up(x, m):
    return -(-x // m) * m


# --------------------------- fused server-tail kernel ------------------------

def _vgg_tail_kernel(x_ref, wc_ref, bc_ref, w1_ref, b1_ref, w2_ref, b2_ref,
                     w3_ref, b3_ref, o_ref, buf_a, buf_b, pool_buf,
                     *, n_convs, H, W, C):
    """One image per grid step.  Everything (convs, maxpool, classifier) stays
    in VMEM; only the input block and the logits cross HBM."""
    WP = W + 2                       # padded row pitch
    L = H * WP                       # rows of a conv output in row-flat layout
    HALO = WP + 1                    # flat offset of pixel (0, 0) in a padded buffer
    Ho, Wo = H // 2, W // 2
    PL = pool_buf.shape[0]

    # ---- stage the NHWC input into the zero-padded row-flat layout ----------
    buf_a[...] = jnp.zeros_like(buf_a)
    for y in range(H):
        buf_a[pl.ds((y + 1) * WP + 1, W), :] = x_ref[0, y].astype(buf_a.dtype)

    # 0 on the junk columns (x >= W) of a row-flat conv output, 1 elsewhere.
    col_ok = (jax.lax.broadcasted_iota(jnp.int32, (L, C), 0) % WP) < W

    def conv_relu(src_ref, li):
        """3x3 conv (padding=1) + bias + ReLU.  The 9 taps are static
        sublane-offset slices of the padded activation already resident in
        VMEM, accumulated in registers (SSA), f32 epilogue."""
        acc = None
        for t in range(9):
            off = (t // 3) * WP + (t % 3)
            lhs = src_ref[pl.ds(off, L), :].astype(jnp.bfloat16)
            part = jnp.dot(lhs, wc_ref[li, t], preferred_element_type=jnp.float32)
            acc = part if acc is None else acc + part
        return jnp.maximum(acc + bc_ref[li], 0.0)            # (L, C) f32

    def emit_padded(dst_ref, y):
        """Write a conv output directly in the next layer's zero-padded
        row-flat layout (halo rows + junk columns forced to zero)."""
        dst_ref[...] = jnp.zeros_like(dst_ref)
        dst_ref[pl.ds(HALO, L), :] = jnp.where(col_ok, y, 0.0).astype(dst_ref.dtype)

    src, dst = buf_a, buf_b
    for li in range(n_convs):
        emit_padded(dst, conv_relu(src, li))
        src, dst = dst, src
    # `src` now holds the last conv's output (padded row-flat, zero halo).

    # ---- fused 2x2 maxpool: four sublane-offset slices of the same buffer ---
    p = jnp.maximum(
        jnp.maximum(src[pl.ds(HALO, PL), :], src[pl.ds(HALO + 1, PL), :]),
        jnp.maximum(src[pl.ds(HALO + WP, PL), :], src[pl.ds(HALO + WP + 1, PL), :]))
    pool_buf[...] = p
    # pooled value of output position (i, j) sits at pool_buf row 2*WP*i + 2*j.

    # ---- classifier: Linear+ReLU -> Linear+ReLU -> Linear, all in VMEM ------
    # fc1 contracts over (position, channel) one pooled position at a time, so
    # the activation never needs a lane<->sublane relayout / flatten.
    # TODO(synk): Dropout is identity (eval-mode semantics).
    parts = []
    for i in range(Ho):
        for j in range(Wo):
            lhs = pool_buf[pl.ds(2 * WP * i + 2 * j, 1), :].astype(jnp.bfloat16)
            parts.append(jnp.dot(lhs, w1_ref[i * Wo + j],
                                 preferred_element_type=jnp.float32))
    acc = parts[0]
    for q in parts[1:]:
        acc = acc + q
    h = jnp.maximum(acc + b1_ref[...], 0.0)
    h = jnp.dot(h.astype(jnp.bfloat16), w2_ref[...],
                preferred_element_type=jnp.float32)
    h = jnp.maximum(h + b2_ref[...], 0.0)
    h = jnp.dot(h.astype(jnp.bfloat16), w3_ref[...],
                preferred_element_type=jnp.float32)
    o_ref[0] = h + b3_ref[...]


def forward(prepared, x_nchw):
    """Fused Pallas forward for the server tail (block5 + avgpool + classifier)."""
    N, Cin, H, W = x_nchw.shape
    wc = prepared['conv_w']
    n_convs, _, c_in, C = wc.shape
    assert c_in == Cin and C == Cin, "fused kernel expects C -> C convs"
    assert H % 2 == 0 and W % 2 == 0
    Ho, Wo = H // 2, W // 2
    n_classes = prepared['fc3_w'].shape[-1]
    assert prepared['fc1_w'].shape[0] == Ho * Wo, "avgpool(7,7) must be identity"

    WP = W + 2
    L = H * WP
    RP = _round_up(L + 2 * WP + 2, 8)                       # padded-buffer rows
    PL = _round_up(2 * WP * (Ho - 1) + 2 * (Wo - 1) + 1, 8)  # maxpool slab rows
    assert 2 * WP + 1 + PL <= RP                            # pool reads stay in range

    x = jnp.transpose(x_nchw, (0, 2, 3, 1)).astype(jnp.float32)   # NCHW -> NHWC

    kern = functools.partial(_vgg_tail_kernel, n_convs=n_convs, H=H, W=W, C=C)
    out = pl.pallas_call(
        kern,
        grid=(N,),
        in_specs=[
            pl.BlockSpec((1, H, W, Cin), lambda n: (n, 0, 0, 0)),
            pl.BlockSpec(wc.shape, lambda n: (0, 0, 0, 0)),          # conv taps
            pl.BlockSpec(prepared['conv_b'].shape, lambda n: (0, 0, 0)),
            pl.BlockSpec(prepared['fc1_w'].shape, lambda n: (0, 0, 0)),
            pl.BlockSpec(prepared['fc1_b'].shape, lambda n: (0, 0)),
            pl.BlockSpec(prepared['fc2_w'].shape, lambda n: (0, 0)),
            pl.BlockSpec(prepared['fc2_b'].shape, lambda n: (0, 0)),
            pl.BlockSpec(prepared['fc3_w'].shape, lambda n: (0, 0)),
            pl.BlockSpec(prepared['fc3_b'].shape, lambda n: (0, 0)),
        ],
        out_specs=pl.BlockSpec((1, 1, n_classes), lambda n: (n, 0, 0)),
        out_shape=jax.ShapeDtypeStruct((N, 1, n_classes), jnp.float32),
        scratch_shapes=[
            pltpu.VMEM((RP, C), jnp.float32),    # padded activation buffer A
            pltpu.VMEM((RP, C), jnp.float32),    # padded activation buffer B
            pltpu.VMEM((PL, C), jnp.float32),    # 2x2-maxpool result
        ],
        compiler_params=pltpu.CompilerParams(dimension_semantics=("parallel",)),
    )(x, wc, prepared['conv_b'],
      prepared['fc1_w'], prepared['fc1_b'],
      prepared['fc2_w'], prepared['fc2_b'],
      prepared['fc3_w'], prepared['fc3_b'])
    return out.reshape(N, n_classes)


# ------------------------------ model building -------------------------------

_BB = [0, 5, 10, 17, 24, 31]
_CFG = [4, 4, 'M', 8, 8, 'M', 16, 16, 16, 'M', 32, 32, 32, 'M', 32, 32, 32, 'M']


def vgg16_feature_layers(cfg):
    layers, in_c = [], 3
    for v in cfg:
        if v == 'M':
            layers.append(('maxpool',))
        else:
            layers.append(('conv', in_c, v))
            layers.append(('relu',))
            in_c = v
    return layers


def init_params(key, arc_config, num_classes=10, hidden=64):
    """Synthetic params in PyTorch-native layouts:
    Conv2d weight (Cout, Cin, 3, 3); Linear weight (out, in)."""
    layers = vgg16_feature_layers(_CFG)
    server_layers = layers[_BB[arc_config]:_BB[-1]]

    params = {'features': []}
    k = key
    for lyr in server_layers:
        if lyr[0] == 'conv':
            _, cin, cout = lyr
            k, k1, k2 = jax.random.split(k, 3)
            w = jax.random.normal(k1, (cout, cin, 3, 3), jnp.float32) * (
                0.3 / (3.0 * float(cin) ** 0.5))
            b = jax.random.normal(k2, (cout,), jnp.float32) * 0.01
            params['features'].append(('conv', w, b))
        else:
            params['features'].append((lyr[0],))

    c_last = 32                                    # last conv width in scaled cfg
    dims = [c_last * 7 * 7, hidden, hidden, num_classes]
    cls = []
    for i in range(3):
        k, k1, k2 = jax.random.split(k, 3)
        w = jax.random.normal(k1, (dims[i + 1], dims[i]), jnp.float32) * (
            1.0 / float(dims[i]) ** 0.5)
        b = jax.random.normal(k2, (dims[i + 1],), jnp.float32) * 0.01
        cls.append((w, b))
    params['classifier'] = cls

    in_channels = server_layers[0][1]              # bb boundaries start on a conv
    return params, in_channels


def prepare_params(params, pool_hw=(7, 7)):
    """One-time conversion to fused-kernel layouts.

    Conv weights -> stacked (n_convs, 9, Cin, Cout) bf16 taps (t = dy*3+dx);
    fc1 -> (ph*pw, C, hidden) bf16 with the torch (C, H, W) flatten order
    regrouped position-major; fc2/fc3 -> (in, out) bf16; biases stay f32.
    """
    feats = params['features']
    kinds = [l[0] for l in feats]
    n_convs = kinds.count('conv')
    if kinds != ['conv', 'relu'] * n_convs + ['maxpool']:
        # TODO(synk): other arc_config split points need the generic builder.
        raise NotImplementedError(f"unsupported server feature stack: {kinds}")

    convs = [l for l in feats if l[0] == 'conv']
    cout0, cin0 = convs[0][1].shape[0], convs[0][1].shape[1]
    for _, w, _ in convs:
        assert w.shape == (cout0, cin0, 3, 3), "fused kernel expects equal-width convs"

    wc = jnp.stack([jnp.transpose(w, (2, 3, 1, 0)).reshape(9, cin0, cout0)
                    for _, w, _ in convs]).astype(jnp.bfloat16)
    bc = jnp.stack([b.reshape(1, cout0) for _, _, b in convs]).astype(jnp.float32)

    (w1, b1), (w2, b2), (w3, b3) = params['classifier']
    ph, pw = pool_hw
    hid = w1.shape[0]
    c_last = w1.shape[1] // (ph * pw)
    w1k = jnp.transpose(w1).reshape(c_last, ph, pw, hid)        # torch (C,H,W) rows
    w1k = jnp.transpose(w1k, (1, 2, 0, 3)).reshape(ph * pw, c_last, hid)
    return {
        'conv_w': wc, 'conv_b': bc,
        'fc1_w': w1k.astype(jnp.bfloat16),
        'fc1_b': b1.reshape(1, -1).astype(jnp.float32),
        'fc2_w': jnp.transpose(w2).astype(jnp.bfloat16),
        'fc2_b': b2.reshape(1, -1).astype(jnp.float32),
        'fc3_w': jnp.transpose(w3).astype(jnp.bfloat16),
        'fc3_b': b3.reshape(1, -1).astype(jnp.float32),
    }


# ------------------------------ pure-JAX reference ---------------------------

def forward_reference(params, x_nchw):
    """Independent pure-JAX NCHW reference in PyTorch layouts (lax.conv,
    reshape pooling, torch-order flatten) with the same bf16-in /
    f32-accumulate numerics as the Pallas kernel."""
    x = x_nchw.astype(jnp.bfloat16)
    feats = params['features']
    i = 0
    while i < len(feats):
        lyr = feats[i]
        if lyr[0] == 'conv':
            _, w, b = lyr
            y = jax.lax.conv_general_dilated(
                x, w.astype(jnp.bfloat16), window_strides=(1, 1),
                padding='SAME', dimension_numbers=('NCHW', 'OIHW', 'NCHW'),
                preferred_element_type=jnp.float32)
            y = y + b.reshape(1, -1, 1, 1)
            if (i + 1 < len(feats)) and feats[i + 1][0] == 'relu':
                y = jnp.maximum(y, 0.0)
                i += 1
            x = y.astype(jnp.bfloat16)
            i += 1
        elif lyr[0] == 'relu':
            x = jnp.maximum(x, 0)
            i += 1
        else:                                                       # maxpool
            N, C, H, W = x.shape
            x = x.reshape(N, C, H // 2, 2, W // 2, 2).max(axis=(3, 5))
            i += 1
    # AdaptiveAvgPool2d((7,7)) is the identity at 7x7 input.
    x = x.reshape(x.shape[0], -1)                                   # (C,H,W) flatten
    (w1, b1), (w2, b2), (w3, b3) = params['classifier']
    h = jnp.dot(x, jnp.transpose(w1).astype(jnp.bfloat16),
                preferred_element_type=jnp.float32) + b1
    h = jnp.maximum(h, 0.0)
    h = jnp.dot(h.astype(jnp.bfloat16), jnp.transpose(w2).astype(jnp.bfloat16),
                preferred_element_type=jnp.float32) + b2
    h = jnp.maximum(h, 0.0)
    return jnp.dot(h.astype(jnp.bfloat16), jnp.transpose(w3).astype(jnp.bfloat16),
                   preferred_element_type=jnp.float32) + b3


# ---------------------------------- main --------------------------------------

if __name__ == "__main__":
    key = jax.random.PRNGKey(0)
    kp, kx = jax.random.split(key)

    arc_config = 4   # server owns VGG16 block5 + avgpool + classifier
    params, in_c = init_params(kp, arc_config)
    prepared = prepare_params(params)

    # Server input = activations after block4 (scaled widths), NCHW:
    # (batch=2, channels=32, 14, 14) -> block5 maxpool -> 7x7 -> avgpool 7x7 (id).
    x = jax.random.normal(kx, (2, in_c, 14, 14), jnp.float32)

    fwd = jax.jit(lambda xx: forward(prepared, xx))
    out = jax.block_until_ready(fwd(x))

    ref_fn = jax.jit(lambda xx: forward_reference(params, xx))
    ref = jax.block_until_ready(ref_fn(x))

    assert out.shape == (2, 10), out.shape
    assert jnp.allclose(out, ref, atol=3e-3, rtol=3e-3), (
        "mismatch vs reference: max |diff| = "
        f"{float(jnp.max(jnp.abs(out - ref)))}")

    print("KERNEL_OK")
</pallas_src>

<mosaic_0001>
module attributes {stable_mosaic.version = 11 : i64} {
  func.func @_vgg_tail_kernel(%arg0: i32, %arg1: memref<1x14x14x32xf32, #tpu.memory_space<vmem>>, %arg2: memref<3x9x32x32xbf16, #tpu.memory_space<vmem>>, %arg3: memref<3x1x32xf32, #tpu.memory_space<vmem>>, %arg4: memref<49x32x64xbf16, #tpu.memory_space<vmem>>, %arg5: memref<1x64xf32, #tpu.memory_space<vmem>>, %arg6: memref<64x64xbf16, #tpu.memory_space<vmem>>, %arg7: memref<1x64xf32, #tpu.memory_space<vmem>>, %arg8: memref<64x10xbf16, #tpu.memory_space<vmem>>, %arg9: memref<1x10xf32, #tpu.memory_space<vmem>>, %arg10: memref<1x1x10xf32, #tpu.memory_space<vmem>>, %arg11: memref<264x32xf32, #tpu.memory_space<vmem>>, %arg12: memref<264x32xf32, #tpu.memory_space<vmem>>, %arg13: memref<208x32xf32, #tpu.memory_space<vmem>>) attributes {dimension_semantics = [#tpu.dimension_semantics<parallel>], iteration_bounds = array<i64: 2>, scalar_prefetch = 0 : i64, scratch_operands = 3 : i64, tpu.core_type = #tpu.core_type<tc>, window_params = [{transform_indices = @transform_0, window_bounds = array<i64: 1, 14, 14, 32>}, {pipeline_mode = #tpu.pipeline_mode<synchronous>, transform_indices = @transform_1, window_bounds = array<i64: 3, 9, 32, 32>}, {pipeline_mode = #tpu.pipeline_mode<synchronous>, transform_indices = @transform_2, window_bounds = array<i64: 3, 1, 32>}, {pipeline_mode = #tpu.pipeline_mode<synchronous>, transform_indices = @transform_3, window_bounds = array<i64: 49, 32, 64>}, {pipeline_mode = #tpu.pipeline_mode<synchronous>, transform_indices = @transform_4, window_bounds = array<i64: 1, 64>}, {pipeline_mode = #tpu.pipeline_mode<synchronous>, transform_indices = @transform_5, window_bounds = array<i64: 64, 64>}, {pipeline_mode = #tpu.pipeline_mode<synchronous>, transform_indices = @transform_6, window_bounds = array<i64: 1, 64>}, {pipeline_mode = #tpu.pipeline_mode<synchronous>, transform_indices = @transform_7, window_bounds = array<i64: 64, 10>}, {pipeline_mode = #tpu.pipeline_mode<synchronous>, transform_indices = @transform_8, window_bounds = array<i64: 1, 10>}, {transform_indices = @transform_9, window_bounds = array<i64: 1, 1, 10>}]} {
    %cst = arith.constant 0.000000e+00 : f32
    %0 = vector.broadcast %cst : f32 to vector<264x32xf32>
    %c0 = arith.constant 0 : index
    %c0_0 = arith.constant 0 : index
    %1 = vector.load %arg11[%c0, %c0_0] : memref<264x32xf32, #tpu.memory_space<vmem>>, vector<264x32xf32>
    tpu.vector_store %arg11[%c0, %c0_0], %0 {strides = array<i32>} : memref<264x32xf32, #tpu.memory_space<vmem>>, vector<264x32xf32>,
    %c0_1 = arith.constant 0 : index
    %c0_2 = arith.constant 0 : index
    %c0_3 = arith.constant 0 : index
    %c0_4 = arith.constant 0 : index
    %2 = vector.load %arg1[%c0_1, %c0_2, %c0_3, %c0_4] : memref<1x14x14x32xf32, #tpu.memory_space<vmem>>, vector<1x1x14x32xf32>
    %3 = vector.shape_cast %2 : vector<1x1x14x32xf32> to vector<14x32xf32>
    %c17 = arith.constant 17 : index
    %c0_5 = arith.constant 0 : index
    %4 = vector.load %arg11[%c17, %c0_5] : memref<264x32xf32, #tpu.memory_space<vmem>>, vector<14x32xf32>
    tpu.vector_store %arg11[%c17, %c0_5], %3 {strides = array<i32>} : memref<264x32xf32, #tpu.memory_space<vmem>>, vector<14x32xf32>,
    %c0_6 = arith.constant 0 : index
    %c1 = arith.constant 1 : index
    %c0_7 = arith.constant 0 : index
    %c0_8 = arith.constant 0 : index
    %5 = vector.load %arg1[%c0_6, %c1, %c0_7, %c0_8] : memref<1x14x14x32xf32, #tpu.memory_space<vmem>>, vector<1x1x14x32xf32>
    %6 = vector.shape_cast %5 : vector<1x1x14x32xf32> to vector<14x32xf32>
    %c33 = arith.constant 33 : index
    %c0_9 = arith.constant 0 : index
    %7 = vector.load %arg11[%c33, %c0_9] : memref<264x32xf32, #tpu.memory_space<vmem>>, vector<14x32xf32>
    tpu.vector_store %arg11[%c33, %c0_9], %6 {strides = array<i32>} : memref<264x32xf32, #tpu.memory_space<vmem>>, vector<14x32xf32>,
    %c0_10 = arith.constant 0 : index
    %c2 = arith.constant 2 : index
    %c0_11 = arith.constant 0 : index
    %c0_12 = arith.constant 0 : index
    %8 = vector.load %arg1[%c0_10, %c2, %c0_11, %c0_12] : memref<1x14x14x32xf32, #tpu.memory_space<vmem>>, vector<1x1x14x32xf32>
    %9 = vector.shape_cast %8 : vector<1x1x14x32xf32> to vector<14x32xf32>
    %c49 = arith.constant 49 : index
    %c0_13 = arith.constant 0 : index
    %10 = vector.load %arg11[%c49, %c0_13] : memref<264x32xf32, #tpu.memory_space<vmem>>, vector<14x32xf32>
    tpu.vector_store %arg11[%c49, %c0_13], %9 {strides = array<i32>} : memref<264x32xf32, #tpu.memory_space<vmem>>, vector<14x32xf32>,
    %c0_14 = arith.constant 0 : index
    %c3 = arith.constant 3 : index
    %c0_15 = arith.constant 0 : index
    %c0_16 = arith.constant 0 : index
    %11 = vector.load %arg1[%c0_14, %c3, %c0_15, %c0_16] : memref<1x14x14x32xf32, #tpu.memory_space<vmem>>, vector<1x1x14x32xf32>
    %12 = vector.shape_cast %11 : vector<1x1x14x32xf32> to vector<14x32xf32>
    %c65 = arith.constant 65 : index
    %c0_17 = arith.constant 0 : index
    %13 = vector.load %arg11[%c65, %c0_17] : memref<264x32xf32, #tpu.memory_space<vmem>>, vector<14x32xf32>
    tpu.vector_store %arg11[%c65, %c0_17], %12 {strides = array<i32>} : memref<264x32xf32, #tpu.memory_space<vmem>>, vector<14x32xf32>,
    %c0_18 = arith.constant 0 : index
    %c4 = arith.constant 4 : index
    %c0_19 = arith.constant 0 : index
    %c0_20 = arith.constant 0 : index
    %14 = vector.load %arg1[%c0_18, %c4, %c0_19, %c0_20] : memref<1x14x14x32xf32, #tpu.memory_space<vmem>>, vector<1x1x14x32xf32>
    %15 = vector.shape_cast %14 : vector<1x1x14x32xf32> to vector<14x32xf32>
    %c81 = arith.constant 81 : index
    %c0_21 = arith.constant 0 : index
    %16 = vector.load %arg11[%c81, %c0_21] : memref<264x32xf32, #tpu.memory_space<vmem>>, vector<14x32xf32>
    tpu.vector_store %arg11[%c81, %c0_21], %15 {strides = array<i32>} : memref<264x32xf32, #tpu.memory_space<vmem>>, vector<14x32xf32>,
    %c0_22 = arith.constant 0 : index
    %c5 = arith.constant 5 : index
    %c0_23 = arith.constant 0 : index
    %c0_24 = arith.constant 0 : index
    %17 = vector.load %arg1[%c0_22, %c5, %c0_23, %c0_24] : memref<1x14x14x32xf32, #tpu.memory_space<vmem>>, vector<1x1x14x32xf32>
    %18 = vector.shape_cast %17 : vector<1x1x14x32xf32> to vector<14x32xf32>
    %c97 = arith.constant 97 : index
    %c0_25 = arith.constant 0 : index
    %19 = vector.load %arg11[%c97, %c0_25] : memref<264x32xf32, #tpu.memory_space<vmem>>, vector<14x32xf32>
    tpu.vector_store %arg11[%c97, %c0_25], %18 {strides = array<i32>} : memref<264x32xf32, #tpu.memory_space<vmem>>, vector<14x32xf32>,
    %c0_26 = arith.constant 0 : index
    %c6 = arith.constant 6 : index
    %c0_27 = arith.constant 0 : index
    %c0_28 = arith.constant 0 : index
    %20 = vector.load %arg1[%c0_26, %c6, %c0_27, %c0_28] : memref<1x14x14x32xf32, #tpu.memory_space<vmem>>, vector<1x1x14x32xf32>
    %21 = vector.shape_cast %20 : vector<1x1x14x32xf32> to vector<14x32xf32>
    %c113 = arith.constant 113 : index
    %c0_29 = arith.constant 0 : index
    %22 = vector.load %arg11[%c113, %c0_29] : memref<264x32xf32, #tpu.memory_space<vmem>>, vector<14x32xf32>
    tpu.vector_store %arg11[%c113, %c0_29], %21 {strides = array<i32>} : memref<264x32xf32, #tpu.memory_space<vmem>>, vector<14x32xf32>,
    %c0_30 = arith.constant 0 : index
    %c7 = arith.constant 7 : index
    %c0_31 = arith.constant 0 : index
    %c0_32 = arith.constant 0 : index
    %23 = vector.load %arg1[%c0_30, %c7, %c0_31, %c0_32] : memref<1x14x14x32xf32, #tpu.memory_space<vmem>>, vector<1x1x14x32xf32>
    %24 = vector.shape_cast %23 : vector<1x1x14x32xf32> to vector<14x32xf32>
    %c129 = arith.constant 129 : index
    %c0_33 = arith.constant 0 : index
    %25 = vector.load %arg11[%c129, %c0_33] : memref<264x32xf32, #tpu.memory_space<vmem>>, vector<14x32xf32>
    tpu.vector_store %arg11[%c129, %c0_33], %24 {strides = array<i32>} : memref<264x32xf32, #tpu.memory_space<vmem>>, vector<14x32xf32>,
    %c0_34 = arith.constant 0 : index
    %c8 = arith.constant 8 : index
    %c0_35 = arith.constant 0 : index
    %c0_36 = arith.constant 0 : index
    %26 = vector.load %arg1[%c0_34, %c8, %c0_35, %c0_36] : memref<1x14x14x32xf32, #tpu.memory_space<vmem>>, vector<1x1x14x32xf32>
    %27 = vector.shape_cast %26 : vector<1x1x14x32xf32> to vector<14x32xf32>
    %c145 = arith.constant 145 : index
    %c0_37 = arith.constant 0 : index
    %28 = vector.load %arg11[%c145, %c0_37] : memref<264x32xf32, #tpu.memory_space<vmem>>, vector<14x32xf32>
    tpu.vector_store %arg11[%c145, %c0_37], %27 {strides = array<i32>} : memref<264x32xf32, #tpu.memory_space<vmem>>, vector<14x32xf32>,
    %c0_38 = arith.constant 0 : index
    %c9 = arith.constant 9 : index
    %c0_39 = arith.constant 0 : index
    %c0_40 = arith.constant 0 : index
    %29 = vector.load %arg1[%c0_38, %c9, %c0_39, %c0_40] : memref<1x14x14x32xf32, #tpu.memory_space<vmem>>, vector<1x1x14x32xf32>
    %30 = vector.shape_cast %29 : vector<1x1x14x32xf32> to vector<14x32xf32>
    %c161 = arith.constant 161 : index
    %c0_41 = arith.constant 0 : index
    %31 = vector.load %arg11[%c161, %c0_41] : memref<264x32xf32, #tpu.memory_space<vmem>>, vector<14x32xf32>
    tpu.vector_store %arg11[%c161, %c0_41], %30 {strides = array<i32>} : memref<264x32xf32, #tpu.memory_space<vmem>>, vector<14x32xf32>,
    %c0_42 = arith.constant 0 : index
    %c10 = arith.constant 10 : index
    %c0_43 = arith.constant 0 : index
    %c0_44 = arith.constant 0 : index
    %32 = vector.load %arg1[%c0_42, %c10, %c0_43, %c0_44] : memref<1x14x14x32xf32, #tpu.memory_space<vmem>>, vector<1x1x14x32xf32>
    %33 = vector.shape_cast %32 : vector<1x1x14x32xf32> to vector<14x32xf32>
    %c177 = arith.constant 177 : index
    %c0_45 = arith.constant 0 : index
    %34 = vector.load %arg11[%c177, %c0_45] : memref<264x32xf32, #tpu.memory_space<vmem>>, vector<14x32xf32>
    tpu.vector_store %arg11[%c177, %c0_45], %33 {strides = array<i32>} : memref<264x32xf32, #tpu.memory_space<vmem>>, vector<14x32xf32>,
    %c0_46 = arith.constant 0 : index
    %c11 = arith.constant 11 : index
    %c0_47 = arith.constant 0 : index
    %c0_48 = arith.constant 0 : index
    %35 = vector.load %arg1[%c0_46, %c11, %c0_47, %c0_48] : memref<1x14x14x32xf32, #tpu.memory_space<vmem>>, vector<1x1x14x32xf32>
    %36 = vector.shape_cast %35 : vector<1x1x14x32xf32> to vector<14x32xf32>
    %c193 = arith.constant 193 : index
    %c0_49 = arith.constant 0 : index
    %37 = vector.load %arg11[%c193, %c0_49] : memref<264x32xf32, #tpu.memory_space<vmem>>, vector<14x32xf32>
    tpu.vector_store %arg11[%c193, %c0_49], %36 {strides = array<i32>} : memref<264x32xf32, #tpu.memory_space<vmem>>, vector<14x32xf32>,
    %c0_50 = arith.constant 0 : index
    %c12 = arith.constant 12 : index
    %c0_51 = arith.constant 0 : index
    %c0_52 = arith.constant 0 : index
    %38 = vector.load %arg1[%c0_50, %c12, %c0_51, %c0_52] : memref<1x14x14x32xf32, #tpu.memory_space<vmem>>, vector<1x1x14x32xf32>
    %39 = vector.shape_cast %38 : vector<1x1x14x32xf32> to vector<14x32xf32>
    %c209 = arith.constant 209 : index
    %c0_53 = arith.constant 0 : index
    %40 = vector.load %arg11[%c209, %c0_53] : memref<264x32xf32, #tpu.memory_space<vmem>>, vector<14x32xf32>
    tpu.vector_store %arg11[%c209, %c0_53], %39 {strides = array<i32>} : memref<264x32xf32, #tpu.memory_space<vmem>>, vector<14x32xf32>,
    %c0_54 = arith.constant 0 : index
    %c13 = arith.constant 13 : index
    %c0_55 = arith.constant 0 : index
    %c0_56 = arith.constant 0 : index
    %41 = vector.load %arg1[%c0_54, %c13, %c0_55, %c0_56] : memref<1x14x14x32xf32, #tpu.memory_space<vmem>>, vector<1x1x14x32xf32>
    %42 = vector.shape_cast %41 : vector<1x1x14x32xf32> to vector<14x32xf32>
    %c225 = arith.constant 225 : index
    %c0_57 = arith.constant 0 : index
    %43 = vector.load %arg11[%c225, %c0_57] : memref<264x32xf32, #tpu.memory_space<vmem>>, vector<14x32xf32>
    tpu.vector_store %arg11[%c225, %c0_57], %42 {strides = array<i32>} : memref<264x32xf32, #tpu.memory_space<vmem>>, vector<14x32xf32>,
    %44 = tpu.iota {dimensions = array<i32: 0>} : vector<224x32xi32>
    %c16_i32 = arith.constant 16 : i32
    %c0_i32 = arith.constant 0 : i32
    %45 = arith.cmpi eq, %c16_i32, %c0_i32 : i32
    %c1_i32 = arith.constant 1 : i32
    %46 = arith.select %45, %c1_i32, %c16_i32 : i32
    %47 = vector.broadcast %46 : i32 to vector<224x32xi32>
    %48 = arith.remsi %44, %47 : vector<224x32xi32>
    %c0_i32_58 = arith.constant 0 : i32
    %49 = vector.broadcast %c0_i32_58 : i32 to vector<224x32xi32>
    %50 = arith.cmpi ne, %48, %49 : vector<224x32xi32>
    %c0_i32_59 = arith.constant 0 : i32
    %51 = vector.broadcast %c0_i32_59 : i32 to vector<224x32xi32>
    %52 = arith.cmpi slt, %48, %51 : vector<224x32xi32>
    %c0_i32_60 = arith.constant 0 : i32
    %53 = arith.cmpi slt, %46, %c0_i32_60 : i32
    %54 = vector.broadcast %53 : i1 to vector<224x32xi1>
    %55 = vector.broadcast %54 : vector<224x32xi1> to vector<224x32xi1>
    %56 = arith.xori %52, %55 : vector<224x32xi1>
    %57 = arith.andi %56, %50 : vector<224x32xi1>
    %58 = vector.broadcast %46 : i32 to vector<224x32xi32>
    %59 = arith.addi %48, %58 : vector<224x32xi32>
    %60 = arith.select %57, %59, %48 : vector<224x32xi1>, vector<224x32xi32>
    %c14_i32 = arith.constant 14 : i32
    %61 = vector.broadcast %c14_i32 : i32 to vector<224x32xi32>
    %62 = arith.cmpi slt, %60, %61 : vector<224x32xi32>
    %c0_61 = arith.constant 0 : index
    %c0_62 = arith.constant 0 : index
    %63 = vector.load %arg11[%c0_61, %c0_62] : memref<264x32xf32, #tpu.memory_space<vmem>>, vector<224x32xf32>
    %64 = arith.truncf %63 : vector<224x32xf32> to vector<224x32xbf16>
    %c0_63 = arith.constant 0 : index
    %c0_64 = arith.constant 0 : index
    %c0_65 = arith.constant 0 : index
    %c0_66 = arith.constant 0 : index
    %65 = vector.load %arg2[%c0_63, %c0_64, %c0_65, %c0_66] : memref<3x9x32x32xbf16, #tpu.memory_space<vmem>>, vector<1x1x32x32xbf16>
    %66 = vector.shape_cast %65 : vector<1x1x32x32xbf16> to vector<32x32xbf16>
    %cst_67 = arith.constant dense<0.000000e+00> : vector<224x32xf32>
    %67 = tpu.matmul %64, %66, %cst_67 {dimension_numbers = #tpu.dot_dimension_numbers<[1], [0], [0], [1], [0, 0, 1, 1], [], []>} : vector<224x32xbf16>, vector<32x32xbf16>, vector<224x32xf32> -> vector<224x32xf32>
    %c1_68 = arith.constant 1 : index
    %c0_69 = arith.constant 0 : index
    %68 = vector.load %arg11[%c1_68, %c0_69] : memref<264x32xf32, #tpu.memory_space<vmem>>, vector<224x32xf32>
    %69 = arith.truncf %68 : vector<224x32xf32> to vector<224x32xbf16>
    %c0_70 = arith.constant 0 : index
    %c1_71 = arith.constant 1 : index
    %c0_72 = arith.constant 0 : index
    %c0_73 = arith.constant 0 : index
    %70 = vector.load %arg2[%c0_70, %c1_71, %c0_72, %c0_73] : memref<3x9x32x32xbf16, #tpu.memory_space<vmem>>, vector<1x1x32x32xbf16>
    %71 = vector.shape_cast %70 : vector<1x1x32x32xbf16> to vector<32x32xbf16>
    %cst_74 = arith.constant dense<0.000000e+00> : vector<224x32xf32>
    %72 = tpu.matmul %69, %71, %cst_74 {dimension_numbers = #tpu.dot_dimension_numbers<[1], [0], [0], [1], [0, 0, 1, 1], [], []>} : vector<224x32xbf16>, vector<32x32xbf16>, vector<224x32xf32> -> vector<224x32xf32>
    %73 = arith.addf %67, %72 : vector<224x32xf32>
    %c2_75 = arith.constant 2 : index
    %c0_76 = arith.constant 0 : index
    %74 = vector.load %arg11[%c2_75, %c0_76] : memref<264x32xf32, #tpu.memory_space<vmem>>, vector<224x32xf32>
    %75 = arith.truncf %74 : vector<224x32xf32> to vector<224x32xbf16>
    %c0_77 = arith.constant 0 : index
    %c2_78 = arith.constant 2 : index
    %c0_79 = arith.constant 0 : index
    %c0_80 = arith.constant 0 : index
    %76 = vector.load %arg2[%c0_77, %c2_78, %c0_79, %c0_80] : memref<3x9x32x32xbf16, #tpu.memory_space<vmem>>, vector<1x1x32x32xbf16>
    %77 = vector.shape_cast %76 : vector<1x1x32x32xbf16> to vector<32x32xbf16>
    %cst_81 = arith.constant dense<0.000000e+00> : vector<224x32xf32>
    %78 = tpu.matmul %75, %77, %cst_81 {dimension_numbers = #tpu.dot_dimension_numbers<[1], [0], [0], [1], [0, 0, 1, 1], [], []>} : vector<224x32xbf16>, vector<32x32xbf16>, vector<224x32xf32> -> vector<224x32xf32>
    %79 = arith.addf %73, %78 : vector<224x32xf32>
    %c16 = arith.constant 16 : index
    %c0_82 = arith.constant 0 : index
    %80 = vector.load %arg11[%c16, %c0_82] : memref<264x32xf32, #tpu.memory_space<vmem>>, vector<224x32xf32>
    %81 = arith.truncf %80 : vector<224x32xf32> to vector<224x32xbf16>
    %c0_83 = arith.constant 0 : index
    %c3_84 = arith.constant 3 : index
    %c0_85 = arith.constant 0 : index
    %c0_86 = arith.constant 0 : index
    %82 = vector.load %arg2[%c0_83, %c3_84, %c0_85, %c0_86] : memref<3x9x32x32xbf16, #tpu.memory_space<vmem>>, vector<1x1x32x32xbf16>
    %83 = vector.shape_cast %82 : vector<1x1x32x32xbf16> to vector<32x32xbf16>
    %cst_87 = arith.constant dense<0.000000e+00> : vector<224x32xf32>
    %84 = tpu.matmul %81, %83, %cst_87 {dimension_numbers = #tpu.dot_dimension_numbers<[1], [0], [0], [1], [0, 0, 1, 1], [], []>} : vector<224x32xbf16>, vector<32x32xbf16>, vector<224x32xf32> -> vector<224x32xf32>
    %85 = arith.addf %79, %84 : vector<224x32xf32>
    %c17_88 = arith.constant 17 : index
    %c0_89 = arith.constant 0 : index
    %86 = vector.load %arg11[%c17_88, %c0_89] : memref<264x32xf32, #tpu.memory_space<vmem>>, vector<224x32xf32>
    %87 = arith.truncf %86 : vector<224x32xf32> to vector<224x32xbf16>
    %c0_90 = arith.constant 0 : index
    %c4_91 = arith.constant 4 : index
    %c0_92 = arith.constant 0 : index
    %c0_93 = arith.constant 0 : index
    %88 = vector.load %arg2[%c0_90, %c4_91, %c0_92, %c0_93] : memref<3x9x32x32xbf16, #tpu.memory_space<vmem>>, vector<1x1x32x32xbf16>
    %89 = vector.shape_cast %88 : vector<1x1x32x32xbf16> to vector<32x32xbf16>
    %cst_94 = arith.constant dense<0.000000e+00> : vector<224x32xf32>
    %90 = tpu.matmul %87, %89, %cst_94 {dimension_numbers = #tpu.dot_dimension_numbers<[1], [0], [0], [1], [0, 0, 1, 1], [], []>} : vector<224x32xbf16>, vector<32x32xbf16>, vector<224x32xf32> -> vector<224x32xf32>
    %91 = arith.addf %85, %90 : vector<224x32xf32>
    %c18 = arith.constant 18 : index
    %c0_95 = arith.constant 0 : index
    %92 = vector.load %arg11[%c18, %c0_95] : memref<264x32xf32, #tpu.memory_space<vmem>>, vector<224x32xf32>
    %93 = arith.truncf %92 : vector<224x32xf32> to vector<224x32xbf16>
    %c0_96 = arith.constant 0 : index
    %c5_97 = arith.constant 5 : index
    %c0_98 = arith.constant 0 : index
    %c0_99 = arith.constant 0 : index
    %94 = vector.load %arg2[%c0_96, %c5_97, %c0_98, %c0_99] : memref<3x9x32x32xbf16, #tpu.memory_space<vmem>>, vector<1x1x32x32xbf16>
    %95 = vector.shape_cast %94 : vector<1x1x32x32xbf16> to vector<32x32xbf16>
    %cst_100 = arith.constant dense<0.000000e+00> : vector<224x32xf32>
    %96 = tpu.matmul %93, %95, %cst_100 {dimension_numbers = #tpu.dot_dimension_numbers<[1], [0], [0], [1], [0, 0, 1, 1], [], []>} : vector<224x32xbf16>, vector<32x32xbf16>, vector<224x32xf32> -> vector<224x32xf32>
    %97 = arith.addf %91, %96 : vector<224x32xf32>
    %c32 = arith.constant 32 : index
    %c0_101 = arith.constant 0 : index
    %98 = vector.load %arg11[%c32, %c0_101] : memref<264x32xf32, #tpu.memory_space<vmem>>, vector<224x32xf32>
    %99 = arith.truncf %98 : vector<224x32xf32> to vector<224x32xbf16>
    %c0_102 = arith.constant 0 : index
    %c6_103 = arith.constant 6 : index
    %c0_104 = arith.constant 0 : index
    %c0_105 = arith.constant 0 : index
    %100 = vector.load %arg2[%c0_102, %c6_103, %c0_104, %c0_105] : memref<3x9x32x32xbf16, #tpu.memory_space<vmem>>, vector<1x1x32x32xbf16>
    %101 = vector.shape_cast %100 : vector<1x1x32x32xbf16> to vector<32x32xbf16>
    %cst_106 = arith.constant dense<0.000000e+00> : vector<224x32xf32>
    %102 = tpu.matmul %99, %101, %cst_106 {dimension_numbers = #tpu.dot_dimension_numbers<[1], [0], [0], [1], [0, 0, 1, 1], [], []>} : vector<224x32xbf16>, vector<32x32xbf16>, vector<224x32xf32> -> vector<224x32xf32>
    %103 = arith.addf %97, %102 : vector<224x32xf32>
    %c33_107 = arith.constant 33 : index
    %c0_108 = arith.constant 0 : index
    %104 = vector.load %arg11[%c33_107, %c0_108] : memref<264x32xf32, #tpu.memory_space<vmem>>, vector<224x32xf32>
    %105 = arith.truncf %104 : vector<224x32xf32> to vector<224x32xbf16>
    %c0_109 = arith.constant 0 : index
    %c7_110 = arith.constant 7 : index
    %c0_111 = arith.constant 0 : index
    %c0_112 = arith.constant 0 : index
    %106 = vector.load %arg2[%c0_109, %c7_110, %c0_111, %c0_112] : memref<3x9x32x32xbf16, #tpu.memory_space<vmem>>, vector<1x1x32x32xbf16>
    %107 = vector.shape_cast %106 : vector<1x1x32x32xbf16> to vector<32x32xbf16>
    %cst_113 = arith.constant dense<0.000000e+00> : vector<224x32xf32>
    %108 = tpu.matmul %105, %107, %cst_113 {dimension_numbers = #tpu.dot_dimension_numbers<[1], [0], [0], [1], [0, 0, 1, 1], [], []>} : vector<224x32xbf16>, vector<32x32xbf16>, vector<224x32xf32> -> vector<224x32xf32>
    %109 = arith.addf %103, %108 : vector<224x32xf32>
    %c34 = arith.constant 34 : index
    %c0_114 = arith.constant 0 : index
    %110 = vector.load %arg11[%c34, %c0_114] : memref<264x32xf32, #tpu.memory_space<vmem>>, vector<224x32xf32>
    %111 = arith.truncf %110 : vector<224x32xf32> to vector<224x32xbf16>
    %c0_115 = arith.constant 0 : index
    %c8_116 = arith.constant 8 : index
    %c0_117 = arith.constant 0 : index
    %c0_118 = arith.constant 0 : index
    %112 = vector.load %arg2[%c0_115, %c8_116, %c0_117, %c0_118] : memref<3x9x32x32xbf16, #tpu.memory_space<vmem>>, vector<1x1x32x32xbf16>
    %113 = vector.shape_cast %112 : vector<1x1x32x32xbf16> to vector<32x32xbf16>
    %cst_119 = arith.constant dense<0.000000e+00> : vector<224x32xf32>
    %114 = tpu.matmul %111, %113, %cst_119 {dimension_numbers = #tpu.dot_dimension_numbers<[1], [0], [0], [1], [0, 0, 1, 1], [], []>} : vector<224x32xbf16>, vector<32x32xbf16>, vector<224x32xf32> -> vector<224x32xf32>
    %115 = arith.addf %109, %114 : vector<224x32xf32>
    %c0_120 = arith.constant 0 : index
    %c0_121 = arith.constant 0 : index
    %c0_122 = arith.constant 0 : index
    %116 = vector.load %arg3[%c0_120, %c0_121, %c0_122] : memref<3x1x32xf32, #tpu.memory_space<vmem>>, vector<1x1x32xf32>
    %117 = vector.shape_cast %116 : vector<1x1x32xf32> to vector<1x32xf32>
    %118 = vector.broadcast %117 : vector<1x32xf32> to vector<224x32xf32>
    %119 = arith.addf %115, %118 : vector<224x32xf32>
    %cst_123 = arith.constant 0.000000e+00 : f32
    %120 = vector.broadcast %cst_123 : f32 to vector<224x32xf32>
    %121 = arith.maximumf %119, %120 : vector<224x32xf32>
    %cst_124 = arith.constant 0.000000e+00 : f32
    %122 = vector.broadcast %cst_124 : f32 to vector<264x32xf32>
    %c0_125 = arith.constant 0 : index
    %c0_126 = arith.constant 0 : index
    %123 = vector.load %arg12[%c0_125, %c0_126] : memref<264x32xf32, #tpu.memory_space<vmem>>, vector<264x32xf32>
    tpu.vector_store %arg12[%c0_125, %c0_126], %122 {strides = array<i32>} : memref<264x32xf32, #tpu.memory_space<vmem>>, vector<264x32xf32>,
    %cst_127 = arith.constant 0.000000e+00 : f32
    %124 = vector.broadcast %cst_127 : f32 to vector<224x32xf32>
    %125 = arith.select %62, %121, %124 : vector<224x32xi1>, vector<224x32xf32>
    %c17_128 = arith.constant 17 : index
    %c0_129 = arith.constant 0 : index
    %126 = vector.load %arg12[%c17_128, %c0_129] : memref<264x32xf32, #tpu.memory_space<vmem>>, vector<224x32xf32>
    tpu.vector_store %arg12[%c17_128, %c0_129], %125 {strides = array<i32>} : memref<264x32xf32, #tpu.memory_space<vmem>>, vector<224x32xf32>,
    %c0_130 = arith.constant 0 : index
    %c0_131 = arith.constant 0 : index
    %127 = vector.load %arg12[%c0_130, %c0_131] : memref<264x32xf32, #tpu.memory_space<vmem>>, vector<224x32xf32>
    %128 = arith.truncf %127 : vector<224x32xf32> to vector<224x32xbf16>
    %c1_132 = arith.constant 1 : index
    %c0_133 = arith.constant 0 : index
    %c0_134 = arith.constant 0 : index
    %c0_135 = arith.constant 0 : index
    %129 = vector.load %arg2[%c1_132, %c0_133, %c0_134, %c0_135] : memref<3x9x32x32xbf16, #tpu.memory_space<vmem>>, vector<1x1x32x32xbf16>
    %130 = vector.shape_cast %129 : vector<1x1x32x32xbf16> to vector<32x32xbf16>
    %cst_136 = arith.constant dense<0.000000e+00> : vector<224x32xf32>
    %131 = tpu.matmul %128, %130, %cst_136 {dimension_numbers = #tpu.dot_dimension_numbers<[1], [0], [0], [1], [0, 0, 1, 1], [], []>} : vector<224x32xbf16>, vector<32x32xbf16>, vector<224x32xf32> -> vector<224x32xf32>
    %c1_137 = arith.constant 1 : index
    %c0_138 = arith.constant 0 : index
    %132 = vector.load %arg12[%c1_137, %c0_138] : memref<264x32xf32, #tpu.memory_space<vmem>>, vector<224x32xf32>
    %133 = arith.truncf %132 : vector<224x32xf32> to vector<224x32xbf16>
    %c1_139 = arith.constant 1 : index
    %c1_140 = arith.constant 1 : index
    %c0_141 = arith.constant 0 : index
    %c0_142 = arith.constant 0 : index
    %134 = vector.load %arg2[%c1_139, %c1_140, %c0_141, %c0_142] : memref<3x9x32x32xbf16, #tpu.memory_space<vmem>>, vector<1x1x32x32xbf16>
    %135 = vector.shape_cast %134 : vector<1x1x32x32xbf16> to vector<32x32xbf16>
    %cst_143 = arith.constant dense<0.000000e+00> : vector<224x32xf32>
    %136 = tpu.matmul %133, %135, %cst_143 {dimension_numbers = #tpu.dot_dimension_numbers<[1], [0], [0], [1], [0, 0, 1, 1], [], []>} : vector<224x32xbf16>, vector<32x32xbf16>, vector<224x32xf32> -> vector<224x32xf32>
    %137 = arith.addf %131, %136 : vector<224x32xf32>
    %c2_144 = arith.constant 2 : index
    %c0_145 = arith.constant 0 : index
    %138 = vector.load %arg12[%c2_144, %c0_145] : memref<264x32xf32, #tpu.memory_space<vmem>>, vector<224x32xf32>
    %139 = arith.truncf %138 : vector<224x32xf32> to vector<224x32xbf16>
    %c1_146 = arith.constant 1 : index
    %c2_147 = arith.constant 2 : index
    %c0_148 = arith.constant 0 : index
    %c0_149 = arith.constant 0 : index
    %140 = vector.load %arg2[%c1_146, %c2_147, %c0_148, %c0_149] : memref<3x9x32x32xbf16, #tpu.memory_space<vmem>>, vector<1x1x32x32xbf16>
    %141 = vector.shape_cast %140 : vector<1x1x32x32xbf16> to vector<32x32xbf16>
    %cst_150 = arith.constant dense<0.000000e+00> : vector<224x32xf32>
    %142 = tpu.matmul %139, %141, %cst_150 {dimension_numbers = #tpu.dot_dimension_numbers<[1], [0], [0], [1], [0, 0, 1, 1], [], []>} : vector<224x32xbf16>, vector<32x32xbf16>, vector<224x32xf32> -> vector<224x32xf32>
    %143 = arith.addf %137, %142 : vector<224x32xf32>
    %c16_151 = arith.constant 16 : index
    %c0_152 = arith.constant 0 : index
    %144 = vector.load %arg12[%c16_151, %c0_152] : memref<264x32xf32, #tpu.memory_space<vmem>>, vector<224x32xf32>
    %145 = arith.truncf %144 : vector<224x32xf32> to vector<224x32xbf16>
    %c1_153 = arith.constant 1 : index
    %c3_154 = arith.constant 3 : index
    %c0_155 = arith.constant 0 : index
    %c0_156 = arith.constant 0 : index
    %146 = vector.load %arg2[%c1_153, %c3_154, %c0_155, %c0_156] : memref<3x9x32x32xbf16, #tpu.memory_space<vmem>>, vector<1x1x32x32xbf16>
    %147 = vector.shape_cast %146 : vector<1x1x32x32xbf16> to vector<32x32xbf16>
    %cst_157 = arith.constant dense<0.000000e+00> : vector<224x32xf32>
    %148 = tpu.matmul %145, %147, %cst_157 {dimension_numbers = #tpu.dot_dimension_numbers<[1], [0], [0], [1], [0, 0, 1, 1], [], []>} : vector<224x32xbf16>, vector<32x32xbf16>, vector<224x32xf32> -> vector<224x32xf32>
    %149 = arith.addf %143, %148 : vector<224x32xf32>
    %c17_158 = arith.constant 17 : index
    %c0_159 = arith.constant 0 : index
    %150 = vector.load %arg12[%c17_158, %c0_159] : memref<264x32xf32, #tpu.memory_space<vmem>>, vector<224x32xf32>
    %151 = arith.truncf %150 : vector<224x32xf32> to vector<224x32xbf16>
    %c1_160 = arith.constant 1 : index
    %c4_161 = arith.constant 4 : index
    %c0_162 = arith.constant 0 : index
    %c0_163 = arith.constant 0 : index
    %152 = vector.load %arg2[%c1_160, %c4_161, %c0_162, %c0_163] : memref<3x9x32x32xbf16, #tpu.memory_space<vmem>>, vector<1x1x32x32xbf16>
    %153 = vector.shape_cast %152 : vector<1x1x32x32xbf16> to vector<32x32xbf16>
    %cst_164 = arith.constant dense<0.000000e+00> : vector<224x32xf32>
    %154 = tpu.matmul %151, %153, %cst_164 {dimension_numbers = #tpu.dot_dimension_numbers<[1], [0], [0], [1], [0, 0, 1, 1], [], []>} : vector<224x32xbf16>, vector<32x32xbf16>, vector<224x32xf32> -> vector<224x32xf32>
    %155 = arith.addf %149, %154 : vector<224x32xf32>
    %c18_165 = arith.constant 18 : index
    %c0_166 = arith.constant 0 : index
    %156 = vector.load %arg12[%c18_165, %c0_166] : memref<264x32xf32, #tpu.memory_space<vmem>>, vector<224x32xf32>
    %157 = arith.truncf %156 : vector<224x32xf32> to vector<224x32xbf16>
    %c1_167 = arith.constant 1 : index
    %c5_168 = arith.constant 5 : index
    %c0_169 = arith.constant 0 : index
    %c0_170 = arith.constant 0 : index
    %158 = vector.load %arg2[%c1_167, %c5_168, %c0_169, %c0_170] : memref<3x9x32x32xbf16, #tpu.memory_space<vmem>>, vector<1x1x32x32xbf16>
    %159 = vector.shape_cast %158 : vector<1x1x32x32xbf16> to vector<32x32xbf16>
    %cst_171 = arith.constant dense<0.000000e+00> : vector<224x32xf32>
    %160 = tpu.matmul %157, %159, %cst_171 {dimension_numbers = #tpu.dot_dimension_numbers<[1], [0], [0], [1], [0, 0, 1, 1], [], []>} : vector<224x32xbf16>, vector<32x32xbf16>, vector<224x32xf32> -> vector<224x32xf32>
    %161 = arith.addf %155, %160 : vector<224x32xf32>
    %c32_172 = arith.constant 32 : index
    %c0_173 = arith.constant 0 : index
    %162 = vector.load %arg12[%c32_172, %c0_173] : memref<264x32xf32, #tpu.memory_space<vmem>>, vector<224x32xf32>
    %163 = arith.truncf %162 : vector<224x32xf32> to vector<224x32xbf16>
    %c1_174 = arith.constant 1 : index
    %c6_175 = arith.constant 6 : index
    %c0_176 = arith.constant 0 : index
    %c0_177 = arith.constant 0 : index
    %164 = vector.load %arg2[%c1_174, %c6_175, %c0_176, %c0_177] : memref<3x9x32x32xbf16, #tpu.memory_space<vmem>>, vector<1x1x32x32xbf16>
    %165 = vector.shape_cast %164 : vector<1x1x32x32xbf16> to vector<32x32xbf16>
    %cst_178 = arith.constant dense<0.000000e+00> : vector<224x32xf32>
    %166 = tpu.matmul %163, %165, %cst_178 {dimension_numbers = #tpu.dot_dimension_numbers<[1], [0], [0], [1], [0, 0, 1, 1], [], []>} : vector<224x32xbf16>, vector<32x32xbf16>, vector<224x32xf32> -> vector<224x32xf32>
    %167 = arith.addf %161, %166 : vector<224x32xf32>
    %c33_179 = arith.constant 33 : index
    %c0_180 = arith.constant 0 : index
    %168 = vector.load %arg12[%c33_179, %c0_180] : memref<264x32xf32, #tpu.memory_space<vmem>>, vector<224x32xf32>
    %169 = arith.truncf %168 : vector<224x32xf32> to vector<224x32xbf16>
    %c1_181 = arith.constant 1 : index
    %c7_182 = arith.constant 7 : index
    %c0_183 = arith.constant 0 : index
    %c0_184 = arith.constant 0 : index
    %170 = vector.load %arg2[%c1_181, %c7_182, %c0_183, %c0_184] : memref<3x9x32x32xbf16, #tpu.memory_space<vmem>>, vector<1x1x32x32xbf16>
    %171 = vector.shape_cast %170 : vector<1x1x32x32xbf16> to vector<32x32xbf16>
    %cst_185 = arith.constant dense<0.000000e+00> : vector<224x32xf32>
    %172 = tpu.matmul %169, %171, %cst_185 {dimension_numbers = #tpu.dot_dimension_numbers<[1], [0], [0], [1], [0, 0, 1, 1], [], []>} : vector<224x32xbf16>, vector<32x32xbf16>, vector<224x32xf32> -> vector<224x32xf32>
    %173 = arith.addf %167, %172 : vector<224x32xf32>
    %c34_186 = arith.constant 34 : index
    %c0_187 = arith.constant 0 : index
    %174 = vector.load %arg12[%c34_186, %c0_187] : memref<264x32xf32, #tpu.memory_space<vmem>>, vector<224x32xf32>
    %175 = arith.truncf %174 : vector<224x32xf32> to vector<224x32xbf16>
    %c1_188 = arith.constant 1 : index
    %c8_189 = arith.constant 8 : index
    %c0_190 = arith.constant 0 : index
    %c0_191 = arith.constant 0 : index
    %176 = vector.load %arg2[%c1_188, %c8_189, %c0_190, %c0_191] : memref<3x9x32x32xbf16, #tpu.memory_space<vmem>>, vector<1x1x32x32xbf16>
    %177 = vector.shape_cast %176 : vector<1x1x32x32xbf16> to vector<32x32xbf16>
    %cst_192 = arith.constant dense<0.000000e+00> : vector<224x32xf32>
    %178 = tpu.matmul %175, %177, %cst_192 {dimension_numbers = #tpu.dot_dimension_numbers<[1], [0], [0], [1], [0, 0, 1, 1], [], []>} : vector<224x32xbf16>, vector<32x32xbf16>, vector<224x32xf32> -> vector<224x32xf32>
    %179 = arith.addf %173, %178 : vector<224x32xf32>
    %c1_193 = arith.constant 1 : index
    %c0_194 = arith.constant 0 : index
    %c0_195 = arith.constant 0 : index
    %180 = vector.load %arg3[%c1_193, %c0_194, %c0_195] : memref<3x1x32xf32, #tpu.memory_space<vmem>>, vector<1x1x32xf32>
    %181 = vector.shape_cast %180 : vector<1x1x32xf32> to vector<1x32xf32>
    %182 = vector.broadcast %181 : vector<1x32xf32> to vector<224x32xf32>
    %183 = arith.addf %179, %182 : vector<224x32xf32>
    %cst_196 = arith.constant 0.000000e+00 : f32
    %184 = vector.broadcast %cst_196 : f32 to vector<224x32xf32>
    %185 = arith.maximumf %183, %184 : vector<224x32xf32>
    %cst_197 = arith.constant 0.000000e+00 : f32
    %186 = vector.broadcast %cst_197 : f32 to vector<264x32xf32>
    %c0_198 = arith.constant 0 : index
    %c0_199 = arith.constant 0 : index
    %187 = vector.load %arg11[%c0_198, %c0_199] : memref<264x32xf32, #tpu.memory_space<vmem>>, vector<264x32xf32>
    tpu.vector_store %arg11[%c0_198, %c0_199], %186 {strides = array<i32>} : memref<264x32xf32, #tpu.memory_space<vmem>>, vector<264x32xf32>,
    %cst_200 = arith.constant 0.000000e+00 : f32
    %188 = vector.broadcast %cst_200 : f32 to vector<224x32xf32>
    %189 = arith.select %62, %185, %188 : vector<224x32xi1>, vector<224x32xf32>
    %c17_201 = arith.constant 17 : index
    %c0_202 = arith.constant 0 : index
    %190 = vector.load %arg11[%c17_201, %c0_202] : memref<264x32xf32, #tpu.memory_space<vmem>>, vector<224x32xf32>
    tpu.vector_store %arg11[%c17_201, %c0_202], %189 {strides = array<i32>} : memref<264x32xf32, #tpu.memory_space<vmem>>, vector<224x32xf32>,
    %c0_203 = arith.constant 0 : index
    %c0_204 = arith.constant 0 : index
    %191 = vector.load %arg11[%c0_203, %c0_204] : memref<264x32xf32, #tpu.memory_space<vmem>>, vector<224x32xf32>
    %192 = arith.truncf %191 : vector<224x32xf32> to vector<224x32xbf16>
    %c2_205 = arith.constant 2 : index
    %c0_206 = arith.constant 0 : index
    %c0_207 = arith.constant 0 : index
    %c0_208 = arith.constant 0 : index
    %193 = vector.load %arg2[%c2_205, %c0_206, %c0_207, %c0_208] : memref<3x9x32x32xbf16, #tpu.memory_space<vmem>>, vector<1x1x32x32xbf16>
    %194 = vector.shape_cast %193 : vector<1x1x32x32xbf16> to vector<32x32xbf16>
    %cst_209 = arith.constant dense<0.000000e+00> : vector<224x32xf32>
    %195 = tpu.matmul %192, %194, %cst_209 {dimension_numbers = #tpu.dot_dimension_numbers<[1], [0], [0], [1], [0, 0, 1, 1], [], []>} : vector<224x32xbf16>, vector<32x32xbf16>, vector<224x32xf32> -> vector<224x32xf32>
    %c1_210 = arith.constant 1 : index
    %c0_211 = arith.constant 0 : index
    %196 = vector.load %arg11[%c1_210, %c0_211] : memref<264x32xf32, #tpu.memory_space<vmem>>, vector<224x32xf32>
    %197 = arith.truncf %196 : vector<224x32xf32> to vector<224x32xbf16>
    %c2_212 = arith.constant 2 : index
    %c1_213 = arith.constant 1 : index
    %c0_214 = arith.constant 0 : index
    %c0_215 = arith.constant 0 : index
    %198 = vector.load %arg2[%c2_212, %c1_213, %c0_214, %c0_215] : memref<3x9x32x32xbf16, #tpu.memory_space<vmem>>, vector<1x1x32x32xbf16>
    %199 = vector.shape_cast %198 : vector<1x1x32x32xbf16> to vector<32x32xbf16>
    %cst_216 = arith.constant dense<0.000000e+00> : vector<224x32xf32>
    %200 = tpu.matmul %197, %199, %cst_216 {dimension_numbers = #tpu.dot_dimension_numbers<[1], [0], [0], [1], [0, 0, 1, 1], [], []>} : vector<224x32xbf16>, vector<32x32xbf16>, vector<224x32xf32> -> vector<224x32xf32>
    %201 = arith.addf %195, %200 : vector<224x32xf32>
    %c2_217 = arith.constant 2 : index
    %c0_218 = arith.constant 0 : index
    %202 = vector.load %arg11[%c2_217, %c0_218] : memref<264x32xf32, #tpu.memory_space<vmem>>, vector<224x32xf32>
    %203 = arith.truncf %202 : vector<224x32xf32> to vector<224x32xbf16>
    %c2_219 = arith.constant 2 : index
    %c2_220 = arith.constant 2 : index
    %c0_221 = arith.constant 0 : index
    %c0_222 = arith.constant 0 : index
    %204 = vector.load %arg2[%c2_219, %c2_220, %c0_221, %c0_222] : memref<3x9x32x32xbf16, #tpu.memory_space<vmem>>, vector<1x1x32x32xbf16>
    %205 = vector.shape_cast %204 : vector<1x1x32x32xbf16> to vector<32x32xbf16>
    %cst_223 = arith.constant dense<0.000000e+00> : vector<224x32xf32>
    %206 = tpu.matmul %203, %205, %cst_223 {dimension_numbers = #tpu.dot_dimension_numbers<[1], [0], [0], [1], [0, 0, 1, 1], [], []>} : vector<224x32xbf16>, vector<32x32xbf16>, vector<224x32xf32> -> vector<224x32xf32>
    %207 = arith.addf %201, %206 : vector<224x32xf32>
    %c16_224 = arith.constant 16 : index
    %c0_225 = arith.constant 0 : index
    %208 = vector.load %arg11[%c16_224, %c0_225] : memref<264x32xf32, #tpu.memory_space<vmem>>, vector<224x32xf32>
    %209 = arith.truncf %208 : vector<224x32xf32> to vector<224x32xbf16>
    %c2_226 = arith.constant 2 : index
    %c3_227 = arith.constant 3 : index
    %c0_228 = arith.constant 0 : index
    %c0_229 = arith.constant 0 : index
    %210 = vector.load %arg2[%c2_226, %c3_227, %c0_228, %c0_229] : memref<3x9x32x32xbf16, #tpu.memory_space<vmem>>, vector<1x1x32x32xbf16>
    %211 = vector.shape_cast %210 : vector<1x1x32x32xbf16> to vector<32x32xbf16>
    %cst_230 = arith.constant dense<0.000000e+00> : vector<224x32xf32>
    %212 = tpu.matmul %209, %211, %cst_230 {dimension_numbers = #tpu.dot_dimension_numbers<[1], [0], [0], [1], [0, 0, 1, 1], [], []>} : vector<224x32xbf16>, vector<32x32xbf16>, vector<224x32xf32> -> vector<224x32xf32>
    %213 = arith.addf %207, %212 : vector<224x32xf32>
    %c17_231 = arith.constant 17 : index
    %c0_232 = arith.constant 0 : index
    %214 = vector.load %arg11[%c17_231, %c0_232] : memref<264x32xf32, #tpu.memory_space<vmem>>, vector<224x32xf32>
    %215 = arith.truncf %214 : vector<224x32xf32> to vector<224x32xbf16>
    %c2_233 = arith.constant 2 : index
    %c4_234 = arith.constant 4 : index
    %c0_235 = arith.constant 0 : index
    %c0_236 = arith.constant 0 : index
    %216 = vector.load %arg2[%c2_233, %c4_234, %c0_235, %c0_236] : memref<3x9x32x32xbf16, #tpu.memory_space<vmem>>, vector<1x1x32x32xbf16>
    %217 = vector.shape_cast %216 : vector<1x1x32x32xbf16> to vector<32x32xbf16>
    %cst_237 = arith.constant dense<0.000000e+00> : vector<224x32xf32>
    %218 = tpu.matmul %215, %217, %cst_237 {dimension_numbers = #tpu.dot_dimension_numbers<[1], [0], [0], [1], [0, 0, 1, 1], [], []>} : vector<224x32xbf16>, vector<32x32xbf16>, vector<224x32xf32> -> vector<224x32xf32>
    %219 = arith.addf %213, %218 : vector<224x32xf32>
    %c18_238 = arith.constant 18 : index
    %c0_239 = arith.constant 0 : index
    %220 = vector.load %arg11[%c18_238, %c0_239] : memref<264x32xf32, #tpu.memory_space<vmem>>, vector<224x32xf32>
    %221 = arith.truncf %220 : vector<224x32xf32> to vector<224x32xbf16>
    %c2_240 = arith.constant 2 : index
    %c5_241 = arith.constant 5 : index
    %c0_242 = arith.constant 0 : index
    %c0_243 = arith.constant 0 : index
    %222 = vector.load %arg2[%c2_240, %c5_241, %c0_242, %c0_243] : memref<3x9x32x32xbf16, #tpu.memory_space<vmem>>, vector<1x1x32x32xbf16>
    %223 = vector.shape_cast %222 : vector<1x1x32x32xbf16> to vector<32x32xbf16>
    %cst_244 = arith.constant dense<0.000000e+00> : vector<224x32xf32>
    %224 = tpu.matmul %221, %223, %cst_244 {dimension_numbers = #tpu.dot_dimension_numbers<[1], [0], [0], [1], [0, 0, 1, 1], [], []>} : vector<224x32xbf16>, vector<32x32xbf16>, vector<224x32xf32> -> vector<224x32xf32>
    %225 = arith.addf %219, %224 : vector<224x32xf32>
    %c32_245 = arith.constant 32 : index
    %c0_246 = arith.constant 0 : index
    %226 = vector.load %arg11[%c32_245, %c0_246] : memref<264x32xf32, #tpu.memory_space<vmem>>, vector<224x32xf32>
    %227 = arith.truncf %226 : vector<224x32xf32> to vector<224x32xbf16>
    %c2_247 = arith.constant 2 : index
    %c6_248 = arith.constant 6 : index
    %c0_249 = arith.constant 0 : index
    %c0_250 = arith.constant 0 : index
    %228 = vector.load %arg2[%c2_247, %c6_248, %c0_249, %c0_250] : memref<3x9x32x32xbf16, #tpu.memory_space<vmem>>, vector<1x1x32x32xbf16>
    %229 = vector.shape_cast %228 : vector<1x1x32x32xbf16> to vector<32x32xbf16>
    %cst_251 = arith.constant dense<0.000000e+00> : vector<224x32xf32>
    %230 = tpu.matmul %227, %229, %cst_251 {dimension_numbers = #tpu.dot_dimension_numbers<[1], [0], [0], [1], [0, 0, 1, 1], [], []>} : vector<224x32xbf16>, vector<32x32xbf16>, vector<224x32xf32> -> vector<224x32xf32>
    %231 = arith.addf %225, %230 : vector<224x32xf32>
    %c33_252 = arith.constant 33 : index
    %c0_253 = arith.constant 0 : index
    %232 = vector.load %arg11[%c33_252, %c0_253] : memref<264x32xf32, #tpu.memory_space<vmem>>, vector<224x32xf32>
    %233 = arith.truncf %232 : vector<224x32xf32> to vector<224x32xbf16>
    %c2_254 = arith.constant 2 : index
    %c7_255 = arith.constant 7 : index
    %c0_256 = arith.constant 0 : index
    %c0_257 = arith.constant 0 : index
    %234 = vector.load %arg2[%c2_254, %c7_255, %c0_256, %c0_257] : memref<3x9x32x32xbf16, #tpu.memory_space<vmem>>, vector<1x1x32x32xbf16>
    %235 = vector.shape_cast %234 : vector<1x1x32x32xbf16> to vector<32x32xbf16>
    %cst_258 = arith.constant dense<0.000000e+00> : vector<224x32xf32>
    %236 = tpu.matmul %233, %235, %cst_258 {dimension_numbers = #tpu.dot_dimension_numbers<[1], [0], [0], [1], [0, 0, 1, 1], [], []>} : vector<224x32xbf16>, vector<32x32xbf16>, vector<224x32xf32> -> vector<224x32xf32>
    %237 = arith.addf %231, %236 : vector<224x32xf32>
    %c34_259 = arith.constant 34 : index
    %c0_260 = arith.constant 0 : index
    %238 = vector.load %arg11[%c34_259, %c0_260] : memref<264x32xf32, #tpu.memory_space<vmem>>, vector<224x32xf32>
    %239 = arith.truncf %238 : vector<224x32xf32> to vector<224x32xbf16>
    %c2_261 = arith.constant 2 : index
    %c8_262 = arith.constant 8 : index
    %c0_263 = arith.constant 0 : index
    %c0_264 = arith.constant 0 : index
    %240 = vector.load %arg2[%c2_261, %c8_262, %c0_263, %c0_264] : memref<3x9x32x32xbf16, #tpu.memory_space<vmem>>, vector<1x1x32x32xbf16>
    %241 = vector.shape_cast %240 : vector<1x1x32x32xbf16> to vector<32x32xbf16>
    %cst_265 = arith.constant dense<0.000000e+00> : vector<224x32xf32>
    %242 = tpu.matmul %239, %241, %cst_265 {dimension_numbers = #tpu.dot_dimension_numbers<[1], [0], [0], [1], [0, 0, 1, 1], [], []>} : vector<224x32xbf16>, vector<32x32xbf16>, vector<224x32xf32> -> vector<224x32xf32>
    %243 = arith.addf %237, %242 : vector<224x32xf32>
    %c2_266 = arith.constant 2 : index
    %c0_267 = arith.constant 0 : index
    %c0_268 = arith.constant 0 : index
    %244 = vector.load %arg3[%c2_266, %c0_267, %c0_268] : memref<3x1x32xf32, #tpu.memory_space<vmem>>, vector<1x1x32xf32>
    %245 = vector.shape_cast %244 : vector<1x1x32xf32> to vector<1x32xf32>
    %246 = vector.broadcast %245 : vector<1x32xf32> to vector<224x32xf32>
    %247 = arith.addf %243, %246 : vector<224x32xf32>
    %cst_269 = arith.constant 0.000000e+00 : f32
    %248 = vector.broadcast %cst_269 : f32 to vector<224x32xf32>
    %249 = arith.maximumf %247, %248 : vector<224x32xf32>
    %cst_270 = arith.constant 0.000000e+00 : f32
    %250 = vector.broadcast %cst_270 : f32 to vector<264x32xf32>
    %c0_271 = arith.constant 0 : index
    %c0_272 = arith.constant 0 : index
    %251 = vector.load %arg12[%c0_271, %c0_272] : memref<264x32xf32, #tpu.memory_space<vmem>>, vector<264x32xf32>
    tpu.vector_store %arg12[%c0_271, %c0_272], %250 {strides = array<i32>} : memref<264x32xf32, #tpu.memory_space<vmem>>, vector<264x32xf32>,
    %cst_273 = arith.constant 0.000000e+00 : f32
    %252 = vector.broadcast %cst_273 : f32 to vector<224x32xf32>
    %253 = arith.select %62, %249, %252 : vector<224x32xi1>, vector<224x32xf32>
    %c17_274 = arith.constant 17 : index
    %c0_275 = arith.constant 0 : index
    %254 = vector.load %arg12[%c17_274, %c0_275] : memref<264x32xf32, #tpu.memory_space<vmem>>, vector<224x32xf32>
    tpu.vector_store %arg12[%c17_274, %c0_275], %253 {strides = array<i32>} : memref<264x32xf32, #tpu.memory_space<vmem>>, vector<224x32xf32>,
    %c17_276 = arith.constant 17 : index
    %c0_277 = arith.constant 0 : index
    %255 = vector.load %arg12[%c17_276, %c0_277] : memref<264x32xf32, #tpu.memory_space<vmem>>, vector<208x32xf32>
    %c18_278 = arith.constant 18 : index
    %c0_279 = arith.constant 0 : index
    %256 = vector.load %arg12[%c18_278, %c0_279] : memref<264x32xf32, #tpu.memory_space<vmem>>, vector<208x32xf32>
    %257 = arith.maximumf %255, %256 : vector<208x32xf32>
    %c33_280 = arith.constant 33 : index
    %c0_281 = arith.constant 0 : index
    %258 = vector.load %arg12[%c33_280, %c0_281] : memref<264x32xf32, #tpu.memory_space<vmem>>, vector<208x32xf32>
    %c34_282 = arith.constant 34 : index
    %c0_283 = arith.constant 0 : index
    %259 = vector.load %arg12[%c34_282, %c0_283] : memref<264x32xf32, #tpu.memory_space<vmem>>, vector<208x32xf32>
    %260 = arith.maximumf %258, %259 : vector<208x32xf32>
    %261 = arith.maximumf %257, %260 : vector<208x32xf32>
    %c0_284 = arith.constant 0 : index
    %c0_285 = arith.constant 0 : index
    %262 = vector.load %arg13[%c0_284, %c0_285] : memref<208x32xf32, #tpu.memory_space<vmem>>, vector<208x32xf32>
    tpu.vector_store %arg13[%c0_284, %c0_285], %261 {strides = array<i32>} : memref<208x32xf32, #tpu.memory_space<vmem>>, vector<208x32xf32>,
    %c0_286 = arith.constant 0 : index
    %c0_287 = arith.constant 0 : index
    %263 = vector.load %arg13[%c0_286, %c0_287] : memref<208x32xf32, #tpu.memory_space<vmem>>, vector<1x32xf32>
    %264 = arith.truncf %263 : vector<1x32xf32> to vector<1x32xbf16>
    %c0_288 = arith.constant 0 : index
    %c0_289 = arith.constant 0 : index
    %c0_290 = arith.constant 0 : index
    %265 = vector.load %arg4[%c0_288, %c0_289, %c0_290] : memref<49x32x64xbf16, #tpu.memory_space<vmem>>, vector<1x32x64xbf16>
    %266 = vector.shape_cast %265 : vector<1x32x64xbf16> to vector<32x64xbf16>
    %cst_291 = arith.constant dense<0.000000e+00> : vector<1x64xf32>
    %267 = tpu.matmul %264, %266, %cst_291 {dimension_numbers = #tpu.dot_dimension_numbers<[1], [0], [0], [1], [0, 0, 1, 1], [], []>} : vector<1x32xbf16>, vector<32x64xbf16>, vector<1x64xf32> -> vector<1x64xf32>
    %c2_292 = arith.constant 2 : index
    %c0_293 = arith.constant 0 : index
    %268 = vector.load %arg13[%c2_292, %c0_293] : memref<208x32xf32, #tpu.memory_space<vmem>>, vector<1x32xf32>
    %269 = arith.truncf %268 : vector<1x32xf32> to vector<1x32xbf16>
    %c1_294 = arith.constant 1 : index
    %c0_295 = arith.constant 0 : index
    %c0_296 = arith.constant 0 : index
    %270 = vector.load %arg4[%c1_294, %c0_295, %c0_296] : memref<49x32x64xbf16, #tpu.memory_space<vmem>>, vector<1x32x64xbf16>
    %271 = vector.shape_cast %270 : vector<1x32x64xbf16> to vector<32x64xbf16>
    %cst_297 = arith.constant dense<0.000000e+00> : vector<1x64xf32>
    %272 = tpu.matmul %269, %271, %cst_297 {dimension_numbers = #tpu.dot_dimension_numbers<[1], [0], [0], [1], [0, 0, 1, 1], [], []>} : vector<1x32xbf16>, vector<32x64xbf16>, vector<1x64xf32> -> vector<1x64xf32>
    %c4_298 = arith.constant 4 : index
    %c0_299 = arith.constant 0 : index
    %273 = vector.load %arg13[%c4_298, %c0_299] : memref<208x32xf32, #tpu.memory_space<vmem>>, vector<1x32xf32>
    %274 = arith.truncf %273 : vector<1x32xf32> to vector<1x32xbf16>
    %c2_300 = arith.constant 2 : index
    %c0_301 = arith.constant 0 : index
    %c0_302 = arith.constant 0 : index
    %275 = vector.load %arg4[%c2_300, %c0_301, %c0_302] : memref<49x32x64xbf16, #tpu.memory_space<vmem>>, vector<1x32x64xbf16>
    %276 = vector.shape_cast %275 : vector<1x32x64xbf16> to vector<32x64xbf16>
    %cst_303 = arith.constant dense<0.000000e+00> : vector<1x64xf32>
    %277 = tpu.matmul %274, %276, %cst_303 {dimension_numbers = #tpu.dot_dimension_numbers<[1], [0], [0], [1], [0, 0, 1, 1], [], []>} : vector<1x32xbf16>, vector<32x64xbf16>, vector<1x64xf32> -> vector<1x64xf32>
    %c6_304 = arith.constant 6 : index
    %c0_305 = arith.constant 0 : index
    %278 = vector.load %arg13[%c6_304, %c0_305] : memref<208x32xf32, #tpu.memory_space<vmem>>, vector<1x32xf32>
    %279 = arith.truncf %278 : vector<1x32xf32> to vector<1x32xbf16>
    %c3_306 = arith.constant 3 : index
    %c0_307 = arith.constant 0 : index
    %c0_308 = arith.constant 0 : index
    %280 = vector.load %arg4[%c3_306, %c0_307, %c0_308] : memref<49x32x64xbf16, #tpu.memory_space<vmem>>, vector<1x32x64xbf16>
    %281 = vector.shape_cast %280 : vector<1x32x64xbf16> to vector<32x64xbf16>
    %cst_309 = arith.constant dense<0.000000e+00> : vector<1x64xf32>
    %282 = tpu.matmul %279, %281, %cst_309 {dimension_numbers = #tpu.dot_dimension_numbers<[1], [0], [0], [1], [0, 0, 1, 1], [], []>} : vector<1x32xbf16>, vector<32x64xbf16>, vector<1x64xf32> -> vector<1x64xf32>
    %c8_310 = arith.constant 8 : index
    %c0_311 = arith.constant 0 : index
    %283 = vector.load %arg13[%c8_310, %c0_311] : memref<208x32xf32, #tpu.memory_space<vmem>>, vector<1x32xf32>
    %284 = arith.truncf %283 : vector<1x32xf32> to vector<1x32xbf16>
    %c4_312 = arith.constant 4 : index
    %c0_313 = arith.constant 0 : index
    %c0_314 = arith.constant 0 : index
    %285 = vector.load %arg4[%c4_312, %c0_313, %c0_314] : memref<49x32x64xbf16, #tpu.memory_space<vmem>>, vector<1x32x64xbf16>
    %286 = vector.shape_cast %285 : vector<1x32x64xbf16> to vector<32x64xbf16>
    %cst_315 = arith.constant dense<0.000000e+00> : vector<1x64xf32>
    %287 = tpu.matmul %284, %286, %cst_315 {dimension_numbers = #tpu.dot_dimension_numbers<[1], [0], [0], [1], [0, 0, 1, 1], [], []>} : vector<1x32xbf16>, vector<32x64xbf16>, vector<1x64xf32> -> vector<1x64xf32>
    %c10_316 = arith.constant 10 : index
    %c0_317 = arith.constant 0 : index
    %288 = vector.load %arg13[%c10_316, %c0_317] : memref<208x32xf32, #tpu.memory_space<vmem>>, vector<1x32xf32>
    %289 = arith.truncf %288 : vector<1x32xf32> to vector<1x32xbf16>
    %c5_318 = arith.constant 5 : index
    %c0_319 = arith.constant 0 : index
    %c0_320 = arith.constant 0 : index
    %290 = vector.load %arg4[%c5_318, %c0_319, %c0_320] : memref<49x32x64xbf16, #tpu.memory_space<vmem>>, vector<1x32x64xbf16>
    %291 = vector.shape_cast %290 : vector<1x32x64xbf16> to vector<32x64xbf16>
    %cst_321 = arith.constant dense<0.000000e+00> : vector<1x64xf32>
    %292 = tpu.matmul %289, %291, %cst_321 {dimension_numbers = #tpu.dot_dimension_numbers<[1], [0], [0], [1], [0, 0, 1, 1], [], []>} : vector<1x32xbf16>, vector<32x64xbf16>, vector<1x64xf32> -> vector<1x64xf32>
    %c12_322 = arith.constant 12 : index
    %c0_323 = arith.constant 0 : index
    %293 = vector.load %arg13[%c12_322, %c0_323] : memref<208x32xf32, #tpu.memory_space<vmem>>, vector<1x32xf32>
    %294 = arith.truncf %293 : vector<1x32xf32> to vector<1x32xbf16>
    %c6_324 = arith.constant 6 : index
    %c0_325 = arith.constant 0 : index
    %c0_326 = arith.constant 0 : index
    %295 = vector.load %arg4[%c6_324, %c0_325, %c0_326] : memref<49x32x64xbf16, #tpu.memory_space<vmem>>, vector<1x32x64xbf16>
    %296 = vector.shape_cast %295 : vector<1x32x64xbf16> to vector<32x64xbf16>
    %cst_327 = arith.constant dense<0.000000e+00> : vector<1x64xf32>
    %297 = tpu.matmul %294, %296, %cst_327 {dimension_numbers = #tpu.dot_dimension_numbers<[1], [0], [0], [1], [0, 0, 1, 1], [], []>} : vector<1x32xbf16>, vector<32x64xbf16>, vector<1x64xf32> -> vector<1x64xf32>
    %c32_328 = arith.constant 32 : index
    %c0_329 = arith.constant 0 : index
    %298 = vector.load %arg13[%c32_328, %c0_329] : memref<208x32xf32, #tpu.memory_space<vmem>>, vector<1x32xf32>
    %299 = arith.truncf %298 : vector<1x32xf32> to vector<1x32xbf16>
    %c7_330 = arith.constant 7 : index
    %c0_331 = arith.constant 0 : index
    %c0_332 = arith.constant 0 : index
    %300 = vector.load %arg4[%c7_330, %c0_331, %c0_332] : memref<49x32x64xbf16, #tpu.memory_space<vmem>>, vector<1x32x64xbf16>
    %301 = vector.shape_cast %300 : vector<1x32x64xbf16> to vector<32x64xbf16>
    %cst_333 = arith.constant dense<0.000000e+00> : vector<1x64xf32>
    %302 = tpu.matmul %299, %301, %cst_333 {dimension_numbers = #tpu.dot_dimension_numbers<[1], [0], [0], [1], [0, 0, 1, 1], [], []>} : vector<1x32xbf16>, vector<32x64xbf16>, vector<1x64xf32> -> vector<1x64xf32>
    %c34_334 = arith.constant 34 : index
    %c0_335 = arith.constant 0 : index
    %303 = vector.load %arg13[%c34_334, %c0_335] : memref<208x32xf32, #tpu.memory_space<vmem>>, vector<1x32xf32>
    %304 = arith.truncf %303 : vector<1x32xf32> to vector<1x32xbf16>
    %c8_336 = arith.constant 8 : index
    %c0_337 = arith.constant 0 : index
    %c0_338 = arith.constant 0 : index
    %305 = vector.load %arg4[%c8_336, %c0_337, %c0_338] : memref<49x32x64xbf16, #tpu.memory_space<vmem>>, vector<1x32x64xbf16>
    %306 = vector.shape_cast %305 : vector<1x32x64xbf16> to vector<32x64xbf16>
    %cst_339 = arith.constant dense<0.000000e+00> : vector<1x64xf32>
    %307 = tpu.matmul %304, %306, %cst_339 {dimension_numbers = #tpu.dot_dimension_numbers<[1], [0], [0], [1], [0, 0, 1, 1], [], []>} : vector<1x32xbf16>, vector<32x64xbf16>, vector<1x64xf32> -> vector<1x64xf32>
    %c36 = arith.constant 36 : index
    %c0_340 = arith.constant 0 : index
    %308 = vector.load %arg13[%c36, %c0_340] : memref<208x32xf32, #tpu.memory_space<vmem>>, vector<1x32xf32>
    %309 = arith.truncf %308 : vector<1x32xf32> to vector<1x32xbf16>
    %c9_341 = arith.constant 9 : index
    %c0_342 = arith.constant 0 : index
    %c0_343 = arith.constant 0 : index
    %310 = vector.load %arg4[%c9_341, %c0_342, %c0_343] : memref<49x32x64xbf16, #tpu.memory_space<vmem>>, vector<1x32x64xbf16>
    %311 = vector.shape_cast %310 : vector<1x32x64xbf16> to vector<32x64xbf16>
    %cst_344 = arith.constant dense<0.000000e+00> : vector<1x64xf32>
    %312 = tpu.matmul %309, %311, %cst_344 {dimension_numbers = #tpu.dot_dimension_numbers<[1], [0], [0], [1], [0, 0, 1, 1], [], []>} : vector<1x32xbf16>, vector<32x64xbf16>, vector<1x64xf32> -> vector<1x64xf32>
    %c38 = arith.constant 38 : index
    %c0_345 = arith.constant 0 : index
    %313 = vector.load %arg13[%c38, %c0_345] : memref<208x32xf32, #tpu.memory_space<vmem>>, vector<1x32xf32>
    %314 = arith.truncf %313 : vector<1x32xf32> to vector<1x32xbf16>
    %c10_346 = arith.constant 10 : index
    %c0_347 = arith.constant 0 : index
    %c0_348 = arith.constant 0 : index
    %315 = vector.load %arg4[%c10_346, %c0_347, %c0_348] : memref<49x32x64xbf16, #tpu.memory_space<vmem>>, vector<1x32x64xbf16>
    %316 = vector.shape_cast %315 : vector<1x32x64xbf16> to vector<32x64xbf16>
    %cst_349 = arith.constant dense<0.000000e+00> : vector<1x64xf32>
    %317 = tpu.matmul %314, %316, %cst_349 {dimension_numbers = #tpu.dot_dimension_numbers<[1], [0], [0], [1], [0, 0, 1, 1], [], []>} : vector<1x32xbf16>, vector<32x64xbf16>, vector<1x64xf32> -> vector<1x64xf32>
    %c40 = arith.constant 40 : index
    %c0_350 = arith.constant 0 : index
    %318 = vector.load %arg13[%c40, %c0_350] : memref<208x32xf32, #tpu.memory_space<vmem>>, vector<1x32xf32>
    %319 = arith.truncf %318 : vector<1x32xf32> to vector<1x32xbf16>
    %c11_351 = arith.constant 11 : index
    %c0_352 = arith.constant 0 : index
    %c0_353 = arith.constant 0 : index
    %320 = vector.load %arg4[%c11_351, %c0_352, %c0_353] : memref<49x32x64xbf16, #tpu.memory_space<vmem>>, vector<1x32x64xbf16>
    %321 = vector.shape_cast %320 : vector<1x32x64xbf16> to vector<32x64xbf16>
    %cst_354 = arith.constant dense<0.000000e+00> : vector<1x64xf32>
    %322 = tpu.matmul %319, %321, %cst_354 {dimension_numbers = #tpu.dot_dimension_numbers<[1], [0], [0], [1], [0, 0, 1, 1], [], []>} : vector<1x32xbf16>, vector<32x64xbf16>, vector<1x64xf32> -> vector<1x64xf32>
    %c42 = arith.constant 42 : index
    %c0_355 = arith.constant 0 : index
    %323 = vector.load %arg13[%c42, %c0_355] : memref<208x32xf32, #tpu.memory_space<vmem>>, vector<1x32xf32>
    %324 = arith.truncf %323 : vector<1x32xf32> to vector<1x32xbf16>
    %c12_356 = arith.constant 12 : index
    %c0_357 = arith.constant 0 : index
    %c0_358 = arith.constant 0 : index
    %325 = vector.load %arg4[%c12_356, %c0_357, %c0_358] : memref<49x32x64xbf16, #tpu.memory_space<vmem>>, vector<1x32x64xbf16>
    %326 = vector.shape_cast %325 : vector<1x32x64xbf16> to vector<32x64xbf16>
    %cst_359 = arith.constant dense<0.000000e+00> : vector<1x64xf32>
    %327 = tpu.matmul %324, %326, %cst_359 {dimension_numbers = #tpu.dot_dimension_numbers<[1], [0], [0], [1], [0, 0, 1, 1], [], []>} : vector<1x32xbf16>, vector<32x64xbf16>, vector<1x64xf32> -> vector<1x64xf32>
    %c44 = arith.constant 44 : index
    %c0_360 = arith.constant 0 : index
    %328 = vector.load %arg13[%c44, %c0_360] : memref<208x32xf32, #tpu.memory_space<vmem>>, vector<1x32xf32>
    %329 = arith.truncf %328 : vector<1x32xf32> to vector<1x32xbf16>
    %c13_361 = arith.constant 13 : index
    %c0_362 = arith.constant 0 : index
    %c0_363 = arith.constant 0 : index
    %330 = vector.load %arg4[%c13_361, %c0_362, %c0_363] : memref<49x32x64xbf16, #tpu.memory_space<vmem>>, vector<1x32x64xbf16>
    %331 = vector.shape_cast %330 : vector<1x32x64xbf16> to vector<32x64xbf16>
    %cst_364 = arith.constant dense<0.000000e+00> : vector<1x64xf32>
    %332 = tpu.matmul %329, %331, %cst_364 {dimension_numbers = #tpu.dot_dimension_numbers<[1], [0], [0], [1], [0, 0, 1, 1], [], []>} : vector<1x32xbf16>, vector<32x64xbf16>, vector<1x64xf32> -> vector<1x64xf32>
    %c64 = arith.constant 64 : index
    %c0_365 = arith.constant 0 : index
    %333 = vector.load %arg13[%c64, %c0_365] : memref<208x32xf32, #tpu.memory_space<vmem>>, vector<1x32xf32>
    %334 = arith.truncf %333 : vector<1x32xf32> to vector<1x32xbf16>
    %c14 = arith.constant 14 : index
    %c0_366 = arith.constant 0 : index
    %c0_367 = arith.constant 0 : index
    %335 = vector.load %arg4[%c14, %c0_366, %c0_367] : memref<49x32x64xbf16, #tpu.memory_space<vmem>>, vector<1x32x64xbf16>
    %336 = vector.shape_cast %335 : vector<1x32x64xbf16> to vector<32x64xbf16>
    %cst_368 = arith.constant dense<0.000000e+00> : vector<1x64xf32>
    %337 = tpu.matmul %334, %336, %cst_368 {dimension_numbers = #tpu.dot_dimension_numbers<[1], [0], [0], [1], [0, 0, 1, 1], [], []>} : vector<1x32xbf16>, vector<32x64xbf16>, vector<1x64xf32> -> vector<1x64xf32>
    %c66 = arith.constant 66 : index
    %c0_369 = arith.constant 0 : index
    %338 = vector.load %arg13[%c66, %c0_369] : memref<208x32xf32, #tpu.memory_space<vmem>>, vector<1x32xf32>
    %339 = arith.truncf %338 : vector<1x32xf32> to vector<1x32xbf16>
    %c15 = arith.constant 15 : index
    %c0_370 = arith.constant 0 : index
    %c0_371 = arith.constant 0 : index
    %340 = vector.load %arg4[%c15, %c0_370, %c0_371] : memref<49x32x64xbf16, #tpu.memory_space<vmem>>, vector<1x32x64xbf16>
    %341 = vector.shape_cast %340 : vector<1x32x64xbf16> to vector<32x64xbf16>
    %cst_372 = arith.constant dense<0.000000e+00> : vector<1x64xf32>
    %342 = tpu.matmul %339, %341, %cst_372 {dimension_numbers = #tpu.dot_dimension_numbers<[1], [0], [0], [1], [0, 0, 1, 1], [], []>} : vector<1x32xbf16>, vector<32x64xbf16>, vector<1x64xf32> -> vector<1x64xf32>
    %c68 = arith.constant 68 : index
    %c0_373 = arith.constant 0 : index
    %343 = vector.load %arg13[%c68, %c0_373] : memref<208x32xf32, #tpu.memory_space<vmem>>, vector<1x32xf32>
    %344 = arith.truncf %343 : vector<1x32xf32> to vector<1x32xbf16>
    %c16_374 = arith.constant 16 : index
    %c0_375 = arith.constant 0 : index
    %c0_376 = arith.constant 0 : index
    %345 = vector.load %arg4[%c16_374, %c0_375, %c0_376] : memref<49x32x64xbf16, #tpu.memory_space<vmem>>, vector<1x32x64xbf16>
    %346 = vector.shape_cast %345 : vector<1x32x64xbf16> to vector<32x64xbf16>
    %cst_377 = arith.constant dense<0.000000e+00> : vector<1x64xf32>
    %347 = tpu.matmul %344, %346, %cst_377 {dimension_numbers = #tpu.dot_dimension_numbers<[1], [0], [0], [1], [0, 0, 1, 1], [], []>} : vector<1x32xbf16>, vector<32x64xbf16>, vector<1x64xf32> -> vector<1x64xf32>
    %c70 = arith.constant 70 : index
    %c0_378 = arith.constant 0 : index
    %348 = vector.load %arg13[%c70, %c0_378] : memref<208x32xf32, #tpu.memory_space<vmem>>, vector<1x32xf32>
    %349 = arith.truncf %348 : vector<1x32xf32> to vector<1x32xbf16>
    %c17_379 = arith.constant 17 : index
    %c0_380 = arith.constant 0 : index
    %c0_381 = arith.constant 0 : index
    %350 = vector.load %arg4[%c17_379, %c0_380, %c0_381] : memref<49x32x64xbf16, #tpu.memory_space<vmem>>, vector<1x32x64xbf16>
    %351 = vector.shape_cast %350 : vector<1x32x64xbf16> to vector<32x64xbf16>
    %cst_382 = arith.constant dense<0.000000e+00> : vector<1x64xf32>
    %352 = tpu.matmul %349, %351, %cst_382 {dimension_numbers = #tpu.dot_dimension_numbers<[1], [0], [0], [1], [0, 0, 1, 1], [], []>} : vector<1x32xbf16>, vector<32x64xbf16>, vector<1x64xf32> -> vector<1x64xf32>
    %c72 = arith.constant 72 : index
    %c0_383 = arith.constant 0 : index
    %353 = vector.load %arg13[%c72, %c0_383] : memref<208x32xf32, #tpu.memory_space<vmem>>, vector<1x32xf32>
    %354 = arith.truncf %353 : vector<1x32xf32> to vector<1x32xbf16>
    %c18_384 = arith.constant 18 : index
    %c0_385 = arith.constant 0 : index
    %c0_386 = arith.constant 0 : index
    %355 = vector.load %arg4[%c18_384, %c0_385, %c0_386] : memref<49x32x64xbf16, #tpu.memory_space<vmem>>, vector<1x32x64xbf16>
    %356 = vector.shape_cast %355 : vector<1x32x64xbf16> to vector<32x64xbf16>
    %cst_387 = arith.constant dense<0.000000e+00> : vector<1x64xf32>
    %357 = tpu.matmul %354, %356, %cst_387 {dimension_numbers = #tpu.dot_dimension_numbers<[1], [0], [0], [1], [0, 0, 1, 1], [], []>} : vector<1x32xbf16>, vector<32x64xbf16>, vector<1x64xf32> -> vector<1x64xf32>
    %c74 = arith.constant 74 : index
    %c0_388 = arith.constant 0 : index
    %358 = vector.load %arg13[%c74, %c0_388] : memref<208x32xf32, #tpu.memory_space<vmem>>, vector<1x32xf32>
    %359 = arith.truncf %358 : vector<1x32xf32> to vector<1x32xbf16>
    %c19 = arith.constant 19 : index
    %c0_389 = arith.constant 0 : index
    %c0_390 = arith.constant 0 : index
    %360 = vector.load %arg4[%c19, %c0_389, %c0_390] : memref<49x32x64xbf16, #tpu.memory_space<vmem>>, vector<1x32x64xbf16>
    %361 = vector.shape_cast %360 : vector<1x32x64xbf16> to vector<32x64xbf16>
    %cst_391 = arith.constant dense<0.000000e+00> : vector<1x64xf32>
    %362 = tpu.matmul %359, %361, %cst_391 {dimension_numbers = #tpu.dot_dimension_numbers<[1], [0], [0], [1], [0, 0, 1, 1], [], []>} : vector<1x32xbf16>, vector<32x64xbf16>, vector<1x64xf32> -> vector<1x64xf32>
    %c76 = arith.constant 76 : index
    %c0_392 = arith.constant 0 : index
    %363 = vector.load %arg13[%c76, %c0_392] : memref<208x32xf32, #tpu.memory_space<vmem>>, vector<1x32xf32>
    %364 = arith.truncf %363 : vector<1x32xf32> to vector<1x32xbf16>
    %c20 = arith.constant 20 : index
    %c0_393 = arith.constant 0 : index
    %c0_394 = arith.constant 0 : index
    %365 = vector.load %arg4[%c20, %c0_393, %c0_394] : memref<49x32x64xbf16, #tpu.memory_space<vmem>>, vector<1x32x64xbf16>
    %366 = vector.shape_cast %365 : vector<1x32x64xbf16> to vector<32x64xbf16>
    %cst_395 = arith.constant dense<0.000000e+00> : vector<1x64xf32>
    %367 = tpu.matmul %364, %366, %cst_395 {dimension_numbers = #tpu.dot_dimension_numbers<[1], [0], [0], [1], [0, 0, 1, 1], [], []>} : vector<1x32xbf16>, vector<32x64xbf16>, vector<1x64xf32> -> vector<1x64xf32>
    %c96 = arith.constant 96 : index
    %c0_396 = arith.constant 0 : index
    %368 = vector.load %arg13[%c96, %c0_396] : memref<208x32xf32, #tpu.memory_space<vmem>>, vector<1x32xf32>
    %369 = arith.truncf %368 : vector<1x32xf32> to vector<1x32xbf16>
    %c21 = arith.constant 21 : index
    %c0_397 = arith.constant 0 : index
    %c0_398 = arith.constant 0 : index
    %370 = vector.load %arg4[%c21, %c0_397, %c0_398] : memref<49x32x64xbf16, #tpu.memory_space<vmem>>, vector<1x32x64xbf16>
    %371 = vector.shape_cast %370 : vector<1x32x64xbf16> to vector<32x64xbf16>
    %cst_399 = arith.constant dense<0.000000e+00> : vector<1x64xf32>
    %372 = tpu.matmul %369, %371, %cst_399 {dimension_numbers = #tpu.dot_dimension_numbers<[1], [0], [0], [1], [0, 0, 1, 1], [], []>} : vector<1x32xbf16>, vector<32x64xbf16>, vector<1x64xf32> -> vector<1x64xf32>
    %c98 = arith.constant 98 : index
    %c0_400 = arith.constant 0 : index
    %373 = vector.load %arg13[%c98, %c0_400] : memref<208x32xf32, #tpu.memory_space<vmem>>, vector<1x32xf32>
    %374 = arith.truncf %373 : vector<1x32xf32> to vector<1x32xbf16>
    %c22 = arith.constant 22 : index
    %c0_401 = arith.constant 0 : index
    %c0_402 = arith.constant 0 : index
    %375 = vector.load %arg4[%c22, %c0_401, %c0_402] : memref<49x32x64xbf16, #tpu.memory_space<vmem>>, vector<1x32x64xbf16>
    %376 = vector.shape_cast %375 : vector<1x32x64xbf16> to vector<32x64xbf16>
    %cst_403 = arith.constant dense<0.000000e+00> : vector<1x64xf32>
    %377 = tpu.matmul %374, %376, %cst_403 {dimension_numbers = #tpu.dot_dimension_numbers<[1], [0], [0], [1], [0, 0, 1, 1], [], []>} : vector<1x32xbf16>, vector<32x64xbf16>, vector<1x64xf32> -> vector<1x64xf32>
    %c100 = arith.constant 100 : index
    %c0_404 = arith.constant 0 : index
    %378 = vector.load %arg13[%c100, %c0_404] : memref<208x32xf32, #tpu.memory_space<vmem>>, vector<1x32xf32>
    %379 = arith.truncf %378 : vector<1x32xf32> to vector<1x32xbf16>
    %c23 = arith.constant 23 : index
    %c0_405 = arith.constant 0 : index
    %c0_406 = arith.constant 0 : index
    %380 = vector.load %arg4[%c23, %c0_405, %c0_406] : memref<49x32x64xbf16, #tpu.memory_space<vmem>>, vector<1x32x64xbf16>
    %381 = vector.shape_cast %380 : vector<1x32x64xbf16> to vector<32x64xbf16>
    %cst_407 = arith.constant dense<0.000000e+00> : vector<1x64xf32>
    %382 = tpu.matmul %379, %381, %cst_407 {dimension_numbers = #tpu.dot_dimension_numbers<[1], [0], [0], [1], [0, 0, 1, 1], [], []>} : vector<1x32xbf16>, vector<32x64xbf16>, vector<1x64xf32> -> vector<1x64xf32>
    %c102 = arith.constant 102 : index
    %c0_408 = arith.constant 0 : index
    %383 = vector.load %arg13[%c102, %c0_408] : memref<208x32xf32, #tpu.memory_space<vmem>>, vector<1x32xf32>
    %384 = arith.truncf %383 : vector<1x32xf32> to vector<1x32xbf16>
    %c24 = arith.constant 24 : index
    %c0_409 = arith.constant 0 : index
    %c0_410 = arith.constant 0 : index
    %385 = vector.load %arg4[%c24, %c0_409, %c0_410] : memref<49x32x64xbf16, #tpu.memory_space<vmem>>, vector<1x32x64xbf16>
    %386 = vector.shape_cast %385 : vector<1x32x64xbf16> to vector<32x64xbf16>
    %cst_411 = arith.constant dense<0.000000e+00> : vector<1x64xf32>
    %387 = tpu.matmul %384, %386, %cst_411 {dimension_numbers = #tpu.dot_dimension_numbers<[1], [0], [0], [1], [0, 0, 1, 1], [], []>} : vector<1x32xbf16>, vector<32x64xbf16>, vector<1x64xf32> -> vector<1x64xf32>
    %c104 = arith.constant 104 : index
    %c0_412 = arith.constant 0 : index
    %388 = vector.load %arg13[%c104, %c0_412] : memref<208x32xf32, #tpu.memory_space<vmem>>, vector<1x32xf32>
    %389 = arith.truncf %388 : vector<1x32xf32> to vector<1x32xbf16>
    %c25 = arith.constant 25 : index
    %c0_413 = arith.constant 0 : index
    %c0_414 = arith.constant 0 : index
    %390 = vector.load %arg4[%c25, %c0_413, %c0_414] : memref<49x32x64xbf16, #tpu.memory_space<vmem>>, vector<1x32x64xbf16>
    %391 = vector.shape_cast %390 : vector<1x32x64xbf16> to vector<32x64xbf16>
    %cst_415 = arith.constant dense<0.000000e+00> : vector<1x64xf32>
    %392 = tpu.matmul %389, %391, %cst_415 {dimension_numbers = #tpu.dot_dimension_numbers<[1], [0], [0], [1], [0, 0, 1, 1], [], []>} : vector<1x32xbf16>, vector<32x64xbf16>, vector<1x64xf32> -> vector<1x64xf32>
    %c106 = arith.constant 106 : index
    %c0_416 = arith.constant 0 : index
    %393 = vector.load %arg13[%c106, %c0_416] : memref<208x32xf32, #tpu.memory_space<vmem>>, vector<1x32xf32>
    %394 = arith.truncf %393 : vector<1x32xf32> to vector<1x32xbf16>
    %c26 = arith.constant 26 : index
    %c0_417 = arith.constant 0 : index
    %c0_418 = arith.constant 0 : index
    %395 = vector.load %arg4[%c26, %c0_417, %c0_418] : memref<49x32x64xbf16, #tpu.memory_space<vmem>>, vector<1x32x64xbf16>
    %396 = vector.shape_cast %395 : vector<1x32x64xbf16> to vector<32x64xbf16>
    %cst_419 = arith.constant dense<0.000000e+00> : vector<1x64xf32>
    %397 = tpu.matmul %394, %396, %cst_419 {dimension_numbers = #tpu.dot_dimension_numbers<[1], [0], [0], [1], [0, 0, 1, 1], [], []>} : vector<1x32xbf16>, vector<32x64xbf16>, vector<1x64xf32> -> vector<1x64xf32>
    %c108 = arith.constant 108 : index
    %c0_420 = arith.constant 0 : index
    %398 = vector.load %arg13[%c108, %c0_420] : memref<208x32xf32, #tpu.memory_space<vmem>>, vector<1x32xf32>
    %399 = arith.truncf %398 : vector<1x32xf32> to vector<1x32xbf16>
    %c27 = arith.constant 27 : index
    %c0_421 = arith.constant 0 : index
    %c0_422 = arith.constant 0 : index
    %400 = vector.load %arg4[%c27, %c0_421, %c0_422] : memref<49x32x64xbf16, #tpu.memory_space<vmem>>, vector<1x32x64xbf16>
    %401 = vector.shape_cast %400 : vector<1x32x64xbf16> to vector<32x64xbf16>
    %cst_423 = arith.constant dense<0.000000e+00> : vector<1x64xf32>
    %402 = tpu.matmul %399, %401, %cst_423 {dimension_numbers = #tpu.dot_dimension_numbers<[1], [0], [0], [1], [0, 0, 1, 1], [], []>} : vector<1x32xbf16>, vector<32x64xbf16>, vector<1x64xf32> -> vector<1x64xf32>
    %c128 = arith.constant 128 : index
    %c0_424 = arith.constant 0 : index
    %403 = vector.load %arg13[%c128, %c0_424] : memref<208x32xf32, #tpu.memory_space<vmem>>, vector<1x32xf32>
    %404 = arith.truncf %403 : vector<1x32xf32> to vector<1x32xbf16>
    %c28 = arith.constant 28 : index
    %c0_425 = arith.constant 0 : index
    %c0_426 = arith.constant 0 : index
    %405 = vector.load %arg4[%c28, %c0_425, %c0_426] : memref<49x32x64xbf16, #tpu.memory_space<vmem>>, vector<1x32x64xbf16>
    %406 = vector.shape_cast %405 : vector<1x32x64xbf16> to vector<32x64xbf16>
    %cst_427 = arith.constant dense<0.000000e+00> : vector<1x64xf32>
    %407 = tpu.matmul %404, %406, %cst_427 {dimension_numbers = #tpu.dot_dimension_numbers<[1], [0], [0], [1], [0, 0, 1, 1], [], []>} : vector<1x32xbf16>, vector<32x64xbf16>, vector<1x64xf32> -> vector<1x64xf32>
    %c130 = arith.constant 130 : index
    %c0_428 = arith.constant 0 : index
    %408 = vector.load %arg13[%c130, %c0_428] : memref<208x32xf32, #tpu.memory_space<vmem>>, vector<1x32xf32>
    %409 = arith.truncf %408 : vector<1x32xf32> to vector<1x32xbf16>
    %c29 = arith.constant 29 : index
    %c0_429 = arith.constant 0 : index
    %c0_430 = arith.constant 0 : index
    %410 = vector.load %arg4[%c29, %c0_429, %c0_430] : memref<49x32x64xbf16, #tpu.memory_space<vmem>>, vector<1x32x64xbf16>
    %411 = vector.shape_cast %410 : vector<1x32x64xbf16> to vector<32x64xbf16>
    %cst_431 = arith.constant dense<0.000000e+00> : vector<1x64xf32>
    %412 = tpu.matmul %409, %411, %cst_431 {dimension_numbers = #tpu.dot_dimension_numbers<[1], [0], [0], [1], [0, 0, 1, 1], [], []>} : vector<1x32xbf16>, vector<32x64xbf16>, vector<1x64xf32> -> vector<1x64xf32>
    %c132 = arith.constant 132 : index
    %c0_432 = arith.constant 0 : index
    %413 = vector.load %arg13[%c132, %c0_432] : memref<208x32xf32, #tpu.memory_space<vmem>>, vector<1x32xf32>
    %414 = arith.truncf %413 : vector<1x32xf32> to vector<1x32xbf16>
    %c30 = arith.constant 30 : index
    %c0_433 = arith.constant 0 : index
    %c0_434 = arith.constant 0 : index
    %415 = vector.load %arg4[%c30, %c0_433, %c0_434] : memref<49x32x64xbf16, #tpu.memory_space<vmem>>, vector<1x32x64xbf16>
    %416 = vector.shape_cast %415 : vector<1x32x64xbf16> to vector<32x64xbf16>
    %cst_435 = arith.constant dense<0.000000e+00> : vector<1x64xf32>
    %417 = tpu.matmul %414, %416, %cst_435 {dimension_numbers = #tpu.dot_dimension_numbers<[1], [0], [0], [1], [0, 0, 1, 1], [], []>} : vector<1x32xbf16>, vector<32x64xbf16>, vector<1x64xf32> -> vector<1x64xf32>
    %c134 = arith.constant 134 : index
    %c0_436 = arith.constant 0 : index
    %418 = vector.load %arg13[%c134, %c0_436] : memref<208x32xf32, #tpu.memory_space<vmem>>, vector<1x32xf32>
    %419 = arith.truncf %418 : vector<1x32xf32> to vector<1x32xbf16>
    %c31 = arith.constant 31 : index
    %c0_437 = arith.constant 0 : index
    %c0_438 = arith.constant 0 : index
    %420 = vector.load %arg4[%c31, %c0_437, %c0_438] : memref<49x32x64xbf16, #tpu.memory_space<vmem>>, vector<1x32x64xbf16>
    %421 = vector.shape_cast %420 : vector<1x32x64xbf16> to vector<32x64xbf16>
    %cst_439 = arith.constant dense<0.000000e+00> : vector<1x64xf32>
    %422 = tpu.matmul %419, %421, %cst_439 {dimension_numbers = #tpu.dot_dimension_numbers<[1], [0], [0], [1], [0, 0, 1, 1], [], []>} : vector<1x32xbf16>, vector<32x64xbf16>, vector<1x64xf32> -> vector<1x64xf32>
    %c136 = arith.constant 136 : index
    %c0_440 = arith.constant 0 : index
    %423 = vector.load %arg13[%c136, %c0_440] : memref<208x32xf32, #tpu.memory_space<vmem>>, vector<1x32xf32>
    %424 = arith.truncf %423 : vector<1x32xf32> to vector<1x32xbf16>
    %c32_441 = arith.constant 32 : index
    %c0_442 = arith.constant 0 : index
    %c0_443 = arith.constant 0 : index
    %425 = vector.load %arg4[%c32_441, %c0_442, %c0_443] : memref<49x32x64xbf16, #tpu.memory_space<vmem>>, vector<1x32x64xbf16>
    %426 = vector.shape_cast %425 : vector<1x32x64xbf16> to vector<32x64xbf16>
    %cst_444 = arith.constant dense<0.000000e+00> : vector<1x64xf32>
    %427 = tpu.matmul %424, %426, %cst_444 {dimension_numbers = #tpu.dot_dimension_numbers<[1], [0], [0], [1], [0, 0, 1, 1], [], []>} : vector<1x32xbf16>, vector<32x64xbf16>, vector<1x64xf32> -> vector<1x64xf32>
    %c138 = arith.constant 138 : index
    %c0_445 = arith.constant 0 : index
    %428 = vector.load %arg13[%c138, %c0_445] : memref<208x32xf32, #tpu.memory_space<vmem>>, vector<1x32xf32>
    %429 = arith.truncf %428 : vector<1x32xf32> to vector<1x32xbf16>
    %c33_446 = arith.constant 33 : index
    %c0_447 = arith.constant 0 : index
    %c0_448 = arith.constant 0 : index
    %430 = vector.load %arg4[%c33_446, %c0_447, %c0_448] : memref<49x32x64xbf16, #tpu.memory_space<vmem>>, vector<1x32x64xbf16>
    %431 = vector.shape_cast %430 : vector<1x32x64xbf16> to vector<32x64xbf16>
    %cst_449 = arith.constant dense<0.000000e+00> : vector<1x64xf32>
    %432 = tpu.matmul %429, %431, %cst_449 {dimension_numbers = #tpu.dot_dimension_numbers<[1], [0], [0], [1], [0, 0, 1, 1], [], []>} : vector<1x32xbf16>, vector<32x64xbf16>, vector<1x64xf32> -> vector<1x64xf32>
    %c140 = arith.constant 140 : index
    %c0_450 = arith.constant 0 : index
    %433 = vector.load %arg13[%c140, %c0_450] : memref<208x32xf32, #tpu.memory_space<vmem>>, vector<1x32xf32>
    %434 = arith.truncf %433 : vector<1x32xf32> to vector<1x32xbf16>
    %c34_451 = arith.constant 34 : index
    %c0_452 = arith.constant 0 : index
    %c0_453 = arith.constant 0 : index
    %435 = vector.load %arg4[%c34_451, %c0_452, %c0_453] : memref<49x32x64xbf16, #tpu.memory_space<vmem>>, vector<1x32x64xbf16>
    %436 = vector.shape_cast %435 : vector<1x32x64xbf16> to vector<32x64xbf16>
    %cst_454 = arith.constant dense<0.000000e+00> : vector<1x64xf32>
    %437 = tpu.matmul %434, %436, %cst_454 {dimension_numbers = #tpu.dot_dimension_numbers<[1], [0], [0], [1], [0, 0, 1, 1], [], []>} : vector<1x32xbf16>, vector<32x64xbf16>, vector<1x64xf32> -> vector<1x64xf32>
    %c160 = arith.constant 160 : index
    %c0_455 = arith.constant 0 : index
    %438 = vector.load %arg13[%c160, %c0_455] : memref<208x32xf32, #tpu.memory_space<vmem>>, vector<1x32xf32>
    %439 = arith.truncf %438 : vector<1x32xf32> to vector<1x32xbf16>
    %c35 = arith.constant 35 : index
    %c0_456 = arith.constant 0 : index
    %c0_457 = arith.constant 0 : index
    %440 = vector.load %arg4[%c35, %c0_456, %c0_457] : memref<49x32x64xbf16, #tpu.memory_space<vmem>>, vector<1x32x64xbf16>
    %441 = vector.shape_cast %440 : vector<1x32x64xbf16> to vector<32x64xbf16>
    %cst_458 = arith.constant dense<0.000000e+00> : vector<1x64xf32>
    %442 = tpu.matmul %439, %441, %cst_458 {dimension_numbers = #tpu.dot_dimension_numbers<[1], [0], [0], [1], [0, 0, 1, 1], [], []>} : vector<1x32xbf16>, vector<32x64xbf16>, vector<1x64xf32> -> vector<1x64xf32>
    %c162 = arith.constant 162 : index
    %c0_459 = arith.constant 0 : index
    %443 = vector.load %arg13[%c162, %c0_459] : memref<208x32xf32, #tpu.memory_space<vmem>>, vector<1x32xf32>
    %444 = arith.truncf %443 : vector<1x32xf32> to vector<1x32xbf16>
    %c36_460 = arith.constant 36 : index
    %c0_461 = arith.constant 0 : index
    %c0_462 = arith.constant 0 : index
    %445 = vector.load %arg4[%c36_460, %c0_461, %c0_462] : memref<49x32x64xbf16, #tpu.memory_space<vmem>>, vector<1x32x64xbf16>
    %446 = vector.shape_cast %445 : vector<1x32x64xbf16> to vector<32x64xbf16>
    %cst_463 = arith.constant dense<0.000000e+00> : vector<1x64xf32>
    %447 = tpu.matmul %444, %446, %cst_463 {dimension_numbers = #tpu.dot_dimension_numbers<[1], [0], [0], [1], [0, 0, 1, 1], [], []>} : vector<1x32xbf16>, vector<32x64xbf16>, vector<1x64xf32> -> vector<1x64xf32>
    %c164 = arith.constant 164 : index
    %c0_464 = arith.constant 0 : index
    %448 = vector.load %arg13[%c164, %c0_464] : memref<208x32xf32, #tpu.memory_space<vmem>>, vector<1x32xf32>
    %449 = arith.truncf %448 : vector<1x32xf32> to vector<1x32xbf16>
    %c37 = arith.constant 37 : index
    %c0_465 = arith.constant 0 : index
    %c0_466 = arith.constant 0 : index
    %450 = vector.load %arg4[%c37, %c0_465, %c0_466] : memref<49x32x64xbf16, #tpu.memory_space<vmem>>, vector<1x32x64xbf16>
    %451 = vector.shape_cast %450 : vector<1x32x64xbf16> to vector<32x64xbf16>
    %cst_467 = arith.constant dense<0.000000e+00> : vector<1x64xf32>
    %452 = tpu.matmul %449, %451, %cst_467 {dimension_numbers = #tpu.dot_dimension_numbers<[1], [0], [0], [1], [0, 0, 1, 1], [], []>} : vector<1x32xbf16>, vector<32x64xbf16>, vector<1x64xf32> -> vector<1x64xf32>
    %c166 = arith.constant 166 : index
    %c0_468 = arith.constant 0 : index
    %453 = vector.load %arg13[%c166, %c0_468] : memref<208x32xf32, #tpu.memory_space<vmem>>, vector<1x32xf32>
    %454 = arith.truncf %453 : vector<1x32xf32> to vector<1x32xbf16>
    %c38_469 = arith.constant 38 : index
    %c0_470 = arith.constant 0 : index
    %c0_471 = arith.constant 0 : index
    %455 = vector.load %arg4[%c38_469, %c0_470, %c0_471] : memref<49x32x64xbf16, #tpu.memory_space<vmem>>, vector<1x32x64xbf16>
    %456 = vector.shape_cast %455 : vector<1x32x64xbf16> to vector<32x64xbf16>
    %cst_472 = arith.constant dense<0.000000e+00> : vector<1x64xf32>
    %457 = tpu.matmul %454, %456, %cst_472 {dimension_numbers = #tpu.dot_dimension_numbers<[1], [0], [0], [1], [0, 0, 1, 1], [], []>} : vector<1x32xbf16>, vector<32x64xbf16>, vector<1x64xf32> -> vector<1x64xf32>
    %c168 = arith.constant 168 : index
    %c0_473 = arith.constant 0 : index
    %458 = vector.load %arg13[%c168, %c0_473] : memref<208x32xf32, #tpu.memory_space<vmem>>, vector<1x32xf32>
    %459 = arith.truncf %458 : vector<1x32xf32> to vector<1x32xbf16>
    %c39 = arith.constant 39 : index
    %c0_474 = arith.constant 0 : index
    %c0_475 = arith.constant 0 : index
    %460 = vector.load %arg4[%c39, %c0_474, %c0_475] : memref<49x32x64xbf16, #tpu.memory_space<vmem>>, vector<1x32x64xbf16>
    %461 = vector.shape_cast %460 : vector<1x32x64xbf16> to vector<32x64xbf16>
    %cst_476 = arith.constant dense<0.000000e+00> : vector<1x64xf32>
    %462 = tpu.matmul %459, %461, %cst_476 {dimension_numbers = #tpu.dot_dimension_numbers<[1], [0], [0], [1], [0, 0, 1, 1], [], []>} : vector<1x32xbf16>, vector<32x64xbf16>, vector<1x64xf32> -> vector<1x64xf32>
    %c170 = arith.constant 170 : index
    %c0_477 = arith.constant 0 : index
    %463 = vector.load %arg13[%c170, %c0_477] : memref<208x32xf32, #tpu.memory_space<vmem>>, vector<1x32xf32>
    %464 = arith.truncf %463 : vector<1x32xf32> to vector<1x32xbf16>
    %c40_478 = arith.constant 40 : index
    %c0_479 = arith.constant 0 : index
    %c0_480 = arith.constant 0 : index
    %465 = vector.load %arg4[%c40_478, %c0_479, %c0_480] : memref<49x32x64xbf16, #tpu.memory_space<vmem>>, vector<1x32x64xbf16>
    %466 = vector.shape_cast %465 : vector<1x32x64xbf16> to vector<32x64xbf16>
    %cst_481 = arith.constant dense<0.000000e+00> : vector<1x64xf32>
    %467 = tpu.matmul %464, %466, %cst_481 {dimension_numbers = #tpu.dot_dimension_numbers<[1], [0], [0], [1], [0, 0, 1, 1], [], []>} : vector<1x32xbf16>, vector<32x64xbf16>, vector<1x64xf32> -> vector<1x64xf32>
    %c172 = arith.constant 172 : index
    %c0_482 = arith.constant 0 : index
    %468 = vector.load %arg13[%c172, %c0_482] : memref<208x32xf32, #tpu.memory_space<vmem>>, vector<1x32xf32>
    %469 = arith.truncf %468 : vector<1x32xf32> to vector<1x32xbf16>
    %c41 = arith.constant 41 : index
    %c0_483 = arith.constant 0 : index
    %c0_484 = arith.constant 0 : index
    %470 = vector.load %arg4[%c41, %c0_483, %c0_484] : memref<49x32x64xbf16, #tpu.memory_space<vmem>>, vector<1x32x64xbf16>
    %471 = vector.shape_cast %470 : vector<1x32x64xbf16> to vector<32x64xbf16>
    %cst_485 = arith.constant dense<0.000000e+00> : vector<1x64xf32>
    %472 = tpu.matmul %469, %471, %cst_485 {dimension_numbers = #tpu.dot_dimension_numbers<[1], [0], [0], [1], [0, 0, 1, 1], [], []>} : vector<1x32xbf16>, vector<32x64xbf16>, vector<1x64xf32> -> vector<1x64xf32>
    %c192 = arith.constant 192 : index
    %c0_486 = arith.constant 0 : index
    %473 = vector.load %arg13[%c192, %c0_486] : memref<208x32xf32, #tpu.memory_space<vmem>>, vector<1x32xf32>
    %474 = arith.truncf %473 : vector<1x32xf32> to vector<1x32xbf16>
    %c42_487 = arith.constant 42 : index
    %c0_488 = arith.constant 0 : index
    %c0_489 = arith.constant 0 : index
    %475 = vector.load %arg4[%c42_487, %c0_488, %c0_489] : memref<49x32x64xbf16, #tpu.memory_space<vmem>>, vector<1x32x64xbf16>
    %476 = vector.shape_cast %475 : vector<1x32x64xbf16> to vector<32x64xbf16>
    %cst_490 = arith.constant dense<0.000000e+00> : vector<1x64xf32>
    %477 = tpu.matmul %474, %476, %cst_490 {dimension_numbers = #tpu.dot_dimension_numbers<[1], [0], [0], [1], [0, 0, 1, 1], [], []>} : vector<1x32xbf16>, vector<32x64xbf16>, vector<1x64xf32> -> vector<1x64xf32>
    %c194 = arith.constant 194 : index
    %c0_491 = arith.constant 0 : index
    %478 = vector.load %arg13[%c194, %c0_491] : memref<208x32xf32, #tpu.memory_space<vmem>>, vector<1x32xf32>
    %479 = arith.truncf %478 : vector<1x32xf32> to vector<1x32xbf16>
    %c43 = arith.constant 43 : index
    %c0_492 = arith.constant 0 : index
    %c0_493 = arith.constant 0 : index
    %480 = vector.load %arg4[%c43, %c0_492, %c0_493] : memref<49x32x64xbf16, #tpu.memory_space<vmem>>, vector<1x32x64xbf16>
    %481 = vector.shape_cast %480 : vector<1x32x64xbf16> to vector<32x64xbf16>
    %cst_494 = arith.constant dense<0.000000e+00> : vector<1x64xf32>
    %482 = tpu.matmul %479, %481, %cst_494 {dimension_numbers = #tpu.dot_dimension_numbers<[1], [0], [0], [1], [0, 0, 1, 1], [], []>} : vector<1x32xbf16>, vector<32x64xbf16>, vector<1x64xf32> -> vector<1x64xf32>
    %c196 = arith.constant 196 : index
    %c0_495 = arith.constant 0 : index
    %483 = vector.load %arg13[%c196, %c0_495] : memref<208x32xf32, #tpu.memory_space<vmem>>, vector<1x32xf32>
    %484 = arith.truncf %483 : vector<1x32xf32> to vector<1x32xbf16>
    %c44_496 = arith.constant 44 : index
    %c0_497 = arith.constant 0 : index
    %c0_498 = arith.constant 0 : index
    %485 = vector.load %arg4[%c44_496, %c0_497, %c0_498] : memref<49x32x64xbf16, #tpu.memory_space<vmem>>, vector<1x32x64xbf16>
    %486 = vector.shape_cast %485 : vector<1x32x64xbf16> to vector<32x64xbf16>
    %cst_499 = arith.constant dense<0.000000e+00> : vector<1x64xf32>
    %487 = tpu.matmul %484, %486, %cst_499 {dimension_numbers = #tpu.dot_dimension_numbers<[1], [0], [0], [1], [0, 0, 1, 1], [], []>} : vector<1x32xbf16>, vector<32x64xbf16>, vector<1x64xf32> -> vector<1x64xf32>
    %c198 = arith.constant 198 : index
    %c0_500 = arith.constant 0 : index
    %488 = vector.load %arg13[%c198, %c0_500] : memref<208x32xf32, #tpu.memory_space<vmem>>, vector<1x32xf32>
    %489 = arith.truncf %488 : vector<1x32xf32> to vector<1x32xbf16>
    %c45 = arith.constant 45 : index
    %c0_501 = arith.constant 0 : index
    %c0_502 = arith.constant 0 : index
    %490 = vector.load %arg4[%c45, %c0_501, %c0_502] : memref<49x32x64xbf16, #tpu.memory_space<vmem>>, vector<1x32x64xbf16>
    %491 = vector.shape_cast %490 : vector<1x32x64xbf16> to vector<32x64xbf16>
    %cst_503 = arith.constant dense<0.000000e+00> : vector<1x64xf32>
    %492 = tpu.matmul %489, %491, %cst_503 {dimension_numbers = #tpu.dot_dimension_numbers<[1], [0], [0], [1], [0, 0, 1, 1], [], []>} : vector<1x32xbf16>, vector<32x64xbf16>, vector<1x64xf32> -> vector<1x64xf32>
    %c200 = arith.constant 200 : index
    %c0_504 = arith.constant 0 : index
    %493 = vector.load %arg13[%c200, %c0_504] : memref<208x32xf32, #tpu.memory_space<vmem>>, vector<1x32xf32>
    %494 = arith.truncf %493 : vector<1x32xf32> to vector<1x32xbf16>
    %c46 = arith.constant 46 : index
    %c0_505 = arith.constant 0 : index
    %c0_506 = arith.constant 0 : index
    %495 = vector.load %arg4[%c46, %c0_505, %c0_506] : memref<49x32x64xbf16, #tpu.memory_space<vmem>>, vector<1x32x64xbf16>
    %496 = vector.shape_cast %495 : vector<1x32x64xbf16> to vector<32x64xbf16>
    %cst_507 = arith.constant dense<0.000000e+00> : vector<1x64xf32>
    %497 = tpu.matmul %494, %496, %cst_507 {dimension_numbers = #tpu.dot_dimension_numbers<[1], [0], [0], [1], [0, 0, 1, 1], [], []>} : vector<1x32xbf16>, vector<32x64xbf16>, vector<1x64xf32> -> vector<1x64xf32>
    %c202 = arith.constant 202 : index
    %c0_508 = arith.constant 0 : index
    %498 = vector.load %arg13[%c202, %c0_508] : memref<208x32xf32, #tpu.memory_space<vmem>>, vector<1x32xf32>
    %499 = arith.truncf %498 : vector<1x32xf32> to vector<1x32xbf16>
    %c47 = arith.constant 47 : index
    %c0_509 = arith.constant 0 : index
    %c0_510 = arith.constant 0 : index
    %500 = vector.load %arg4[%c47, %c0_509, %c0_510] : memref<49x32x64xbf16, #tpu.memory_space<vmem>>, vector<1x32x64xbf16>
    %501 = vector.shape_cast %500 : vector<1x32x64xbf16> to vector<32x64xbf16>
    %cst_511 = arith.constant dense<0.000000e+00> : vector<1x64xf32>
    %502 = tpu.matmul %499, %501, %cst_511 {dimension_numbers = #tpu.dot_dimension_numbers<[1], [0], [0], [1], [0, 0, 1, 1], [], []>} : vector<1x32xbf16>, vector<32x64xbf16>, vector<1x64xf32> -> vector<1x64xf32>
    %c204 = arith.constant 204 : index
    %c0_512 = arith.constant 0 : index
    %503 = vector.load %arg13[%c204, %c0_512] : memref<208x32xf32, #tpu.memory_space<vmem>>, vector<1x32xf32>
    %504 = arith.truncf %503 : vector<1x32xf32> to vector<1x32xbf16>
    %c48 = arith.constant 48 : index
    %c0_513 = arith.constant 0 : index
    %c0_514 = arith.constant 0 : index
    %505 = vector.load %arg4[%c48, %c0_513, %c0_514] : memref<49x32x64xbf16, #tpu.memory_space<vmem>>, vector<1x32x64xbf16>
    %506 = vector.shape_cast %505 : vector<1x32x64xbf16> to vector<32x64xbf16>
    %cst_515 = arith.constant dense<0.000000e+00> : vector<1x64xf32>
    %507 = tpu.matmul %504, %506, %cst_515 {dimension_numbers = #tpu.dot_dimension_numbers<[1], [0], [0], [1], [0, 0, 1, 1], [], []>} : vector<1x32xbf16>, vector<32x64xbf16>, vector<1x64xf32> -> vector<1x64xf32>
    %508 = arith.addf %267, %272 : vector<1x64xf32>
    %509 = arith.addf %508, %277 : vector<1x64xf32>
    %510 = arith.addf %509, %282 : vector<1x64xf32>
    %511 = arith.addf %510, %287 : vector<1x64xf32>
    %512 = arith.addf %511, %292 : vector<1x64xf32>
    %513 = arith.addf %512, %297 : vector<1x64xf32>
    %514 = arith.addf %513, %302 : vector<1x64xf32>
    %515 = arith.addf %514, %307 : vector<1x64xf32>
    %516 = arith.addf %515, %312 : vector<1x64xf32>
    %517 = arith.addf %516, %317 : vector<1x64xf32>
    %518 = arith.addf %517, %322 : vector<1x64xf32>
    %519 = arith.addf %518, %327 : vector<1x64xf32>
    %520 = arith.addf %519, %332 : vector<1x64xf32>
    %521 = arith.addf %520, %337 : vector<1x64xf32>
    %522 = arith.addf %521, %342 : vector<1x64xf32>
    %523 = arith.addf %522, %347 : vector<1x64xf32>
    %524 = arith.addf %523, %352 : vector<1x64xf32>
    %525 = arith.addf %524, %357 : vector<1x64xf32>
    %526 = arith.addf %525, %362 : vector<1x64xf32>
    %527 = arith.addf %526, %367 : vector<1x64xf32>
    %528 = arith.addf %527, %372 : vector<1x64xf32>
    %529 = arith.addf %528, %377 : vector<1x64xf32>
    %530 = arith.addf %529, %382 : vector<1x64xf32>
    %531 = arith.addf %530, %387 : vector<1x64xf32>
    %532 = arith.addf %531, %392 : vector<1x64xf32>
    %533 = arith.addf %532, %397 : vector<1x64xf32>
    %534 = arith.addf %533, %402 : vector<1x64xf32>
    %535 = arith.addf %534, %407 : vector<1x64xf32>
    %536 = arith.addf %535, %412 : vector<1x64xf32>
    %537 = arith.addf %536, %417 : vector<1x64xf32>
    %538 = arith.addf %537, %422 : vector<1x64xf32>
    %539 = arith.addf %538, %427 : vector<1x64xf32>
    %540 = arith.addf %539, %432 : vector<1x64xf32>
    %541 = arith.addf %540, %437 : vector<1x64xf32>
    %542 = arith.addf %541, %442 : vector<1x64xf32>
    %543 = arith.addf %542, %447 : vector<1x64xf32>
    %544 = arith.addf %543, %452 : vector<1x64xf32>
    %545 = arith.addf %544, %457 : vector<1x64xf32>
    %546 = arith.addf %545, %462 : vector<1x64xf32>
    %547 = arith.addf %546, %467 : vector<1x64xf32>
    %548 = arith.addf %547, %472 : vector<1x64xf32>
    %549 = arith.addf %548, %477 : vector<1x64xf32>
    %550 = arith.addf %549, %482 : vector<1x64xf32>
    %551 = arith.addf %550, %487 : vector<1x64xf32>
    %552 = arith.addf %551, %492 : vector<1x64xf32>
    %553 = arith.addf %552, %497 : vector<1x64xf32>
    %554 = arith.addf %553, %502 : vector<1x64xf32>
    %555 = arith.addf %554, %507 : vector<1x64xf32>
    %c0_516 = arith.constant 0 : index
    %c0_517 = arith.constant 0 : index
    %556 = vector.load %arg5[%c0_516, %c0_517] : memref<1x64xf32, #tpu.memory_space<vmem>>, vector<1x64xf32>
    %557 = arith.addf %555, %556 : vector<1x64xf32>
    %cst_518 = arith.constant 0.000000e+00 : f32
    %558 = vector.broadcast %cst_518 : f32 to vector<1x64xf32>
    %559 = arith.maximumf %557, %558 : vector<1x64xf32>
    %560 = arith.truncf %559 : vector<1x64xf32> to vector<1x64xbf16>
    %c0_519 = arith.constant 0 : index
    %c0_520 = arith.constant 0 : index
    %561 = vector.load %arg6[%c0_519, %c0_520] : memref<64x64xbf16, #tpu.memory_space<vmem>>, vector<64x64xbf16>
    %cst_521 = arith.constant dense<0.000000e+00> : vector<1x64xf32>
    %562 = tpu.matmul %560, %561, %cst_521 {dimension_numbers = #tpu.dot_dimension_numbers<[1], [0], [0], [1], [0, 0, 1, 1], [], []>} : vector<1x64xbf16>, vector<64x64xbf16>, vector<1x64xf32> -> vector<1x64xf32>
    %c0_522 = arith.constant 0 : index
    %c0_523 = arith.constant 0 : index
    %563 = vector.load %arg7[%c0_522, %c0_523] : memref<1x64xf32, #tpu.memory_space<vmem>>, vector<1x64xf32>
    %564 = arith.addf %562, %563 : vector<1x64xf32>
    %cst_524 = arith.constant 0.000000e+00 : f32
    %565 = vector.broadcast %cst_524 : f32 to vector<1x64xf32>
    %566 = arith.maximumf %564, %565 : vector<1x64xf32>
    %567 = arith.truncf %566 : vector<1x64xf32> to vector<1x64xbf16>
    %c0_525 = arith.constant 0 : index
    %c0_526 = arith.constant 0 : index
    %568 = vector.load %arg8[%c0_525, %c0_526] : memref<64x10xbf16, #tpu.memory_space<vmem>>, vector<64x10xbf16>
    %cst_527 = arith.constant dense<0.000000e+00> : vector<1x10xf32>
    %569 = tpu.matmul %567, %568, %cst_527 {dimension_numbers = #tpu.dot_dimension_numbers<[1], [0], [0], [1], [0, 0, 1, 1], [], []>} : vector<1x64xbf16>, vector<64x10xbf16>, vector<1x10xf32> -> vector<1x10xf32>
    %c0_528 = arith.constant 0 : index
    %c0_529 = arith.constant 0 : index
    %570 = vector.load %arg9[%c0_528, %c0_529] : memref<1x10xf32, #tpu.memory_space<vmem>>, vector<1x10xf32>
    %571 = arith.addf %569, %570 : vector<1x10xf32>
    %c0_530 = arith.constant 0 : index
    %c0_531 = arith.constant 0 : index
    %c0_532 = arith.constant 0 : index
    %572 = vector.load %arg10[%c0_530, %c0_531, %c0_532] : memref<1x1x10xf32, #tpu.memory_space<vmem>>, vector<1x1x10xf32>
    %573 = vector.shape_cast %572 : vector<1x1x10xf32> to vector<1x10xf32>
    %574 = vector.shape_cast %571 : vector<1x10xf32> to vector<1x1x10xf32>
    tpu.vector_store %arg10[%c0_530, %c0_531, %c0_532], %574 {strides = array<i32>} : memref<1x1x10xf32, #tpu.memory_space<vmem>>, vector<1x1x10xf32>,
    return
  }
  func.func @transform_0(%arg0: i32) -> (i32, i32, i32, i32) {
    %c0_i32 = arith.constant 0 : i32
    %c0_i32_0 = arith.constant 0 : i32
    %c0_i32_1 = arith.constant 0 : i32
    %c0_i32_2 = arith.constant 0 : i32
    return %arg0, %c0_i32, %c0_i32_0, %c0_i32_1 : i32, i32, i32, i32
  }
  func.func @transform_1(%arg0: i32) -> (i32, i32, i32, i32) {
    %c0_i32 = arith.constant 0 : i32
    %c0_i32_0 = arith.constant 0 : i32
    %c0_i32_1 = arith.constant 0 : i32
    %c0_i32_2 = arith.constant 0 : i32
    %c0_i32_3 = arith.constant 0 : i32
    return %c0_i32, %c0_i32_0, %c0_i32_1, %c0_i32_2 : i32, i32, i32, i32
  }
  func.func @transform_2(%arg0: i32) -> (i32, i32, i32) {
    %c0_i32 = arith.constant 0 : i32
    %c0_i32_0 = arith.constant 0 : i32
    %c0_i32_1 = arith.constant 0 : i32
    %c0_i32_2 = arith.constant 0 : i32
    return %c0_i32, %c0_i32_0, %c0_i32_1 : i32, i32, i32
  }
  func.func @transform_3(%arg0: i32) -> (i32, i32, i32) {
    %c0_i32 = arith.constant 0 : i32
    %c0_i32_0 = arith.constant 0 : i32
    %c0_i32_1 = arith.constant 0 : i32
    %c0_i32_2 = arith.constant 0 : i32
    return %c0_i32, %c0_i32_0, %c0_i32_1 : i32, i32, i32
  }
  func.func @transform_4(%arg0: i32) -> (i32, i32) {
    %c0_i32 = arith.constant 0 : i32
    %c0_i32_0 = arith.constant 0 : i32
    %c0_i32_1 = arith.constant 0 : i32
    return %c0_i32, %c0_i32_0 : i32, i32
  }
  func.func @transform_5(%arg0: i32) -> (i32, i32) {
    %c0_i32 = arith.constant 0 : i32
    %c0_i32_0 = arith.constant 0 : i32
    %c0_i32_1 = arith.constant 0 : i32
    return %c0_i32, %c0_i32_0 : i32, i32
  }
  func.func @transform_6(%arg0: i32) -> (i32, i32) {
    %c0_i32 = arith.constant 0 : i32
    %c0_i32_0 = arith.constant 0 : i32
    %c0_i32_1 = arith.constant 0 : i32
    return %c0_i32, %c0_i32_0 : i32, i32
  }
  func.func @transform_7(%arg0: i32) -> (i32, i32) {
    %c0_i32 = arith.constant 0 : i32
    %c0_i32_0 = arith.constant 0 : i32
    %c0_i32_1 = arith.constant 0 : i32
    return %c0_i32, %c0_i32_0 : i32, i32
  }
  func.func @transform_8(%arg0: i32) -> (i32, i32) {
    %c0_i32 = arith.constant 0 : i32
    %c0_i32_0 = arith.constant 0 : i32
    %c0_i32_1 = arith.constant 0 : i32
    return %c0_i32, %c0_i32_0 : i32, i32
  }
  func.func @transform_9(%arg0: i32) -> (i32, i32, i32) {
    %c0_i32 = arith.constant 0 : i32
    %c0_i32_0 = arith.constant 0 : i32
    %c0_i32_1 = arith.constant 0 : i32
    return %arg0, %c0_i32, %c0_i32_0 : i32, i32, i32
  }
}

</mosaic_0001>

<bundles_post_ra>
// kernel: _lambda_.1
= control target key start
LH: loop header
LB: loop body
LE: loop exit
PB: predicated region body
PF: predicated region fallthrough
CT: control target
= control target key end

     0   :  { %s19770_s0 = inlined_call_operand.vmem [shape: f32[2,14,14,32], index: 0, kind: input, shape index: {}]   ;;  %s19771_s1 = inlined_call_operand.hbm [shape: bf16[3,9,32,32], index: 1, kind: input, shape index: {}]   ;;  %s19772_s2 = inlined_call_operand.hbm [shape: f32[3,1,32], index: 2, kind: input, shape index: {}]   ;;  %s19773_s3 = inlined_call_operand.vmem [shape: bf16[49,32,64], index: 3, kind: input, shape index: {}]   ;;  %s19774_s4 = inlined_call_operand.hbm [shape: f32[1,64], index: 4, kind: input, shape index: {}]   ;;  %s19775_s5 = inlined_call_operand.vmem [shape: bf16[64,64], index: 5, kind: input, shape index: {}]   ;;  %s19776_s6 = inlined_call_operand.hbm [shape: f32[1,64], index: 6, kind: input, shape index: {}]   ;;  %s19777_s7 = inlined_call_operand.vmem [shape: bf16[64,10], index: 7, kind: input, shape index: {}]   ;;  %s19778_s8 = inlined_call_operand.vmem [shape: f32[1,10], index: 8, kind: input, shape index: {}]   ;;  %s19779_s9 = inlined_call_operand.hbm [shape: f32[2,1,10], index: 9, kind: output, shape index: {}]  }
   0x1   :  { %19833 = sst [smem:[#allocation98_spill]] %s19772_s2 }
   0x2   :  { %14 = vsyncpa [#allocation6], 0 }
   0x3   :  { %15 = vsyncpa [#allocation9], 0 }
   0x4   :  { %16 = vsyncpa [#allocation12], 0 }
   0x5   :  { %17 = vsyncpa [#allocation7], 0 }
   0x6   :  { %19 = vsyncpa [#allocation7 + $0x1], 0  ;;  %s15241_s30 = smov 0   ;;  %s15243_s10 = smov 0  }
   0x7   :  { %s15245_s11 = smov 0   ;;  %s15247_s12 = smov 0  }
   0x8 LB: > { %s15262_s13 = sadd.s32 4294967295, %s15178_s12   ;;  %s12060_s14 = sadd.s32 4294967294, %s15178_s12   ;;  %s15178_s12 = sphi %s15247_s12, %s20337_s12   ;;  %s15174_s11 = sphi %s15245_s11, %s20336_s11   ;;  %s15170_s10 = sphi %s15243_s10, %s20335_s10   ;;  %s15166_s30 = sphi %s15241_s30, %s20334_s30  }
   0x9   : > { %s15266_s15 = sadd.s32 1, %s15178_s12   ;;  %s226_s16 = sadd.s32 1, %s15174_s11 }
   0xa   : > { %s223_s17 = ssub.s32 %s15178_s12, %s15266_s15  ;;  %p236_p0 = scmp.ne.s32.totalorder %s15174_s11, %s15170_s10 }
   0xb   : > { %p224_p1 = scmp.eq.s32.totalorder %s223_s17, 0  ;;  %p237_p2 = scmp.eq.s32.totalorder %s15262_s13, 1 }
   0xc   : > { %p242_p3 = scmp.ne.s32.totalorder %s15170_s10, %s15166_s30  ;;  %p243_p4 = scmp.eq.s32.totalorder %s12060_s14, 1 }
   0xd   : > { %s15277_s18 = scalar_select %p224_p1, %s15174_s11, %s226_s16  }
   0xe   : > { %p15279_p5 = por %p237_p2, %p236_p0  ;;  %p15283_p6 = por %p243_p4, %p242_p3 }
   0xf   : > { %p12061_p7 = scmp.ge.s32.totalorder %s15178_s12, 1  ;;  %p250_p8 = scmp.lt.s32.totalorder %s15178_s12, 3 }
  0x10   : > { %s19834_s19 = scalar_select %p15279_p5, 1, 0 }
  0x11   : > { %s19835_s20 = scalar_select %p15283_p6, 1, 0 }
  0x12   : > { %p19780_p9 = scmp.eq.s32.totalorder %s15262_s13, 0  ;;  %p15290_p10 = pnand %p12061_p7, %p250_p8 }
  0x13   : > { %s15180_s22 = smov [#allocation8]   ;;  %s15181_s25 = smov [#allocation5]  }
  0x14   : > { %s275_s23 = sshll.u32 %s15180_s22, 4  ;;  %p14774_p11 = pneg %p15290_p10  ;;  %s276_s23 = int_to_ptr.vmem [resolvable:$true] %s275_s23 }
  0x15   : > { %s262_s26 = sshll.u32 %s15181_s25, 4  ;;  %s15013_s27 = scalar_lea.vmem %s276_s23, 48  ;;  %s15302_s26 = int_to_ptr.vmem [resolvable:$true] %s262_s26 }
  0x16   : > { %p15298_p12 = pnand %p19780_p9, %p14774_p11  ;;  %p15014_p0 = scmp.ne.s32.totalorder %s276_s23, %s15013_s27 }
  0x17   : > { %s15020_s28 = scalar_lea.vmem %s276_s23, 64  ;;  %p15021_p3 = scmp.lt.s32.totalorder %s276_s23, %s276_s23 }
  0x18   : > { %p15004_p13 = pneg %p15298_p12  ;;  %p15022_p4 = scmp.lt.s32.totalorder %s15020_s28, %s15013_s27 }
  0x1a   : > { %p15016_p1 = pnand %p15014_p0, %p15004_p13  ;;  %p15023_p7 = por %p15022_p4, %p15021_p3 }
  0x1c   : > { %p15017_p2 = pneg %p15016_p1 }
  0x1e   : > { %p15024_p8 = pnand %p15023_p7, %p15017_p2 }
  0x20   : > { %15027 = shalt.err (!%p15024_p8)
}
  0x21   : > { %s15182_s29 = smov 16   ;;  %s15183_s14 = smov 1  }
  0x22   : > { %s19838_s2 = sld [smem:[#allocation98_spill]]  ;;  %s15039_s22 = scalar_lea.vmem %s15302_s26, 6912 }
  0x23   : > { %p15040_p11 = scmp.ne.s32.totalorder %s15302_s26, %s15039_s22  ;;  %p15047_p2 = scmp.lt.s32.totalorder %s15302_s26, %s15302_s26 }
  0x24   : > { %p15048_p3 = scmp.lt.s32.totalorder %s15039_s22, %s15039_s22 }
  0x25   : > { %p15042_p0 = pnand %p15040_p11, %p15004_p13 }
  0x26   : > { %p15049_p4 = por %p15048_p3, %p15047_p2 }
  0x27   : > { %p15043_p1 = pneg %p15042_p0 }
  0x28   : > { %14780 = dma.hbm_to_vmem [thread:$0]  (!%p15298_p12), %s19838_s2, 48, %s276_s23, [#allocation9], %s15182_s29, %s15182_s29, %s15183_s14  }
  0x29   : > { %p15050_p7 = pnand %p15049_p4, %p15043_p1 }
  0x2b   : > { %15053 = shalt.err (!%p15050_p7)
}
  0x2c   : > { %s15184_s25 = smov 64   ;;  %s15185_s27 = smov 4  }
  0x2d   : > { %14777 = dma.hbm_to_vmem [thread:$0]  (!%p15298_p12), %s19771_s1, 6912, %s15302_s26, [#allocation6], %s15184_s25, %s15184_s25, %s15185_s27  }
  0x2e   : > { %s15186_s29 = smov [#allocation10]   ;;  %s15187_s16 = smov [#allocation11]  }
  0x2f   : > { %s292_s14 = sshll.u32 %s15186_s29, 4  ;;  %s306_s17 = sshll.u32 %s15187_s16, 4  ;;  %s293_s14 = int_to_ptr.vmem [resolvable:$true] %s292_s14  ;;  %s307_s17 = int_to_ptr.vmem [resolvable:$true] %s306_s17 }
  0x30   : > { %s15065_s22 = scalar_lea.vmem %s293_s14, 16  ;;  %s15072_s2 = scalar_lea.vmem %s293_s14, 32 }
  0x31   : > { %p15066_p8 = scmp.ne.s32.totalorder %s293_s14, %s15065_s22  ;;  %p15073_p1 = scmp.lt.s32.totalorder %s293_s14, %s293_s14 }
  0x32   : > { %p15074_p2 = scmp.lt.s32.totalorder %s15072_s2, %s15065_s22 }
  0x33   : > { %p15068_p11 = pnand %p15066_p8, %p15004_p13 }
  0x34   : > { %p15075_p3 = por %p15074_p2, %p15073_p1 }
  0x35   : > { %p15069_p0 = pneg %p15068_p11 }
  0x37   : > { %p15076_p4 = pnand %p15075_p3, %p15069_p0 }
  0x39   : > { %15079 = shalt.err (!%p15076_p4)
}
  0x3a   : > { %14783 = dma.hbm_to_vmem [thread:$0]  (!%p15298_p12), %s19774_s4, 16, %s293_s14, [#allocation9]  }
  0x3b   : > { %s15091_s27 = scalar_lea.vmem %s307_s17, 16  ;;  %s15098_s28 = scalar_lea.vmem %s307_s17, 32 }
  0x3c   : > { %p15092_p7 = scmp.ne.s32.totalorder %s307_s17, %s15091_s27  ;;  %p15099_p11 = scmp.lt.s32.totalorder %s307_s17, %s307_s17 }
  0x3d   : > { %p15100_p6 = scmp.lt.s32.totalorder %s15098_s28, %s15091_s27 }
  0x3e   : > { %p15094_p9 = pnand %p15092_p7, %p15004_p13 }
  0x3f   : > { %p15101_p5 = por %p15100_p6, %p15099_p11 }
  0x40   : > { %p15095_p8 = pneg %p15094_p9 }
  0x42   : > { %p15102_p1 = pnand %p15101_p5, %p15095_p8 }
  0x44   : > { %15105 = shalt.err (!%p15102_p1)
}
  0x45   : > { %14786 = dma.hbm_to_vmem [thread:$0]  (!%p15298_p12), %s19776_s6, 16, %s307_s17, [#allocation12]  }
  0x46   : > { %333 = sbr.rel (%p15290_p10) target bundleno = 2385 (0x951), region = 56 }
  0x4b   : > { %p19839_p0 = scmp.eq.s32.totalorder %s15262_s13, 0 }
  0x4d   : > { %15149 = dma.done.wait (%p19839_p0), [#allocation6], 6912   ;;  %p19840_p9 = pmov %p19839_p0 }
  0x4e   : > { %p19841_p13 = pmov %p19839_p0 }
  0x4f   : > { %15151 = vsyncadd (%p19840_p9), [#allocation6], 4294960384 }
  0x50   : > { %15153 = dma.done.wait (%p19841_p13), [#allocation9], 64   ;;  %p19842_p5 = pmov %p19839_p0 }
  0x51   : > { %p19843_p6 = pmov %p19839_p0 }
  0x52   : > { %15155 = vsyncadd (%p19842_p5), [#allocation9], 4294967232 }
  0x53   : > { %15157 = dma.done.wait (%p19843_p6), [#allocation12], 16   ;;  %p19844_p12 = pmov %p19839_p0 }
  0x54   : > { %vm386_vm0 = vcmask 261120   ;;  %p380_p10 = scmp.lt.s32.totalorder %s15262_s13, 1  ;;  %v19782_v0 = vmov 0.0   ;;  %v14842_v1 = vld [vmem:[#allocation5 + $0x18] sm:$0xff]   ;;  %v14843_v2 = vld [vmem:[#allocation5 + $0x8] sm:$0xff]   ;;  %v14844_v3 = vld [vmem:[#allocation5 + $0x10] sm:$0xff]  }
  0x55   : > { %15159 = vsyncadd (%p19844_p12), [#allocation12], 4294967280  ;;  %387 = vst.msk [vmem:[#allocation2] sm:$0xff] %vm386_vm0, %v19782_v0  ;;  %13475 = vmatprep.subr.bf16.mxu0 %v14842_v1  ;;  %13507 = vmatprep.subr.bf16.mxu1 %v14843_v2  ;;  %v14845_v4 = vld [vmem:[#allocation5] sm:$0xff]   ;;  %vm423_vm1 = vcmask 259072   ;;  %v14846_v13 = vld [vmem:[#allocation5 + $0x28] sm:$0xff]  }
  0x56   : > { %388 = vst.msk [vmem:[#allocation2 + $0x8] sm:$0xff] %vm386_vm0, %v19782_v0  ;;  %389 = vst.msk [vmem:[#allocation2 + $0x10] sm:$0xff] %vm386_vm0, %v19782_v0  ;;  %s381_s21 = scalar_select %p380_p10, %s15262_s13, 1  ;;  %13476 = vmatpush3.bf16.msra.mxu0 %v14842_v1  ;;  %13508 = vmatpush3.bf16.msra.mxu1 %v14843_v2  ;;  %v14847_v26 = vld [vmem:[#allocation5 + $0x20] sm:$0xff]  }
  0x57   : > { %390 = vst.msk [vmem:[#allocation2 + $0x18] sm:$0xff] %vm386_vm0, %v19782_v0  ;;  %391 = vst.msk [vmem:[#allocation2 + $0x20] sm:$0xff] %vm386_vm0, %v19782_v0  ;;  %13477 = vmatprep.subr.bf16.mxu0 %v14844_v3  ;;  %13509 = vmatprep.subr.bf16.mxu1 %v14845_v4  ;;  %s378_s27 = sand.u32 1, %s15170_s10   ;;  %s12883_s23 = sshll.u32 %s15262_s13, 4 }
  0x58   : > { %392 = vst.msk [vmem:[#allocation2 + $0x28] sm:$0xff] %vm386_vm0, %v19782_v0  ;;  %393 = vst.msk [vmem:[#allocation2 + $0x30] sm:$0xff] %vm386_vm0, %v19782_v0  ;;  %s14755_s24 = smul.u32 224, %s381_s21  ;;  %s379_s21 = scalar_lea.vmem [#allocation13], %s378_s27 }
  0x59   : > { %394 = vst.msk [vmem:[#allocation2 + $0x38] sm:$0xff] %vm386_vm0, %v19782_v0  ;;  %395 = vst.msk [vmem:[#allocation2 + $0x40] sm:$0xff] %vm386_vm0, %v19782_v0  ;;  %s11952_s17 = scalar_lea.sflag [#allocation7], %s378_s27  ;;  %p20332_p3 = scmp.ne.s32.totalorder %s19834_s19, 0 }
  0x5a   : > { %396 = vst.msk [vmem:[#allocation2 + $0x48] sm:$0xff] %vm386_vm0, %v19782_v0  ;;  %397 = vst.msk [vmem:[#allocation2 + $0x50] sm:$0xff] %vm386_vm0, %v19782_v0  ;;  %s15496_s16 = scalar_lea.vmem %s19770_s0, %s14755_s24  ;;  %13478 = vmatpush3.bf16.msra.mxu0 %v14844_v3  ;;  %13510 = vmatpush3.bf16.msra.mxu1 %v14845_v4  ;;  %s11964_s24 = sshll.u32 %s379_s21, 4  ;;  %s19731_s24 = int_to_ptr.vmem [resolvable:$true] %s11964_s24 }
  0x5b   : > { %398 = vst.msk [vmem:[#allocation2 + $0x58] sm:$0xff] %vm386_vm0, %v19782_v0  ;;  %399 = vst.msk [vmem:[#allocation2 + $0x60] sm:$0xff] %vm386_vm0, %v19782_v0  ;;  %v420_v10 = vld [vmem:[%s15496_s16] sm:$0xff]  ;;  %v421_v11 = vld [vmem:[%s15496_s16 + $0x8] sm:$0x3f]  ;;  %13539 = vmatprep.subr.bf16.mxu0 %v14846_v13  ;;  %s15106_s13 = scalar_lea.vmem %s19731_s24, 16 }
  0x5c   : > { %400 = vst.msk [vmem:[#allocation2 + $0x68] sm:$0xff] %vm386_vm0, %v19782_v0  ;;  %401 = vst.msk [vmem:[#allocation2 + $0x70] sm:$0xff] %vm386_vm0, %v19782_v0  ;;  %v883_v7 = vld [vmem:[#allocation2] sm:$0xff]  ;;  %v12073_v14 = vld [vmem:[%s15496_s16 + $0x10] sm:$0xff]  ;;  %p15107_p2 = scmp.ne.s32.totalorder %s19731_s24, %s15106_s13  ;;  %s15190_s22 = smov [#allocation13]  }
  0x5d   : > { %402 = vst.msk [vmem:[#allocation2 + $0x78] sm:$0xff] %vm386_vm0, %v19782_v0  ;;  %403 = vst.msk [vmem:[#allocation2 + $0x80] sm:$0xff] %vm386_vm0, %v19782_v0  ;;  %v929_v5 = vld [vmem:[#allocation2 + $0x1] sm:$0xff]  ;;  %v930_v6 = vld [vmem:[#allocation2 + $0x9] sm:$0xff]  ;;  %s15110_s26 = sshll.u32 %s15190_s22, 4  ;;  %s15111_s26 = int_to_ptr.vmem [resolvable:$false] %s15110_s26 }
  0x5e   : > { %404 = vst.msk [vmem:[#allocation2 + $0x88] sm:$0xff] %vm386_vm0, %v19782_v0  ;;  %405 = vst.msk [vmem:[#allocation2 + $0x90] sm:$0xff] %vm386_vm0, %v19782_v0  ;;  %v957_v8 = vpack.c.bf16 %v930_v6, %v929_v5  ;;  %v884_v9 = vld [vmem:[#allocation2 + $0x8] sm:$0xff]  ;;  %v12074_v15 = vld [vmem:[%s15496_s16 + $0x18] sm:$0x3f]  ;;  %p15108_p4 = pnand %p15107_p2, %p20332_p3  ;;  %s15112_s25 = scalar_lea.vmem %s15111_s26, 32 }
  0x5f   : > { %406 = vst.msk [vmem:[#allocation2 + $0x98] sm:$0xff] %vm386_vm0, %v19782_v0  ;;  %407 = vst.msk [vmem:[#allocation2 + $0xa0] sm:$0xff] %vm386_vm0, %v19782_v0  ;;  %v911_v12 = vpack.c.bf16 %v884_v9, %v883_v7  ;;  %v12075_v16 = vld [vmem:[%s15496_s16 + $0x20] sm:$0xff]  ;;  %v12076_v17 = vld [vmem:[%s15496_s16 + $0x28] sm:$0x3f]  ;;  %p15113_p8 = scmp.lt.s32.totalorder %s19731_s24, %s15111_s26  ;;  %p15114_p11 = scmp.lt.s32.totalorder %s15112_s25, %s15106_s13 }
  0x60   : > { %408 = vst.msk [vmem:[#allocation2 + $0xa8] sm:$0xff] %vm386_vm0, %v19782_v0  ;;  %409 = vst.msk [vmem:[#allocation2 + $0xb0] sm:$0xff] %vm386_vm0, %v19782_v0  ;;  %13479 = vmatprep.mubr.msk.bf16.mxu0 %vm386_vm0, %v957_v8  ;;  %v12077_v18 = vld [vmem:[%s15496_s16 + $0x30] sm:$0xff]  ;;  %v12078_v19 = vld [vmem:[%s15496_s16 + $0x38] sm:$0x3f]  ;;  %p15109_p7 = pneg %p15108_p4 }
  0x61   : > { %410 = vst.msk [vmem:[#allocation2 + $0xb8] sm:$0xff] %vm386_vm0, %v19782_v0  ;;  %411 = vst.msk [vmem:[#allocation2 + $0xc0] sm:$0xff] %vm386_vm0, %v19782_v0  ;;  %13511 = vmatprep.mubr.msk.bf16.mxu1 %vm386_vm0, %v911_v12  ;;  %v12079_v20 = vld [vmem:[%s15496_s16 + $0x40] sm:$0xff]  ;;  %v12080_v21 = vld [vmem:[%s15496_s16 + $0x48] sm:$0x3f]  ;;  %p15115_p1 = por %p15114_p11, %p15113_p8 }
  0x62   : > { %412 = vst.msk [vmem:[#allocation2 + $0xc8] sm:$0xff] %vm386_vm0, %v19782_v0  ;;  %413 = vst.msk [vmem:[#allocation2 + $0xd0] sm:$0xff] %vm386_vm0, %v19782_v0  ;;  %v12081_v22 = vld [vmem:[%s15496_s16 + $0x50] sm:$0xff]  ;;  %v12082_v23 = vld [vmem:[%s15496_s16 + $0x58] sm:$0x3f] }
  0x63   : > { %414 = vst.msk [vmem:[#allocation2 + $0xd8] sm:$0xff] %vm386_vm0, %v19782_v0  ;;  %415 = vst.msk [vmem:[#allocation2 + $0xe0] sm:$0xff] %vm386_vm0, %v19782_v0  ;;  %v12083_v24 = vld [vmem:[%s15496_s16 + $0x60] sm:$0xff]  ;;  %v12084_v25 = vld [vmem:[%s15496_s16 + $0x68] sm:$0x3f]  ;;  %p15116_p0 = pnand %p15115_p1, %p15109_p7 }
  0x64   : > { %416 = vst.msk [vmem:[#allocation2 + $0xe8] sm:$0xff] %vm386_vm0, %v19782_v0  ;;  %417 = vst.msk [vmem:[#allocation2 + $0xf0] sm:$0xff] %vm386_vm0, %v19782_v0  ;;  %v12085_v27 = vld [vmem:[%s15496_s16 + $0x70] sm:$0xff]  ;;  %v12086_v28 = vld [vmem:[%s15496_s16 + $0x78] sm:$0x3f] }
  0x65   : > { %418 = vst.msk [vmem:[#allocation2 + $0xf8] sm:$0xff] %vm386_vm0, %v19782_v0  ;;  %419 = vst.msk [vmem:[#allocation2 + $0x100] sm:$0xff] %vm386_vm0, %v19782_v0  ;;  %v12087_v29 = vld [vmem:[%s15496_s16 + $0x80] sm:$0xff]  ;;  %v12088_v35 = vld [vmem:[%s15496_s16 + $0x88] sm:$0x3f] }
  0x66   : > { %3355 = vst.msk [vmem:[#allocation3] sm:$0xff] %vm386_vm0, %v19782_v0  ;;  %3356 = vst.msk [vmem:[#allocation3 + $0x8] sm:$0xff] %vm386_vm0, %v19782_v0  ;;  %v12089_v36 = vld [vmem:[%s15496_s16 + $0x90] sm:$0xff]  ;;  %v12090_v62 = vld [vmem:[%s15496_s16 + $0x98] sm:$0x3f] }
  0x67   : > { %3357 = vst.msk [vmem:[#allocation3 + $0x10] sm:$0xff] %vm386_vm0, %v19782_v0  ;;  %3358 = vst.msk [vmem:[#allocation3 + $0x18] sm:$0xff] %vm386_vm0, %v19782_v0  ;;  %v12091_v2 = vld [vmem:[%s15496_s16 + $0xa0] sm:$0xff]  ;;  %v12092_v3 = vld [vmem:[%s15496_s16 + $0xa8] sm:$0x3f] }
  0x68   : > { %3359 = vst.msk [vmem:[#allocation3 + $0x20] sm:$0xff] %vm386_vm0, %v19782_v0  ;;  %3360 = vst.msk [vmem:[#allocation3 + $0x28] sm:$0xff] %vm386_vm0, %v19782_v0  ;;  %v12093_v4 = vld [vmem:[%s15496_s16 + $0xb0] sm:$0xff]  ;;  %v12094_v5 = vld [vmem:[%s15496_s16 + $0xb8] sm:$0x3f] }
  0x69   : > { %3361 = vst.msk [vmem:[#allocation3 + $0x30] sm:$0xff] %vm386_vm0, %v19782_v0  ;;  %3362 = vst.msk [vmem:[#allocation3 + $0x38] sm:$0xff] %vm386_vm0, %v19782_v0  ;;  %v12095_v7 = vld [vmem:[%s15496_s16 + $0xc0] sm:$0xff]  ;;  %v12096_v8 = vld [vmem:[%s15496_s16 + $0xc8] sm:$0x3f] }
  0x6a   : > { %3363 = vst.msk [vmem:[#allocation3 + $0x40] sm:$0xff] %vm386_vm0, %v19782_v0  ;;  %3364 = vst.msk [vmem:[#allocation3 + $0x48] sm:$0xff] %vm386_vm0, %v19782_v0 }
  0x6b   : > { %3365 = vst.msk [vmem:[#allocation3 + $0x50] sm:$0xff] %vm386_vm0, %v19782_v0  ;;  %3366 = vst.msk [vmem:[#allocation3 + $0x58] sm:$0xff] %vm386_vm0, %v19782_v0 }
  0x6c   : > { %3367 = vst.msk [vmem:[#allocation3 + $0x60] sm:$0xff] %vm386_vm0, %v19782_v0  ;;  %3368 = vst.msk [vmem:[#allocation3 + $0x68] sm:$0xff] %vm386_vm0, %v19782_v0 }
  0x6d   : > { %3369 = vst.msk [vmem:[#allocation3 + $0x70] sm:$0xff] %vm386_vm0, %v19782_v0  ;;  %3370 = vst.msk [vmem:[#allocation3 + $0x78] sm:$0xff] %vm386_vm0, %v19782_v0 }
  0x6e   : > { %3371 = vst.msk [vmem:[#allocation3 + $0x80] sm:$0xff] %vm386_vm0, %v19782_v0  ;;  %3372 = vst.msk [vmem:[#allocation3 + $0x88] sm:$0xff] %vm386_vm0, %v19782_v0 }
  0x6f   : > { %3373 = vst.msk [vmem:[#allocation3 + $0x90] sm:$0xff] %vm386_vm0, %v19782_v0  ;;  %3374 = vst.msk [vmem:[#allocation3 + $0x98] sm:$0xff] %vm386_vm0, %v19782_v0 }
  0x70   : > { %3375 = vst.msk [vmem:[#allocation3 + $0xa0] sm:$0xff] %vm386_vm0, %v19782_v0  ;;  %3376 = vst.msk [vmem:[#allocation3 + $0xa8] sm:$0xff] %vm386_vm0, %v19782_v0 }
  0x71   : > { %3377 = vst.msk [vmem:[#allocation3 + $0xb0] sm:$0xff] %vm386_vm0, %v19782_v0  ;;  %3378 = vst.msk [vmem:[#allocation3 + $0xb8] sm:$0xff] %vm386_vm0, %v19782_v0 }
  0x72   : > { %3379 = vst.msk [vmem:[#allocation3 + $0xc0] sm:$0xff] %vm386_vm0, %v19782_v0  ;;  %3380 = vst.msk [vmem:[#allocation3 + $0xc8] sm:$0xff] %vm386_vm0, %v19782_v0 }
  0x73   : > { %3381 = vst.msk [vmem:[#allocation3 + $0xd0] sm:$0xff] %vm386_vm0, %v19782_v0  ;;  %3382 = vst.msk [vmem:[#allocation3 + $0xd8] sm:$0xff] %vm386_vm0, %v19782_v0 }
  0x74   : > { %3383 = vst.msk [vmem:[#allocation3 + $0xe0] sm:$0xff] %vm386_vm0, %v19782_v0  ;;  %3384 = vst.msk [vmem:[#allocation3 + $0xe8] sm:$0xff] %vm386_vm0, %v19782_v0 }
  0x75   : > { %3385 = vst.msk [vmem:[#allocation3 + $0xf0] sm:$0xff] %vm386_vm0, %v19782_v0  ;;  %3386 = vst.msk [vmem:[#allocation3 + $0xf8] sm:$0xff] %vm386_vm0, %v19782_v0 }
  0x76   : > { %3387 = vst.msk [vmem:[#allocation3 + $0x100] sm:$0xff] %vm386_vm0, %v19782_v0  ;;  %422 = vst.msk [vmem:[#allocation2 + $0x11] sm:$0xff] %vm386_vm0, %v420_v10 }
  0x77   : > { %424 = vst.msk [vmem:[#allocation2 + $0x19] sm:$0x3f] %vm423_vm1, %v421_v11  ;;  %429 = vst.msk [vmem:[#allocation2 + $0x29] sm:$0x3f] %vm423_vm1, %v12074_v15  ;;  %v14848_v11 = vld [vmem:[#allocation5 + $0x38] sm:$0xff]  }
  0x78   : > { %428 = vst.msk [vmem:[#allocation2 + $0x21] sm:$0xff] %vm386_vm0, %v12073_v14  ;;  %433 = vst.msk [vmem:[#allocation2 + $0x31] sm:$0xff] %vm386_vm0, %v12075_v16  ;;  %v15592_v14 = vld [vmem:[#allocation2 + $0x2] sm:$0xff]  ;;  %13571 = vmatprep.subr.bf16.mxu1 %v14848_v11 }
  0x79   : > { %434 = vst.msk [vmem:[#allocation2 + $0x39] sm:$0x3f] %vm423_vm1, %v12076_v17  ;;  %439 = vst.msk [vmem:[#allocation2 + $0x49] sm:$0x3f] %vm423_vm1, %v12078_v19 }
  0x7a   : > { %438 = vst.msk [vmem:[#allocation2 + $0x41] sm:$0xff] %vm386_vm0, %v12077_v18  ;;  %443 = vst.msk [vmem:[#allocation2 + $0x51] sm:$0xff] %vm386_vm0, %v12079_v20  ;;  %v15606_v20 = vld [vmem:[#allocation5 + $0x48] sm:$0xff]  }
  0x7b   : > { %444 = vst.msk [vmem:[#allocation2 + $0x59] sm:$0x3f] %vm423_vm1, %v12080_v21  ;;  %449 = vst.msk [vmem:[#allocation2 + $0x69] sm:$0x3f] %vm423_vm1, %v12082_v23 }
  0x7c   : > { %448 = vst.msk [vmem:[#allocation2 + $0x61] sm:$0xff] %vm386_vm0, %v12081_v22  ;;  %453 = vst.msk [vmem:[#allocation2 + $0x71] sm:$0xff] %vm386_vm0, %v12083_v24 }
  0x7d   : > { %454 = vst.msk [vmem:[#allocation2 + $0x79] sm:$0x3f] %vm423_vm1, %v12084_v25  ;;  %v931_v30 = vld [vmem:[#allocation2 + $0x11] sm:$0xff]  ;;  %459 = vst.msk [vmem:[#allocation2 + $0x89] sm:$0x3f] %vm423_vm1, %v12086_v28 }
  0x7e   : > { %v932_v31 = vld [vmem:[#allocation2 + $0x19] sm:$0xff]  ;;  %v885_v32 = vld [vmem:[#allocation2 + $0x10] sm:$0xff]  ;;  %458 = vst.msk [vmem:[#allocation2 + $0x81] sm:$0xff] %vm386_vm0, %v12085_v27  ;;  %463 = vst.msk [vmem:[#allocation2 + $0x91] sm:$0xff] %vm386_vm0, %v12087_v29 }
  0x7f   : > { %v15534_v33 = vpack.c.bf16 %v932_v31, %v931_v30  ;;  %v886_v34 = vld [vmem:[#allocation2 + $0x18] sm:$0xff]  ;;  %v933_v38 = vld [vmem:[#allocation2 + $0x21] sm:$0xff]  ;;  %v934_v39 = vld [vmem:[#allocation2 + $0x29] sm:$0xff]  ;;  %464 = vst.msk [vmem:[#allocation2 + $0x99] sm:$0x3f] %vm423_vm1, %v12088_v35 }
  0x80   : > { %v15538_v37 = vpack.c.bf16 %v886_v34, %v885_v32  ;;  %v887_v40 = vld [vmem:[#allocation2 + $0x20] sm:$0xff]  ;;  %468 = vst.msk [vmem:[#allocation2 + $0xa1] sm:$0xff] %vm386_vm0, %v12089_v36  ;;  %v15544_v41 = vpack.c.bf16 %v934_v39, %v933_v38  ;;  %v888_v42 = vld [vmem:[#allocation2 + $0x28] sm:$0xff]  ;;  %v935_v44 = vld [vmem:[#allocation2 + $0x31] sm:$0xff] }
  0x81   : > { %13480 = vmatmul.mubr.msk.bf16.vlgmr.msra.gmra.mxu0 %vm386_vm0, %v15534_v33  ;;  %v15548_v43 = vpack.c.bf16 %v888_v42, %v887_v40  ;;  %v936_v45 = vld [vmem:[#allocation2 + $0x39] sm:$0xff]  ;;  %v889_v46 = vld [vmem:[#allocation2 + $0x30] sm:$0xff]  ;;  %v937_v48 = vld [vmem:[#allocation2 + $0x41] sm:$0xff]  ;;  %469 = vst.msk [vmem:[#allocation2 + $0xa9] sm:$0x3f] %vm423_vm1, %v12090_v62 }
  0x82   : > { %13512 = vmatmul.mubr.msk.bf16.vlgmr.msra.gmra.mxu1 %vm386_vm0, %v15538_v37  ;;  %13540 = vmatpush3.bf16.msra.mxu0 %v14846_v13  ;;  %v890_v47 = vld [vmem:[#allocation2 + $0x38] sm:$0xff]  ;;  %v938_v49 = vld [vmem:[#allocation2 + $0x49] sm:$0xff]  ;;  %v891_v50 = vld [vmem:[#allocation2 + $0x40] sm:$0xff]  ;;  %v15554_v52 = vpack.c.bf16 %v936_v45, %v935_v44  ;;  %473 = vst.msk [vmem:[#allocation2 + $0xb1] sm:$0xff] %vm386_vm0, %v12091_v2 }
  0x83   : > { %13483 = vmatprep.mubr.msk.bf16.mxu0 %vm386_vm0, %v15544_v41  ;;  %13541 = vmatprep.subr.bf16.mxu0 %v14847_v26  ;;  %v892_v51 = vld [vmem:[#allocation2 + $0x48] sm:$0xff]  ;;  %v15556_v53 = vpack.c.bf16 %v890_v47, %v889_v46  ;;  %v15558_v54 = vpack.c.bf16 %v938_v49, %v937_v48  ;;  %v939_v56 = vld [vmem:[#allocation2 + $0x51] sm:$0xff]  ;;  %v940_v57 = vld [vmem:[#allocation2 + $0x59] sm:$0xff]  ;;  %474 = vst.msk [vmem:[#allocation2 + $0xb9] sm:$0x3f] %vm423_vm1, %v12092_v3 }
  0x84   : > { %13515 = vmatprep.mubr.msk.bf16.mxu1 %vm386_vm0, %v15548_v43  ;;  %v15560_v55 = vpack.c.bf16 %v892_v51, %v891_v50  ;;  %v893_v58 = vld [vmem:[#allocation2 + $0x50] sm:$0xff]  ;;  %v894_v59 = vld [vmem:[#allocation2 + $0x58] sm:$0xff]  ;;  %v941_v60 = vld [vmem:[#allocation2 + $0x61] sm:$0xff]  ;;  %v15577_v6 = vpack.c.bf16 %v940_v57, %v939_v56  ;;  %478 = vst.msk [vmem:[#allocation2 + $0xc1] sm:$0xff] %vm386_vm0, %v12093_v4  ;;  %13572 = vmatpush3.bf16.msra.mxu1 %v14848_v11 }
  0x85   : > { %v942_v61 = vld [vmem:[#allocation2 + $0x69] sm:$0xff]  ;;  %v895_v63 = vld [vmem:[#allocation2 + $0x60] sm:$0xff]  ;;  %479 = vst.msk [vmem:[#allocation2 + $0xc9] sm:$0x3f] %vm423_vm1, %v12094_v5  ;;  %v15584_v9 = vpack.c.bf16 %v894_v59, %v893_v58  ;;  %484 = vst.msk [vmem:[#allocation2 + $0xd9] sm:$0x3f] %vm423_vm1, %v12096_v8 }
  0x86   : > { %13542 = vmatpush3.bf16.msra.mxu0 %v14847_v26  ;;  %v896_v1 = vld [vmem:[#allocation2 + $0x68] sm:$0xff]  ;;  %19845 = vst [vmem:[#allocation18_spill] sm:$0xff] %v15577_v6  ;;  %v15586_v10 = vpack.c.bf16 %v942_v61, %v941_v60  ;;  %483 = vst.msk [vmem:[#allocation2 + $0xd1] sm:$0xff] %vm386_vm0, %v12095_v7  ;;  %v14849_v13 = vld [vmem:[#allocation5 + $0x30] sm:$0xff]  }
  0x87   : > { %v15590_v12 = vpack.c.bf16 %v896_v1, %v895_v63  ;;  %v943_v15 = vld [vmem:[#allocation2 + $0x71] sm:$0xff]  ;;  %v944_v16 = vld [vmem:[#allocation2 + $0x79] sm:$0xff]  ;;  %5918 = vst.msk [vmem:[#allocation2] sm:$0xff] %vm386_vm0, %v19782_v0  ;;  %v15616_v23 = vld [vmem:[#allocation2 + $0x22] sm:$0xff]  ;;  %13573 = vmatprep.subr.bf16.mxu1 %v14849_v13  ;;  %13603 = vmatprep.subr.bf16.mxu0 %v15606_v20 }
  0x88   : > { %19846 = vst [vmem:[#allocation19_spill] sm:$0xff] %v15586_v10  ;;  %v15594_v17 = vld [vmem:[#allocation2 + $0xa] sm:$0xff]  ;;  %v15598_v18 = vld [vmem:[#allocation2 + $0x12] sm:$0xff]  ;;  %v15600_v19 = vld [vmem:[#allocation2 + $0x1a] sm:$0xff]  ;;  %v15627_v29 = vpack.c.bf16 %v944_v16, %v943_v15  ;;  %13574 = vmatpush3.bf16.msra.mxu1 %v14849_v13 }
  0x89   : > { %13484 = vmatmul.mubr.msk.bf16.gmra.mxu0 %vm386_vm0, %v15554_v52  ;;  %5919 = vst.msk [vmem:[#allocation2 + $0x8] sm:$0xff] %vm386_vm0, %v19782_v0  ;;  %5921 = vst.msk [vmem:[#allocation2 + $0x18] sm:$0xff] %vm386_vm0, %v19782_v0  ;;  %v897_v21 = vld [vmem:[#allocation2 + $0x70] sm:$0xff]  ;;  %v898_v22 = vld [vmem:[#allocation2 + $0x78] sm:$0xff] }
  0x8a   : > { %13516 = vmatmul.mubr.msk.bf16.gmra.mxu1 %vm386_vm0, %v15556_v53  ;;  %13487 = vmatprep.mubr.msk.bf16.mxu0 %vm386_vm0, %v15558_v54  ;;  %5920 = vst.msk [vmem:[#allocation2 + $0x10] sm:$0xff] %vm386_vm0, %v19782_v0  ;;  %v945_v24 = vld [vmem:[#allocation2 + $0x81] sm:$0xff]  ;;  %v946_v25 = vld [vmem:[#allocation2 + $0x89] sm:$0xff]  ;;  %5922 = vst.msk [vmem:[#allocation2 + $0x20] sm:$0xff] %vm386_vm0, %v19782_v0  ;;  %v15629_v30 = vpack.c.bf16 %v898_v22, %v897_v21 }
  0x8b   : > { %13519 = vmatprep.mubr.msk.bf16.mxu1 %vm386_vm0, %v15560_v55  ;;  %v15620_v26 = vld [vmem:[#allocation2 + $0x2a] sm:$0xff]  ;;  %v899_v27 = vld [vmem:[#allocation2 + $0x80] sm:$0xff]  ;;  %19847 = vst [vmem:[#allocation20_spill] sm:$0xff] %v15627_v29  ;;  %v15631_v31 = vpack.c.bf16 %v946_v25, %v945_v24  ;;  %v15635_v34 = vld [vmem:[#allocation2 + $0x32] sm:$0xff] }
  0x8c   : > { %v900_v28 = vld [vmem:[#allocation2 + $0x88] sm:$0xff]  ;;  %5923 = vst.msk [vmem:[#allocation2 + $0x28] sm:$0xff] %vm386_vm0, %v19782_v0  ;;  %v15637_v35 = vld [vmem:[#allocation2 + $0x3a] sm:$0xff]  ;;  %v947_v36 = vld [vmem:[#allocation2 + $0x91] sm:$0xff] }
  0x8d   : > { %19848 = vst [vmem:[#allocation21_spill] sm:$0xff] %v15631_v31  ;;  %v15633_v32 = vpack.c.bf16 %v900_v28, %v899_v27  ;;  %v948_v38 = vld [vmem:[#allocation2 + $0x99] sm:$0xff]  ;;  %v15639_v39 = vld [vmem:[#allocation2 + $0x42] sm:$0xff]  ;;  %v15641_v40 = vld [vmem:[#allocation2 + $0x4a] sm:$0xff] }
  0x8e   : > { %v15643_v42 = vld [vmem:[#allocation2 + $0x52] sm:$0xff]  ;;  %5924 = vst.msk [vmem:[#allocation2 + $0x30] sm:$0xff] %vm386_vm0, %v19782_v0  ;;  %5925 = vst.msk [vmem:[#allocation2 + $0x38] sm:$0xff] %vm386_vm0, %v19782_v0  ;;  %v949_v46 = vld [vmem:[#allocation2 + $0xa1] sm:$0xff]  ;;  %v15693_v11 = vpack.c.bf16 %v948_v38, %v947_v36 }
  0x8f   : > { %v901_v44 = vld [vmem:[#allocation2 + $0x90] sm:$0xff]  ;;  %v902_v45 = vld [vmem:[#allocation2 + $0x98] sm:$0xff]  ;;  %v15653_v49 = vld [vmem:[#allocation2 + $0x62] sm:$0xff]  ;;  %5926 = vst.msk [vmem:[#allocation2 + $0x40] sm:$0xff] %vm386_vm0, %v19782_v0 }
  0x90   : > { %v950_v47 = vld [vmem:[#allocation2 + $0xa9] sm:$0xff]  ;;  %v15651_v48 = vld [vmem:[#allocation2 + $0x5a] sm:$0xff]  ;;  %5927 = vst.msk [vmem:[#allocation2 + $0x48] sm:$0xff] %vm386_vm0, %v19782_v0  ;;  %5928 = vst.msk [vmem:[#allocation2 + $0x50] sm:$0xff] %vm386_vm0, %v19782_v0  ;;  %v15707_v24 = vpack.c.bf16 %v902_v45, %v901_v44 }
  0x91   : > { %13488 = vmatmul.mubr.msk.bf16.gmra.mxu0 %vm386_vm0, %v15577_v6  ;;  %v15655_v50 = vld [vmem:[#allocation2 + $0x6a] sm:$0xff]  ;;  %v903_v51 = vld [vmem:[#allocation2 + $0xa0] sm:$0xff]  ;;  %v15667_v57 = vld [vmem:[#allocation2 + $0x72] sm:$0xff]  ;;  %5929 = vst.msk [vmem:[#allocation2 + $0x58] sm:$0xff] %vm386_vm0, %v19782_v0  ;;  %v15709_v25 = vpack.c.bf16 %v950_v47, %v949_v46 }
  0x92   : > { %13520 = vmatmul.mubr.msk.bf16.gmra.mxu1 %vm386_vm0, %v15584_v9  ;;  %13491 = vmatprep.mubr.msk.bf16.mxu0 %vm386_vm0, %v15586_v10  ;;  %v904_v56 = vld [vmem:[#allocation2 + $0xa8] sm:$0xff]  ;;  %v15669_v58 = vld [vmem:[#allocation2 + $0x7a] sm:$0xff]  ;;  %5930 = vst.msk [vmem:[#allocation2 + $0x60] sm:$0xff] %vm386_vm0, %v19782_v0  ;;  %5931 = vst.msk [vmem:[#allocation2 + $0x68] sm:$0xff] %vm386_vm0, %v19782_v0 }
  0x93   : > { %13523 = vmatprep.mubr.msk.bf16.mxu1 %vm386_vm0, %v15590_v12  ;;  %v951_v59 = vld [vmem:[#allocation2 + $0xb1] sm:$0xff]  ;;  %v15679_v61 = vld [vmem:[#allocation2 + $0x82] sm:$0xff]  ;;  %5932 = vst.msk [vmem:[#allocation2 + $0x70] sm:$0xff] %vm386_vm0, %v19782_v0  ;;  %5933 = vst.msk [vmem:[#allocation2 + $0x78] sm:$0xff] %vm386_vm0, %v19782_v0  ;;  %v15723_v38 = vpack.c.bf16 %v904_v56, %v903_v51 }
  0x94   : > { %v905_v60 = vld [vmem:[#allocation2 + $0xb0] sm:$0xff]  ;;  %v952_v62 = vld [vmem:[#allocation2 + $0xb9] sm:$0xff]  ;;  %v953_v1 = vld [vmem:[#allocation2 + $0xc1] sm:$0xff]  ;;  %5934 = vst.msk [vmem:[#allocation2 + $0x80] sm:$0xff] %vm386_vm0, %v19782_v0 }
  0x95   : > { %v906_v63 = vld [vmem:[#allocation2 + $0xb8] sm:$0xff]  ;;  %v954_v2 = vld [vmem:[#allocation2 + $0xc9] sm:$0xff]  ;;  %v907_v3 = vld [vmem:[#allocation2 + $0xc0] sm:$0xff]  ;;  %19849 = vst [vmem:[#allocation22_spill] sm:$0xff] %v15693_v11  ;;  %v15747_v51 = vpack.c.bf16 %v952_v62, %v951_v59  ;;  %v19851_v59 = vmov 0.0  }
  0x96   : > { %v908_v4 = vld [vmem:[#allocation2 + $0xc8] sm:$0xff]  ;;  %v15687_v7 = vld [vmem:[#allocation2 + $0x92] sm:$0xff]  ;;  %v15689_v8 = vld [vmem:[#allocation2 + $0x9a] sm:$0xff]  ;;  %19850 = vst [vmem:[#allocation23_spill] sm:$0xff] %v15709_v25 }
  0x97   : > { %v15685_v5 = vld [vmem:[#allocation2 + $0x8a] sm:$0xff]  ;;  %v15695_v16 = vld [vmem:[#allocation2 + $0xa2] sm:$0xff]  ;;  %v15699_v22 = vld [vmem:[#allocation2 + $0xb2] sm:$0xff]  ;;  %5937 = vst.msk [vmem:[#allocation2 + $0x98] sm:$0xff] %vm386_vm0, %v19782_v0 }
  0x98   : > { %v955_v13 = vld [vmem:[#allocation2 + $0xd1] sm:$0xff]  ;;  %5935 = vst.msk [vmem:[#allocation2 + $0x88] sm:$0xff] %vm386_vm0, %v19782_v0  ;;  %5936 = vst.msk [vmem:[#allocation2 + $0x90] sm:$0xff] %vm386_vm0, %v19782_v0  ;;  %v15711_v27 = vld [vmem:[#allocation2 + $0xba] sm:$0xff] }
  0x99   : > { %13492 = vmatmul.mubr.msk.bf16.gmra.mxu0 %vm386_vm0, %v15627_v29  ;;  %v909_v15 = vld [vmem:[#allocation2 + $0xd0] sm:$0xff]  ;;  %v15713_v28 = vld [vmem:[#allocation2 + $0xc2] sm:$0xff]  ;;  %5938 = vst.msk [vmem:[#allocation2 + $0xa0] sm:$0xff] %vm386_vm0, %v19782_v0  ;;  %v12098_v46 = vld [vmem:[%s15496_s16 + $0xd8] sm:$0x3f] }
  0x9a   : > { %13524 = vmatmul.mubr.msk.bf16.gmra.mxu1 %vm386_vm0, %v15629_v30  ;;  %13495 = vmatprep.mubr.msk.bf16.mxu0 %vm386_vm0, %v15631_v31  ;;  %v15697_v21 = vld [vmem:[#allocation2 + $0xaa] sm:$0xff]  ;;  %v15726_v45 = vld [vmem:[#allocation2 + $0xd2] sm:$0xff]  ;;  %5941 = vst.msk [vmem:[#allocation2 + $0xb8] sm:$0xff] %vm386_vm0, %v19782_v0  ;;  %5942 = vst.msk [vmem:[#allocation2 + $0xc0] sm:$0xff] %vm386_vm0, %v19782_v0 }
  0x9b   : > { %13527 = vmatprep.mubr.msk.bf16.mxu1 %vm386_vm0, %v15633_v32  ;;  %v15715_v36 = vld [vmem:[#allocation2 + $0xca] sm:$0xff]  ;;  %5939 = vst.msk [vmem:[#allocation2 + $0xa8] sm:$0xff] %vm386_vm0, %v19782_v0  ;;  %5940 = vst.msk [vmem:[#allocation2 + $0xb0] sm:$0xff] %vm386_vm0, %v19782_v0  ;;  %v14852_v47 = vld [vmem:[#allocation5 + $0x58] sm:$0xff]  }
  0x9c   : > { %v12097_v44 = vld [vmem:[%s15496_s16 + $0xd0] sm:$0xff]  ;;  %5943 = vst.msk [vmem:[#allocation2 + $0xc8] sm:$0xff] %vm386_vm0, %v19782_v0  ;;  %5944 = vst.msk [vmem:[#allocation2 + $0xd0] sm:$0xff] %vm386_vm0, %v19782_v0  ;;  %13635 = vmatprep.subr.bf16.mxu1 %v14852_v47  ;;  %v956_v56 = vld [vmem:[#allocation2 + $0xd9] sm:$0xff]  ;;  %v15753_v0 = vpack.c.bf16 %v908_v4, %v907_v3  ;;  %v1403_v3 = vpack.c.bf16 %v15600_v19, %v15598_v18  ;;  %v15812_v18 = vpack.c.bf16 %v15637_v35, %v15635_v34  ;;  %s19729_s16 = scalar_lea.hbm %s19779_s9, %s12883_s23 }
  0x9d   : > { %488 = vst.msk [vmem:[#allocation2 + $0xe1] sm:$0xff] %vm386_vm0, %v12097_v44  ;;  %v15749_v44 = vpack.c.bf16 %v906_v63, %v905_v60  ;;  %v15783_v63 = vpack.c.bf16 %v956_v56, %v955_v13  ;;  %v14851_v4 = vld [vmem:[#allocation5 + $0x40] sm:$0xff]   ;;  %v15816_v19 = vpack.c.bf16 %v15641_v40, %v15639_v39  ;;  %v15848_v34 = vpack.c.bf16 %v15685_v5, %v15679_v61  ;;  %v15866_v40 = vld [vmem:[#allocation2 + $0xf0] sm:$0xff] }
  0x9e   : > { %489 = vst.msk [vmem:[#allocation2 + $0xe9] sm:$0x3f] %vm423_vm1, %v12098_v46  ;;  %v15751_v46 = vpack.c.bf16 %v954_v2, %v953_v1  ;;  %v1402_v2 = vpack.c.bf16 %v15594_v17, %v15592_v14  ;;  %v14853_v14 = vld [vmem:[#allocation5 + $0x50] sm:$0xff]   ;;  %v14854_v17 = vld [vmem:[#allocation5 + $0x68] sm:$0xff]   ;;  %v15860_v35 = vpack.c.bf16 %v15689_v8, %v15687_v7  ;;  %v15864_v39 = vpack.c.bf16 %v15697_v21, %v15695_v16  ;;  %v14855_v8 = vld [vmem:[#allocation5 + $0x60] sm:$0xff]  }
  0x9f   : > { %v15892_v61 = vpack.c.bf16 %v15715_v36, %v15713_v28  ;;  %v14857_v13 = vld [vmem:[#allocation5 + $0x70] sm:$0xff]   ;;  %v19856_v16 = vld [vmem:[#allocation22_spill] sm:$0xff]  ;;  %v19857_v28 = vld [vmem:[#allocation23_spill] sm:$0xff]  ;;  %vm15189_vm1 = vmmov 0  }
  0xa0   : > { %v15949_v21 = vld [vmem:[#allocation2 + $0xf2] sm:$0xff] }
  0xa1   : > { %13496 = vmatmul.mubr.msk.bf16.gmra.mxu0 %vm386_vm0, %v15693_v11  ;;  %v910_v11 = vld [vmem:[#allocation2 + $0xd8] sm:$0xff] }
  0xa2   : > { %13528 = vmatmul.mubr.msk.bf16.gmra.mxu1 %vm386_vm0, %v15707_v24  ;;  %13499 = vmatprep.mubr.msk.bf16.mxu0 %vm386_vm0, %v15709_v25  ;;  %v15785_v1 = vpack.c.bf16 %v910_v11, %v909_v15  ;;  %v15800_v11 = vpack.c.bf16 %v15620_v26, %v15616_v23  ;;  %v15832_v23 = vpack.c.bf16 %v15655_v50, %v15653_v49  ;;  %v15874_v49 = vld [vmem:[#allocation2 + $0xf1] sm:$0xff]  ;;  %v15876_v50 = vld [vmem:[#allocation2 + $0xf9] sm:$0xff] }
  0xa3   : > { %13531 = vmatprep.mubr.msk.bf16.mxu1 %vm386_vm0, %v15723_v38  ;;  %v15844_v26 = vpack.c.bf16 %v15669_v58, %v15667_v57  ;;  %v2785_v57 = vpack.c.bf16 %v15876_v50, %v15874_v49  ;;  %v15888_v58 = vpack.c.bf16 %v15711_v27, %v15699_v22  ;;  %v19855_v15 = vld [vmem:[#allocation21_spill] sm:$0xff]  ;;  %v15951_v22 = vld [vmem:[#allocation2 + $0xfa] sm:$0xff] }
  0xa4   : > { %v15755_v31 = vld [vmem:[#allocation2 + $0xda] sm:$0xff]  ;;  %v3059_v27 = vpack.c.bf16 %v15951_v22, %v15949_v21  ;;  %5950 = vst.msk [vmem:[#allocation2 + $0x100] sm:$0xff] %vm386_vm0, %v19851_v59 }
  0xa5   : > { %v15757_v29 = vld [vmem:[#allocation2 + $0xe0] sm:$0xff]  ;;  %v15759_v10 = vld [vmem:[#allocation2 + $0xe8] sm:$0xff]  ;;  %5945 = vst.msk [vmem:[#allocation2 + $0xd8] sm:$0xff] %vm386_vm0, %v19851_v59  ;;  %v15904_v5 = vpack.c.bf16 %v15755_v31, %v15726_v45 }
  0xa6   : > { %v15761_v25 = vld [vmem:[#allocation2 + $0xe1] sm:$0xff]  ;;  %v15769_v60 = vld [vmem:[#allocation2 + $0xe9] sm:$0xff]  ;;  %v15908_v7 = vpack.c.bf16 %v15759_v10, %v15757_v29 }
  0xa7   : > { %v15763_v6 = vld [vmem:[#allocation2 + $0xe2] sm:$0xff]  ;;  %v15771_v62 = vld [vmem:[#allocation2 + $0xea] sm:$0xff]  ;;  %v1963_v36 = vpack.c.bf16 %v15769_v60, %v15761_v25 }
  0xa8   : > { %5946 = vst.msk [vmem:[#allocation2 + $0xe0] sm:$0xff] %vm386_vm0, %v19851_v59  ;;  %5947 = vst.msk [vmem:[#allocation2 + $0xe8] sm:$0xff] %vm386_vm0, %v19851_v59  ;;  %v14858_v31 = vld [vmem:[#allocation5 + $0x88] sm:$0xff]   ;;  %v15981_v45 = vpack.c.bf16 %v15771_v62, %v15763_v6 }
  0xa9   : > { %13500 = vmatmul.mubr.msk.bf16.gmra.mxu0 %vm386_vm0, %v15747_v51  ;;  %v19853_v10 = vld [vmem:[#allocation19_spill] sm:$0xff]  ;;  %v19854_v29 = vld [vmem:[#allocation20_spill] sm:$0xff]  ;;  %5948 = vst.msk [vmem:[#allocation2 + $0xf0] sm:$0xff] %vm386_vm0, %v19851_v59 }
  0xaa   : > { %13532 = vmatmul.mubr.msk.bf16.gmra.mxu1 %vm386_vm0, %v15749_v44  ;;  %13503 = vmatprep.mubr.msk.bf16.mxu0 %vm386_vm0, %v15751_v46 }
  0xab   : > { %13535 = vmatprep.mubr.msk.bf16.mxu1 %vm386_vm0, %v15753_v0 }
  0xb1   : > { %13504 = vmatmul.mubr.msk.bf16.gmra.mxu0 %vm386_vm0, %v15783_v63 }
  0xb2   : > { %13536 = vmatmul.mubr.msk.bf16.gmra.mxu1 %vm386_vm0, %v15785_v1  ;;  %13543 = vmatprep.mubr.msk.bf16.mxu0 %vm386_vm0, %v1402_v2 }
  0xb3   : > { %13575 = vmatprep.mubr.msk.bf16.mxu1 %vm386_vm0, %v15538_v37  ;;  %v14856_v37 = vld [vmem:[#allocation5 + $0x78] sm:$0xff]  }
  0xb9   : > { %13544 = vmatmul.mubr.msk.bf16.vlgmr.msra.gmra.mxu0 %vm386_vm0, %v1403_v3 }
  0xba   : > { %13604 = vmatpush3.bf16.msra.mxu0 %v15606_v20  ;;  %13576 = vmatmul.mubr.msk.bf16.vlgmr.msra.gmra.mxu1 %vm386_vm0, %v15548_v43  ;;  %v15828_v20 = vpack.c.bf16 %v15651_v48, %v15643_v42  ;;  %v15868_v42 = vld [vmem:[#allocation2 + $0xf8] sm:$0xff] }
  0xbb   : > { %13547 = vmatprep.mubr.msk.bf16.mxu0 %vm386_vm0, %v15800_v11  ;;  %13579 = vmatprep.mubr.msk.bf16.mxu1 %vm386_vm0, %v15556_v53  ;;  %v2511_v48 = vpack.c.bf16 %v15868_v42, %v15866_v40  ;;  %5949 = vst.msk [vmem:[#allocation2 + $0xf8] sm:$0xff] %vm386_vm0, %v19851_v59 }
  0xbc   : > { %13605 = vmatprep.subr.bf16.mxu0 %v14851_v4  ;;  %13636 = vmatpush3.bf16.msra.mxu1 %v14852_v47  ;;  %v14859_v47 = vld [vmem:[#allocation5 + $0x80] sm:$0xff]  }
  0xbd   : > { %13637 = vmatprep.subr.bf16.mxu1 %v14853_v14 }
  0xbe   : > { %13606 = vmatpush3.bf16.msra.mxu0 %v14851_v4 }
  0xbf   : > { %13667 = vmatprep.subr.bf16.mxu0 %v14854_v17 }
  0xc0   : > { %13638 = vmatpush3.bf16.msra.mxu1 %v14853_v14 }
  0xc1   : > { %13548 = vmatmul.mubr.msk.bf16.gmra.mxu0 %vm386_vm0, %v15812_v18  ;;  %13699 = vmatprep.subr.bf16.mxu1 %v14856_v37 }
  0xc2   : > { %13580 = vmatmul.mubr.msk.bf16.gmra.mxu1 %vm386_vm0, %v15560_v55  ;;  %13551 = vmatprep.mubr.msk.bf16.mxu0 %vm386_vm0, %v15816_v19 }
  0xc3   : > { %13583 = vmatprep.mubr.msk.bf16.mxu1 %vm386_vm0, %v15584_v9 }
  0xc9   : > { %13552 = vmatmul.mubr.msk.bf16.gmra.mxu0 %vm386_vm0, %v15828_v20 }
  0xca   : > { %13584 = vmatmul.mubr.msk.bf16.gmra.mxu1 %vm386_vm0, %v15590_v12  ;;  %13555 = vmatprep.mubr.msk.bf16.mxu0 %vm386_vm0, %v15832_v23 }
  0xcb   : > { %13587 = vmatprep.mubr.msk.bf16.mxu1 %vm386_vm0, %v15629_v30 }
  0xd1   : > { %13556 = vmatmul.mubr.msk.bf16.gmra.mxu0 %vm386_vm0, %v15844_v26 }
  0xd2   : > { %13588 = vmatmul.mubr.msk.bf16.gmra.mxu1 %vm386_vm0, %v15633_v32  ;;  %13559 = vmatprep.mubr.msk.bf16.mxu0 %vm386_vm0, %v15848_v34 }
  0xd3   : > { %13591 = vmatprep.mubr.msk.bf16.mxu1 %vm386_vm0, %v15707_v24 }
  0xd9   : > { %13560 = vmatmul.mubr.msk.bf16.gmra.mxu0 %vm386_vm0, %v15860_v35 }
  0xda   : > { %13592 = vmatmul.mubr.msk.bf16.gmra.mxu1 %vm386_vm0, %v15723_v38  ;;  %13563 = vmatprep.mubr.msk.bf16.mxu0 %vm386_vm0, %v15864_v39 }
  0xdb   : > { %13595 = vmatprep.mubr.msk.bf16.mxu1 %vm386_vm0, %v15749_v44 }
  0xe1   : > { %13564 = vmatmul.mubr.msk.bf16.gmra.mxu0 %vm386_vm0, %v15888_v58 }
  0xe2   : > { %13596 = vmatmul.mubr.msk.bf16.gmra.mxu1 %vm386_vm0, %v15753_v0  ;;  %13567 = vmatprep.mubr.msk.bf16.mxu0 %vm386_vm0, %v15892_v61 }
  0xe3   : > { %13599 = vmatprep.mubr.msk.bf16.mxu1 %vm386_vm0, %v15785_v1 }
  0xe9   : > { %13568 = vmatmul.mubr.msk.bf16.gmra.mxu0 %vm386_vm0, %v15904_v5 }
  0xea   : > { %13600 = vmatmul.mubr.msk.bf16.gmra.mxu1 %vm386_vm0, %v15908_v7  ;;  %13607 = vmatprep.mubr.msk.bf16.mxu0 %vm386_vm0, %v15534_v33  ;;  %v19852_v33 = vld [vmem:[#allocation18_spill] sm:$0xff] }
  0xeb   : > { %13639 = vmatprep.mubr.msk.bf16.mxu1 %vm386_vm0, %v1403_v3 }
  0xf1   : > { %13608 = vmatmul.mubr.msk.bf16.vlgmr.msra.gmra.mxu0 %vm386_vm0, %v15544_v41 }
  0xf2   : > { %13668 = vmatpush3.bf16.msra.mxu0 %v14854_v17  ;;  %13640 = vmatmul.mubr.msk.bf16.vlgmr.msra.gmra.mxu1 %vm386_vm0, %v15800_v11 }
  0xf3   : > { %13611 = vmatprep.mubr.msk.bf16.mxu0 %vm386_vm0, %v15554_v52  ;;  %13643 = vmatprep.mubr.msk.bf16.mxu1 %vm386_vm0, %v15812_v18 }
  0xf4   : > { %13669 = vmatprep.subr.bf16.mxu0 %v14855_v8  ;;  %13700 = vmatpush3.bf16.msra.mxu1 %v14856_v37 }
  0xf5   : > { %13701 = vmatprep.subr.bf16.mxu1 %v14857_v13 }
  0xf6   : > { %13670 = vmatpush3.bf16.msra.mxu0 %v14855_v8 }
  0xf7   : > { %13731 = vmatprep.subr.bf16.mxu0 %v14858_v31 }
  0xf8   : > { %13702 = vmatpush3.bf16.msra.mxu1 %v14857_v13 }
  0xf9   : > { %13612 = vmatmul.mubr.msk.bf16.gmra.mxu0 %vm386_vm0, %v15558_v54 }
  0xfa   : > { %13644 = vmatmul.mubr.msk.bf16.gmra.mxu1 %vm386_vm0, %v15816_v19  ;;  %13615 = vmatprep.mubr.msk.bf16.mxu0 %vm386_vm0, %v19852_v33 }
  0xfb   : > { %13647 = vmatprep.mubr.msk.bf16.mxu1 %vm386_vm0, %v15828_v20 }
 0x101   : > { %13616 = vmatmul.mubr.msk.bf16.gmra.mxu0 %vm386_vm0, %v19853_v10 }
 0x102   : > { %13648 = vmatmul.mubr.msk.bf16.gmra.mxu1 %vm386_vm0, %v15832_v23  ;;  %13619 = vmatprep.mubr.msk.bf16.mxu0 %vm386_vm0, %v19854_v29 }
 0x103   : > { %13651 = vmatprep.mubr.msk.bf16.mxu1 %vm386_vm0, %v15844_v26 }
 0x109   : > { %13620 = vmatmul.mubr.msk.bf16.gmra.mxu0 %vm386_vm0, %v19855_v15 }
 0x10a   : > { %13652 = vmatmul.mubr.msk.bf16.gmra.mxu1 %vm386_vm0, %v15848_v34  ;;  %13623 = vmatprep.mubr.msk.bf16.mxu0 %vm386_vm0, %v19856_v16 }
 0x10b   : > { %13655 = vmatprep.mubr.msk.bf16.mxu1 %vm386_vm0, %v15860_v35 }
 0x111   : > { %13624 = vmatmul.mubr.msk.bf16.gmra.mxu0 %vm386_vm0, %v19857_v28 }
 0x112   : > { %13656 = vmatmul.mubr.msk.bf16.gmra.mxu1 %vm386_vm0, %v15864_v39  ;;  %13627 = vmatprep.mubr.msk.bf16.mxu0 %vm386_vm0, %v15747_v51 }
 0x113   : > { %13659 = vmatprep.mubr.msk.bf16.mxu1 %vm386_vm0, %v15888_v58 }
 0x119   : > { %13628 = vmatmul.mubr.msk.bf16.gmra.mxu0 %vm386_vm0, %v15751_v46 }
 0x11a   : > { %13660 = vmatmul.mubr.msk.bf16.gmra.mxu1 %vm386_vm0, %v15892_v61  ;;  %13631 = vmatprep.mubr.msk.bf16.mxu0 %vm386_vm0, %v15783_v63 }
 0x11b   : > { %13663 = vmatprep.mubr.msk.bf16.mxu1 %vm386_vm0, %v15904_v5 }
 0x121   : > { %13632 = vmatmul.mubr.msk.bf16.gmra.mxu0 %vm386_vm0, %v1963_v36 }
 0x122   : > { %13664 = vmatmul.mubr.msk.bf16.gmra.mxu1 %vm386_vm0, %v15981_v45  ;;  %13671 = vmatprep.mubr.msk.bf16.mxu0 %vm386_vm0, %v15548_v43 }
 0x123   : > { %13703 = vmatprep.mubr.msk.bf16.mxu1 %vm386_vm0, %v15544_v41 }
 0x129   : > { %13672 = vmatmul.mubr.msk.bf16.vlgmr.msra.gmra.mxu0 %vm386_vm0, %v15556_v53 }
 0x12a   : > { %13732 = vmatpush3.bf16.msra.mxu0 %v14858_v31  ;;  %13704 = vmatmul.mubr.msk.bf16.vlgmr.msra.gmra.mxu1 %vm386_vm0, %v15554_v52 }
 0x12b   : > { %13675 = vmatprep.mubr.msk.bf16.mxu0 %vm386_vm0, %v15560_v55  ;;  %13707 = vmatprep.mubr.msk.bf16.mxu1 %vm386_vm0, %v15558_v54 }
 0x12c   : > { %13733 = vmatprep.subr.bf16.mxu0 %v14859_v47 }
 0x12e   : > { %13734 = vmatpush3.bf16.msra.mxu0 %v14859_v47 }
 0x131   : > { %13676 = vmatmul.mubr.msk.bf16.gmra.mxu0 %vm386_vm0, %v15584_v9 }
 0x132   : > { %13708 = vmatmul.mubr.msk.bf16.gmra.mxu1 %vm386_vm0, %v19852_v33  ;;  %13679 = vmatprep.mubr.msk.bf16.mxu0 %vm386_vm0, %v15590_v12 }
 0x133   : > { %13711 = vmatprep.mubr.msk.bf16.mxu1 %vm386_vm0, %v19853_v10 }
 0x139   : > { %13680 = vmatmul.mubr.msk.bf16.gmra.mxu0 %vm386_vm0, %v15629_v30 }
 0x13a   : > { %13712 = vmatmul.mubr.msk.bf16.gmra.mxu1 %vm386_vm0, %v19854_v29  ;;  %13683 = vmatprep.mubr.msk.bf16.mxu0 %vm386_vm0, %v15633_v32 }
 0x13b   : > { %13715 = vmatprep.mubr.msk.bf16.mxu1 %vm386_vm0, %v19855_v15 }
 0x141   : > { %v13481_v41 = vpop.f32.mrf.mxu0  ;;  %13684 = vmatmul.mubr.msk.bf16.gmra.mxu0 %vm386_vm0, %v15707_v24 }
 0x142   : > { %v13513_v43 = vpop.f32.mrf.mxu1  ;;  %13716 = vmatmul.mubr.msk.bf16.gmra.mxu1 %vm386_vm0, %v19856_v16  ;;  %13687 = vmatprep.mubr.msk.bf16.mxu0 %vm386_vm0, %v15723_v38 }
 0x143   : > { %v16020_v52 = vadd.f32 %v13513_v43, %v13481_v41  ;;  %v1064_v53 = vpop.f32.mrf.mxu0  ;;  %13719 = vmatprep.mubr.msk.bf16.mxu1 %vm386_vm0, %v19857_v28 }
 0x144   : > { %v1263_v54 = vpop.f32.mrf.mxu1 }
 0x145   : > { %v16024_v55 = vadd.f32 %v1263_v54, %v1064_v53  ;;  %v13482_v6 = vpop.f32.mrf.mxu0 }
 0x146   : > { %v13514_v9 = vpop.f32.mrf.mxu1 }
 0x147   : > { %v16026_v12 = vadd.f32 %v13514_v9, %v13482_v6  ;;  %v16028_v30 = vpop.f32.mrf.mxu0 }
 0x148   : > { %v16030_v32 = vpop.f32.mrf.mxu1 }
 0x149   : > { %v13485_v24 = vpop.f32.mrf.mxu0  ;;  %13688 = vmatmul.mubr.msk.bf16.gmra.mxu0 %vm386_vm0, %v15749_v44 }
 0x14a   : > { %v13517_v25 = vpop.f32.mrf.mxu1  ;;  %13720 = vmatmul.mubr.msk.bf16.gmra.mxu1 %vm386_vm0, %v15747_v51  ;;  %13691 = vmatprep.mubr.msk.bf16.mxu0 %vm386_vm0, %v15753_v0 }
 0x14b   : > { %v16038_v38 = vadd.f32 %v13517_v25, %v13485_v24  ;;  %v1080_v56 = vpop.f32.mrf.mxu0  ;;  %13723 = vmatprep.mubr.msk.bf16.mxu1 %vm386_vm0, %v15751_v46 }
 0x14c   : > { %v1279_v60 = vpop.f32.mrf.mxu1 }
 0x14d   : > { %v16042_v62 = vadd.f32 %v1279_v60, %v1080_v56  ;;  %v13486_v2 = vpop.f32.mrf.mxu0 }
 0x14e   : > { %v13518_v3 = vpop.f32.mrf.mxu1 }
 0x14f   : > { %v16044_v4 = vadd.f32 %v13518_v3, %v13486_v2  ;;  %v16046_v44 = vpop.f32.mrf.mxu0 }
 0x150   : > { %v16048_v14 = vpop.f32.mrf.mxu1 }
 0x151   : > { %v13489_v51 = vpop.f32.mrf.mxu0  ;;  %13692 = vmatmul.mubr.msk.bf16.gmra.mxu0 %vm386_vm0, %v15785_v1 }
 0x152   : > { %v13521_v0 = vpop.f32.mrf.mxu1  ;;  %13724 = vmatmul.mubr.msk.bf16.gmra.mxu1 %vm386_vm0, %v15783_v63  ;;  %13695 = vmatprep.mubr.msk.bf16.mxu0 %vm386_vm0, %v15908_v7 }
 0x153   : > { %v16056_v46 = vadd.f32 %v13521_v0, %v13489_v51  ;;  %v1096_v17 = vpop.f32.mrf.mxu0  ;;  %13727 = vmatprep.mubr.msk.bf16.mxu1 %vm386_vm0, %v1963_v36 }
 0x154   : > { %v1295_v37 = vpop.f32.mrf.mxu1 }
 0x155   : > { %v16059_v8 = vadd.f32 %v1295_v37, %v1096_v17  ;;  %v13490_v13 = vpop.f32.mrf.mxu0 }
 0x156   : > { %v13522_v31 = vpop.f32.mrf.mxu1 }
 0x157   : > { %v16061_v33 = vadd.f32 %v13522_v31, %v13490_v13  ;;  %v16063_v1 = vpop.f32.mrf.mxu0 }
 0x158   : > { %v16065_v10 = vpop.f32.mrf.mxu1 }
 0x159   : > { %v13493_v63 = vpop.f32.mrf.mxu0  ;;  %13696 = vmatmul.mubr.msk.bf16.gmra.mxu0 %vm386_vm0, %v2511_v48 }
 0x15a   : > { %v13525_v7 = vpop.f32.mrf.mxu1  ;;  %13728 = vmatmul.mubr.msk.bf16.gmra.mxu1 %vm386_vm0, %v2785_v57  ;;  %13735 = vmatprep.mubr.msk.bf16.mxu0 %vm386_vm0, %v15800_v11 }
 0x15b   : > { %v16077_v29 = vadd.f32 %v13525_v7, %v13493_v63  ;;  %v1112_v15 = vpop.f32.mrf.mxu0 }
 0x15c   : > { %v1311_v16 = vpop.f32.mrf.mxu1 }
 0x15d   : > { %v16079_v28 = vadd.f32 %v1311_v16, %v1112_v15  ;;  %v13494_v36 = vpop.f32.mrf.mxu0 }
 0x15e   : > { %v13526_v47 = vpop.f32.mrf.mxu1 }
 0x15f   : > { %v16081_v40 = vadd.f32 %v13526_v47, %v13494_v36  ;;  %v16083_v42 = vpop.f32.mrf.mxu0 }
 0x160   : > { %v16085_v48 = vpop.f32.mrf.mxu1 }
 0x161   : > { %v13497_v49 = vpop.f32.mrf.mxu0  ;;  %13736 = vmatmul.mubr.msk.bf16.vlgmr.msra.gmra.mxu0 %vm386_vm0, %v15812_v18 }
 0x162   : > { %v13529_v50 = vpop.f32.mrf.mxu1  ;;  %13739 = vmatprep.mubr.msk.bf16.mxu0 %vm386_vm0, %v15816_v19 }
 0x163   : > { %v16091_v11 = vadd.f32 %v13529_v50, %v13497_v49  ;;  %v1128_v57 = vpop.f32.mrf.mxu0 }
 0x164   : > { %v1327_v41 = vpop.f32.mrf.mxu1 }
 0x165   : > { %v16093_v43 = vadd.f32 %v1327_v41, %v1128_v57  ;;  %v13498_v53 = vpop.f32.mrf.mxu0 }
 0x166   : > { %v13530_v54 = vpop.f32.mrf.mxu1 }
 0x167   : > { %v16095_v6 = vadd.f32 %v13530_v54, %v13498_v53  ;;  %v16097_v9 = vpop.f32.mrf.mxu0 }
 0x168   : > { %v16099_v24 = vpop.f32.mrf.mxu1 }
 0x169   : > { %v13501_v25 = vpop.f32.mrf.mxu0  ;;  %13740 = vmatmul.mubr.msk.bf16.gmra.mxu0 %vm386_vm0, %v15828_v20 }
 0x16a   : > { %v13533_v18 = vpop.f32.mrf.mxu1  ;;  %13743 = vmatprep.mubr.msk.bf16.mxu0 %vm386_vm0, %v15832_v23 }
 0x16b   : > { %v16105_v19 = vadd.f32 %v13533_v18, %v13501_v25  ;;  %v1144_v56 = vpop.f32.mrf.mxu0 }
 0x16c   : > { %v1343_v60 = vpop.f32.mrf.mxu1 }
 0x16d   : > { %v16107_v2 = vadd.f32 %v1343_v60, %v1144_v56  ;;  %v13502_v3 = vpop.f32.mrf.mxu0 }
 0x16e   : > { %v13534_v51 = vpop.f32.mrf.mxu1 }
 0x16f   : > { %v16109_v0 = vadd.f32 %v13534_v51, %v13502_v3  ;;  %v16111_v17 = vpop.f32.mrf.mxu0 }
 0x170   : > { %v16113_v37 = vpop.f32.mrf.mxu1 }
 0x171   : > { %v13505_v13 = vpop.f32.mrf.mxu0  ;;  %13744 = vmatmul.mubr.msk.bf16.gmra.mxu0 %vm386_vm0, %v15844_v26 }
 0x172   : > { %v13537_v20 = vpop.f32.mrf.mxu1  ;;  %13747 = vmatprep.mubr.msk.bf16.mxu0 %vm386_vm0, %v15848_v34 }
 0x173   : > { %v16119_v23 = vadd.f32 %v13537_v20, %v13505_v13  ;;  %v1160_v31 = vpop.f32.mrf.mxu0 }
 0x174   : > { %v1359_v63 = vpop.f32.mrf.mxu1 }
 0x175   : > { %v16121_v7 = vadd.f32 %v1359_v63, %v1160_v31  ;;  %v13506_v15 = vpop.f32.mrf.mxu0 }
 0x176   : > { %v13538_v16 = vpop.f32.mrf.mxu1 }
 0x177   : > { %v16123_v36 = vadd.f32 %v13538_v16, %v13506_v15  ;;  %v16125_v47 = vpop.f32.mrf.mxu0 }
 0x178   : > { %v16127_v49 = vpop.f32.mrf.mxu1 }
 0x179   : > { %v13545_v50 = vpop.f32.mrf.mxu0  ;;  %13748 = vmatmul.mubr.msk.bf16.gmra.mxu0 %vm386_vm0, %v15860_v35 }
 0x17a   : > { %v1622_v26 = vadd.f32 %v13545_v50, %v16020_v52  ;;  %v13577_v34 = vpop.f32.mrf.mxu1  ;;  %13751 = vmatprep.mubr.msk.bf16.mxu0 %vm386_vm0, %v15864_v39 }
 0x17b   : > { %v1509_v57 = vpop.f32.mrf.mxu0 }
 0x17c   : > { %v1620_v41 = vadd.f32 %v1509_v57, %v16024_v55  ;;  %v16135_v53 = vadd.f32 %v13577_v34, %v1622_v26  ;;  %v1783_v54 = vpop.f32.mrf.mxu1 }
 0x17d   : > { %v13546_v25 = vpop.f32.mrf.mxu0 }
 0x17e   : > { %v1623_v18 = vadd.f32 %v13546_v25, %v16026_v12  ;;  %v16138_v56 = vadd.f32 %v1783_v54, %v1620_v41  ;;  %v13578_v60 = vpop.f32.mrf.mxu1  ;;  %v14860_v12 = vld [vmem:[#allocation5 + $0xa8] sm:$0xff]  }
 0x17f   : > { %v16140_v3 = vpop.f32.mrf.mxu0  ;;  %13763 = vmatprep.subr.bf16.mxu1 %v14860_v12 }
 0x180   : > { %v16142_v35 = vadd.f32 %v13578_v60, %v1623_v18  ;;  %v16144_v52 = vpop.f32.mrf.mxu1  ;;  %13764 = vmatpush3.bf16.msra.mxu1 %v14860_v12 }
 0x181   : > { %v13549_v51 = vpop.f32.mrf.mxu0  ;;  %13752 = vmatmul.mubr.msk.bf16.gmra.mxu0 %vm386_vm0, %v15888_v58 }
 0x182   : > { %v1626_v39 = vadd.f32 %v13549_v51, %v16038_v38  ;;  %v13581_v55 = vpop.f32.mrf.mxu1  ;;  %13755 = vmatprep.mubr.msk.bf16.mxu0 %vm386_vm0, %v15892_v61 }
 0x183   : > { %v1525_v13 = vpop.f32.mrf.mxu0 }
 0x184   : > { %v1624_v20 = vadd.f32 %v1525_v13, %v16042_v62  ;;  %v16152_v31 = vadd.f32 %v13581_v55, %v1626_v39  ;;  %v1799_v63 = vpop.f32.mrf.mxu1 }
 0x185   : > { %v13550_v15 = vpop.f32.mrf.mxu0 }
 0x186   : > { %v1627_v16 = vadd.f32 %v13550_v15, %v16044_v4  ;;  %v16155_v50 = vadd.f32 %v1799_v63, %v1624_v20  ;;  %v13582_v58 = vpop.f32.mrf.mxu1 }
 0x187   : > { %v16157_v38 = vpop.f32.mrf.mxu0 }
 0x188   : > { %v16159_v26 = vadd.f32 %v13582_v58, %v1627_v16  ;;  %v16161_v61 = vpop.f32.mrf.mxu1 }
 0x189   : > { %v13553_v34 = vpop.f32.mrf.mxu0  ;;  %13756 = vmatmul.mubr.msk.bf16.gmra.mxu0 %vm386_vm0, %v15904_v5 }
 0x18a   : > { %v1630_v62 = vadd.f32 %v13553_v34, %v16056_v46  ;;  %v13585_v57 = vpop.f32.mrf.mxu1  ;;  %13759 = vmatprep.mubr.msk.bf16.mxu0 %vm386_vm0, %v15981_v45 }
 0x18b   : > { %v1541_v4 = vpop.f32.mrf.mxu0 }
 0x18c   : > { %v1628_v41 = vadd.f32 %v1541_v4, %v16059_v8  ;;  %v16169_v54 = vadd.f32 %v13585_v57, %v1630_v62  ;;  %v1815_v25 = vpop.f32.mrf.mxu1 }
 0x18d   : > { %v13554_v18 = vpop.f32.mrf.mxu0 }
 0x18e   : > { %v1631_v60 = vadd.f32 %v13554_v18, %v16061_v33  ;;  %v16172_v51 = vadd.f32 %v1815_v25, %v1628_v41  ;;  %v13586_v39 = vpop.f32.mrf.mxu1 }
 0x18f   : > { %v16174_v55 = vpop.f32.mrf.mxu0 }
 0x190   : > { %v16176_v5 = vadd.f32 %v13586_v39, %v1631_v60  ;;  %v16178_v46 = vpop.f32.mrf.mxu1 }
 0x191   : > { %v13557_v12 = vpop.f32.mrf.mxu0  ;;  %13760 = vmatmul.mubr.msk.bf16.gmra.mxu0 %vm386_vm0, %v3059_v27 }
 0x192   : > { %v1634_v45 = vadd.f32 %v13557_v12, %v16077_v29  ;;  %v13589_v8 = vpop.f32.mrf.mxu1  ;;  %v14861_v12 = vld [vmem:[#allocation5 + $0xa0] sm:$0xff]  }
 0x193   : > { %v1557_v13 = vpop.f32.mrf.mxu0  ;;  %13765 = vmatprep.subr.bf16.mxu1 %v14861_v12 }
 0x194   : > { %v1632_v33 = vadd.f32 %v1557_v13, %v16079_v28  ;;  %v16186_v20 = vadd.f32 %v13589_v8, %v1634_v45  ;;  %v1831_v63 = vpop.f32.mrf.mxu1  ;;  %13766 = vmatpush3.bf16.msra.mxu1 %v14861_v12 }
 0x195   : > { %v13558_v15 = vpop.f32.mrf.mxu0 }
 0x196   : > { %v1635_v16 = vadd.f32 %v13558_v15, %v16081_v40  ;;  %v16189_v58 = vadd.f32 %v1831_v63, %v1632_v33  ;;  %v13590_v34 = vpop.f32.mrf.mxu1 }
 0x197   : > { %v16191_v62 = vpop.f32.mrf.mxu0 }
 0x198   : > { %v16193_v21 = vadd.f32 %v13590_v34, %v1635_v16  ;;  %v16195_v22 = vpop.f32.mrf.mxu1 }
 0x199   : > { %v13561_v27 = vpop.f32.mrf.mxu0 }
 0x19a   : > { %v1638_v29 = vadd.f32 %v13561_v27, %v16091_v11  ;;  %v13593_v57 = vpop.f32.mrf.mxu1 }
 0x19b   : > { %v1573_v28 = vpop.f32.mrf.mxu0 }
 0x19c   : > { %v1636_v4 = vadd.f32 %v1573_v28, %v16093_v43  ;;  %v16199_v41 = vadd.f32 %v13593_v57, %v1638_v29  ;;  %v1847_v25 = vpop.f32.mrf.mxu1 }
 0x19d   : > { %v13562_v40 = vpop.f32.mrf.mxu0 }
 0x19e   : > { %v1639_v18 = vadd.f32 %v13562_v40, %v16095_v6  ;;  %v16202_v60 = vadd.f32 %v1847_v25, %v1636_v4  ;;  %v13594_v39 = vpop.f32.mrf.mxu1 }
 0x19f   : > { %v16204_v45 = vpop.f32.mrf.mxu0 }
 0x1a0   : > { %v16206_v8 = vadd.f32 %v13594_v39, %v1639_v18  ;;  %v16208_v13 = vpop.f32.mrf.mxu1 }
 0x1a1   : > { %v13565_v11 = vpop.f32.mrf.mxu0 }
 0x1a2   : > { %v1642_v43 = vadd.f32 %v13565_v11, %v16105_v19  ;;  %v13597_v33 = vpop.f32.mrf.mxu1 }
 0x1a3   : > { %v1589_v63 = vpop.f32.mrf.mxu0 }
 0x1a4   : > { %v1640_v15 = vadd.f32 %v1589_v63, %v16107_v2  ;;  %v16212_v6 = vadd.f32 %v13597_v33, %v1642_v43  ;;  %v1863_v16 = vpop.f32.mrf.mxu1 }
 0x1a5   : > { %v13566_v34 = vpop.f32.mrf.mxu0 }
 0x1a6   : > { %v1643_v27 = vadd.f32 %v13566_v34, %v16109_v0  ;;  %v16215_v29 = vadd.f32 %v1863_v16, %v1640_v15  ;;  %v13598_v57 = vpop.f32.mrf.mxu1 }
 0x1a7   : > { %v16217_v28 = vpop.f32.mrf.mxu0 }
 0x1a8   : > { %v16219_v4 = vadd.f32 %v13598_v57, %v1643_v27  ;;  %v16221_v25 = vpop.f32.mrf.mxu1 }
 0x1a9   : > { %19858 = vst [vmem:[#allocation18_spill] sm:$0xff] %v16221_v25  ;;  %v13569_v19 = vpop.f32.mrf.mxu0 }
 0x1aa   : > { %v1646_v40 = vadd.f32 %v13569_v19, %v16119_v23  ;;  %v13601_v18 = vpop.f32.mrf.mxu1  ;;  %v14862_v23 = vld [vmem:[#allocation5 + $0x98] sm:$0xff]  }
 0x1ab   : > { %v1605_v2 = vpop.f32.mrf.mxu0  ;;  %13795 = vmatprep.subr.bf16.mxu0 %v14862_v23 }
 0x1ac   : > { %v1644_v39 = vadd.f32 %v1605_v2, %v16121_v7  ;;  %v16225_v12 = vadd.f32 %v13601_v18, %v1646_v40  ;;  %v1879_v11 = vpop.f32.mrf.mxu1  ;;  %13796 = vmatpush3.bf16.msra.mxu0 %v14862_v23  ;;  %v14863_v18 = vld [vmem:[#allocation5 + $0x90] sm:$0xff]  }
 0x1ad   : > { %v13570_v0 = vpop.f32.mrf.mxu0  ;;  %13797 = vmatprep.subr.bf16.mxu0 %v14863_v18  ;;  %v3445_v23 = vld [vmem:[#allocation3 + $0x8] sm:$0xff] }
 0x1ae   : > { %v1647_v43 = vadd.f32 %v13570_v0, %v16123_v36  ;;  %v16228_v33 = vadd.f32 %v1879_v11, %v1644_v39  ;;  %v13602_v63 = vpop.f32.mrf.mxu1  ;;  %v16246_v39 = vld [vmem:[#allocation3 + $0x2] sm:$0xff] }
 0x1af   : > { %v16230_v15 = vpop.f32.mrf.mxu0  ;;  %19860 = vst [vmem:[#allocation20_spill] sm:$0xff] %v16246_v39 }
 0x1b0   : > { %v16232_v16 = vadd.f32 %v13602_v63, %v1647_v43  ;;  %v16234_v34 = vpop.f32.mrf.mxu1  ;;  %v3492_v43 = vld [vmem:[#allocation3 + $0x9] sm:$0xff]  ;;  %v3444_v63 = vld [vmem:[#allocation3] sm:$0xff]  ;;  %13798 = vmatpush3.bf16.msra.mxu0 %v14863_v18 }
 0x1b1   : > { %19859 = vst [vmem:[#allocation19_spill] sm:$0xff] %v16234_v34  ;;  %v13609_v27 = vpop.f32.mrf.mxu0  ;;  %v3472_v39 = vpack.c.bf16 %v3445_v23, %v3444_v63 }
 0x1b2   : > { %v16237_v57 = vadd.f32 %v13609_v27, %v16135_v53  ;;  %v16239_v7 = vpop.f32.mrf.mxu1  ;;  %v3491_v53 = vld [vmem:[#allocation3 + $0x1] sm:$0xff] }
 0x1b3   : > { %v2057_v19 = vpop.f32.mrf.mxu0  ;;  %8481 = vst.msk [vmem:[#allocation3] sm:$0xff] %vm386_vm0, %v19851_v59  ;;  %13799 = vmatprep.mubr.msk.bf16.mxu0 %vm386_vm0, %v3472_v39 }
 0x1b4   : > { %v16242_v36 = vadd.f32 %v2057_v19, %v16138_v56  ;;  %v16244_v40 = vpop.f32.mrf.mxu1  ;;  %v3519_v56 = vpack.c.bf16 %v3492_v43, %v3491_v53 }
 0x1b5   : > { %v13610_v2 = vpop.f32.mrf.mxu0 }
 0x1b6   : > { %v16249_v11 = vadd.f32 %v13610_v2, %v16142_v35  ;;  %v16251_v0 = vpop.f32.mrf.mxu1  ;;  %13767 = vmatprep.mubr.msk.bf16.mxu1 %vm386_vm0, %v3519_v56 }
 0x1b7   : > { %v16253_v27 = vpop.f32.mrf.mxu0 }
 0x1b8   : > { %v16257_v19 = vpop.f32.mrf.mxu1 }
 0x1b9   : > { %v13613_v34 = vpop.f32.mrf.mxu0 }
 0x1ba   : > { %v16261_v35 = vadd.f32 %v13613_v34, %v16152_v31  ;;  %v16263_v2 = vpop.f32.mrf.mxu1  ;;  %v16280_v34 = vld [vmem:[#allocation5 + $0xb8] sm:$0xff]  }
 0x1bb   : > { %v2073_v25 = vpop.f32.mrf.mxu0  ;;  %19865 = vst [vmem:[#allocation25_spill] sm:$0xff] %v16280_v34  ;;  %13827 = vmatprep.subr.bf16.mxu1 %v16280_v34 }
 0x1bc   : > { %v16267_v18 = vadd.f32 %v2073_v25, %v16155_v50  ;;  %v16269_v53 = vpop.f32.mrf.mxu1 }
 0x1bd   : > { %v13614_v43 = vpop.f32.mrf.mxu0 }
 0x1be   : > { %v16272_v59 = vadd.f32 %v13614_v43, %v16159_v26  ;;  %v16274_v63 = vpop.f32.mrf.mxu1 }
 0x1bf   : > { %19862 = vst [vmem:[#allocation22_spill] sm:$0xff] %v16274_v63  ;;  %v16276_v56 = vpop.f32.mrf.mxu0 }
 0x1c0   : > { %19861 = vst [vmem:[#allocation21_spill] sm:$0xff] %v16272_v59  ;;  %19863 = vst [vmem:[#allocation23_spill] sm:$0xff] %v16276_v56  ;;  %v16278_v31 = vpop.f32.mrf.mxu1 }
 0x1c1   : > { %19864 = vst [vmem:[#allocation24_spill] sm:$0xff] %v16278_v31  ;;  %v13617_v23 = vpop.f32.mrf.mxu0 }
 0x1c2   : > { %v16283_v39 = vadd.f32 %v13617_v23, %v16169_v54  ;;  %v16285_v50 = vpop.f32.mrf.mxu1 }
 0x1c3   : > { %19866 = vst [vmem:[#allocation26_spill] sm:$0xff] %v16285_v50  ;;  %v2089_v25 = vpop.f32.mrf.mxu0 }
 0x1c4   : > { %v16289_v26 = vadd.f32 %v2089_v25, %v16172_v51  ;;  %v16291_v43 = vpop.f32.mrf.mxu1 }
 0x1c5   : > { %19867 = vst [vmem:[#allocation27_spill] sm:$0xff] %v16291_v43  ;;  %v13618_v63 = vpop.f32.mrf.mxu0 }
 0x1c6   : > { %v16294_v59 = vadd.f32 %v13618_v63, %v16176_v5  ;;  %v16296_v31 = vpop.f32.mrf.mxu1 }
 0x1c7   : > { %19869 = vst [vmem:[#allocation29_spill] sm:$0xff] %v16296_v31  ;;  %v16298_v56 = vpop.f32.mrf.mxu0 }
 0x1c8   : > { %19868 = vst [vmem:[#allocation28_spill] sm:$0xff] %v16294_v59  ;;  %19870 = vst [vmem:[#allocation30_spill] sm:$0xff] %v16298_v56  ;;  %v16300_v54 = vpop.f32.mrf.mxu1 }
 0x1c9   : > { %19871 = vst [vmem:[#allocation31_spill] sm:$0xff] %v16300_v54  ;;  %v13621_v23 = vpop.f32.mrf.mxu0 }
 0x1ca   : > { %v16303_v50 = vadd.f32 %v13621_v23, %v16186_v20  ;;  %v16305_v34 = vpop.f32.mrf.mxu1 }
 0x1cb   : > { %19873 = vst [vmem:[#allocation33_spill] sm:$0xff] %v16305_v34  ;;  %v2105_v51 = vpop.f32.mrf.mxu0 }
 0x1cc   : > { %19872 = vst [vmem:[#allocation32_spill] sm:$0xff] %v16303_v50  ;;  %v16308_v25 = vadd.f32 %v2105_v51, %v16189_v58  ;;  %v16310_v43 = vpop.f32.mrf.mxu1 }
 0x1cd   : > { %19875 = vst [vmem:[#allocation35_spill] sm:$0xff] %v16310_v43  ;;  %v13622_v5 = vpop.f32.mrf.mxu0 }
 0x1ce   : > { %19874 = vst [vmem:[#allocation34_spill] sm:$0xff] %v16308_v25  ;;  %v16313_v63 = vadd.f32 %v13622_v5, %v16193_v21  ;;  %v16315_v31 = vpop.f32.mrf.mxu1 }
 0x1cf   : > { %19877 = vst [vmem:[#allocation37_spill] sm:$0xff] %v16315_v31  ;;  %v16317_v59 = vpop.f32.mrf.mxu0 }
 0x1d0   : > { %19876 = vst [vmem:[#allocation36_spill] sm:$0xff] %v16313_v63  ;;  %19878 = vst [vmem:[#allocation38_spill] sm:$0xff] %v16317_v59  ;;  %v16319_v54 = vpop.f32.mrf.mxu1 }
 0x1d1   : > { %19879 = vst [vmem:[#allocation39_spill] sm:$0xff] %v16319_v54  ;;  %v13625_v20 = vpop.f32.mrf.mxu0 }
 0x1d2   : > { %v16322_v23 = vadd.f32 %v13625_v20, %v16199_v41  ;;  %v16324_v34 = vpop.f32.mrf.mxu1 }
 0x1d3   : > { %19881 = vst [vmem:[#allocation41_spill] sm:$0xff] %v16324_v34  ;;  %v2121_v58 = vpop.f32.mrf.mxu0 }
 0x1d4   : > { %19880 = vst [vmem:[#allocation40_spill] sm:$0xff] %v16322_v23  ;;  %v16327_v51 = vadd.f32 %v2121_v58, %v16202_v60  ;;  %v16329_v43 = vpop.f32.mrf.mxu1 }
 0x1d5   : > { %19883 = vst [vmem:[#allocation43_spill] sm:$0xff] %v16329_v43  ;;  %v13626_v21 = vpop.f32.mrf.mxu0 }
 0x1d6   : > { %19882 = vst [vmem:[#allocation42_spill] sm:$0xff] %v16327_v51  ;;  %v16332_v5 = vadd.f32 %v13626_v21, %v16206_v8  ;;  %v16334_v31 = vpop.f32.mrf.mxu1 }
 0x1d7   : > { %19885 = vst [vmem:[#allocation45_spill] sm:$0xff] %v16334_v31  ;;  %v16336_v63 = vpop.f32.mrf.mxu0 }
 0x1d8   : > { %19884 = vst [vmem:[#allocation44_spill] sm:$0xff] %v16332_v5  ;;  %19886 = vst [vmem:[#allocation46_spill] sm:$0xff] %v16336_v63  ;;  %v16338_v54 = vpop.f32.mrf.mxu1 }
 0x1d9   : > { %19887 = vst [vmem:[#allocation47_spill] sm:$0xff] %v16338_v54  ;;  %v13629_v41 = vpop.f32.mrf.mxu0 }
 0x1da   : > { %v16341_v20 = vadd.f32 %v13629_v41, %v16212_v6  ;;  %v16343_v34 = vpop.f32.mrf.mxu1 }
 0x1db   : > { %19889 = vst [vmem:[#allocation49_spill] sm:$0xff] %v16343_v34  ;;  %v2137_v60 = vpop.f32.mrf.mxu0 }
 0x1dc   : > { %19888 = vst [vmem:[#allocation48_spill] sm:$0xff] %v16341_v20  ;;  %v16346_v58 = vadd.f32 %v2137_v60, %v16215_v29  ;;  %v16348_v43 = vpop.f32.mrf.mxu1 }
 0x1dd   : > { %19891 = vst [vmem:[#allocation51_spill] sm:$0xff] %v16348_v43  ;;  %v13630_v8 = vpop.f32.mrf.mxu0 }
 0x1de   : > { %19890 = vst [vmem:[#allocation50_spill] sm:$0xff] %v16346_v58  ;;  %v16351_v21 = vadd.f32 %v13630_v8, %v16219_v4  ;;  %v16353_v31 = vpop.f32.mrf.mxu1 }
 0x1df   : > { %19893 = vst [vmem:[#allocation53_spill] sm:$0xff] %v16353_v31  ;;  %v16355_v5 = vpop.f32.mrf.mxu0 }
 0x1e0   : > { %19892 = vst [vmem:[#allocation52_spill] sm:$0xff] %v16351_v21  ;;  %19894 = vst [vmem:[#allocation54_spill] sm:$0xff] %v16355_v5  ;;  %v16357_v54 = vpop.f32.mrf.mxu1 }
 0x1e1   : > { %19895 = vst [vmem:[#allocation55_spill] sm:$0xff] %v16357_v54  ;;  %v13633_v6 = vpop.f32.mrf.mxu0 }
 0x1e2   : > { %v16360_v41 = vadd.f32 %v13633_v6, %v16225_v12  ;;  %v16362_v34 = vpop.f32.mrf.mxu1  ;;  %v16378_v12 = vld [vmem:[#allocation5 + $0xc8] sm:$0xff]  }
 0x1e3   : > { %19897 = vst [vmem:[#allocation57_spill] sm:$0xff] %v16362_v34  ;;  %v2153_v29 = vpop.f32.mrf.mxu0  ;;  %19904 = vst [vmem:[#allocation64_spill] sm:$0xff] %v16378_v12  ;;  %13859 = vmatprep.subr.bf16.mxu0 %v16378_v12 }
 0x1e4   : > { %19896 = vst [vmem:[#allocation56_spill] sm:$0xff] %v16360_v41  ;;  %v16365_v60 = vadd.f32 %v2153_v29, %v16228_v33  ;;  %v16367_v43 = vpop.f32.mrf.mxu1 }
 0x1e5   : > { %19899 = vst [vmem:[#allocation59_spill] sm:$0xff] %v16367_v43  ;;  %v13634_v4 = vpop.f32.mrf.mxu0 }
 0x1e6   : > { %19898 = vst [vmem:[#allocation58_spill] sm:$0xff] %v16365_v60  ;;  %v16370_v8 = vadd.f32 %v13634_v4, %v16232_v16  ;;  %v16372_v31 = vpop.f32.mrf.mxu1 }
 0x1e7   : > { %19901 = vst [vmem:[#allocation61_spill] sm:$0xff] %v16372_v31  ;;  %v16374_v21 = vpop.f32.mrf.mxu0 }
 0x1e8   : > { %19900 = vst [vmem:[#allocation60_spill] sm:$0xff] %v16370_v8  ;;  %19902 = vst [vmem:[#allocation62_spill] sm:$0xff] %v16374_v21  ;;  %v16376_v54 = vpop.f32.mrf.mxu1 }
 0x1e9   : > { %19903 = vst [vmem:[#allocation63_spill] sm:$0xff] %v16376_v54  ;;  %v13673_v6 = vpop.f32.mrf.mxu0 }
 0x1ea   : > { %v16380_v34 = vpop.f32.mrf.mxu1 }
 0x1eb   : > { %v16383_v33 = vpop.f32.mrf.mxu0 }
 0x1ec   : > { %v16385_v29 = vpop.f32.mrf.mxu1 }
 0x1ed   : > { %v16387_v43 = vpop.f32.mrf.mxu0 }
 0x1ee   : > { %v16389_v16 = vpop.f32.mrf.mxu1 }
 0x1ef   : > { %v16391_v4 = vpop.f32.mrf.mxu0 }
 0x1f0   : > { %v16395_v54 = vpop.f32.mrf.mxu1 }
 0x1f1   : > { %v16393_v31 = vpop.f32.mrf.mxu0 }
 0x1f2   : > { %v16401_v21 = vpop.f32.mrf.mxu1 }
 0x1f3   : > { %v16397_v8 = vpop.f32.mrf.mxu0 }
 0x1f4   : > { %v16407_v12 = vpop.f32.mrf.mxu1 }
 0x1f5   : > { %v16399_v60 = vpop.f32.mrf.mxu0  ;;  %19906 = vst [vmem:[#allocation66_spill] sm:$0xff] %v16407_v12 }
 0x1f6   : > { %v16413_v63 = vpop.f32.mrf.mxu1 }
 0x1f7   : > { %v16403_v41 = vpop.f32.mrf.mxu0  ;;  %19909 = vst [vmem:[#allocation69_spill] sm:$0xff] %v16413_v63 }
 0x1f8   : > { %v16419_v25 = vpop.f32.mrf.mxu1 }
 0x1f9   : > { %v16405_v58 = vpop.f32.mrf.mxu0  ;;  %19912 = vst [vmem:[#allocation72_spill] sm:$0xff] %v16419_v25 }
 0x1fa   : > { %19905 = vst [vmem:[#allocation65_spill] sm:$0xff] %v16405_v58  ;;  %v16425_v56 = vpop.f32.mrf.mxu1 }
 0x1fb   : > { %v16409_v5 = vpop.f32.mrf.mxu0  ;;  %19915 = vst [vmem:[#allocation75_spill] sm:$0xff] %v16425_v56 }
 0x1fc   : > { %19907 = vst [vmem:[#allocation67_spill] sm:$0xff] %v16409_v5  ;;  %v16431_v5 = vpop.f32.mrf.mxu1 }
 0x1fd   : > { %v16411_v20 = vpop.f32.mrf.mxu0  ;;  %19918 = vst [vmem:[#allocation78_spill] sm:$0xff] %v16431_v5 }
 0x1fe   : > { %19908 = vst [vmem:[#allocation68_spill] sm:$0xff] %v16411_v20 }
 0x1ff   : > { %v16415_v51 = vpop.f32.mrf.mxu0 }
 0x200   : > { %19910 = vst [vmem:[#allocation70_spill] sm:$0xff] %v16415_v51  ;;  %v16437_v51 = vpop.f32.mrf.mxu1 }
 0x201   : > { %v16417_v23 = vpop.f32.mrf.mxu0  ;;  %19921 = vst [vmem:[#allocation81_spill] sm:$0xff] %v16437_v51 }
 0x202   : > { %19911 = vst [vmem:[#allocation71_spill] sm:$0xff] %v16417_v23 }
 0x203   : > { %v16421_v50 = vpop.f32.mrf.mxu0 }
 0x204   : > { %19913 = vst [vmem:[#allocation73_spill] sm:$0xff] %v16421_v50  ;;  %v490_v50 = vlaneseq }
 0x205   : > { %v16423_v59 = vpop.f32.mrf.mxu0 }
 0x206   : > { %19914 = vst [vmem:[#allocation74_spill] sm:$0xff] %v16423_v59  ;;  %v16443_v59 = vpop.f32.mrf.mxu1 }
 0x207   : > { %v16427_v58 = vpop.f32.mrf.mxu0 }
 0x208   : > { %19916 = vst [vmem:[#allocation76_spill] sm:$0xff] %v16427_v58  ;;  %v1267_v58 = vadd.f32 %v16030_v32, %v16028_v30  ;;  %v1315_v30 = vadd.f32 %v16085_v48, %v16083_v42  ;;  %v1331_v32 = vadd.f32 %v16099_v24, %v16097_v9 }
 0x209   : > { %v16429_v12 = vpop.f32.mrf.mxu0 }
 0x20a   : > { %19917 = vst [vmem:[#allocation77_spill] sm:$0xff] %v16429_v12  ;;  %v1621_v12 = vadd.f32 %v16140_v3, %v1267_v58  ;;  %v1633_v48 = vadd.f32 %v16191_v62, %v1315_v30 }
 0x20b   : > { %v16433_v20 = vpop.f32.mrf.mxu0 }
 0x20c   : > { %19919 = vst [vmem:[#allocation79_spill] sm:$0xff] %v16433_v20  ;;  %v16452_v20 = vshrl.u32 %v490_v50, 7  ;;  %v1895_v3 = vadd.f32 %v16144_v52, %v1621_v12 }
 0x20d   : > { %v16435_v63 = vpop.f32.mrf.mxu0 }
 0x20e   : > { %19920 = vst [vmem:[#allocation80_spill] sm:$0xff] %v16435_v63  ;;  %v16454_v63 = vpop.f32.mrf.mxu1  ;;  %v494_v58 = vadd.s32 24, %v16452_v20  ;;  %v2169_v9 = vadd.f32 %v16253_v27, %v1895_v3  ;;  %v498_v62 = vadd.s32 56, %v16452_v20  ;;  %v2445_v27 = vadd.f32 %v16251_v0, %v16249_v11  ;;  %v19925_v0 = vld [vmem:[#allocation18_spill] sm:$0xff] }
 0x20f   : > { %v16439_v23 = vpop.f32.mrf.mxu0  ;;  %v16530_v3 = vadd.s32 88, %v16452_v20 }
 0x210   : > { %19922 = vst [vmem:[#allocation82_spill] sm:$0xff] %v16439_v23  ;;  %v1299_v23 = vadd.f32 %v16065_v10, %v16063_v1  ;;  %v2444_v1 = vadd.f32 %v16239_v7, %v16237_v57  ;;  %v16477_v10 = vpop.f32.mrf.mxu1 }
 0x211   : > { %v16441_v25 = vpop.f32.mrf.mxu0 }
 0x212   : > { %19923 = vst [vmem:[#allocation83_spill] sm:$0xff] %v16441_v25  ;;  %v1283_v25 = vadd.f32 %v16048_v14, %v16046_v44  ;;  %v1363_v44 = vadd.f32 %v16127_v49, %v16125_v47  ;;  %v1629_v42 = vadd.f32 %v16174_v55, %v1299_v23  ;;  %v2442_v49 = vadd.f32 %v16244_v40, %v16242_v36 }
 0x213   : > { %v16447_v56 = vpop.f32.mrf.mxu0  ;;  %v2718_v52 = vadd.f32 %v13673_v6, %v2444_v1  ;;  %v544_v55 = vand.u32 15, %v494_v58  ;;  %v2443_v40 = vadd.f32 %v16257_v19, %v2169_v9  ;;  %v2719_v6 = vadd.f32 %v16387_v43, %v2445_v27  ;;  %v16523_v19 = vld [vmem:[#allocation8] ss:$0 sm:$0xff]  ;;  %v19930_v1 = vld [vmem:[#allocation23_spill] sm:$0xff] }
 0x214   : > { %v1625_v14 = vadd.f32 %v16157_v38, %v1283_v25  ;;  %v1645_v38 = vadd.f32 %v16230_v15, %v1363_v44  ;;  %v16497_v25 = vpop.f32.mrf.mxu1  ;;  %v16503_v36 = vadd.f32 %v16178_v46, %v1629_v42  ;;  %v16506_v15 = vadd.f32 %v16195_v22, %v1633_v48  ;;  %v19926_v46 = vld [vmem:[#allocation19_spill] sm:$0xff] }
 0x215   : > { %v16450_v5 = vpop.f32.mrf.mxu0  ;;  %v2992_v12 = vadd.f32 %v16380_v34, %v2718_v52  ;;  %v2717_v22 = vadd.f32 %v16391_v4, %v2443_v40  ;;  %vm16525_vm2 = vcmp.lt.s32.totalorder %v544_v55, 14  ;;  %v2448_v34 = vadd.f32 %v16263_v2, %v16261_v35 }
 0x216   : > { %v1899_v7 = vadd.f32 %v16161_v61, %v1625_v14  ;;  %v16535_v58 = vpop.f32.mrf.mxu1  ;;  %v2446_v14 = vadd.f32 %v16269_v53, %v16267_v18  ;;  %v19931_v9 = vmov 0  ;;  %v16549_v35 = vadd.s32 120, %v16452_v20  ;;  %v19934_v53 = vld [vmem:[#allocation21_spill] sm:$0xff] }
 0x217   : > { %v16456_v51 = vpop.f32.mrf.mxu0  ;;  %v2993_v2 = vadd.f32 %v16389_v16, %v2719_v6  ;;  %v2991_v52 = vadd.f32 %v16395_v54, %v2717_v22  ;;  %v600_v55 = vand.u32 15, %v16530_v3  ;;  %v19971_v3 = vld [vmem:[#allocation40_spill] sm:$0xff] }
 0x218   : > { %19924 = vst [vmem:[#allocation84_spill] sm:$0xff] %v16456_v51  ;;  %v1347_v51 = vadd.f32 %v16113_v37, %v16111_v17  ;;  %v492_v17 = vadd.s32 8, %v16452_v20  ;;  %v1637_v37 = vadd.f32 %v16204_v45, %v1331_v32  ;;  %v2716_v45 = vadd.f32 %v16383_v33, %v2442_v49  ;;  %v16562_v27 = vpop.f32.mrf.mxu1 }
 0x219   : > { %v16467_v50 = vpop.f32.mrf.mxu0  ;;  %v16520_v33 = vadd.f32 %v19926_v46, %v1645_v38  ;;  %v19927_v32 = vmov 0  ;;  %v2173_v42 = vadd.f32 %v19930_v1, %v1899_v7  ;;  %v2720_v7 = vadd.f32 %v16397_v8, %v2446_v14 }
 0x21a   : > { %v1641_v47 = vadd.f32 %v16217_v28, %v1347_v51  ;;  %v16500_v28 = vadd.s32 40, %v16452_v20  ;;  %v530_v61 = vand.u32 15, %v492_v17  ;;  %v16512_v11 = vadd.f32 %v16208_v13, %v1637_v37 }
 0x21b   : > { %v16482_v24 = vpop.f32.mrf.mxu0  ;;  %v19928_v32 = vsel %vm16525_vm2, 4294967295, %v19927_v32  ;;  %v572_v13 = vand.u32 15, %v498_v62  ;;  %v2990_v43 = vadd.f32 %v16385_v29, %v2716_v45  ;;  %v16546_v17 = vadd.s32 72, %v16452_v20 }
 0x21c   : > { %v16515_v51 = vadd.f32 %v19925_v0, %v1641_v47  ;;  %19929 = vst [vmem:[#allocation18_spill] sm:$0xff] %v19928_v32  ;;  %v558_v4 = vand.u32 15, %v16500_v28  ;;  %vm16541_vm3 = vcmp.lt.s32.totalorder %v530_v61, 14  ;;  %v2722_v29 = vadd.f32 %v16393_v31, %v2448_v34  ;;  %v19935_v47 = vld [vmem:[#allocation22_spill] sm:$0xff]  ;;  %v19936_v28 = vld [vmem:[#allocation24_spill] sm:$0xff] }
 0x21d   : > { %v16490_v57 = vpop.f32.mrf.mxu0  ;;  %v19932_v9 = vsel %vm16541_vm3, 4294967295, %v19931_v9  ;;  %v2449_v49 = vadd.f32 %v19935_v47, %v19934_v53  ;;  %v16559_v62 = vadd.s32 104, %v16452_v20  ;;  %v2447_v40 = vadd.f32 %v19936_v28, %v2173_v42  ;;  %v19942_v42 = vld [vmem:[#allocation66_spill] sm:$0xff]  ;;  %v19946_v47 = vld [vmem:[#allocation69_spill] sm:$0xff]  ;;  %v20015_v32 = vld [vmem:[#allocation56_spill] sm:$0xff] }
 0x21e   : > { %19933 = vst [vmem:[#allocation19_spill] sm:$0xff] %v19932_v9  ;;  %v586_v54 = vand.u32 15, %v16546_v17  ;;  %v2996_v6 = vadd.f32 %v16401_v21, %v2722_v29  ;;  %vm16577_vm4 = vcmp.lt.s32.totalorder %v572_v13, 14  ;;  %v19939_v1 = vmov 0  ;;  %v19945_v13 = vld [vmem:[#allocation29_spill] sm:$0xff] }
 0x21f   : > { %v16509_v23 = vpop.f32.mrf.mxu0  ;;  %v2723_v61 = vadd.f32 %v16399_v60, %v2449_v49  ;;  %v2721_v60 = vadd.f32 %v16403_v41, %v2447_v40  ;;  %v19940_v1 = vsel %vm16577_vm4, 4294967295, %v19939_v1  ;;  %v614_v21 = vand.u32 15, %v16559_v62  ;;  %v16754_v62 = vld [vmem:[#allocation5 + $0xd8] sm:$0xff]  }
 0x220   : > { %19941 = vst [vmem:[#allocation23_spill] sm:$0xff] %v19940_v1  ;;  %vm16593_vm5 = vcmp.lt.s32.totalorder %v558_v4, 14  ;;  %vm16630_vm6 = vcmp.lt.s32.totalorder %v600_v55, 14  ;;  %v19972_v55 = vld [vmem:[#allocation41_spill] sm:$0xff]  ;;  %vm16654_vm7 = vcmp.lt.s32.totalorder %v586_v54, 14 }
 0x221   : > { %v13737_v30 = vpop.f32.mrf.mxu0  ;;  %v2997_v49 = vadd.f32 %v19946_v47, %v2723_v61  ;;  %v19953_v61 = vld [vmem:[#allocation67_spill] sm:$0xff]  ;;  %vm16741_vm9 = vcmp.lt.s32.totalorder %v614_v21, 14 }
 0x222   : > { %v3266_v44 = vadd.f32 %v13737_v30, %v2992_v12  ;;  %v628_v12 = vand.u32 15, %v16549_v35  ;;  %v19937_v30 = vld [vmem:[#allocation26_spill] sm:$0xff]  ;;  %v19990_v35 = vld [vmem:[#allocation48_spill] sm:$0xff] }
 0x223   : > { %v3153_v48 = vpop.f32.mrf.mxu0  ;;  %v2452_v34 = vadd.f32 %v19937_v30, %v16283_v39  ;;  %v16756_v21 = vld [vmem:[#allocation5 + $0xe8] sm:$0xff]  }
 0x224   : > { %v3301_v37 = vadd.f32 %v16523_v19, %v3266_v44  ;;  %v3264_v18 = vadd.f32 %v3153_v48, %v2990_v43  ;;  %v19938_v43 = vld [vmem:[#allocation27_spill] sm:$0xff]  ;;  %v2994_v48 = vadd.f32 %v19942_v42, %v2720_v7  ;;  %v19948_v7 = vmov 0 }
 0x225   : > { %v13738_v38 = vpop.f32.mrf.mxu0  ;;  %v2450_v44 = vadd.f32 %v19938_v43, %v16289_v26  ;;  %v19943_v26 = vld [vmem:[#allocation30_spill] sm:$0xff]  ;;  %v19949_v7 = vsel %vm16593_vm5, 4294967295, %v19948_v7  ;;  %vm16713_vm8 = vcmp.lt.s32.totalorder %v628_v12, 14  ;;  %v19991_v12 = vld [vmem:[#allocation49_spill] sm:$0xff] }
 0x226   : > { %v3329_v16 = vmax.f32 %v3301_v37, 0.0  ;;  %v3299_v31 = vadd.f32 %v16523_v19, %v3264_v18  ;;  %v3267_v45 = vadd.f32 %v13738_v38, %v2993_v2  ;;  %v16583_v2 = vpop.f32.mrf.mxu1  ;;  %v2177_v41 = vadd.f32 %v19943_v26, %v16503_v36  ;;  %v19944_v18 = vld [vmem:[#allocation28_spill] sm:$0xff]  ;;  %19950 = vst [vmem:[#allocation21_spill] sm:$0xff] %v19949_v7  ;;  %v19951_v36 = vld [vmem:[#allocation38_spill] sm:$0xff] }
 0x227   : > { %v3156_v0 = vpop.f32.mrf.mxu0  ;;  %v2453_v53 = vadd.f32 %v19945_v13, %v19944_v18  ;;  %v19959_v18 = vld [vmem:[#allocation68_spill] sm:$0xff] }
 0x228   : > { %3418 = vst.msk [vmem:[#allocation3 + $0x21] sm:$0xff] %vm386_vm0, %v3329_v16  ;;  %v3327_v8 = vmax.f32 %v3299_v31, 0.0  ;;  %v3302_v46 = vadd.f32 %v16523_v19, %v3267_v45  ;;  %v3265_v22 = vadd.f32 %v3156_v0, %v2991_v52  ;;  %v19947_v52 = vld [vmem:[#allocation65_spill] sm:$0xff]  ;;  %v2181_v0 = vadd.f32 %v19951_v36, %v16506_v15  ;;  %v16608_v30 = vpop.f32.mrf.mxu1  ;;  %v19954_v15 = vld [vmem:[#allocation31_spill] sm:$0xff] }
 0x229   : > { %v13741_v14 = vpop.f32.mrf.mxu0  ;;  %v2726_v38 = vadd.f32 %v19947_v52, %v2452_v34  ;;  %v2727_v13 = vadd.f32 %v19959_v18, %v2453_v53  ;;  %v19960_v52 = vld [vmem:[#allocation75_spill] sm:$0xff] }
 0x22a   : > { %3416 = vst.msk [vmem:[#allocation3 + $0x11] sm:$0xff] %vm386_vm0, %v3327_v8  ;;  %v3330_v29 = vmax.f32 %v3302_v46, 0.0  ;;  %v3300_v39 = vadd.f32 %v16523_v19, %v3265_v22  ;;  %v3270_v37 = vadd.f32 %v13741_v14, %v2996_v6  ;;  %v19952_v6 = vld [vmem:[#allocation72_spill] sm:$0xff]  ;;  %v2724_v46 = vadd.f32 %v19953_v61, %v2450_v44  ;;  %v19963_v36 = vld [vmem:[#allocation39_spill] sm:$0xff]  ;;  %v19964_v61 = vld [vmem:[#allocation70_spill] sm:$0xff] }
 0x22b   : > { %v3169_v16 = vpop.f32.mrf.mxu0  ;;  %v2995_v8 = vadd.f32 %v19952_v6, %v2721_v60  ;;  %v16606_v22 = vadd.s32 152, %v16452_v20  ;;  %v19955_v60 = vld [vmem:[#allocation32_spill] sm:$0xff]  ;;  %v2455_v6 = vadd.f32 %v19963_v36, %v2181_v0 }
 0x22c   : > { %v3391_v31 = vsel %vm16525_vm2, %v3330_v29, 0.0  ;;  %v3328_v45 = vmax.f32 %v3300_v39, 0.0  ;;  %v3305_v28 = vadd.f32 %v16523_v19, %v3270_v37  ;;  %v3268_v40 = vadd.f32 %v3169_v16, %v2994_v48  ;;  %v19956_v29 = vld [vmem:[#allocation33_spill] sm:$0xff]  ;;  %v19957_v39 = vld [vmem:[#allocation34_spill] sm:$0xff]  ;;  %v19958_v37 = vld [vmem:[#allocation35_spill] sm:$0xff] }
 0x22d   : > { %3419 = vst.msk [vmem:[#allocation3 + $0x29] sm:$0xff] %vm386_vm0, %v3391_v31  ;;  %v13742_v4 = vpop.f32.mrf.mxu0  ;;  %v2451_v48 = vadd.f32 %v19954_v15, %v2177_v41  ;;  %v2456_v44 = vadd.f32 %v19956_v29, %v19955_v60  ;;  %v2454_v26 = vadd.f32 %v19958_v37, %v19957_v39  ;;  %v3000_v16 = vadd.f32 %v19960_v52, %v2726_v38  ;;  %v19961_v41 = vld [vmem:[#allocation36_spill] sm:$0xff]  ;;  %v19965_v15 = vld [vmem:[#allocation71_spill] sm:$0xff]  ;;  %v19973_v39 = vld [vmem:[#allocation42_spill] sm:$0xff] }
 0x22e   : > { %v3389_v34 = vsel %vm16541_vm3, %v3328_v45, 0.0  ;;  %v3333_v43 = vmax.f32 %v3305_v28, 0.0  ;;  %v3303_v14 = vadd.f32 %v16523_v19, %v3268_v40  ;;  %v3271_v42 = vadd.f32 %v13742_v4, %v2997_v49  ;;  %v19962_v28 = vld [vmem:[#allocation37_spill] sm:$0xff]  ;;  %v19974_v37 = vld [vmem:[#allocation43_spill] sm:$0xff] }
 0x22f   : > { %3417 = vst.msk [vmem:[#allocation3 + $0x19] sm:$0xff] %vm386_vm0, %v3389_v34  ;;  %v3172_v47 = vpop.f32.mrf.mxu0  ;;  %v2457_v40 = vadd.f32 %v19962_v28, %v19961_v41  ;;  %v2725_v4 = vadd.f32 %v19964_v61, %v2451_v48  ;;  %v2730_v53 = vadd.f32 %v19965_v15, %v2456_v44  ;;  %v19966_v38 = vmov 0  ;;  %v19976_v52 = vld [vmem:[#allocation81_spill] sm:$0xff]  ;;  %v19980_v15 = vld [vmem:[#allocation44_spill] sm:$0xff] }
 0x230   : > { %3422 = vst.msk [vmem:[#allocation3 + $0x41] sm:$0xff] %vm386_vm0, %v3333_v43  ;;  %v3331_v31 = vmax.f32 %v3303_v14, 0.0  ;;  %v3306_v49 = vadd.f32 %v16523_v19, %v3271_v42  ;;  %v3269_v45 = vadd.f32 %v3172_v47, %v2995_v8  ;;  %v19967_v38 = vsel %vm16630_vm6, 4294967295, %v19966_v38  ;;  %v19969_v43 = vld [vmem:[#allocation78_spill] sm:$0xff]  ;;  %v16637_v14 = vpop.f32.mrf.mxu1 }
 0x231   : > { %v13745_v60 = vpop.f32.mrf.mxu0  ;;  %19968 = vst [vmem:[#allocation22_spill] sm:$0xff] %v19967_v38  ;;  %v16634_v34 = vld [vmem:[#allocation3 + $0xa] sm:$0xff]  ;;  %v2998_v8 = vadd.f32 %v19969_v43, %v2724_v46  ;;  %v19970_v29 = vmov 0.0   ;;  %v2460_v44 = vadd.f32 %v19972_v55, %v19971_v3  ;;  %v16647_v18 = vadd.f32 %v19974_v37, %v19973_v39  ;;  %v19975_v46 = vld [vmem:[#allocation46_spill] sm:$0xff] }
 0x232   : > { %3420 = vst.msk [vmem:[#allocation3 + $0x31] sm:$0xff] %vm386_vm0, %v3331_v31  ;;  %v3334_v0 = vmax.f32 %v3306_v49, 0.0  ;;  %v3304_v42 = vadd.f32 %v16523_v19, %v3269_v45  ;;  %v3274_v48 = vadd.f32 %v13745_v60, %v3000_v16  ;;  %8482 = vst.msk [vmem:[#allocation3 + $0x8] sm:$0xff] %vm386_vm0, %v19970_v29  ;;  %v2185_v47 = vadd.f32 %v19975_v46, %v16512_v11  ;;  %v3493_v61 = vld [vmem:[#allocation3 + $0x11] sm:$0xff] }
 0x233   : > { %v3001_v41 = vadd.f32 %v19976_v52, %v2727_v13  ;;  %v3185_v31 = vpop.f32.mrf.mxu0  ;;  %v19977_v16 = vmov 0  ;;  %v19981_v60 = vld [vmem:[#allocation45_spill] sm:$0xff]  ;;  %v2999_v13 = vadd.f32 %v16443_v59, %v2725_v4  ;;  %v3004_v54 = vadd.f32 %v16454_v63, %v2730_v53  ;;  %v19983_v63 = vld [vmem:[#allocation74_spill] sm:$0xff] }
 0x234   : > { %v19978_v16 = vsel %vm16654_vm7, 4294967295, %v19977_v16  ;;  %v3395_v49 = vsel %vm16577_vm4, %v3334_v0, 0.0  ;;  %v3332_v45 = vmax.f32 %v3304_v42, 0.0  ;;  %v3309_v28 = vadd.f32 %v16523_v19, %v3274_v48  ;;  %v19982_v43 = vld [vmem:[#allocation73_spill] sm:$0xff]  ;;  %v3495_v0 = vld [vmem:[#allocation3 + $0x21] sm:$0xff]  ;;  %v16669_v48 = vpop.f32.mrf.mxu1 }
 0x235   : > { %19979 = vst [vmem:[#allocation24_spill] sm:$0xff] %v19978_v16  ;;  %v3272_v36 = vadd.f32 %v3185_v31, %v2998_v8  ;;  %v16663_v11 = vadd.f32 %v19981_v60, %v19980_v15  ;;  %v2728_v17 = vadd.f32 %v19982_v43, %v2454_v26  ;;  %3423 = vst.msk [vmem:[#allocation3 + $0x49] sm:$0xff] %vm386_vm0, %v3395_v49  ;;  %v13746_v3 = vpop.f32.mrf.mxu0  ;;  %v3446_v55 = vld [vmem:[#allocation3 + $0x10] sm:$0xff]  ;;  %v3449_v39 = vld [vmem:[#allocation3 + $0x28] sm:$0xff] }
 0x236   : > { %v3496_v42 = vld [vmem:[#allocation3 + $0x29] sm:$0xff]  ;;  %v3393_v8 = vsel %vm16593_vm5, %v3332_v45, 0.0  ;;  %v3337_v37 = vmax.f32 %v3309_v28, 0.0  ;;  %v3275_v59 = vadd.f32 %v13746_v3, %v3001_v41  ;;  %v3494_v4 = vld [vmem:[#allocation3 + $0x19] sm:$0xff]  ;;  %v2731_v53 = vadd.f32 %v19983_v63, %v2457_v40 }
 0x237   : > { %v3307_v46 = vadd.f32 %v16523_v19, %v3272_v36  ;;  %v3447_v26 = vld [vmem:[#allocation3 + $0x18] sm:$0xff]  ;;  %v3448_v52 = vld [vmem:[#allocation3 + $0x20] sm:$0xff]  ;;  %3421 = vst.msk [vmem:[#allocation3 + $0x39] sm:$0xff] %vm386_vm0, %v3393_v8  ;;  %v3188_v31 = vpop.f32.mrf.mxu0  ;;  %v16676_v49 = vpack.c.bf16 %v3494_v4, %v3493_v61  ;;  %v16690_v3 = vpack.c.bf16 %v3496_v42, %v3495_v0  ;;  %v16692_v61 = vld [vmem:[#allocation5 + $0xb0] sm:$0xff]  }
 0x238   : > { %v16678_v15 = vpack.c.bf16 %v3447_v26, %v3446_v55  ;;  %v16680_v60 = vpack.c.bf16 %v3449_v39, %v3448_v52  ;;  %v16682_v43 = vld [vmem:[#allocation3 + $0x12] sm:$0xff]  ;;  %v16684_v45 = vld [vmem:[#allocation3 + $0x1a] sm:$0xff]  ;;  %v16686_v28 = vld [vmem:[#allocation3 + $0x22] sm:$0xff]  ;;  %3426 = vst.msk [vmem:[#allocation3 + $0x61] sm:$0xff] %vm386_vm0, %v3337_v37  ;;  %v3310_v40 = vadd.f32 %v16523_v19, %v3275_v59  ;;  %v3273_v36 = vadd.f32 %v3188_v31, %v2999_v13 }
 0x239   : > { %v3335_v41 = vmax.f32 %v3307_v46, 0.0  ;;  %v16694_v55 = vld [vmem:[#allocation5 + $0xc0] sm:$0xff]   ;;  %8483 = vst.msk [vmem:[#allocation3 + $0x10] sm:$0xff] %vm386_vm0, %v19970_v29  ;;  %8484 = vst.msk [vmem:[#allocation3 + $0x18] sm:$0xff] %vm386_vm0, %v19970_v29  ;;  %v19985_v37 = vld [vmem:[#allocation76_spill] sm:$0xff]  ;;  %v13749_v46 = vpop.f32.mrf.mxu0  ;;  %13768 = vmatmul.mubr.msk.bf16.vlgmr.msra.gmra.mxu1 %vm386_vm0, %v16676_v49  ;;  %v19987_v59 = vmov 0 }
 0x23a   : > { %8485 = vst.msk [vmem:[#allocation3 + $0x20] sm:$0xff] %vm386_vm0, %v19970_v29  ;;  %v19984_v39 = vld [vmem:[#allocation47_spill] sm:$0xff]  ;;  %v2729_v13 = vadd.f32 %v19985_v37, %v2455_v6  ;;  %v19986_v0 = vld [vmem:[#allocation77_spill] sm:$0xff]  ;;  %13800 = vmatmul.mubr.msk.bf16.vlgmr.msra.gmra.mxu0 %vm386_vm0, %v16678_v15  ;;  %v19988_v59 = vsel %vm16713_vm8, 4294967295, %v19987_v59  ;;  %v3002_v6 = vadd.f32 %v16477_v10, %v2728_v17  ;;  %v3338_v26 = vmax.f32 %v3310_v40, 0.0  ;;  %13771 = vmatprep.mubr.msk.bf16.mxu1 %vm386_vm0, %v16690_v3  ;;  %v19992_v17 = vld [vmem:[#allocation54_spill] sm:$0xff] }
 0x23b   : > { %v16703_v8 = vadd.f32 %v19984_v39, %v2185_v47  ;;  %v2734_v42 = vadd.f32 %v19986_v0, %v2460_v44  ;;  %19989 = vst [vmem:[#allocation26_spill] sm:$0xff] %v19988_v59  ;;  %v16718_v4 = vld [vmem:[#allocation3 + $0x2a] sm:$0xff]  ;;  %v16721_v44 = vpop.f32.mrf.mxu1  ;;  %3424 = vst.msk [vmem:[#allocation3 + $0x51] sm:$0xff] %vm386_vm0, %v3335_v41  ;;  %v3308_v52 = vadd.f32 %v16523_v19, %v3273_v36  ;;  %13803 = vmatprep.mubr.msk.bf16.mxu0 %vm386_vm0, %v16680_v60  ;;  %v19994_v36 = vmov 0  ;;  %v19997_v37 = vld [vmem:[#allocation64_spill] sm:$0xff] }
 0x23c   : > { %v3278_v63 = vadd.f32 %v13749_v46, %v3004_v54  ;;  %8486 = vst.msk [vmem:[#allocation3 + $0x28] sm:$0xff] %vm386_vm0, %v19970_v29  ;;  %v2464_v10 = vadd.f32 %v19991_v12, %v19990_v35  ;;  %v16735_v31 = vadd.f32 %v19992_v17, %v16515_v51  ;;  %v3005_v41 = vadd.f32 %v16497_v25, %v2731_v53  ;;  %v19993_v40 = vld [vmem:[#allocation25_spill] sm:$0xff]  ;;  %v3201_v54 = vpop.f32.mrf.mxu0  ;;  %v19998_v12 = vld [vmem:[#allocation79_spill] sm:$0xff] }
 0x23d   : > { %13828 = vmatpush3.bf16.msra.mxu1 %v19993_v40  ;;  %v19995_v36 = vsel %vm16741_vm9, 4294967295, %v19994_v36  ;;  %v16746_v39 = vadd.s32 136, %v16452_v20  ;;  %13860 = vmatpush3.bf16.msra.mxu0 %v19997_v37  ;;  %v3399_v51 = vsel %vm16630_vm6, %v3338_v26, 0.0  ;;  %v3336_v0 = vmax.f32 %v3308_v52, 0.0  ;;  %v3497_v46 = vld [vmem:[#allocation3 + $0x31] sm:$0xff]  ;;  %v19999_v52 = vld [vmem:[#allocation80_spill] sm:$0xff]  ;;  %v16765_v38 = vpop.f32.mrf.mxu1 }
 0x23e   : > { %19996 = vst [vmem:[#allocation27_spill] sm:$0xff] %v19995_v36  ;;  %v3313_v25 = vadd.f32 %v16523_v19, %v3278_v63  ;;  %v3276_v53 = vadd.f32 %v3201_v54, %v3002_v6  ;;  %13829 = vmatprep.subr.bf16.mxu1 %v16692_v61  ;;  %13861 = vmatprep.subr.bf16.mxu0 %v16694_v55  ;;  %3427 = vst.msk [vmem:[#allocation3 + $0x69] sm:$0xff] %vm386_vm0, %v3399_v51  ;;  %v13750_v6 = vpop.f32.mrf.mxu0  ;;  %v3450_v40 = vld [vmem:[#allocation3 + $0x30] sm:$0xff]  ;;  %v3499_v54 = vld [vmem:[#allocation3 + $0x41] sm:$0xff] }
 0x23f   : > { %v3003_v35 = vadd.f32 %v16535_v58, %v2729_v13  ;;  %v2732_v17 = vadd.f32 %v19998_v12, %v16647_v18  ;;  %v3008_v26 = vadd.f32 %v16562_v27, %v2734_v42  ;;  %v2735_v63 = vadd.f32 %v19999_v52, %v16663_v11  ;;  %v3500_v37 = vld [vmem:[#allocation3 + $0x49] sm:$0xff]  ;;  %v3498_v27 = vld [vmem:[#allocation3 + $0x39] sm:$0xff]  ;;  %v3503_v59 = vld [vmem:[#allocation3 + $0x61] sm:$0xff] }
 0x240   : > { %v3453_v47 = vld [vmem:[#allocation3 + $0x48] sm:$0xff]  ;;  %v3397_v58 = vsel %vm16654_vm7, %v3336_v0, 0.0  ;;  %v3341_v13 = vmax.f32 %v3313_v25, 0.0  ;;  %v3311_v18 = vadd.f32 %v16523_v19, %v3276_v53  ;;  %v3279_v12 = vadd.f32 %v13750_v6, %v3005_v41  ;;  %v3451_v42 = vld [vmem:[#allocation3 + $0x38] sm:$0xff]  ;;  %v3452_v7 = vld [vmem:[#allocation3 + $0x40] sm:$0xff]  ;;  %v3204_v11 = vpop.f32.mrf.mxu0 }
 0x241   : > { %3425 = vst.msk [vmem:[#allocation3 + $0x59] sm:$0xff] %vm386_vm0, %v3397_v58  ;;  %v16771_v51 = vpack.c.bf16 %v3498_v27, %v3497_v46  ;;  %v16773_v52 = vpack.c.bf16 %v3451_v42, %v3450_v40  ;;  %v16775_v1 = vpack.c.bf16 %v3453_v47, %v3452_v7  ;;  %v642_v9 = vand.u32 15, %v16746_v39  ;;  %13830 = vmatpush3.bf16.msra.mxu1 %v16692_v61  ;;  %v16780_v0 = vld [vmem:[#allocation3 + $0x32] sm:$0xff]  ;;  %v16782_v41 = vld [vmem:[#allocation3 + $0x3a] sm:$0xff]  ;;  %v16784_v25 = vld [vmem:[#allocation3 + $0x42] sm:$0xff] }
 0x242   : > { %13862 = vmatpush3.bf16.msra.mxu0 %v16694_v55  ;;  %3430 = vst.msk [vmem:[#allocation3 + $0x81] sm:$0xff] %vm386_vm0, %v3341_v13  ;;  %v3339_v53 = vmax.f32 %v3311_v18, 0.0  ;;  %v3314_v46 = vadd.f32 %v16523_v19, %v3279_v12  ;;  %v3277_v6 = vadd.f32 %v3204_v11, %v3003_v35  ;;  %v16788_v7 = vpack.c.bf16 %v3500_v37, %v3499_v54  ;;  %v20001_v61 = vld [vmem:[#allocation82_spill] sm:$0xff]  ;;  %v20002_v47 = vld [vmem:[#allocation83_spill] sm:$0xff]  ;;  %v13753_v35 = vpop.f32.mrf.mxu0  ;;  %v16820_v13 = vpop.f32.mrf.mxu1  ;;  %v20010_v11 = vld [vmem:[#allocation53_spill] sm:$0xff] }
 0x243   : > { %13891 = vmatprep.subr.bf16.mxu1 %v16754_v62  ;;  %13923 = vmatprep.subr.bf16.mxu0 %v16756_v21  ;;  %8488 = vst.msk [vmem:[#allocation3 + $0x38] sm:$0xff] %vm386_vm0, %v19970_v29  ;;  %8487 = vst.msk [vmem:[#allocation3 + $0x30] sm:$0xff] %vm386_vm0, %v19970_v29  ;;  %v2733_v55 = vadd.f32 %v20001_v61, %v16703_v8  ;;  %v2738_v39 = vadd.f32 %v20002_v47, %v2464_v10  ;;  %v20003_v40 = vand.u32 15, %v16606_v22  ;;  %v20004_v54 = vmov 0  ;;  %v16817_v10 = vld [vmem:[#allocation3 + $0x4a] sm:$0xff]  ;;  %v20007_v27 = vld [vmem:[#allocation50_spill] sm:$0xff] }
 0x244   : > { %20000 = vst [vmem:[#allocation66_spill] sm:$0xff] %v16788_v7  ;;  %8489 = vst.msk [vmem:[#allocation3 + $0x40] sm:$0xff] %vm386_vm0, %v19970_v29  ;;  %13772 = vmatmul.mubr.msk.bf16.gmra.mxu1 %vm386_vm0, %v16771_v51  ;;  %13804 = vmatmul.mubr.msk.bf16.gmra.mxu0 %vm386_vm0, %v16773_v52  ;;  %v16812_v37 = vadd.s32 184, %v16452_v20  ;;  %v16815_v8 = vadd.s32 168, %v16452_v20  ;;  %v3006_v58 = vadd.f32 %v16583_v2, %v2732_v17  ;;  %v3342_v18 = vmax.f32 %v3314_v46, 0.0  ;;  %v20008_v42 = vld [vmem:[#allocation51_spill] sm:$0xff] }
 0x245   : > { %vm16807_vm10 = vcmp.lt.s32.totalorder %v20003_v40, 14  ;;  %3428 = vst.msk [vmem:[#allocation3 + $0x71] sm:$0xff] %vm386_vm0, %v3339_v53  ;;  %v3312_v22 = vadd.f32 %v16523_v19, %v3277_v6  ;;  %v3282_v12 = vadd.f32 %v13753_v35, %v3008_v26  ;;  %13775 = vmatprep.mubr.msk.bf16.mxu1 %vm386_vm0, %v16788_v7  ;;  %13807 = vmatprep.mubr.msk.bf16.mxu0 %vm386_vm0, %v16775_v1  ;;  %8490 = vst.msk [vmem:[#allocation3 + $0x48] sm:$0xff] %vm386_vm0, %v19970_v29  ;;  %v20009_v17 = vld [vmem:[#allocation52_spill] sm:$0xff]  ;;  %v20011_v53 = vld [vmem:[#allocation55_spill] sm:$0xff]  ;;  %v3217_v6 = vpop.f32.mrf.mxu0  ;;  %v20012_v47 = vmov 0  ;;  %v13729_v7 = vpop.f32.mrf.mxu1 }
 0x246   : > { %v20005_v54 = vsel %vm16807_vm10, 4294967295, %v20004_v54  ;;  %v2462_v2 = vadd.f32 %v20008_v42, %v20007_v27  ;;  %v2465_v61 = vadd.f32 %v20010_v11, %v20009_v17  ;;  %v2463_v46 = vadd.f32 %v20011_v53, %v16735_v31  ;;  %v3501_v42 = vld [vmem:[#allocation3 + $0x51] sm:$0xff] }
 0x247   : > { %20006 = vst [vmem:[#allocation30_spill] sm:$0xff] %v20005_v54  ;;  %v3009_v26 = vadd.f32 %v16608_v30, %v2735_v63  ;;  %vm16837_vm11 = vcmp.lt.s32.totalorder %v642_v9, 14  ;;  %v3403_v35 = vsel %vm16713_vm8, %v3342_v18, 0.0  ;;  %v3340_v40 = vmax.f32 %v3312_v22, 0.0  ;;  %v20016_v17 = vld [vmem:[#allocation57_spill] sm:$0xff]  ;;  %v13754_v63 = vpop.f32.mrf.mxu0 }
 0x248   : > { %v20013_v47 = vsel %vm16837_vm11, 4294967295, %v20012_v47  ;;  %v3317_v16 = vadd.f32 %v16523_v19, %v3282_v12  ;;  %v3280_v27 = vadd.f32 %v3217_v6, %v3006_v58  ;;  %v2468_v11 = vadd.f32 %v20016_v17, %v20015_v32  ;;  %3431 = vst.msk [vmem:[#allocation3 + $0x89] sm:$0xff] %vm386_vm0, %v3403_v35  ;;  %v3454_v53 = vld [vmem:[#allocation3 + $0x50] sm:$0xff]  ;;  %v3457_v22 = vld [vmem:[#allocation3 + $0x68] sm:$0xff] }
 0x249   : > { %20014 = vst [vmem:[#allocation28_spill] sm:$0xff] %v20013_v47  ;;  %v3007_v31 = vadd.f32 %v16637_v14, %v2733_v55  ;;  %v2736_v30 = vadd.f32 %v16447_v56, %v2462_v2  ;;  %v3012_v9 = vadd.f32 %v16669_v48, %v2738_v39  ;;  %v3504_v18 = vld [vmem:[#allocation3 + $0x69] sm:$0xff]  ;;  %v3401_v58 = vsel %vm16741_vm9, %v3340_v40, 0.0  ;;  %v3502_v14 = vld [vmem:[#allocation3 + $0x59] sm:$0xff]  ;;  %v3220_v39 = vpop.f32.mrf.mxu0 }
 0x24a   : > { %v3345_v12 = vmax.f32 %v3317_v16, 0.0  ;;  %v3315_v32 = vadd.f32 %v16523_v19, %v3280_v27  ;;  %v3283_v6 = vadd.f32 %v13754_v63, %v3009_v26  ;;  %v3455_v55 = vld [vmem:[#allocation3 + $0x58] sm:$0xff]  ;;  %v3456_v56 = vld [vmem:[#allocation3 + $0x60] sm:$0xff]  ;;  %v2739_v48 = vadd.f32 %v16450_v5, %v2465_v61  ;;  %3429 = vst.msk [vmem:[#allocation3 + $0x79] sm:$0xff] %vm386_vm0, %v3401_v58 }
 0x24b   : > { %v16855_v2 = vpack.c.bf16 %v3502_v14, %v3501_v42  ;;  %v16857_v35 = vpack.c.bf16 %v3455_v55, %v3454_v53  ;;  %v16859_v17 = vpack.c.bf16 %v3457_v22, %v3456_v56  ;;  %v16861_v36 = vld [vmem:[#allocation3 + $0x52] sm:$0xff]  ;;  %v16863_v16 = vld [vmem:[#allocation3 + $0x5a] sm:$0xff]  ;;  %v16865_v40 = vld [vmem:[#allocation3 + $0x62] sm:$0xff]  ;;  %v3281_v61 = vadd.f32 %v3220_v39, %v3007_v31 }
 0x24c   : > { %3434 = vst.msk [vmem:[#allocation3 + $0xa1] sm:$0xff] %vm386_vm0, %v3345_v12  ;;  %v3343_v26 = vmax.f32 %v3315_v32, 0.0  ;;  %v3318_v5 = vadd.f32 %v16523_v19, %v3283_v6  ;;  %v16869_v27 = vpack.c.bf16 %v3504_v18, %v3503_v59  ;;  %8491 = vst.msk [vmem:[#allocation3 + $0x50] sm:$0xff] %vm386_vm0, %v19970_v29  ;;  %v20017_v42 = vld [vmem:[#allocation62_spill] sm:$0xff]  ;;  %v20018_v53 = vld [vmem:[#allocation84_spill] sm:$0xff]  ;;  %v2742_v58 = vadd.f32 %v16467_v50, %v2468_v11  ;;  %v13757_v12 = vpop.f32.mrf.mxu0  ;;  %v2975_v32 = vpop.f32.mrf.mxu1 }
 0x24d   : > { %8492 = vst.msk [vmem:[#allocation3 + $0x58] sm:$0xff] %vm386_vm0, %v19970_v29  ;;  %8493 = vst.msk [vmem:[#allocation3 + $0x60] sm:$0xff] %vm386_vm0, %v19970_v29  ;;  %v2193_v63 = vadd.f32 %v20017_v42, %v16520_v33  ;;  %v2737_v22 = vadd.f32 %v20018_v53, %v2463_v46  ;;  %13776 = vmatmul.mubr.msk.bf16.gmra.mxu1 %vm386_vm0, %v16855_v2  ;;  %13808 = vmatmul.mubr.msk.bf16.gmra.mxu0 %vm386_vm0, %v16857_v35  ;;  %v684_v59 = vand.u32 15, %v16812_v37  ;;  %v16886_v31 = vld [vmem:[#allocation3 + $0x6a] sm:$0xff]  ;;  %v20019_v37 = vld [vmem:[#allocation58_spill] sm:$0xff] }
 0x24e   : > { %v3010_v18 = vadd.f32 %v16721_v44, %v2736_v30  ;;  %3432 = vst.msk [vmem:[#allocation3 + $0x91] sm:$0xff] %vm386_vm0, %v3343_v26  ;;  %v3346_v33 = vmax.f32 %v3318_v5, 0.0  ;;  %v3316_v46 = vadd.f32 %v16523_v19, %v3281_v61  ;;  %v3286_v50 = vadd.f32 %v13757_v12, %v3012_v9  ;;  %13779 = vmatprep.mubr.msk.bf16.mxu1 %vm386_vm0, %v16869_v27  ;;  %v20020_v11 = vld [vmem:[#allocation59_spill] sm:$0xff]  ;;  %v20021_v44 = vld [vmem:[#allocation60_spill] sm:$0xff]  ;;  %v20022_v30 = vld [vmem:[#allocation61_spill] sm:$0xff]  ;;  %v3233_v56 = vpop.f32.mrf.mxu0 }
 0x24f   : > { %13811 = vmatprep.mubr.msk.bf16.mxu0 %vm386_vm0, %v16859_v17  ;;  %8494 = vst.msk [vmem:[#allocation3 + $0x68] sm:$0xff] %vm386_vm0, %v19970_v29  ;;  %v2466_v6 = vadd.f32 %v20020_v11, %v20019_v37  ;;  %v2469_v14 = vadd.f32 %v20022_v30, %v20021_v44  ;;  %v3013_v55 = vadd.f32 %v16765_v38, %v2739_v48  ;;  %v670_v9 = vand.u32 15, %v16815_v8  ;;  %v3505_v42 = vld [vmem:[#allocation3 + $0x71] sm:$0xff]  ;;  %v20023_v53 = vld [vmem:[#allocation63_spill] sm:$0xff]  ;;  %v3508_v30 = vld [vmem:[#allocation3 + $0x89] sm:$0xff] }
 0x250   : > { %v3407_v39 = vsel %vm16807_vm10, %v3346_v33, 0.0  ;;  %v3344_v26 = vmax.f32 %v3316_v46, 0.0  ;;  %v3321_v5 = vadd.f32 %v16523_v19, %v3286_v50  ;;  %v3284_v61 = vadd.f32 %v3233_v56, %v3010_v18  ;;  %v13758_v38 = vpop.f32.mrf.mxu0  ;;  %v3458_v48 = vld [vmem:[#allocation3 + $0x70] sm:$0xff]  ;;  %v3507_v8 = vld [vmem:[#allocation3 + $0x81] sm:$0xff]  ;;  %v13730_v33 = vpop.f32.mrf.mxu1 }
 0x251   : > { %v2467_v12 = vadd.f32 %v20023_v53, %v2193_v63  ;;  %v3011_v37 = vadd.f32 %v16820_v13, %v2737_v22  ;;  %v2740_v11 = vadd.f32 %v16482_v24, %v2466_v6  ;;  %v3016_v44 = vadd.f32 %v13729_v7, %v2742_v58  ;;  %3435 = vst.msk [vmem:[#allocation3 + $0xa9] sm:$0xff] %vm386_vm0, %v3407_v39  ;;  %v3461_v54 = vld [vmem:[#allocation3 + $0x88] sm:$0xff]  ;;  %v3506_v56 = vld [vmem:[#allocation3 + $0x79] sm:$0xff] }
 0x252   : > { %v3405_v46 = vsel %vm16837_vm11, %v3344_v26, 0.0  ;;  %v3349_v18 = vmax.f32 %v3321_v5, 0.0  ;;  %v3319_v50 = vadd.f32 %v16523_v19, %v3284_v61  ;;  %v3287_v63 = vadd.f32 %v13758_v38, %v3013_v55  ;;  %v3459_v13 = vld [vmem:[#allocation3 + $0x78] sm:$0xff]  ;;  %v3460_v22 = vld [vmem:[#allocation3 + $0x80] sm:$0xff]  ;;  %v3236_v7 = vpop.f32.mrf.mxu0 }
 0x253   : > { %v2743_v24 = vadd.f32 %v16490_v57, %v2469_v14  ;;  %3433 = vst.msk [vmem:[#allocation3 + $0x99] sm:$0xff] %vm386_vm0, %v3405_v46  ;;  %v16915_v58 = vpack.c.bf16 %v3506_v56, %v3505_v42  ;;  %v16917_v6 = vpack.c.bf16 %v3459_v13, %v3458_v48  ;;  %v16919_v39 = vpack.c.bf16 %v3461_v54, %v3460_v22  ;;  %v16921_v53 = vld [vmem:[#allocation3 + $0x72] sm:$0xff]  ;;  %v16923_v26 = vld [vmem:[#allocation3 + $0x7a] sm:$0xff]  ;;  %v16925_v5 = vld [vmem:[#allocation3 + $0x82] sm:$0xff] }
 0x254   : > { %3438 = vst.msk [vmem:[#allocation3 + $0xc1] sm:$0xff] %vm386_vm0, %v3349_v18  ;;  %v3347_v55 = vmax.f32 %v3319_v50, 0.0  ;;  %v3322_v57 = vadd.f32 %v16523_v19, %v3287_v63  ;;  %v3285_v14 = vadd.f32 %v3236_v7, %v3011_v37  ;;  %v16929_v61 = vpack.c.bf16 %v3508_v30, %v3507_v8  ;;  %8495 = vst.msk [vmem:[#allocation3 + $0x70] sm:$0xff] %vm386_vm0, %v19970_v29  ;;  %v13761_v38 = vpop.f32.mrf.mxu0  ;;  %v2978_v30 = vpop.f32.mrf.mxu1 }
 0x255   : > { %8496 = vst.msk [vmem:[#allocation3 + $0x78] sm:$0xff] %vm386_vm0, %v19970_v29  ;;  %8497 = vst.msk [vmem:[#allocation3 + $0x80] sm:$0xff] %vm386_vm0, %v19970_v29  ;;  %v2741_v54 = vadd.f32 %v16509_v23, %v2467_v12  ;;  %vm16938_vm12 = vcmp.lt.s32.totalorder %v684_v59, 14  ;;  %v20024_v42 = vmov 0  ;;  %13780 = vmatmul.mubr.msk.bf16.gmra.mxu1 %vm386_vm0, %v16915_v58  ;;  %13812 = vmatmul.mubr.msk.bf16.gmra.mxu0 %vm386_vm0, %v16917_v6  ;;  %v518_v37 = vadd.s32 216, %v16452_v20  ;;  %v16947_v48 = vld [vmem:[#allocation3 + $0x8a] sm:$0xff] }
 0x256   : > { %v20025_v42 = vsel %vm16938_vm12, 4294967295, %v20024_v42  ;;  %v3014_v8 = vadd.f32 %v2975_v32, %v2740_v11  ;;  %3436 = vst.msk [vmem:[#allocation3 + $0xb1] sm:$0xff] %vm386_vm0, %v3347_v55  ;;  %v3350_v23 = vmax.f32 %v3322_v57, 0.0  ;;  %v3320_v59 = vadd.f32 %v16523_v19, %v3285_v14  ;;  %13783 = vmatprep.mubr.msk.bf16.mxu1 %vm386_vm0, %v16929_v61  ;;  %13815 = vmatprep.mubr.msk.bf16.mxu0 %vm386_vm0, %v16919_v39  ;;  %v3249_v32 = vpop.f32.mrf.mxu0  ;;  %v3509_v13 = vld [vmem:[#allocation3 + $0x91] sm:$0xff] }
 0x257   : > { %20026 = vst [vmem:[#allocation29_spill] sm:$0xff] %v20025_v42  ;;  %v3290_v12 = vadd.f32 %v13761_v38, %v3016_v44  ;;  %8498 = vst.msk [vmem:[#allocation3 + $0x88] sm:$0xff] %vm386_vm0, %v19970_v29  ;;  %v3017_v46 = vadd.f32 %v13730_v33, %v2743_v24  ;;  %vm16957_vm13 = vcmp.lt.s32.totalorder %v670_v9, 14  ;;  %v20027_v18 = vmov 0  ;;  %v3462_v9 = vld [vmem:[#allocation3 + $0x90] sm:$0xff]  ;;  %v3511_v24 = vld [vmem:[#allocation3 + $0xa1] sm:$0xff] }
 0x258   : > { %v20028_v18 = vsel %vm16957_vm13, 4294967295, %v20027_v18  ;;  %v516_v11 = vadd.s32 200, %v16452_v20  ;;  %v3411_v44 = vsel %vm16938_vm12, %v3350_v23, 0.0  ;;  %v3348_v50 = vmax.f32 %v3320_v59, 0.0  ;;  %v13762_v33 = vpop.f32.mrf.mxu0  ;;  %v3512_v55 = vld [vmem:[#allocation3 + $0xa9] sm:$0xff] }
 0x259   : > { %20029 = vst [vmem:[#allocation69_spill] sm:$0xff] %v20028_v18  ;;  %v3325_v63 = vadd.f32 %v16523_v19, %v3290_v12  ;;  %v3288_v56 = vadd.f32 %v3249_v32, %v3014_v8  ;;  %v3015_v22 = vadd.f32 %v2978_v30, %v2741_v54  ;;  %3439 = vst.msk [vmem:[#allocation3 + $0xc9] sm:$0xff] %vm386_vm0, %v3411_v44  ;;  %v712_v7 = vand.u32 15, %v518_v37  ;;  %v3465_v57 = vld [vmem:[#allocation3 + $0xa8] sm:$0xff] }
 0x25a   : > { %v3409_v20 = vsel %vm16957_vm13, %v3348_v50, 0.0  ;;  %v3291_v23 = vadd.f32 %v13762_v33, %v3017_v46  ;;  %v3510_v59 = vld [vmem:[#allocation3 + $0x99] sm:$0xff]  ;;  %v698_v54 = vand.u32 15, %v516_v11  ;;  %v3252_v30 = vpop.f32.mrf.mxu0  ;;  %v16984_v11 = vpack.c.bf16 %v3512_v55, %v3511_v24 }
 0x25b   : > { %v3353_v14 = vmax.f32 %v3325_v63, 0.0  ;;  %v3323_v38 = vadd.f32 %v16523_v19, %v3288_v56  ;;  %v3463_v12 = vld [vmem:[#allocation3 + $0x98] sm:$0xff]  ;;  %v3464_v8 = vld [vmem:[#allocation3 + $0xa0] sm:$0xff]  ;;  %3437 = vst.msk [vmem:[#allocation3 + $0xb9] sm:$0xff] %vm386_vm0, %v3409_v20  ;;  %v16970_v37 = vpack.c.bf16 %v3510_v59, %v3509_v13  ;;  %v3289_v33 = vadd.f32 %v3252_v30, %v3015_v22 }
 0x25c   : > { %v16972_v32 = vpack.c.bf16 %v3463_v12, %v3462_v9  ;;  %v16974_v44 = vpack.c.bf16 %v3465_v57, %v3464_v8  ;;  %v16976_v42 = vld [vmem:[#allocation3 + $0x92] sm:$0xff]  ;;  %v16978_v50 = vld [vmem:[#allocation3 + $0x9a] sm:$0xff]  ;;  %v16980_v63 = vld [vmem:[#allocation3 + $0xa2] sm:$0xff]  ;;  %v3326_v56 = vadd.f32 %v16523_v19, %v3291_v23  ;;  %vm16992_vm14 = vcmp.lt.s32.totalorder %v712_v7, 14 }
 0x25d   : > { %3442 = vst.msk [vmem:[#allocation3 + $0xe1] sm:$0xff] %vm386_vm0, %v3353_v14  ;;  %v3351_v46 = vmax.f32 %v3323_v38, 0.0  ;;  %8499 = vst.msk [vmem:[#allocation3 + $0x90] sm:$0xff] %vm386_vm0, %v19970_v29  ;;  %v20030_v13 = vmov 0  ;;  %13784 = vmatmul.mubr.msk.bf16.gmra.mxu1 %vm386_vm0, %v16970_v37  ;;  %v17000_v22 = vld [vmem:[#allocation3 + $0xaa] sm:$0xff]  ;;  %v3324_v24 = vadd.f32 %v16523_v19, %v3289_v33  ;;  %vm17010_vm15 = vcmp.lt.s32.totalorder %v698_v54, 14 }
 0x25e   : > { %8500 = vst.msk [vmem:[#allocation3 + $0x98] sm:$0xff] %vm386_vm0, %v19970_v29  ;;  %8501 = vst.msk [vmem:[#allocation3 + $0xa0] sm:$0xff] %vm386_vm0, %v19970_v29  ;;  %v20031_v13 = vsel %vm16992_vm14, 4294967295, %v20030_v13  ;;  %13816 = vmatmul.mubr.msk.bf16.gmra.mxu0 %vm386_vm0, %v16972_v32  ;;  %v3354_v9 = vmax.f32 %v3326_v56, 0.0  ;;  %13787 = vmatprep.mubr.msk.bf16.mxu1 %vm386_vm0, %v16984_v11  ;;  %v20033_v7 = vmov 0  ;;  %v3513_v20 = vld [vmem:[#allocation3 + $0xb1] sm:$0xff] }
 0x25f   : > { %20032 = vst [vmem:[#allocation65_spill] sm:$0xff] %v20031_v13  ;;  %3440 = vst.msk [vmem:[#allocation3 + $0xd1] sm:$0xff] %vm386_vm0, %v3351_v46  ;;  %13819 = vmatprep.mubr.msk.bf16.mxu0 %vm386_vm0, %v16974_v44  ;;  %v20034_v7 = vsel %vm17010_vm15, 4294967295, %v20033_v7  ;;  %v3352_v57 = vmax.f32 %v3324_v24, 0.0  ;;  %v3466_v19 = vld [vmem:[#allocation3 + $0xb0] sm:$0xff]  ;;  %v3515_v14 = vld [vmem:[#allocation3 + $0xc1] sm:$0xff] }
 0x260   : > { %8502 = vst.msk [vmem:[#allocation3 + $0xa8] sm:$0xff] %vm386_vm0, %v19970_v29  ;;  %20035 = vst [vmem:[#allocation38_spill] sm:$0xff] %v20034_v7  ;;  %v3415_v55 = vsel %vm16992_vm14, %v3354_v9, 0.0  ;;  %v3516_v38 = vld [vmem:[#allocation3 + $0xc9] sm:$0xff] }
 0x261   : > { %3443 = vst.msk [vmem:[#allocation3 + $0xe9] sm:$0xff] %vm386_vm0, %v3415_v55  ;;  %v3469_v23 = vld [vmem:[#allocation3 + $0xc8] sm:$0xff]  ;;  %v3413_v59 = vsel %vm17010_vm15, %v3352_v57, 0.0  ;;  %v17032_v55 = vpack.c.bf16 %v3516_v38, %v3515_v14 }
 0x262   : > { %v3514_v12 = vld [vmem:[#allocation3 + $0xb9] sm:$0xff]  ;;  %3441 = vst.msk [vmem:[#allocation3 + $0xd9] sm:$0xff] %vm386_vm0, %v3413_v59  ;;  %v17030_v24 = vld [vmem:[#allocation3 + $0xc2] sm:$0xff] }
 0x263   : > { %v3467_v8 = vld [vmem:[#allocation3 + $0xb8] sm:$0xff]  ;;  %v3468_v54 = vld [vmem:[#allocation3 + $0xc0] sm:$0xff]  ;;  %v17020_v30 = vpack.c.bf16 %v3514_v12, %v3513_v20 }
 0x264   : > { %v17022_v46 = vpack.c.bf16 %v3467_v8, %v3466_v19  ;;  %v17024_v56 = vpack.c.bf16 %v3469_v23, %v3468_v54  ;;  %v17026_v33 = vld [vmem:[#allocation3 + $0xb2] sm:$0xff]  ;;  %v17028_v9 = vld [vmem:[#allocation3 + $0xba] sm:$0xff] }
 0x265   : > { %8503 = vst.msk [vmem:[#allocation3 + $0xb0] sm:$0xff] %vm386_vm0, %v19970_v29  ;;  %8504 = vst.msk [vmem:[#allocation3 + $0xb8] sm:$0xff] %vm386_vm0, %v19970_v29  ;;  %13788 = vmatmul.mubr.msk.bf16.gmra.mxu1 %vm386_vm0, %v17020_v30  ;;  %v17052_v20 = vld [vmem:[#allocation3 + $0xe1] sm:$0xff] }
 0x266   : > { %8505 = vst.msk [vmem:[#allocation3 + $0xc0] sm:$0xff] %vm386_vm0, %v19970_v29  ;;  %13820 = vmatmul.mubr.msk.bf16.gmra.mxu0 %vm386_vm0, %v17022_v46  ;;  %v17044_v57 = vld [vmem:[#allocation3 + $0xca] sm:$0xff]  ;;  %13791 = vmatprep.mubr.msk.bf16.mxu1 %vm386_vm0, %v17032_v55  ;;  %20036 = vst [vmem:[#allocation72_spill] sm:$0xff] %v17052_v20 }
 0x267   : > { %13823 = vmatprep.mubr.msk.bf16.mxu0 %vm386_vm0, %v17024_v56  ;;  %8506 = vst.msk [vmem:[#allocation3 + $0xc8] sm:$0xff] %vm386_vm0, %v19970_v29  ;;  %v3517_v19 = vld [vmem:[#allocation3 + $0xd1] sm:$0xff] }
 0x268   : > { %v3470_v14 = vld [vmem:[#allocation3 + $0xd0] sm:$0xff]  ;;  %v17054_v38 = vld [vmem:[#allocation3 + $0xe8] sm:$0xff] }
 0x269   : > { %v17056_v23 = vld [vmem:[#allocation3 + $0xe9] sm:$0xff]  ;;  %v3518_v8 = vld [vmem:[#allocation3 + $0xd9] sm:$0xff] }
 0x26a   : > { %20037 = vst [vmem:[#allocation67_spill] sm:$0xff] %v17056_v23  ;;  %v17058_v59 = vld [vmem:[#allocation3 + $0xe2] sm:$0xff]  ;;  %v17060_v12 = vld [vmem:[#allocation3 + $0xea] sm:$0xff]  ;;  %v3471_v54 = vld [vmem:[#allocation3 + $0xd8] sm:$0xff]  ;;  %v17066_v13 = vpack.c.bf16 %v3518_v8, %v3517_v19  ;;  %v17089_v19 = vpack.c.bf16 %v16718_v4, %v16686_v28  ;;  %v17106_v28 = vpack.c.bf16 %v16817_v10, %v16784_v25  ;;  %v17118_v4 = vpack.c.bf16 %v16863_v16, %v16861_v36 }
 0x26b   : > { %20038 = vst [vmem:[#allocation31_spill] sm:$0xff] %v17058_v59  ;;  %v17062_v7 = vld [vmem:[#allocation3 + $0xd2] sm:$0xff]  ;;  %8510 = vst.msk [vmem:[#allocation3 + $0xe8] sm:$0xff] %vm386_vm0, %v19970_v29  ;;  %v17068_v18 = vpack.c.bf16 %v3471_v54, %v3470_v14  ;;  %v3963_v47 = vld [vmem:[#allocation3 + $0xda] sm:$0xff]  ;;  %v17134_v36 = vpack.c.bf16 %v16923_v26, %v16921_v53 }
 0x26c   : > { %v4236_v20 = vld [vmem:[#allocation3 + $0xe0] sm:$0xff]  ;;  %8507 = vst.msk [vmem:[#allocation3 + $0xd0] sm:$0xff] %vm386_vm0, %v19970_v29  ;;  %8508 = vst.msk [vmem:[#allocation3 + $0xd8] sm:$0xff] %vm386_vm0, %v19970_v29  ;;  %v14869_v14 = vld [vmem:[#allocation5 + $0xd0] sm:$0xff]   ;;  %v17187_v53 = vpack.c.bf16 %v3963_v47, %v17062_v7 }
 0x26d   : > { %v20039_v23 = vld [vmem:[#allocation20_spill] sm:$0xff]  ;;  %8509 = vst.msk [vmem:[#allocation3 + $0xe0] sm:$0xff] %vm386_vm0, %v19970_v29  ;;  %13792 = vmatmul.mubr.msk.bf16.gmra.mxu1 %vm386_vm0, %v17066_v13  ;;  %v17160_v25 = vld [vmem:[#allocation3 + $0xf1] sm:$0xff]  ;;  %v17162_v10 = vld [vmem:[#allocation3 + $0xf9] sm:$0xff]  ;;  %v17190_v26 = vpack.c.bf16 %v17054_v38, %v4236_v20 }
 0x26e   : > { %v3964_v59 = vpack.c.bf16 %v16634_v34, %v20039_v23  ;;  %13824 = vmatmul.mubr.msk.bf16.gmra.mxu0 %vm386_vm0, %v17068_v18  ;;  %v3965_v34 = vpack.c.bf16 %v16684_v45, %v16682_v43  ;;  %v14871_v23 = vld [vmem:[#allocation5 + $0xe0] sm:$0xff]   ;;  %v14874_v43 = vld [vmem:[#allocation5 + $0x108] sm:$0xff]   ;;  %v17102_v45 = vpack.c.bf16 %v16782_v41, %v16780_v0  ;;  %v17150_v0 = vpack.c.bf16 %v16978_v50, %v16976_v42  ;;  %v17233_v50 = vld [vmem:[#allocation3 + $0xf0] sm:$0xff] }
 0x26f   : > { %13863 = vmatprep.mubr.msk.bf16.mxu0 %vm386_vm0, %v16678_v15  ;;  %v14872_v15 = vld [vmem:[#allocation5 + $0xf8] sm:$0xff]   ;;  %v17154_v41 = vpack.c.bf16 %v17000_v22, %v16980_v63  ;;  %v5347_v16 = vpack.c.bf16 %v17162_v10, %v17160_v25  ;;  %v14875_v42 = vld [vmem:[#allocation5 + $0x100] sm:$0xff]   ;;  %v14877_v38 = vld [vmem:[#allocation5 + $0x110] sm:$0xff]  }
 0x270   : > { %13831 = vmatprep.mubr.msk.bf16.mxu1 %vm386_vm0, %v3964_v59  ;;  %v20040_v47 = vld [vmem:[#allocation66_spill] sm:$0xff]  ;;  %v17237_v22 = vld [vmem:[#allocation3 + $0xfa] sm:$0xff] }
 0x271   : > { %v17235_v63 = vld [vmem:[#allocation3 + $0xf2] sm:$0xff]  ;;  %8513 = vst.msk [vmem:[#allocation3 + $0x100] sm:$0xff] %vm386_vm0, %v19970_v29 }
 0x272   : > { %v5621_v7 = vpack.c.bf16 %v17237_v22, %v17235_v63  ;;  %8511 = vst.msk [vmem:[#allocation3 + $0xf0] sm:$0xff] %vm386_vm0, %v19970_v29 }
 0x275   : > { %13832 = vmatmul.mubr.msk.bf16.vlgmr.msra.gmra.mxu1 %vm386_vm0, %v3965_v34 }
 0x276   : > { %13864 = vmatmul.mubr.msk.bf16.vlgmr.msra.gmra.mxu0 %vm386_vm0, %v16680_v60  ;;  %13835 = vmatprep.mubr.msk.bf16.mxu1 %vm386_vm0, %v17089_v19 }
 0x277   : > { %13867 = vmatprep.mubr.msk.bf16.mxu0 %vm386_vm0, %v16773_v52  ;;  %13892 = vmatpush3.bf16.msra.mxu1 %v16754_v62  ;;  %v17122_v62 = vpack.c.bf16 %v16886_v31, %v16865_v40  ;;  %v17172_v40 = vpack.c.bf16 %v17028_v9, %v17026_v33  ;;  %v17176_v31 = vpack.c.bf16 %v17044_v57, %v17030_v24  ;;  %v20041_v33 = vld [vmem:[#allocation72_spill] sm:$0xff]  ;;  %v20042_v9 = vld [vmem:[#allocation67_spill] sm:$0xff] }
 0x278   : > { %13924 = vmatpush3.bf16.msra.mxu0 %v16756_v21  ;;  %13893 = vmatprep.subr.bf16.mxu1 %v14869_v14  ;;  %v17138_v21 = vpack.c.bf16 %v16947_v48, %v16925_v5  ;;  %v14873_v5 = vld [vmem:[#allocation5 + $0xf0] sm:$0xff]   ;;  %v17231_v48 = vld [vmem:[#allocation3 + $0xf8] sm:$0xff]  ;;  %v4525_v24 = vpack.c.bf16 %v20042_v9, %v20041_v33 }
 0x279   : > { %13925 = vmatprep.subr.bf16.mxu0 %v14871_v23  ;;  %8512 = vst.msk [vmem:[#allocation3 + $0xf8] sm:$0xff] %vm386_vm0, %v19970_v29  ;;  %v20043_v57 = vld [vmem:[#allocation31_spill] sm:$0xff] }
 0x27a   : > { %v17267_v20 = vpack.c.bf16 %v17060_v12, %v20043_v57  ;;  %v6008_v29 = vld [vmem:[#allocation2 + $0x8] sm:$0xff] }
 0x27b   : > { %13894 = vmatpush3.bf16.msra.mxu1 %v14869_v14 }
 0x27c   : > { %13926 = vmatpush3.bf16.msra.mxu0 %v14871_v23  ;;  %13955 = vmatprep.subr.bf16.mxu1 %v14872_v15 }
 0x27d   : > { %13987 = vmatprep.subr.bf16.mxu0 %v14874_v43  ;;  %13836 = vmatmul.mubr.msk.bf16.gmra.mxu1 %vm386_vm0, %v17102_v45 }
 0x27e   : > { %13868 = vmatmul.mubr.msk.bf16.gmra.mxu0 %vm386_vm0, %v16775_v1  ;;  %13839 = vmatprep.mubr.msk.bf16.mxu1 %vm386_vm0, %v17106_v28 }
 0x27f   : > { %13871 = vmatprep.mubr.msk.bf16.mxu0 %vm386_vm0, %v16857_v35 }
 0x285   : > { %13840 = vmatmul.mubr.msk.bf16.gmra.mxu1 %vm386_vm0, %v17118_v4 }
 0x286   : > { %13872 = vmatmul.mubr.msk.bf16.gmra.mxu0 %vm386_vm0, %v16859_v17  ;;  %13843 = vmatprep.mubr.msk.bf16.mxu1 %vm386_vm0, %v17122_v62 }
 0x287   : > { %13875 = vmatprep.mubr.msk.bf16.mxu0 %vm386_vm0, %v16917_v6 }
 0x28d   : > { %13844 = vmatmul.mubr.msk.bf16.gmra.mxu1 %vm386_vm0, %v17134_v36 }
 0x28e   : > { %13876 = vmatmul.mubr.msk.bf16.gmra.mxu0 %vm386_vm0, %v16919_v39  ;;  %13847 = vmatprep.mubr.msk.bf16.mxu1 %vm386_vm0, %v17138_v21 }
 0x28f   : > { %13879 = vmatprep.mubr.msk.bf16.mxu0 %vm386_vm0, %v16972_v32 }
 0x295   : > { %13848 = vmatmul.mubr.msk.bf16.gmra.mxu1 %vm386_vm0, %v17150_v0 }
 0x296   : > { %13880 = vmatmul.mubr.msk.bf16.gmra.mxu0 %vm386_vm0, %v16974_v44  ;;  %13851 = vmatprep.mubr.msk.bf16.mxu1 %vm386_vm0, %v17154_v41 }
 0x297   : > { %13883 = vmatprep.mubr.msk.bf16.mxu0 %vm386_vm0, %v17022_v46 }
 0x29d   : > { %13852 = vmatmul.mubr.msk.bf16.gmra.mxu1 %vm386_vm0, %v17172_v40 }
 0x29e   : > { %13884 = vmatmul.mubr.msk.bf16.gmra.mxu0 %vm386_vm0, %v17024_v56  ;;  %13855 = vmatprep.mubr.msk.bf16.mxu1 %vm386_vm0, %v17176_v31 }
 0x29f   : > { %13887 = vmatprep.mubr.msk.bf16.mxu0 %vm386_vm0, %v17068_v18 }
 0x2a5   : > { %13856 = vmatmul.mubr.msk.bf16.gmra.mxu1 %vm386_vm0, %v17187_v53 }
 0x2a6   : > { %13888 = vmatmul.mubr.msk.bf16.gmra.mxu0 %vm386_vm0, %v17190_v26  ;;  %13895 = vmatprep.mubr.msk.bf16.mxu1 %vm386_vm0, %v16676_v49  ;;  %v14876_v49 = vld [vmem:[#allocation5 + $0x118] sm:$0xff]  }
 0x2a7   : > { %13927 = vmatprep.mubr.msk.bf16.mxu0 %vm386_vm0, %v3965_v34 }
 0x2ad   : > { %13896 = vmatmul.mubr.msk.bf16.vlgmr.msra.gmra.mxu1 %vm386_vm0, %v16690_v3 }
 0x2ae   : > { %13928 = vmatmul.mubr.msk.bf16.vlgmr.msra.gmra.mxu0 %vm386_vm0, %v17089_v19  ;;  %13899 = vmatprep.mubr.msk.bf16.mxu1 %vm386_vm0, %v16771_v51 }
 0x2af   : > { %13931 = vmatprep.mubr.msk.bf16.mxu0 %vm386_vm0, %v17102_v45  ;;  %13956 = vmatpush3.bf16.msra.mxu1 %v14872_v15 }
 0x2b0   : > { %13988 = vmatpush3.bf16.msra.mxu0 %v14874_v43  ;;  %13957 = vmatprep.subr.bf16.mxu1 %v14873_v5 }
 0x2b1   : > { %13989 = vmatprep.subr.bf16.mxu0 %v14875_v42 }
 0x2b3   : > { %13958 = vmatpush3.bf16.msra.mxu1 %v14873_v5 }
 0x2b4   : > { %13990 = vmatpush3.bf16.msra.mxu0 %v14875_v42  ;;  %14019 = vmatprep.subr.bf16.mxu1 %v14876_v49 }
 0x2b5   : > { %13900 = vmatmul.mubr.msk.bf16.gmra.mxu1 %vm386_vm0, %v20040_v47 }
 0x2b6   : > { %13932 = vmatmul.mubr.msk.bf16.gmra.mxu0 %vm386_vm0, %v17106_v28  ;;  %13903 = vmatprep.mubr.msk.bf16.mxu1 %vm386_vm0, %v16855_v2 }
 0x2b7   : > { %13935 = vmatprep.mubr.msk.bf16.mxu0 %vm386_vm0, %v17118_v4 }
 0x2bd   : > { %13904 = vmatmul.mubr.msk.bf16.gmra.mxu1 %vm386_vm0, %v16869_v27 }
 0x2be   : > { %13936 = vmatmul.mubr.msk.bf16.gmra.mxu0 %vm386_vm0, %v17122_v62  ;;  %13907 = vmatprep.mubr.msk.bf16.mxu1 %vm386_vm0, %v16915_v58 }
 0x2bf   : > { %13939 = vmatprep.mubr.msk.bf16.mxu0 %vm386_vm0, %v17134_v36 }
 0x2c5   : > { %13908 = vmatmul.mubr.msk.bf16.gmra.mxu1 %vm386_vm0, %v16929_v61 }
 0x2c6   : > { %13940 = vmatmul.mubr.msk.bf16.gmra.mxu0 %vm386_vm0, %v17138_v21  ;;  %13911 = vmatprep.mubr.msk.bf16.mxu1 %vm386_vm0, %v16970_v37 }
 0x2c7   : > { %13943 = vmatprep.mubr.msk.bf16.mxu0 %vm386_vm0, %v17150_v0 }
 0x2cd   : > { %13912 = vmatmul.mubr.msk.bf16.gmra.mxu1 %vm386_vm0, %v16984_v11 }
 0x2ce   : > { %13944 = vmatmul.mubr.msk.bf16.gmra.mxu0 %vm386_vm0, %v17154_v41  ;;  %13915 = vmatprep.mubr.msk.bf16.mxu1 %vm386_vm0, %v17020_v30 }
 0x2cf   : > { %13947 = vmatprep.mubr.msk.bf16.mxu0 %vm386_vm0, %v17172_v40 }
 0x2d5   : > { %13916 = vmatmul.mubr.msk.bf16.gmra.mxu1 %vm386_vm0, %v17032_v55 }
 0x2d6   : > { %13948 = vmatmul.mubr.msk.bf16.gmra.mxu0 %vm386_vm0, %v17176_v31  ;;  %13919 = vmatprep.mubr.msk.bf16.mxu1 %vm386_vm0, %v17066_v13 }
 0x2d7   : > { %13951 = vmatprep.mubr.msk.bf16.mxu0 %vm386_vm0, %v17187_v53 }
 0x2dd   : > { %13920 = vmatmul.mubr.msk.bf16.gmra.mxu1 %vm386_vm0, %v4525_v24 }
 0x2de   : > { %13952 = vmatmul.mubr.msk.bf16.gmra.mxu0 %vm386_vm0, %v17267_v20  ;;  %13959 = vmatprep.mubr.msk.bf16.mxu1 %vm386_vm0, %v16680_v60 }
 0x2df   : > { %13991 = vmatprep.mubr.msk.bf16.mxu0 %vm386_vm0, %v16690_v3 }
 0x2e5   : > { %13960 = vmatmul.mubr.msk.bf16.vlgmr.msra.gmra.mxu1 %vm386_vm0, %v16773_v52 }
 0x2e6   : > { %13992 = vmatmul.mubr.msk.bf16.vlgmr.msra.gmra.mxu0 %vm386_vm0, %v16771_v51  ;;  %13963 = vmatprep.mubr.msk.bf16.mxu1 %vm386_vm0, %v16775_v1 }
 0x2e7   : > { %13995 = vmatprep.mubr.msk.bf16.mxu0 %vm386_vm0, %v20040_v47  ;;  %14020 = vmatpush3.bf16.msra.mxu1 %v14876_v49 }
 0x2e8   : > { %14021 = vmatprep.subr.bf16.mxu1 %v14877_v38 }
 0x2eb   : > { %14022 = vmatpush3.bf16.msra.mxu1 %v14877_v38 }
 0x2ed   : > { %13964 = vmatmul.mubr.msk.bf16.gmra.mxu1 %vm386_vm0, %v16857_v35 }
 0x2ee   : > { %13996 = vmatmul.mubr.msk.bf16.gmra.mxu0 %vm386_vm0, %v16855_v2  ;;  %13967 = vmatprep.mubr.msk.bf16.mxu1 %vm386_vm0, %v16859_v17 }
 0x2ef   : > { %13999 = vmatprep.mubr.msk.bf16.mxu0 %vm386_vm0, %v16869_v27 }
 0x2f5   : > { %13968 = vmatmul.mubr.msk.bf16.gmra.mxu1 %vm386_vm0, %v16917_v6 }
 0x2f6   : > { %14000 = vmatmul.mubr.msk.bf16.gmra.mxu0 %vm386_vm0, %v16915_v58  ;;  %13971 = vmatprep.mubr.msk.bf16.mxu1 %vm386_vm0, %v16919_v39 }
 0x2f7   : > { %14003 = vmatprep.mubr.msk.bf16.mxu0 %vm386_vm0, %v16929_v61 }
 0x2f9   : > { %v13769_v1 = vpop.f32.mrf.mxu1 }
 0x2fa   : > { %v13801_v60 = vpop.f32.mrf.mxu0 }
 0x2fb   : > { %v17304_v3 = vadd.f32 %v13801_v60, %v13769_v1  ;;  %v3626_v51 = vpop.f32.mrf.mxu1 }
 0x2fc   : > { %v3825_v52 = vpop.f32.mrf.mxu0 }
 0x2fd   : > { %13972 = vmatmul.mubr.msk.bf16.gmra.mxu1 %vm386_vm0, %v16972_v32  ;;  %v17310_v2 = vadd.f32 %v3825_v52, %v3626_v51  ;;  %v13770_v35 = vpop.f32.mrf.mxu1 }
 0x2fe   : > { %14004 = vmatmul.mubr.msk.bf16.gmra.mxu0 %vm386_vm0, %v16970_v37  ;;  %13975 = vmatprep.mubr.msk.bf16.mxu1 %vm386_vm0, %v16974_v44  ;;  %v13802_v17 = vpop.f32.mrf.mxu0 }
 0x2ff   : > { %14007 = vmatprep.mubr.msk.bf16.mxu0 %vm386_vm0, %v16984_v11  ;;  %v17312_v27 = vadd.f32 %v13802_v17, %v13770_v35  ;;  %v17314_v58 = vpop.f32.mrf.mxu1 }
 0x300   : > { %v17316_v6 = vpop.f32.mrf.mxu0 }
 0x304   : > { %v13773_v39 = vpop.f32.mrf.mxu1  ;;  %v13805_v61 = vpop.f32.mrf.mxu0 }
 0x305   : > { %13976 = vmatmul.mubr.msk.bf16.gmra.mxu1 %vm386_vm0, %v17022_v46  ;;  %v17322_v37 = vadd.f32 %v13805_v61, %v13773_v39 }
 0x306   : > { %14008 = vmatmul.mubr.msk.bf16.gmra.mxu0 %vm386_vm0, %v17020_v30  ;;  %13979 = vmatprep.mubr.msk.bf16.mxu1 %vm386_vm0, %v17024_v56  ;;  %v3642_v32 = vpop.f32.mrf.mxu1  ;;  %v3841_v44 = vpop.f32.mrf.mxu0 }
 0x307   : > { %14011 = vmatprep.mubr.msk.bf16.mxu0 %vm386_vm0, %v17032_v55  ;;  %v17328_v11 = vadd.f32 %v3841_v44, %v3642_v32 }
 0x308   : > { %v13774_v59 = vpop.f32.mrf.mxu1  ;;  %v13806_v12 = vpop.f32.mrf.mxu0 }
 0x309   : > { %v17330_v8 = vadd.f32 %v13806_v12, %v13774_v59 }
 0x30a   : > { %v17332_v46 = vpop.f32.mrf.mxu1  ;;  %v17334_v54 = vpop.f32.mrf.mxu0 }
 0x30d   : > { %v13777_v30 = vpop.f32.mrf.mxu1  ;;  %v13809_v34 = vpop.f32.mrf.mxu0  ;;  %13980 = vmatmul.mubr.msk.bf16.gmra.mxu1 %vm386_vm0, %v17068_v18 }
 0x30e   : > { %14012 = vmatmul.mubr.msk.bf16.gmra.mxu0 %vm386_vm0, %v17066_v13  ;;  %v17340_v56 = vadd.f32 %v13809_v34, %v13777_v30  ;;  %13983 = vmatprep.mubr.msk.bf16.mxu1 %vm386_vm0, %v17190_v26  ;;  %v5073_v13 = vpack.c.bf16 %v17231_v48, %v17233_v50 }
 0x30f   : > { %14015 = vmatprep.mubr.msk.bf16.mxu0 %vm386_vm0, %v4525_v24  ;;  %v3658_v55 = vpop.f32.mrf.mxu1  ;;  %v3857_v14 = vpop.f32.mrf.mxu0 }
 0x310   : > { %v17345_v23 = vadd.f32 %v3857_v14, %v3658_v55 }
 0x311   : > { %v13778_v15 = vpop.f32.mrf.mxu1  ;;  %v13810_v43 = vpop.f32.mrf.mxu0 }
 0x312   : > { %v17347_v5 = vadd.f32 %v13810_v43, %v13778_v15 }
 0x313   : > { %v17349_v42 = vpop.f32.mrf.mxu1  ;;  %v17351_v18 = vpop.f32.mrf.mxu0 }
 0x315   : > { %v13781_v49 = vpop.f32.mrf.mxu1  ;;  %v13813_v47 = vpop.f32.mrf.mxu0  ;;  %13984 = vmatmul.mubr.msk.bf16.gmra.mxu1 %vm386_vm0, %v5073_v13 }
 0x316   : > { %14016 = vmatmul.mubr.msk.bf16.gmra.mxu0 %vm386_vm0, %v5347_v16  ;;  %v17360_v26 = vadd.f32 %v13813_v47, %v13781_v49  ;;  %14023 = vmatprep.mubr.msk.bf16.mxu1 %vm386_vm0, %v17089_v19 }
 0x317   : > { %v3674_v33 = vpop.f32.mrf.mxu1  ;;  %v3873_v9 = vpop.f32.mrf.mxu0 }
 0x318   : > { %v17364_v24 = vadd.f32 %v3873_v9, %v3674_v33 }
 0x319   : > { %v13782_v57 = vpop.f32.mrf.mxu1  ;;  %v13814_v48 = vpop.f32.mrf.mxu0 }
 0x31a   : > { %v17366_v50 = vadd.f32 %v13814_v48, %v13782_v57 }
 0x31b   : > { %v17368_v38 = vpop.f32.mrf.mxu1  ;;  %v17370_v1 = vpop.f32.mrf.mxu0 }
 0x31d   : > { %v13785_v25 = vpop.f32.mrf.mxu1  ;;  %14024 = vmatmul.mubr.msk.bf16.vlgmr.msra.gmra.mxu1 %vm386_vm0, %v17102_v45 }
 0x31e   : > { %v13817_v10 = vpop.f32.mrf.mxu0  ;;  %14027 = vmatprep.mubr.msk.bf16.mxu1 %vm386_vm0, %v17106_v28 }
 0x31f   : > { %v17374_v16 = vadd.f32 %v13817_v10, %v13785_v25  ;;  %v3690_v19 = vpop.f32.mrf.mxu1 }
 0x320   : > { %v3889_v60 = vpop.f32.mrf.mxu0 }
 0x321   : > { %v17378_v51 = vadd.f32 %v3889_v60, %v3690_v19  ;;  %v13786_v52 = vpop.f32.mrf.mxu1 }
 0x322   : > { %v13818_v35 = vpop.f32.mrf.mxu0 }
 0x323   : > { %v17380_v17 = vadd.f32 %v13818_v35, %v13786_v52  ;;  %v17382_v39 = vpop.f32.mrf.mxu1 }
 0x324   : > { %v17384_v61 = vpop.f32.mrf.mxu0 }
 0x325   : > { %v13789_v32 = vpop.f32.mrf.mxu1  ;;  %14028 = vmatmul.mubr.msk.bf16.gmra.mxu1 %vm386_vm0, %v17118_v4 }
 0x326   : > { %v13821_v44 = vpop.f32.mrf.mxu0  ;;  %14031 = vmatprep.mubr.msk.bf16.mxu1 %vm386_vm0, %v17122_v62 }
 0x327   : > { %v17388_v45 = vadd.f32 %v13821_v44, %v13789_v32  ;;  %v3706_v28 = vpop.f32.mrf.mxu1 }
 0x328   : > { %v3905_v59 = vpop.f32.mrf.mxu0 }
 0x329   : > { %v17392_v12 = vadd.f32 %v3905_v59, %v3706_v28  ;;  %v13790_v30 = vpop.f32.mrf.mxu1 }
 0x32a   : > { %v13822_v34 = vpop.f32.mrf.mxu0 }
 0x32b   : > { %v17394_v55 = vadd.f32 %v13822_v34, %v13790_v30  ;;  %v17396_v14 = vpop.f32.mrf.mxu1 }
 0x32c   : > { %v17398_v15 = vpop.f32.mrf.mxu0 }
 0x32d   : > { %v13793_v43 = vpop.f32.mrf.mxu1  ;;  %14032 = vmatmul.mubr.msk.bf16.gmra.mxu1 %vm386_vm0, %v17134_v36 }
 0x32e   : > { %v13825_v13 = vpop.f32.mrf.mxu0  ;;  %14035 = vmatprep.mubr.msk.bf16.mxu1 %vm386_vm0, %v17138_v21 }
 0x32f   : > { %v17402_v4 = vadd.f32 %v13825_v13, %v13793_v43  ;;  %v3722_v62 = vpop.f32.mrf.mxu1 }
 0x330   : > { %v3921_v49 = vpop.f32.mrf.mxu0 }
 0x331   : > { %v17406_v47 = vadd.f32 %v3921_v49, %v3722_v62  ;;  %v13794_v33 = vpop.f32.mrf.mxu1  ;;  %v14878_v49 = vld [vmem:[#allocation5 + $0x138] sm:$0xff]  }
 0x332   : > { %v13826_v9 = vpop.f32.mrf.mxu0  ;;  %14051 = vmatprep.subr.bf16.mxu0 %v14878_v49 }
 0x333   : > { %v17408_v57 = vadd.f32 %v13826_v9, %v13794_v33  ;;  %v17410_v48 = vpop.f32.mrf.mxu1  ;;  %14052 = vmatpush3.bf16.msra.mxu0 %v14878_v49 }
 0x334   : > { %v17412_v25 = vpop.f32.mrf.mxu0 }
 0x335   : > { %v13833_v10 = vpop.f32.mrf.mxu1  ;;  %14036 = vmatmul.mubr.msk.bf16.gmra.mxu1 %vm386_vm0, %v17150_v0 }
 0x336   : > { %v13865_v19 = vpop.f32.mrf.mxu0  ;;  %v4184_v36 = vadd.f32 %v13833_v10, %v17304_v3  ;;  %14039 = vmatprep.mubr.msk.bf16.mxu1 %vm386_vm0, %v17154_v41 }
 0x337   : > { %v4071_v21 = vpop.f32.mrf.mxu1 }
 0x338   : > { %v4345_v60 = vpop.f32.mrf.mxu0  ;;  %v17419_v52 = vadd.f32 %v13865_v19, %v4184_v36  ;;  %v4182_v35 = vadd.f32 %v4071_v21, %v17310_v2 }
 0x339   : > { %v13834_v32 = vpop.f32.mrf.mxu1 }
 0x33a   : > { %v13866_v44 = vpop.f32.mrf.mxu0  ;;  %v17422_v28 = vadd.f32 %v4345_v60, %v4182_v35  ;;  %v4185_v59 = vadd.f32 %v13834_v32, %v17312_v27 }
 0x33b   : > { %v17425_v30 = vpop.f32.mrf.mxu1 }
 0x33c   : > { %v17427_v0 = vpop.f32.mrf.mxu0  ;;  %v17429_v3 = vadd.f32 %v13866_v44, %v4185_v59 }
 0x33d   : > { %v13837_v34 = vpop.f32.mrf.mxu1  ;;  %14040 = vmatmul.mubr.msk.bf16.gmra.mxu1 %vm386_vm0, %v17172_v40 }
 0x33e   : > { %v13869_v41 = vpop.f32.mrf.mxu0  ;;  %v4188_v43 = vadd.f32 %v13837_v34, %v17322_v37  ;;  %14043 = vmatprep.mubr.msk.bf16.mxu1 %vm386_vm0, %v17176_v31 }
 0x33f   : > { %v4087_v2 = vpop.f32.mrf.mxu1 }
 0x340   : > { %v4361_v13 = vpop.f32.mrf.mxu0  ;;  %v17436_v62 = vadd.f32 %v13869_v41, %v4188_v43  ;;  %v4186_v27 = vadd.f32 %v4087_v2, %v17328_v11 }
 0x341   : > { %v13838_v33 = vpop.f32.mrf.mxu1 }
 0x342   : > { %v13870_v9 = vpop.f32.mrf.mxu0  ;;  %v17439_v10 = vadd.f32 %v4361_v13, %v4186_v27  ;;  %v4189_v19 = vadd.f32 %v13838_v33, %v17330_v8 }
 0x343   : > { %v17442_v40 = vpop.f32.mrf.mxu1 }
 0x344   : > { %v17444_v37 = vpop.f32.mrf.mxu0  ;;  %v17446_v31 = vadd.f32 %v13870_v9, %v4189_v19 }
 0x345   : > { %v13841_v36 = vpop.f32.mrf.mxu1  ;;  %14044 = vmatmul.mubr.msk.bf16.gmra.mxu1 %vm386_vm0, %v17187_v53 }
 0x346   : > { %v13873_v21 = vpop.f32.mrf.mxu0  ;;  %v4192_v11 = vadd.f32 %v13841_v36, %v17340_v56  ;;  %14047 = vmatprep.mubr.msk.bf16.mxu1 %vm386_vm0, %v17267_v20 }
 0x347   : > { %v4103_v60 = vpop.f32.mrf.mxu1 }
 0x348   : > { %v4377_v8 = vpop.f32.mrf.mxu0  ;;  %v17453_v35 = vadd.f32 %v13873_v21, %v4192_v11  ;;  %v4190_v32 = vadd.f32 %v4103_v60, %v17345_v23 }
 0x349   : > { %v13842_v44 = vpop.f32.mrf.mxu1 }
 0x34a   : > { %v13874_v59 = vpop.f32.mrf.mxu0  ;;  %v17456_v34 = vadd.f32 %v4377_v8, %v4190_v32  ;;  %v4193_v41 = vadd.f32 %v13842_v44, %v17347_v5 }
 0x34b   : > { %v17459_v43 = vpop.f32.mrf.mxu1 }
 0x34c   : > { %v17461_v53 = vpop.f32.mrf.mxu0  ;;  %v17463_v56 = vadd.f32 %v13874_v59, %v4193_v41 }
 0x34d   : > { %v13845_v2 = vpop.f32.mrf.mxu1  ;;  %14048 = vmatmul.mubr.msk.bf16.gmra.mxu1 %vm386_vm0, %v5621_v7 }
 0x34e   : > { %v13877_v20 = vpop.f32.mrf.mxu0  ;;  %v4196_v23 = vadd.f32 %v13845_v2, %v17360_v26  ;;  %v14879_v2 = vld [vmem:[#allocation5 + $0x130] sm:$0xff]  }
 0x34f   : > { %v4119_v13 = vpop.f32.mrf.mxu1  ;;  %14053 = vmatprep.subr.bf16.mxu0 %v14879_v2 }
 0x350   : > { %v4393_v27 = vpop.f32.mrf.mxu0  ;;  %v17470_v49 = vadd.f32 %v13877_v20, %v4196_v23  ;;  %v4194_v5 = vadd.f32 %v4119_v13, %v17364_v24  ;;  %14054 = vmatpush3.bf16.msra.mxu0 %v14879_v2 }
 0x351   : > { %v13846_v33 = vpop.f32.mrf.mxu1 }
 0x352   : > { %v13878_v9 = vpop.f32.mrf.mxu0  ;;  %v17473_v19 = vadd.f32 %v4393_v27, %v4194_v5  ;;  %v4197_v36 = vadd.f32 %v13846_v33, %v17366_v50 }
 0x353   : > { %v17476_v21 = vpop.f32.mrf.mxu1 }
 0x354   : > { %v17478_v11 = vpop.f32.mrf.mxu0  ;;  %v17480_v63 = vadd.f32 %v13878_v9, %v4197_v36 }
 0x355   : > { %20044 = vst [vmem:[#allocation32_spill] sm:$0xff] %v17478_v11  ;;  %v13849_v22 = vpop.f32.mrf.mxu1 }
 0x356   : > { %v13881_v7 = vpop.f32.mrf.mxu0  ;;  %v4200_v26 = vadd.f32 %v13849_v22, %v17374_v16 }
 0x357   : > { %v4135_v60 = vpop.f32.mrf.mxu1 }
 0x358   : > { %v4409_v8 = vpop.f32.mrf.mxu0  ;;  %v17483_v32 = vadd.f32 %v13881_v7, %v4200_v26  ;;  %v4198_v24 = vadd.f32 %v4135_v60, %v17378_v51 }
 0x359   : > { %v13850_v44 = vpop.f32.mrf.mxu1 }
 0x35a   : > { %v13882_v59 = vpop.f32.mrf.mxu0  ;;  %v17486_v41 = vadd.f32 %v4409_v8, %v4198_v24  ;;  %v4201_v50 = vadd.f32 %v13850_v44, %v17380_v17 }
 0x35b   : > { %v17489_v20 = vpop.f32.mrf.mxu1 }
 0x35c   : > { %v17491_v23 = vpop.f32.mrf.mxu0  ;;  %v17493_v13 = vadd.f32 %v13882_v59, %v4201_v50 }
 0x35d   : > { %20045 = vst [vmem:[#allocation33_spill] sm:$0xff] %v17491_v23  ;;  %v13853_v16 = vpop.f32.mrf.mxu1 }
 0x35e   : > { %v13885_v27 = vpop.f32.mrf.mxu0  ;;  %v4204_v5 = vadd.f32 %v13853_v16, %v17388_v45 }
 0x35f   : > { %v4151_v51 = vpop.f32.mrf.mxu1 }
 0x360   : > { %v4425_v33 = vpop.f32.mrf.mxu0  ;;  %v17496_v9 = vadd.f32 %v13885_v27, %v4204_v5  ;;  %v4202_v36 = vadd.f32 %v4151_v51, %v17392_v12 }
 0x361   : > { %v13854_v17 = vpop.f32.mrf.mxu1 }
 0x362   : > { %v13886_v22 = vpop.f32.mrf.mxu0  ;;  %v17499_v7 = vadd.f32 %v4425_v33, %v4202_v36  ;;  %v4205_v26 = vadd.f32 %v13854_v17, %v17394_v55 }
 0x363   : > { %v17502_v60 = vpop.f32.mrf.mxu1 }
 0x364   : > { %v17504_v8 = vpop.f32.mrf.mxu0  ;;  %v17506_v24 = vadd.f32 %v13886_v22, %v4205_v26  ;;  %v14880_v22 = vld [vmem:[#allocation5 + $0x128] sm:$0xff]  }
 0x365   : > { %20046 = vst [vmem:[#allocation34_spill] sm:$0xff] %v17504_v8  ;;  %v13857_v44 = vpop.f32.mrf.mxu1  ;;  %14083 = vmatprep.subr.bf16.mxu1 %v14880_v22 }
 0x366   : > { %v13889_v45 = vpop.f32.mrf.mxu0  ;;  %v4208_v59 = vadd.f32 %v13857_v44, %v17402_v4  ;;  %14084 = vmatpush3.bf16.msra.mxu1 %v14880_v22 }
 0x367   : > { %v4167_v50 = vpop.f32.mrf.mxu1 }
 0x368   : > { %v4441_v2 = vpop.f32.mrf.mxu0  ;;  %v17509_v16 = vadd.f32 %v13889_v45, %v4208_v59  ;;  %v4206_v12 = vadd.f32 %v4167_v50, %v17406_v47  ;;  %v14881_v59 = vld [vmem:[#allocation5 + $0x120] sm:$0xff]  }
 0x369   : > { %v13858_v27 = vpop.f32.mrf.mxu1  ;;  %14085 = vmatprep.subr.bf16.mxu1 %v14881_v59 }
 0x36a   : > { %v13890_v5 = vpop.f32.mrf.mxu0  ;;  %v17512_v51 = vadd.f32 %v4441_v2, %v4206_v12  ;;  %v4209_v55 = vadd.f32 %v13858_v27, %v17408_v57  ;;  %v6054_v27 = vld [vmem:[#allocation2 + $0x1] sm:$0xff]  ;;  %14086 = vmatpush3.bf16.msra.mxu1 %v14881_v59 }
 0x36b   : > { %v17515_v33 = vpop.f32.mrf.mxu1 }
 0x36c   : > { %20047 = vst [vmem:[#allocation35_spill] sm:$0xff] %v17515_v33  ;;  %v17517_v36 = vpop.f32.mrf.mxu0  ;;  %v17519_v17 = vadd.f32 %v13890_v5, %v4209_v55  ;;  %v6055_v5 = vld [vmem:[#allocation2 + $0x9] sm:$0xff] }
 0x36d   : > { %20048 = vst [vmem:[#allocation68_spill] sm:$0xff] %v17517_v36  ;;  %v13897_v4 = vpop.f32.mrf.mxu1  ;;  %v6082_v22 = vpack.c.bf16 %v6055_v5, %v6054_v27 }
 0x36e   : > { %v17521_v26 = vpop.f32.mrf.mxu0  ;;  %v17524_v44 = vadd.f32 %v13897_v4, %v17419_v52  ;;  %v6007_v52 = vld [vmem:[#allocation2] sm:$0xff] }
 0x36f   : > { %v4619_v47 = vpop.f32.mrf.mxu1  ;;  %14055 = vmatprep.mubr.msk.bf16.mxu0 %vm386_vm0, %v6082_v22 }
 0x370   : > { %v17526_v45 = vpop.f32.mrf.mxu0  ;;  %v17529_v57 = vadd.f32 %v4619_v47, %v17422_v28  ;;  %v6035_v28 = vpack.c.bf16 %v6008_v29, %v6007_v52 }
 0x371   : > { %v13898_v50 = vpop.f32.mrf.mxu1 }
 0x372   : > { %v17531_v2 = vpop.f32.mrf.mxu0  ;;  %v17534_v12 = vadd.f32 %v13898_v50, %v17429_v3  ;;  %14087 = vmatprep.mubr.msk.bf16.mxu1 %vm386_vm0, %v6035_v28 }
 0x373   : > { %v17536_v55 = vpop.f32.mrf.mxu1 }
 0x374   : > { %v17538_v4 = vpop.f32.mrf.mxu0 }
 0x375   : > { %v13901_v47 = vpop.f32.mrf.mxu1 }
 0x376   : > { %v17540_v36 = vpop.f32.mrf.mxu0  ;;  %v17544_v3 = vadd.f32 %v13901_v47, %v17436_v62  ;;  %v17561_v62 = vld [vmem:[#allocation5 + $0x148] sm:$0xff]  }
 0x377   : > { %v4635_v50 = vpop.f32.mrf.mxu1  ;;  %20050 = vst [vmem:[#allocation36_spill] sm:$0xff] %v17561_v62  ;;  %14115 = vmatprep.subr.bf16.mxu0 %v17561_v62 }
 0x378   : > { %v17547_v33 = vpop.f32.mrf.mxu0  ;;  %v17550_v8 = vadd.f32 %v4635_v50, %v17439_v10 }
 0x379   : > { %v13902_v59 = vpop.f32.mrf.mxu1 }
 0x37a   : > { %v17552_v27 = vpop.f32.mrf.mxu0  ;;  %v17555_v29 = vadd.f32 %v13902_v59, %v17446_v31 }
 0x37b   : > { %v17557_v5 = vpop.f32.mrf.mxu1 }
 0x37c   : > { %v17559_v52 = vpop.f32.mrf.mxu0 }
 0x37d   : > { %20049 = vst [vmem:[#allocation75_spill] sm:$0xff] %v17559_v52  ;;  %v13905_v22 = vpop.f32.mrf.mxu1 }
 0x37e   : > { %v17563_v28 = vpop.f32.mrf.mxu0  ;;  %v17566_v47 = vadd.f32 %v13905_v22, %v17453_v35 }
 0x37f   : > { %20051 = vst [vmem:[#allocation37_spill] sm:$0xff] %v17563_v28  ;;  %v4651_v10 = vpop.f32.mrf.mxu1 }
 0x380   : > { %20052 = vst [vmem:[#allocation39_spill] sm:$0xff] %v17566_v47  ;;  %v17569_v50 = vpop.f32.mrf.mxu0  ;;  %v17572_v31 = vadd.f32 %v4651_v10, %v17456_v34 }
 0x381   : > { %20053 = vst [vmem:[#allocation70_spill] sm:$0xff] %v17569_v50  ;;  %v13906_v59 = vpop.f32.mrf.mxu1 }
 0x382   : > { %v17574_v23 = vpop.f32.mrf.mxu0  ;;  %v17577_v52 = vadd.f32 %v13906_v59, %v17463_v56 }
 0x383   : > { %20054 = vst [vmem:[#allocation71_spill] sm:$0xff] %v17574_v23  ;;  %v17579_v11 = vpop.f32.mrf.mxu1 }
 0x384   : > { %20055 = vst [vmem:[#allocation78_spill] sm:$0xff] %v17577_v52  ;;  %20056 = vst [vmem:[#allocation40_spill] sm:$0xff] %v17579_v11  ;;  %v17581_v28 = vpop.f32.mrf.mxu0 }
 0x385   : > { %20057 = vst [vmem:[#allocation41_spill] sm:$0xff] %v17581_v28  ;;  %v13909_v35 = vpop.f32.mrf.mxu1 }
 0x386   : > { %v17583_v22 = vpop.f32.mrf.mxu0  ;;  %v17586_v62 = vadd.f32 %v13909_v35, %v17470_v49 }
 0x387   : > { %20058 = vst [vmem:[#allocation42_spill] sm:$0xff] %v17583_v22  ;;  %v4667_v50 = vpop.f32.mrf.mxu1 }
 0x388   : > { %20059 = vst [vmem:[#allocation43_spill] sm:$0xff] %v17586_v62  ;;  %v17588_v47 = vpop.f32.mrf.mxu0  ;;  %v17591_v34 = vadd.f32 %v4667_v50, %v17473_v19 }
 0x389   : > { %20060 = vst [vmem:[#allocation46_spill] sm:$0xff] %v17588_v47  ;;  %v13910_v10 = vpop.f32.mrf.mxu1 }
 0x38a   : > { %20061 = vst [vmem:[#allocation81_spill] sm:$0xff] %v17591_v34  ;;  %v17593_v23 = vpop.f32.mrf.mxu0  ;;  %v17596_v56 = vadd.f32 %v13910_v10, %v17480_v63 }
 0x38b   : > { %20062 = vst [vmem:[#allocation44_spill] sm:$0xff] %v17593_v23  ;;  %v17598_v59 = vpop.f32.mrf.mxu1 }
 0x38c   : > { %20063 = vst [vmem:[#allocation45_spill] sm:$0xff] %v17596_v56  ;;  %20064 = vst [vmem:[#allocation73_spill] sm:$0xff] %v17598_v59  ;;  %v17600_v28 = vpop.f32.mrf.mxu0 }
 0x38d   : > { %20065 = vst [vmem:[#allocation74_spill] sm:$0xff] %v17600_v28  ;;  %v13913_v22 = vpop.f32.mrf.mxu1 }
 0x38e   : > { %v17602_v52 = vpop.f32.mrf.mxu0  ;;  %v17605_v49 = vadd.f32 %v13913_v22, %v17483_v32 }
 0x38f   : > { %20066 = vst [vmem:[#allocation47_spill] sm:$0xff] %v17602_v52  ;;  %v4683_v35 = vpop.f32.mrf.mxu1 }
 0x390   : > { %20067 = vst [vmem:[#allocation76_spill] sm:$0xff] %v17605_v49  ;;  %v17607_v47 = vpop.f32.mrf.mxu0  ;;  %v17610_v19 = vadd.f32 %v4683_v35, %v17486_v41 }
 0x391   : > { %20068 = vst [vmem:[#allocation77_spill] sm:$0xff] %v17607_v47  ;;  %v13914_v50 = vpop.f32.mrf.mxu1 }
 0x392   : > { %20069 = vst [vmem:[#allocation48_spill] sm:$0xff] %v17610_v19  ;;  %v17612_v23 = vpop.f32.mrf.mxu0  ;;  %v17615_v63 = vadd.f32 %v13914_v50, %v17493_v13 }
 0x393   : > { %20070 = vst [vmem:[#allocation49_spill] sm:$0xff] %v17612_v23  ;;  %v17617_v10 = vpop.f32.mrf.mxu1 }
 0x394   : > { %20071 = vst [vmem:[#allocation54_spill] sm:$0xff] %v17615_v63  ;;  %20072 = vst [vmem:[#allocation25_spill] sm:$0xff] %v17617_v10  ;;  %v17619_v28 = vpop.f32.mrf.mxu0 }
 0x395   : > { %20073 = vst [vmem:[#allocation64_spill] sm:$0xff] %v17619_v28  ;;  %v13917_v52 = vpop.f32.mrf.mxu1 }
 0x396   : > { %v17621_v56 = vpop.f32.mrf.mxu0  ;;  %v17624_v32 = vadd.f32 %v13917_v52, %v17496_v9 }
 0x397   : > { %20074 = vst [vmem:[#allocation79_spill] sm:$0xff] %v17621_v56  ;;  %v4699_v22 = vpop.f32.mrf.mxu1 }
 0x398   : > { %20075 = vst [vmem:[#allocation80_spill] sm:$0xff] %v17624_v32  ;;  %v17626_v47 = vpop.f32.mrf.mxu0  ;;  %v17629_v41 = vadd.f32 %v4699_v22, %v17499_v7 }
 0x399   : > { %20076 = vst [vmem:[#allocation82_spill] sm:$0xff] %v17626_v47  ;;  %v13918_v35 = vpop.f32.mrf.mxu1 }
 0x39a   : > { %20077 = vst [vmem:[#allocation83_spill] sm:$0xff] %v17629_v41  ;;  %v17631_v23 = vpop.f32.mrf.mxu0  ;;  %v17634_v13 = vadd.f32 %v13918_v35, %v17506_v24 }
 0x39b   : > { %20078 = vst [vmem:[#allocation50_spill] sm:$0xff] %v17631_v23  ;;  %v17636_v50 = vpop.f32.mrf.mxu1 }
 0x39c   : > { %20079 = vst [vmem:[#allocation51_spill] sm:$0xff] %v17634_v13  ;;  %20080 = vst [vmem:[#allocation52_spill] sm:$0xff] %v17636_v50  ;;  %v17638_v28 = vpop.f32.mrf.mxu0 }
 0x39d   : > { %20081 = vst [vmem:[#allocation53_spill] sm:$0xff] %v17638_v28  ;;  %v13921_v56 = vpop.f32.mrf.mxu1 }
 0x39e   : > { %v17640_v10 = vpop.f32.mrf.mxu0  ;;  %v17643_v9 = vadd.f32 %v13921_v56, %v17509_v16 }
 0x39f   : > { %20082 = vst [vmem:[#allocation55_spill] sm:$0xff] %v17640_v10  ;;  %v4715_v52 = vpop.f32.mrf.mxu1  ;;  %v17659_v10 = vld [vmem:[#allocation5 + $0x158] sm:$0xff]  }
 0x3a0   : > { %20083 = vst [vmem:[#allocation56_spill] sm:$0xff] %v17643_v9  ;;  %v17645_v47 = vpop.f32.mrf.mxu0  ;;  %v17648_v7 = vadd.f32 %v4715_v52, %v17512_v51  ;;  %20090 = vst [vmem:[#allocation61_spill] sm:$0xff] %v17659_v10  ;;  %14147 = vmatprep.subr.bf16.mxu1 %v17659_v10 }
 0x3a1   : > { %20084 = vst [vmem:[#allocation57_spill] sm:$0xff] %v17645_v47  ;;  %v13922_v22 = vpop.f32.mrf.mxu1 }
 0x3a2   : > { %20085 = vst [vmem:[#allocation62_spill] sm:$0xff] %v17648_v7  ;;  %v17650_v23 = vpop.f32.mrf.mxu0  ;;  %v17653_v24 = vadd.f32 %v13922_v22, %v17519_v17 }
 0x3a3   : > { %20086 = vst [vmem:[#allocation84_spill] sm:$0xff] %v17650_v23  ;;  %v17655_v35 = vpop.f32.mrf.mxu1 }
 0x3a4   : > { %20087 = vst [vmem:[#allocation58_spill] sm:$0xff] %v17653_v24  ;;  %20088 = vst [vmem:[#allocation59_spill] sm:$0xff] %v17655_v35  ;;  %v17657_v28 = vpop.f32.mrf.mxu0 }
 0x3a5   : > { %20089 = vst [vmem:[#allocation60_spill] sm:$0xff] %v17657_v28  ;;  %v13961_v16 = vpop.f32.mrf.mxu1 }
 0x3a6   : > { %v13993_v56 = vpop.f32.mrf.mxu0 }
 0x3a7   : > { %v5167_v47 = vpop.f32.mrf.mxu1 }
 0x3a8   : > { %v17662_v9 = vpop.f32.mrf.mxu0 }
 0x3a9   : > { %v13962_v51 = vpop.f32.mrf.mxu1 }
 0x3aa   : > { %v17664_v7 = vpop.f32.mrf.mxu0 }
 0x3ab   : > { %v5170_v52 = vpop.f32.mrf.mxu1 }
 0x3ac   : > { %v17670_v22 = vpop.f32.mrf.mxu0 }
 0x3ad   : > { %v17666_v23 = vpop.f32.mrf.mxu1 }
 0x3ae   : > { %v17676_v35 = vpop.f32.mrf.mxu0 }
 0x3af   : > { %v17668_v17 = vpop.f32.mrf.mxu1 }
 0x3b0   : > { %v17682_v10 = vpop.f32.mrf.mxu0 }
 0x3b1   : > { %v17672_v28 = vpop.f32.mrf.mxu1 }
 0x3b2   : > { %v17688_v63 = vpop.f32.mrf.mxu0 }
 0x3b3   : > { %v17674_v24 = vpop.f32.mrf.mxu1  ;;  %20095 = vst [vmem:[#allocation67_spill] sm:$0xff] %v17688_v63 }
 0x3b4   : > { %v17694_v34 = vpop.f32.mrf.mxu0 }
 0x3b5   : > { %v17678_v13 = vpop.f32.mrf.mxu1 }
 0x3b6   : > { %20091 = vst [vmem:[#allocation63_spill] sm:$0xff] %v17678_v13  ;;  %v17700_v13 = vpop.f32.mrf.mxu0 }
 0x3b7   : > { %v17680_v41 = vpop.f32.mrf.mxu1  ;;  %20100 = vst [vmem:[#allocation88_spill] sm:$0xff] %v17700_v13 }
 0x3b8   : > { %20092 = vst [vmem:[#allocation20_spill] sm:$0xff] %v17680_v41 }
 0x3b9   : > { %v17684_v50 = vpop.f32.mrf.mxu1 }
 0x3ba   : > { %20093 = vst [vmem:[#allocation66_spill] sm:$0xff] %v17684_v50  ;;  %v17706_v50 = vpop.f32.mrf.mxu0 }
 0x3bb   : > { %v17686_v32 = vpop.f32.mrf.mxu1  ;;  %20103 = vst [vmem:[#allocation91_spill] sm:$0xff] %v17706_v50 }
 0x3bc   : > { %20094 = vst [vmem:[#allocation72_spill] sm:$0xff] %v17686_v32 }
 0x3bd   : > { %v17690_v19 = vpop.f32.mrf.mxu1 }
 0x3be   : > { %20096 = vst [vmem:[#allocation31_spill] sm:$0xff] %v17690_v19  ;;  %v17712_v19 = vpop.f32.mrf.mxu0 }
 0x3bf   : > { %v17692_v49 = vpop.f32.mrf.mxu1  ;;  %20106 = vst [vmem:[#allocation94_spill] sm:$0xff] %v17712_v19 }
 0x3c0   : > { %20097 = vst [vmem:[#allocation85_spill] sm:$0xff] %v17692_v49  ;;  %v17720_v13 = vpop.f32.mrf.mxu0 }
 0x3c1   : > { %v17696_v62 = vpop.f32.mrf.mxu1 }
 0x3c2   : > { %20098 = vst [vmem:[#allocation86_spill] sm:$0xff] %v17696_v62  ;;  %v3829_v62 = vadd.f32 %v17316_v6, %v17314_v58  ;;  %v3845_v58 = vadd.f32 %v17334_v54, %v17332_v46  ;;  %v3861_v46 = vadd.f32 %v17351_v18, %v17349_v42 }
 0x3c3   : > { %v17698_v59 = vpop.f32.mrf.mxu1 }
 0x3c4   : > { %20099 = vst [vmem:[#allocation87_spill] sm:$0xff] %v17698_v59  ;;  %v4191_v42 = vadd.f32 %v17459_v43, %v3861_v46 }
 0x3c5   : > { %v17702_v41 = vpop.f32.mrf.mxu1 }
 0x3c6   : > { %20101 = vst [vmem:[#allocation89_spill] sm:$0xff] %v17702_v41  ;;  %v4183_v41 = vadd.f32 %v17425_v30, %v3829_v62  ;;  %v5004_v30 = vadd.f32 %v17526_v45, %v17529_v57  ;;  %v3877_v45 = vadd.f32 %v17370_v1, %v17368_v38  ;;  %v3893_v57 = vadd.f32 %v17384_v61, %v17382_v39 }
 0x3c7   : > { %v17704_v11 = vpop.f32.mrf.mxu1  ;;  %v3925_v38 = vadd.f32 %v17412_v25, %v17410_v48  ;;  %v5010_v1 = vadd.f32 %v17540_v36, %v17544_v3 }
 0x3c8   : > { %20102 = vst [vmem:[#allocation90_spill] sm:$0xff] %v17704_v11 }
 0x3c9   : > { %v17708_v32 = vpop.f32.mrf.mxu1  ;;  %v5284_v48 = vadd.f32 %v17666_v23, %v5010_v1 }
 0x3ca   : > { %20104 = vst [vmem:[#allocation92_spill] sm:$0xff] %v17708_v32  ;;  %v17727_v32 = vpop.f32.mrf.mxu0 }
 0x3cb   : > { %v17710_v63 = vpop.f32.mrf.mxu1 }
 0x3cc   : > { %20105 = vst [vmem:[#allocation93_spill] sm:$0xff] %v17710_v63  ;;  %v4457_v63 = vadd.f32 %v17427_v0, %v4183_v41  ;;  %v4187_v0 = vadd.f32 %v17442_v40, %v3845_v58 }
 0x3cd   : > { %v17714_v49 = vpop.f32.mrf.mxu1 }
 0x3ce   : > { %20107 = vst [vmem:[#allocation95_spill] sm:$0xff] %v17714_v49  ;;  %v5006_v49 = vadd.f32 %v17521_v26, %v17524_v44  ;;  %v4731_v6 = vadd.f32 %v17536_v55, %v4457_v63  ;;  %v5007_v26 = vadd.f32 %v17531_v2, %v17534_v12  ;;  %v5278_v44 = vadd.f32 %v5167_v47, %v5004_v30  ;;  %v17763_v47 = vld [vmem:[#allocation8 + $0x1] ss:$0 sm:$0xff] }
 0x3cf   : > { %v17718_v59 = vpop.f32.mrf.mxu1  ;;  %v3909_v2 = vadd.f32 %v17398_v15, %v17396_v14  ;;  %v4461_v12 = vadd.f32 %v17444_v37, %v4187_v0  ;;  %v4199_v14 = vadd.f32 %v17489_v20, %v3893_v57  ;;  %v5008_v15 = vadd.f32 %v17547_v33, %v17550_v8  ;;  %v20115_v57 = vld [vmem:[#allocation39_spill] sm:$0xff] }
 0x3d0   : > { %20108 = vst [vmem:[#allocation96_spill] sm:$0xff] %v17718_v59  ;;  %v5280_v62 = vadd.f32 %v13961_v16, %v5006_v49  ;;  %v5005_v54 = vadd.f32 %v17538_v4, %v4731_v6  ;;  %v5281_v49 = vadd.f32 %v13962_v51, %v5007_v26  ;;  %v5552_v39 = vadd.f32 %v17662_v9, %v5278_v44  ;;  %v20111_v6 = vld [vmem:[#allocation33_spill] sm:$0xff]  ;;  %v20113_v44 = vld [vmem:[#allocation34_spill] sm:$0xff] }
 0x3d1   : > { %v17723_v11 = vpop.f32.mrf.mxu1  ;;  %v4195_v16 = vadd.f32 %v17476_v21, %v3877_v45  ;;  %v4735_v37 = vadd.f32 %v17557_v5, %v4461_v12  ;;  %v4465_v9 = vadd.f32 %v17461_v53, %v4191_v42  ;;  %v4203_v21 = vadd.f32 %v17502_v60, %v3909_v2  ;;  %v20112_v53 = vld [vmem:[#allocation75_spill] sm:$0xff] }
 0x3d2   : > { %v5554_v40 = vadd.f32 %v13993_v56, %v5280_v62  ;;  %v5279_v18 = vadd.f32 %v5170_v52, %v5005_v54  ;;  %v5555_v56 = vadd.f32 %v17664_v7, %v5281_v49  ;;  %v5011_v20 = vadd.f32 %v17552_v27, %v17555_v29  ;;  %v20110_v52 = vld [vmem:[#allocation32_spill] sm:$0xff]  ;;  %v20114_v54 = vld [vmem:[#allocation35_spill] sm:$0xff] }
 0x3d3   : > { %v17725_v50 = vpop.f32.mrf.mxu1  ;;  %v5282_v5 = vadd.f32 %v17668_v17, %v5008_v15  ;;  %v4469_v58 = vadd.f32 %v20110_v52, %v4195_v16  ;;  %v17789_v30 = vadd.f32 %v20111_v6, %v4199_v14  ;;  %v5009_v62 = vadd.f32 %v20112_v53, %v4735_v37  ;;  %v20120_v14 = vld [vmem:[#allocation63_spill] sm:$0xff] }
 0x3d4   : > { %20109 = vst [vmem:[#allocation97_spill] sm:$0xff] %v17725_v50  ;;  %v17741_v50 = vpop.f32.mrf.mxu0  ;;  %v5553_v8 = vadd.f32 %v17670_v22, %v5279_v18  ;;  %v5285_v60 = vadd.f32 %v17672_v28, %v5011_v20  ;;  %v5558_v27 = vadd.f32 %v17676_v35, %v5284_v48  ;;  %v17799_v46 = vadd.f32 %v20113_v44, %v4203_v21  ;;  %v20123_v21 = vld [vmem:[#allocation71_spill] sm:$0xff] }
 0x3d5   : > { %v17730_v19 = vpop.f32.mrf.mxu1  ;;  %v17802_v45 = vadd.f32 %v20114_v54, %v3925_v38  ;;  %v5283_v49 = vadd.f32 %v17674_v24, %v5009_v62  ;;  %v5556_v2 = vadd.f32 %v17682_v10, %v5282_v5  ;;  %v20127_v62 = vld [vmem:[#allocation41_spill] sm:$0xff] }
 0x3d6   : > { %v17757_v63 = vpop.f32.mrf.mxu0 }
 0x3d7   : > { %v17737_v59 = vpop.f32.mrf.mxu1 }
 0x3d8   : > { %v17777_v25 = vpop.f32.mrf.mxu0 }
 0x3d9   : > { %v17744_v41 = vpop.f32.mrf.mxu1 }
 0x3da   : > { %v17794_v29 = vpop.f32.mrf.mxu0 }
 0x3db   : > { %v17751_v55 = vpop.f32.mrf.mxu1 }
 0x3dc   : > { %v17815_v24 = vpop.f32.mrf.mxu0 }
 0x3dd   : > { %v14025_v4 = vpop.f32.mrf.mxu1 }
 0x3de   : > { %v5828_v61 = vadd.f32 %v14025_v4, %v5554_v40  ;;  %v20116_v40 = vld [vmem:[#allocation37_spill] sm:$0xff]  ;;  %v20117_v4 = vld [vmem:[#allocation70_spill] sm:$0xff] }
 0x3df   : > { %v5715_v43 = vpop.f32.mrf.mxu1  ;;  %v5014_v28 = vadd.f32 %v20116_v40, %v20115_v57  ;;  %v5012_v1 = vadd.f32 %v20117_v4, %v17572_v31  ;;  %v20124_v31 = vld [vmem:[#allocation73_spill] sm:$0xff]  ;;  %v20133_v57 = vld [vmem:[#allocation88_spill] sm:$0xff]  ;;  %v20136_v4 = vld [vmem:[#allocation74_spill] sm:$0xff] }
 0x3e0   : > { %v5864_v36 = vadd.f32 %v17763_v47, %v5828_v61  ;;  %v5826_v3 = vadd.f32 %v5715_v43, %v5552_v39  ;;  %v20118_v39 = vld [vmem:[#allocation40_spill] sm:$0xff]  ;;  %v20119_v61 = vld [vmem:[#allocation67_spill] sm:$0xff] }
 0x3e1   : > { %v14026_v33 = vpop.f32.mrf.mxu1  ;;  %v4739_v38 = vadd.f32 %v20118_v39, %v4465_v9  ;;  %v5559_v16 = vadd.f32 %v20119_v61, %v5285_v60  ;;  %v5288_v15 = vadd.f32 %v20120_v14, %v5014_v28  ;;  %v5557_v9 = vadd.f32 %v17694_v34, %v5283_v49  ;;  %v17837_v28 = vpop.f32.mrf.mxu0  ;;  %v20137_v39 = vld [vmem:[#allocation72_spill] sm:$0xff]  ;;  %v20138_v61 = vld [vmem:[#allocation31_spill] sm:$0xff] }
 0x3e2   : > { %v5892_v7 = vmax.f32 %v5864_v36, 0.0  ;;  %v5862_v23 = vadd.f32 %v17763_v47, %v5826_v3  ;;  %v5829_v51 = vadd.f32 %v14026_v33, %v5555_v56  ;;  %v20122_v3 = vld [vmem:[#allocation78_spill] sm:$0xff]  ;;  %v20125_v33 = vld [vmem:[#allocation20_spill] sm:$0xff] }
 0x3e3   : > { %v5718_v0 = vpop.f32.mrf.mxu1  ;;  %v5015_v20 = vadd.f32 %v20123_v21, %v20122_v3  ;;  %v5286_v5 = vadd.f32 %v20125_v33, %v5012_v1  ;;  %v5013_v60 = vadd.f32 %v20127_v62, %v4739_v38  ;;  %v5562_v40 = vadd.f32 %v20133_v57, %v5288_v15  ;;  %v20141_v3 = vld [vmem:[#allocation47_spill] sm:$0xff]  ;;  %v20145_v33 = vld [vmem:[#allocation49_spill] sm:$0xff] }
 0x3e4   : > { %5981 = vst.msk [vmem:[#allocation2 + $0x21] sm:$0xff] %vm386_vm0, %v5892_v7  ;;  %v5890_v17 = vmax.f32 %v5862_v23, 0.0  ;;  %v5865_v22 = vadd.f32 %v17763_v47, %v5829_v51  ;;  %v5827_v26 = vadd.f32 %v5718_v0, %v5553_v8  ;;  %v4743_v8 = vadd.f32 %v20124_v31, %v4469_v58  ;;  %v20128_v0 = vld [vmem:[#allocation43_spill] sm:$0xff]  ;;  %v20130_v58 = vld [vmem:[#allocation81_spill] sm:$0xff] }
 0x3e5   : > { %v14029_v35 = vpop.f32.mrf.mxu1  ;;  %v5287_v38 = vadd.f32 %v20137_v39, %v5013_v60  ;;  %v20143_v31 = vld [vmem:[#allocation77_spill] sm:$0xff] }
 0x3e6   : > { %5979 = vst.msk [vmem:[#allocation2 + $0x11] sm:$0xff] %vm386_vm0, %v5890_v17  ;;  %v5893_v12 = vmax.f32 %v5865_v22, 0.0  ;;  %v5863_v42 = vadd.f32 %v17763_v47, %v5827_v26  ;;  %v5832_v18 = vadd.f32 %v14029_v35, %v5558_v27  ;;  %v20129_v27 = vld [vmem:[#allocation42_spill] sm:$0xff]  ;;  %v5017_v1 = vadd.f32 %v20136_v4, %v4743_v8  ;;  %v20149_v57 = vld [vmem:[#allocation85_spill] sm:$0xff] }
 0x3e7   : > { %v5731_v37 = vpop.f32.mrf.mxu1  ;;  %v5018_v17 = vadd.f32 %v20129_v27, %v20128_v0  ;;  %v20131_v22 = vld [vmem:[#allocation46_spill] sm:$0xff] }
 0x3e8   : > { %v5954_v10 = vsel %vm16525_vm2, %v5893_v12, 0.0  ;;  %v5891_v56 = vmax.f32 %v5863_v42, 0.0  ;;  %v5868_v48 = vadd.f32 %v17763_v47, %v5832_v18  ;;  %v5830_v36 = vadd.f32 %v5731_v37, %v5556_v2  ;;  %v20132_v26 = vld [vmem:[#allocation66_spill] sm:$0xff]  ;;  %v20134_v12 = vld [vmem:[#allocation45_spill] sm:$0xff]  ;;  %v20135_v42 = vld [vmem:[#allocation44_spill] sm:$0xff] }
 0x3e9   : > { %5982 = vst.msk [vmem:[#allocation2 + $0x29] sm:$0xff] %vm386_vm0, %v5954_v10  ;;  %v14030_v7 = vpop.f32.mrf.mxu1  ;;  %v5016_v34 = vadd.f32 %v20131_v22, %v20130_v58  ;;  %v5289_v44 = vadd.f32 %v20132_v26, %v5015_v20  ;;  %v5019_v18 = vadd.f32 %v20135_v42, %v20134_v12  ;;  %v20139_v37 = vld [vmem:[#allocation91_spill] sm:$0xff]  ;;  %v20142_v20 = vld [vmem:[#allocation48_spill] sm:$0xff]  ;;  %v20144_v8 = vld [vmem:[#allocation54_spill] sm:$0xff]  ;;  %v5561_v26 = vadd.f32 %v17720_v13, %v5287_v38 }
 0x3ea   : > { %v5952_v51 = vsel %vm16541_vm3, %v5891_v56, 0.0  ;;  %v5896_v52 = vmax.f32 %v5868_v48, 0.0  ;;  %v5866_v6 = vadd.f32 %v17763_v47, %v5830_v36  ;;  %v5833_v53 = vadd.f32 %v14030_v7, %v5559_v16  ;;  %v20140_v36 = vld [vmem:[#allocation76_spill] sm:$0xff]  ;;  %v20148_v58 = vld [vmem:[#allocation25_spill] sm:$0xff]  ;;  %v20151_v38 = vld [vmem:[#allocation86_spill] sm:$0xff] }
 0x3eb   : > { %5980 = vst.msk [vmem:[#allocation2 + $0x19] sm:$0xff] %vm386_vm0, %v5952_v51  ;;  %v5734_v54 = vpop.f32.mrf.mxu1  ;;  %v5292_v16 = vadd.f32 %v20138_v61, %v5018_v17  ;;  %v5560_v15 = vadd.f32 %v20139_v37, %v5286_v5  ;;  %v5022_v21 = vadd.f32 %v20141_v3, %v20140_v36  ;;  %v17857_v7 = vadd.f32 %v20145_v33, %v20144_v8  ;;  %v20146_v51 = vld [vmem:[#allocation94_spill] sm:$0xff]  ;;  %v20152_v8 = vld [vmem:[#allocation64_spill] sm:$0xff] }
 0x3ec   : > { %5985 = vst.msk [vmem:[#allocation2 + $0x41] sm:$0xff] %vm386_vm0, %v5896_v52  ;;  %v5894_v49 = vmax.f32 %v5866_v6, 0.0  ;;  %v5869_v35 = vadd.f32 %v17763_v47, %v5833_v53  ;;  %v5831_v2 = vadd.f32 %v5734_v54, %v5557_v9  ;;  %v17853_v9 = vadd.f32 %v20143_v31, %v20142_v20  ;;  %v17860_v6 = vpop.f32.mrf.mxu0  ;;  %v14885_v31 = vld [vmem:[#allocation5 + $0x150] sm:$0xff]  }
 0x3ed   : > { %v14033_v14 = vpop.f32.mrf.mxu1  ;;  %v5563_v52 = vadd.f32 %v20146_v51, %v5289_v44  ;;  %v6056_v17 = vld [vmem:[#allocation2 + $0x11] sm:$0xff]  ;;  %v4747_v22 = vadd.f32 %v20148_v58, %v17789_v30  ;;  %v5566_v54 = vadd.f32 %v17727_v32, %v5292_v16  ;;  %v5290_v44 = vadd.f32 %v20149_v57, %v5016_v34  ;;  %v20153_v51 = vld [vmem:[#allocation87_spill] sm:$0xff] }
 0x3ee   : > { %5983 = vst.msk [vmem:[#allocation2 + $0x31] sm:$0xff] %vm386_vm0, %v5894_v49  ;;  %v5897_v10 = vmax.f32 %v5869_v35, 0.0  ;;  %v5867_v56 = vadd.f32 %v17763_v47, %v5831_v2  ;;  %v5836_v48 = vadd.f32 %v14033_v14, %v5562_v40  ;;  %v6009_v49 = vld [vmem:[#allocation2 + $0x10] sm:$0xff]  ;;  %v5293_v32 = vadd.f32 %v20151_v38, %v5019_v18  ;;  %v14883_v18 = vld [vmem:[#allocation5 + $0x140] sm:$0xff]  }
 0x3ef   : > { %v5747_v5 = vpop.f32.mrf.mxu1  ;;  %v5021_v33 = vadd.f32 %v20152_v8, %v4747_v22 }
 0x3f0   : > { %v5958_v62 = vsel %vm16577_vm4, %v5897_v10, 0.0  ;;  %v5895_v60 = vmax.f32 %v5867_v56, 0.0  ;;  %v5872_v0 = vadd.f32 %v17763_v47, %v5836_v48  ;;  %v5834_v27 = vadd.f32 %v5747_v5, %v5560_v15  ;;  %v6059_v35 = vld [vmem:[#allocation2 + $0x29] sm:$0xff]  ;;  %v6058_v15 = vld [vmem:[#allocation2 + $0x21] sm:$0xff]  ;;  %v17882_v56 = vpop.f32.mrf.mxu0  ;;  %v20154_v5 = vld [vmem:[#allocation89_spill] sm:$0xff] }
 0x3f1   : > { %5986 = vst.msk [vmem:[#allocation2 + $0x49] sm:$0xff] %vm386_vm0, %v5958_v62  ;;  %v14034_v40 = vpop.f32.mrf.mxu1  ;;  %v6012_v2 = vld [vmem:[#allocation2 + $0x28] sm:$0xff]  ;;  %v17886_v20 = vpack.c.bf16 %v6059_v35, %v6058_v15  ;;  %v5296_v62 = vadd.f32 %v20154_v5, %v5022_v21 }
 0x3f2   : > { %v5956_v42 = vsel %vm16593_vm5, %v5895_v60, 0.0  ;;  %v5900_v4 = vmax.f32 %v5872_v0, 0.0  ;;  %v5870_v39 = vadd.f32 %v17763_v47, %v5834_v27  ;;  %v5837_v61 = vadd.f32 %v14034_v40, %v5563_v52  ;;  %v6057_v30 = vld [vmem:[#allocation2 + $0x19] sm:$0xff]  ;;  %v20156_v21 = vld [vmem:[#allocation79_spill] sm:$0xff] }
 0x3f3   : > { %v6010_v14 = vld [vmem:[#allocation2 + $0x18] sm:$0xff]  ;;  %v6011_v13 = vld [vmem:[#allocation2 + $0x20] sm:$0xff]  ;;  %5984 = vst.msk [vmem:[#allocation2 + $0x39] sm:$0xff] %vm386_vm0, %v5956_v42  ;;  %v5750_v34 = vpop.f32.mrf.mxu1  ;;  %v17876_v16 = vpack.c.bf16 %v6057_v30, %v6056_v17  ;;  %v5291_v52 = vadd.f32 %v20153_v51, %v5017_v1  ;;  %v5564_v0 = vadd.f32 %v17741_v50, %v5290_v44  ;;  %v20155_v1 = vld [vmem:[#allocation80_spill] sm:$0xff]  ;;  %v5567_v50 = vadd.f32 %v17757_v63, %v5293_v32 }
 0x3f4   : > { %v17878_v37 = vpack.c.bf16 %v6010_v14, %v6009_v49  ;;  %v17880_v10 = vpack.c.bf16 %v6012_v2, %v6011_v13  ;;  %5989 = vst.msk [vmem:[#allocation2 + $0x61] sm:$0xff] %vm386_vm0, %v5900_v4  ;;  %v5898_v48 = vmax.f32 %v5870_v39, 0.0  ;;  %v5873_v36 = vadd.f32 %v17763_v47, %v5837_v61  ;;  %v20158_v44 = vld [vmem:[#allocation36_spill] sm:$0xff]  ;;  %v20159_v49 = vld [vmem:[#allocation61_spill] sm:$0xff]  ;;  %v20161_v13 = vld [vmem:[#allocation90_spill] sm:$0xff] }
 0x3f5   : > { %v5835_v3 = vadd.f32 %v5750_v34, %v5561_v26  ;;  %v14037_v60 = vpop.f32.mrf.mxu1  ;;  %14056 = vmatmul.mubr.msk.bf16.vlgmr.msra.gmra.mxu0 %vm386_vm0, %v17876_v16  ;;  %v5026_v22 = vadd.f32 %v20156_v21, %v20155_v1  ;;  %v20157_v26 = vld [vmem:[#allocation52_spill] sm:$0xff]  ;;  %v17916_v63 = vld [vmem:[#allocation5 + $0x178] sm:$0xff]   ;;  %v5565_v30 = vadd.f32 %v17777_v25, %v5291_v52  ;;  %v5570_v14 = vadd.f32 %v17794_v29, %v5296_v62 }
 0x3f6   : > { %14088 = vmatmul.mubr.msk.bf16.vlgmr.msra.gmra.mxu1 %vm386_vm0, %v17878_v37  ;;  %5987 = vst.msk [vmem:[#allocation2 + $0x51] sm:$0xff] %vm386_vm0, %v5898_v48  ;;  %v5901_v27 = vmax.f32 %v5873_v36, 0.0  ;;  %v5840_v58 = vadd.f32 %v14037_v60, %v5566_v54  ;;  %14059 = vmatprep.mubr.msk.bf16.mxu0 %vm386_vm0, %v17886_v20  ;;  %v4751_v57 = vadd.f32 %v20157_v26, %v17799_v46  ;;  %v17909_v54 = vpop.f32.mrf.mxu0  ;;  %v6060_v61 = vld [vmem:[#allocation2 + $0x31] sm:$0xff]  ;;  %v17914_v46 = vld [vmem:[#allocation5 + $0x168] sm:$0xff]  }
 0x3f7   : > { %v5871_v17 = vadd.f32 %v17763_v47, %v5835_v3  ;;  %14091 = vmatprep.mubr.msk.bf16.mxu1 %vm386_vm0, %v17880_v10  ;;  %14116 = vmatpush3.bf16.msra.mxu0 %v20158_v44  ;;  %v5763_v40 = vpop.f32.mrf.mxu1  ;;  %v5294_v38 = vadd.f32 %v20161_v13, %v17853_v9  ;;  %v20162_v32 = vld [vmem:[#allocation92_spill] sm:$0xff]  ;;  %v20169_v13 = vld [vmem:[#allocation51_spill] sm:$0xff] }
 0x3f8   : > { %14148 = vmatpush3.bf16.msra.mxu1 %v20159_v49  ;;  %v5962_v2 = vsel %vm16630_vm6, %v5901_v27, 0.0  ;;  %v5876_v4 = vadd.f32 %v17763_v47, %v5840_v58  ;;  %v5838_v39 = vadd.f32 %v5763_v40, %v5564_v0  ;;  %14117 = vmatprep.subr.bf16.mxu0 %v14883_v18  ;;  %v5297_v34 = vadd.f32 %v20162_v32, %v17857_v7  ;;  %v6013_v48 = vld [vmem:[#allocation2 + $0x30] sm:$0xff]  ;;  %v6016_v3 = vld [vmem:[#allocation2 + $0x48] sm:$0xff]  ;;  %v17935_v58 = vpop.f32.mrf.mxu0  ;;  %v20170_v32 = vld [vmem:[#allocation50_spill] sm:$0xff] }
 0x3f9   : > { %v5899_v42 = vmax.f32 %v5871_v17, 0.0  ;;  %14149 = vmatprep.subr.bf16.mxu1 %v14885_v31  ;;  %5990 = vst.msk [vmem:[#allocation2 + $0x69] sm:$0xff] %vm386_vm0, %v5962_v2  ;;  %v14038_v15 = vpop.f32.mrf.mxu1  ;;  %v6063_v36 = vld [vmem:[#allocation2 + $0x49] sm:$0xff]  ;;  %v6062_v27 = vld [vmem:[#allocation2 + $0x41] sm:$0xff]  ;;  %v20165_v49 = vld [vmem:[#allocation93_spill] sm:$0xff] }
 0x3fa   : > { %v5904_v5 = vmax.f32 %v5876_v4, 0.0  ;;  %v5874_v25 = vadd.f32 %v17763_v47, %v5838_v39  ;;  %v5841_v52 = vadd.f32 %v14038_v15, %v5567_v50  ;;  %v6061_v29 = vld [vmem:[#allocation2 + $0x39] sm:$0xff]  ;;  %v17939_v50 = vpack.c.bf16 %v6063_v36, %v6062_v27  ;;  %v20164_v44 = vld [vmem:[#allocation68_spill] sm:$0xff] }
 0x3fb   : > { %v5960_v51 = vsel %vm16654_vm7, %v5899_v42, 0.0  ;;  %v6014_v62 = vld [vmem:[#allocation2 + $0x38] sm:$0xff]  ;;  %v6015_v60 = vld [vmem:[#allocation2 + $0x40] sm:$0xff]  ;;  %v5766_v9 = vpop.f32.mrf.mxu1  ;;  %v17929_v7 = vpack.c.bf16 %v6061_v29, %v6060_v61  ;;  %14118 = vmatpush3.bf16.msra.mxu0 %v14883_v18  ;;  %v4481_v40 = vadd.f32 %v20164_v44, %v17802_v45  ;;  %v5295_v18 = vadd.f32 %v20165_v49, %v5021_v33 }
 0x3fc   : > { %5988 = vst.msk [vmem:[#allocation2 + $0x59] sm:$0xff] %vm386_vm0, %v5960_v51  ;;  %v17931_v0 = vpack.c.bf16 %v6014_v62, %v6013_v48  ;;  %v17933_v17 = vpack.c.bf16 %v6016_v3, %v6015_v60  ;;  %14150 = vmatpush3.bf16.msra.mxu1 %v14885_v31  ;;  %5993 = vst.msk [vmem:[#allocation2 + $0x81] sm:$0xff] %vm386_vm0, %v5904_v5  ;;  %v5902_v1 = vmax.f32 %v5874_v25, 0.0  ;;  %14179 = vmatprep.subr.bf16.mxu0 %v17914_v46  ;;  %v20166_v31 = vld [vmem:[#allocation95_spill] sm:$0xff]  ;;  %v20168_v33 = vld [vmem:[#allocation82_spill] sm:$0xff]  ;;  %v5524_v3 = vpop.f32.mrf.mxu0 }
 0x3fd   : > { %v5877_v21 = vadd.f32 %v17763_v47, %v5841_v52  ;;  %v5839_v26 = vadd.f32 %v5766_v9, %v5565_v30  ;;  %14211 = vmatprep.subr.bf16.mxu1 %v17916_v63  ;;  %v5300_v2 = vadd.f32 %v20166_v31, %v5026_v22  ;;  %v14041_v42 = vpop.f32.mrf.mxu1  ;;  %14060 = vmatmul.mubr.msk.bf16.gmra.mxu0 %vm386_vm0, %v17929_v7  ;;  %v20167_v45 = vld [vmem:[#allocation83_spill] sm:$0xff]  ;;  %v20171_v48 = vld [vmem:[#allocation53_spill] sm:$0xff]  ;;  %v20173_v62 = vld [vmem:[#allocation56_spill] sm:$0xff] }
 0x3fe   : > { %14092 = vmatmul.mubr.msk.bf16.gmra.mxu1 %vm386_vm0, %v17931_v0  ;;  %v5568_v4 = vadd.f32 %v17815_v24, %v5294_v38  ;;  %5991 = vst.msk [vmem:[#allocation2 + $0x71] sm:$0xff] %vm386_vm0, %v5902_v1  ;;  %v5844_v30 = vadd.f32 %v14041_v42, %v5570_v14  ;;  %14063 = vmatprep.mubr.msk.bf16.mxu0 %vm386_vm0, %v17939_v50  ;;  %v6064_v29 = vld [vmem:[#allocation2 + $0x51] sm:$0xff]  ;;  %v20174_v60 = vld [vmem:[#allocation55_spill] sm:$0xff]  ;;  %v14017_v49 = vpop.f32.mrf.mxu0 }
 0x3ff   : > { %v5905_v39 = vmax.f32 %v5877_v21, 0.0  ;;  %v5875_v61 = vadd.f32 %v17763_v47, %v5839_v26  ;;  %14095 = vmatprep.mubr.msk.bf16.mxu1 %vm386_vm0, %v17933_v17  ;;  %v5024_v22 = vadd.f32 %v20168_v33, %v20167_v45  ;;  %v5027_v15 = vadd.f32 %v20170_v32, %v20169_v13  ;;  %v5779_v36 = vpop.f32.mrf.mxu1 }
 0x400   : > { %v5025_v24 = vadd.f32 %v20171_v48, %v4751_v57  ;;  %v5571_v38 = vadd.f32 %v17837_v28, %v5297_v34  ;;  %v5880_v25 = vadd.f32 %v17763_v47, %v5844_v30  ;;  %v5842_v52 = vadd.f32 %v5779_v36, %v5568_v4  ;;  %v20175_v57 = vld [vmem:[#allocation96_spill] sm:$0xff] }
 0x401   : > { %v5966_v14 = vsel %vm16713_vm8, %v5905_v39, 0.0  ;;  %v5903_v5 = vmax.f32 %v5875_v61, 0.0  ;;  %v5030_v9 = vadd.f32 %v20174_v60, %v20173_v62  ;;  %v5569_v27 = vadd.f32 %v17860_v6, %v5295_v18  ;;  %v14042_v28 = vpop.f32.mrf.mxu1  ;;  %v6017_v34 = vld [vmem:[#allocation2 + $0x50] sm:$0xff]  ;;  %v6020_v44 = vld [vmem:[#allocation2 + $0x68] sm:$0xff]  ;;  %v5537_v62 = vpop.f32.mrf.mxu0 }
 0x402   : > { %v5574_v1 = vadd.f32 %v17882_v56, %v5300_v2  ;;  %v5298_v21 = vadd.f32 %v20175_v57, %v5024_v22  ;;  %5994 = vst.msk [vmem:[#allocation2 + $0x89] sm:$0xff] %vm386_vm0, %v5966_v14  ;;  %v6067_v26 = vld [vmem:[#allocation2 + $0x69] sm:$0xff]  ;;  %v5908_v4 = vmax.f32 %v5880_v25, 0.0  ;;  %v5878_v39 = vadd.f32 %v17763_v47, %v5842_v52  ;;  %v6066_v22 = vld [vmem:[#allocation2 + $0x61] sm:$0xff] }
 0x403   : > { %v5964_v42 = vsel %vm16741_vm9, %v5903_v5, 0.0  ;;  %v5845_v61 = vadd.f32 %v14042_v28, %v5571_v38  ;;  %v6065_v30 = vld [vmem:[#allocation2 + $0x59] sm:$0xff]  ;;  %v5301_v56 = vadd.f32 %v17723_v11, %v5027_v15  ;;  %v5782_v2 = vpop.f32.mrf.mxu1  ;;  %v17986_v36 = vpack.c.bf16 %v6067_v26, %v6066_v22  ;;  %v20177_v14 = vld [vmem:[#allocation59_spill] sm:$0xff]  ;;  %v20182_v28 = vld [vmem:[#allocation84_spill] sm:$0xff] }
 0x404   : > { %v6018_v6 = vld [vmem:[#allocation2 + $0x58] sm:$0xff]  ;;  %v6019_v18 = vld [vmem:[#allocation2 + $0x60] sm:$0xff]  ;;  %5992 = vst.msk [vmem:[#allocation2 + $0x79] sm:$0xff] %vm386_vm0, %v5964_v42  ;;  %v17978_v45 = vpack.c.bf16 %v6065_v30, %v6064_v29  ;;  %5997 = vst.msk [vmem:[#allocation2 + $0xa1] sm:$0xff] %vm386_vm0, %v5908_v4  ;;  %v5906_v32 = vmax.f32 %v5878_v39, 0.0  ;;  %v5843_v38 = vadd.f32 %v5782_v2, %v5569_v27  ;;  %v4755_v11 = vadd.f32 %v20177_v14, %v4481_v40 }
 0x405   : > { %v17980_v33 = vpack.c.bf16 %v6018_v6, %v6017_v34  ;;  %v17982_v13 = vpack.c.bf16 %v6020_v44, %v6019_v18  ;;  %v5881_v48 = vadd.f32 %v17763_v47, %v5845_v61  ;;  %v20178_v15 = vld [vmem:[#allocation97_spill] sm:$0xff]  ;;  %v5304_v25 = vadd.f32 %v17730_v19, %v5030_v9  ;;  %v14045_v52 = vpop.f32.mrf.mxu1  ;;  %v20179_v19 = vld [vmem:[#allocation62_spill] sm:$0xff]  ;;  %v20184_v61 = vld [vmem:[#allocation60_spill] sm:$0xff] }
 0x406   : > { %v5299_v5 = vadd.f32 %v20178_v15, %v5025_v24  ;;  %14064 = vmatmul.mubr.msk.bf16.gmra.mxu0 %vm386_vm0, %v17978_v45  ;;  %v5572_v29 = vadd.f32 %v17909_v54, %v5298_v21  ;;  %5995 = vst.msk [vmem:[#allocation2 + $0x91] sm:$0xff] %vm386_vm0, %v5906_v32  ;;  %v5879_v27 = vadd.f32 %v17763_v47, %v5843_v38  ;;  %v20180_v24 = vld [vmem:[#allocation57_spill] sm:$0xff]  ;;  %v20181_v57 = vld [vmem:[#allocation58_spill] sm:$0xff] }
 0x407   : > { %14096 = vmatmul.mubr.msk.bf16.gmra.mxu1 %vm386_vm0, %v17980_v33  ;;  %v5909_v60 = vmax.f32 %v5881_v48, 0.0  ;;  %v5848_v40 = vadd.f32 %v14045_v52, %v5574_v1  ;;  %14067 = vmatprep.mubr.msk.bf16.mxu0 %vm386_vm0, %v17986_v36  ;;  %v5028_v9 = vadd.f32 %v20180_v24, %v20179_v19  ;;  %v5031_v34 = vadd.f32 %v20182_v28, %v20181_v57  ;;  %v5795_v21 = vpop.f32.mrf.mxu1  ;;  %v6068_v39 = vld [vmem:[#allocation2 + $0x71] sm:$0xff]  ;;  %v14018_v48 = vpop.f32.mrf.mxu0 }
 0x408   : > { %14099 = vmatprep.mubr.msk.bf16.mxu1 %vm386_vm0, %v17982_v13  ;;  %v5575_v54 = vadd.f32 %v17935_v58, %v5301_v56  ;;  %v5907_v42 = vmax.f32 %v5879_v27, 0.0  ;;  %v5846_v4 = vadd.f32 %v5795_v21, %v5572_v29  ;;  %v5029_v30 = vadd.f32 %v20184_v61, %v4755_v11  ;;  %v6021_v32 = vld [vmem:[#allocation2 + $0x70] sm:$0xff]  ;;  %v6070_v27 = vld [vmem:[#allocation2 + $0x81] sm:$0xff] }
 0x409   : > { %v5970_v44 = vsel %vm16807_vm10, %v5909_v60, 0.0  ;;  %v5884_v1 = vadd.f32 %v17763_v47, %v5848_v40  ;;  %v5573_v6 = vadd.f32 %v5524_v3, %v5299_v5  ;;  %v5302_v18 = vadd.f32 %v17737_v59, %v5028_v9  ;;  %v14046_v22 = vpop.f32.mrf.mxu1  ;;  %v6071_v58 = vld [vmem:[#allocation2 + $0x89] sm:$0xff] }
 0x40a   : > { %v5578_v2 = vadd.f32 %v14017_v49, %v5304_v25  ;;  %5998 = vst.msk [vmem:[#allocation2 + $0xa9] sm:$0xff] %vm386_vm0, %v5970_v44  ;;  %v6024_v56 = vld [vmem:[#allocation2 + $0x88] sm:$0xff]  ;;  %v5968_v14 = vsel %vm16837_vm11, %v5907_v42, 0.0  ;;  %v5882_v52 = vadd.f32 %v17763_v47, %v5846_v4  ;;  %v5849_v29 = vadd.f32 %v14046_v22, %v5575_v54  ;;  %v5540_v54 = vpop.f32.mrf.mxu0 }
 0x40b   : > { %v5912_v15 = vmax.f32 %v5884_v1, 0.0  ;;  %v6069_v60 = vld [vmem:[#allocation2 + $0x79] sm:$0xff]  ;;  %v5305_v59 = vadd.f32 %v17744_v41, %v5031_v34  ;;  %5996 = vst.msk [vmem:[#allocation2 + $0x99] sm:$0xff] %vm386_vm0, %v5968_v14  ;;  %v5798_v49 = vpop.f32.mrf.mxu1  ;;  %v18026_v57 = vpack.c.bf16 %v6071_v58, %v6070_v27  ;;  %v5303_v41 = vadd.f32 %v17751_v55, %v5029_v30  ;;  %v6074_v27 = vld [vmem:[#allocation2 + $0xa1] sm:$0xff] }
 0x40c   : > { %v6022_v11 = vld [vmem:[#allocation2 + $0x78] sm:$0xff]  ;;  %v6023_v3 = vld [vmem:[#allocation2 + $0x80] sm:$0xff]  ;;  %v18018_v5 = vpack.c.bf16 %v6069_v60, %v6068_v39  ;;  %v5910_v19 = vmax.f32 %v5882_v52, 0.0  ;;  %v5885_v24 = vadd.f32 %v17763_v47, %v5849_v29  ;;  %v5847_v9 = vadd.f32 %v5798_v49, %v5573_v6 }
 0x40d   : > { %v18020_v25 = vpack.c.bf16 %v6022_v11, %v6021_v32  ;;  %v18022_v40 = vpack.c.bf16 %v6024_v56, %v6023_v3  ;;  %6001 = vst.msk [vmem:[#allocation2 + $0xc1] sm:$0xff] %vm386_vm0, %v5912_v15  ;;  %v14049_v28 = vpop.f32.mrf.mxu1  ;;  %v5576_v34 = vadd.f32 %v5537_v62, %v5302_v18  ;;  %v5579_v55 = vadd.f32 %v14018_v48, %v5305_v59  ;;  %v6072_v6 = vld [vmem:[#allocation2 + $0x91] sm:$0xff] }
 0x40e   : > { %14068 = vmatmul.mubr.msk.bf16.gmra.mxu0 %vm386_vm0, %v18018_v5  ;;  %5999 = vst.msk [vmem:[#allocation2 + $0xb1] sm:$0xff] %vm386_vm0, %v5910_v19  ;;  %v5913_v21 = vmax.f32 %v5885_v24, 0.0  ;;  %v5883_v44 = vadd.f32 %v17763_v47, %v5847_v9  ;;  %v5852_v42 = vadd.f32 %v14049_v28, %v5578_v2  ;;  %v5577_v18 = vadd.f32 %v5540_v54, %v5303_v41  ;;  %v6025_v22 = vld [vmem:[#allocation2 + $0x90] sm:$0xff] }
 0x40f   : > { %14100 = vmatmul.mubr.msk.bf16.gmra.mxu1 %vm386_vm0, %v18020_v25  ;;  %14071 = vmatprep.mubr.msk.bf16.mxu0 %vm386_vm0, %v18026_v57  ;;  %v5811_v1 = vpop.f32.mrf.mxu1 }
 0x410   : > { %14103 = vmatprep.mubr.msk.bf16.mxu1 %vm386_vm0, %v18022_v40  ;;  %v5974_v39 = vsel %vm16938_vm12, %v5913_v21, 0.0  ;;  %v5911_v61 = vmax.f32 %v5883_v44, 0.0  ;;  %v5888_v62 = vadd.f32 %v17763_v47, %v5852_v42  ;;  %v5850_v30 = vadd.f32 %v5811_v1, %v5576_v34 }
 0x411   : > { %6002 = vst.msk [vmem:[#allocation2 + $0xc9] sm:$0xff] %vm386_vm0, %v5974_v39  ;;  %v14050_v2 = vpop.f32.mrf.mxu1  ;;  %v6075_v32 = vld [vmem:[#allocation2 + $0xa9] sm:$0xff] }
 0x412   : > { %v6028_v58 = vld [vmem:[#allocation2 + $0xa8] sm:$0xff]  ;;  %v5972_v14 = vsel %vm16957_vm13, %v5911_v61, 0.0  ;;  %v5916_v48 = vmax.f32 %v5888_v62, 0.0  ;;  %v5886_v15 = vadd.f32 %v17763_v47, %v5850_v30  ;;  %v5853_v52 = vadd.f32 %v14050_v2, %v5579_v55  ;;  %v6073_v29 = vld [vmem:[#allocation2 + $0x99] sm:$0xff] }
 0x413   : > { %v6026_v60 = vld [vmem:[#allocation2 + $0x98] sm:$0xff]  ;;  %v6027_v11 = vld [vmem:[#allocation2 + $0xa0] sm:$0xff]  ;;  %6000 = vst.msk [vmem:[#allocation2 + $0xb9] sm:$0xff] %vm386_vm0, %v5972_v14  ;;  %v5814_v3 = vpop.f32.mrf.mxu1  ;;  %v18047_v59 = vpack.c.bf16 %v6073_v29, %v6072_v6  ;;  %v18055_v28 = vpack.c.bf16 %v6075_v32, %v6074_v27 }
 0x414   : > { %v18049_v49 = vpack.c.bf16 %v6026_v60, %v6025_v22  ;;  %v18051_v19 = vpack.c.bf16 %v6028_v58, %v6027_v11  ;;  %6005 = vst.msk [vmem:[#allocation2 + $0xe1] sm:$0xff] %vm386_vm0, %v5916_v48  ;;  %v5914_v24 = vmax.f32 %v5886_v15, 0.0  ;;  %v5889_v9 = vadd.f32 %v17763_v47, %v5853_v52  ;;  %v6078_v32 = vld [vmem:[#allocation2 + $0xc1] sm:$0xff]  ;;  %v6500_v52 = vld [vmem:[#allocation2 + $0xa] sm:$0xff] }
 0x415   : > { %v5851_v41 = vadd.f32 %v5814_v3, %v5577_v18  ;;  %v6076_v55 = vld [vmem:[#allocation2 + $0xb1] sm:$0xff]  ;;  %v6499_v15 = vld [vmem:[#allocation2 + $0x2] sm:$0xff] }
 0x416   : > { %14072 = vmatmul.mubr.msk.bf16.gmra.mxu0 %vm386_vm0, %v18047_v59  ;;  %6003 = vst.msk [vmem:[#allocation2 + $0xd1] sm:$0xff] %vm386_vm0, %v5914_v24  ;;  %v5917_v34 = vmax.f32 %v5889_v9, 0.0  ;;  %v6029_v1 = vld [vmem:[#allocation2 + $0xb0] sm:$0xff]  ;;  %v6527_v24 = vpack.c.bf16 %v6500_v52, %v6499_v15  ;;  %v6511_v52 = vld [vmem:[#allocation2 + $0x62] sm:$0xff] }
 0x417   : > { %14104 = vmatmul.mubr.msk.bf16.gmra.mxu1 %vm386_vm0, %v18049_v49  ;;  %v5887_v54 = vadd.f32 %v17763_v47, %v5851_v41  ;;  %14075 = vmatprep.mubr.msk.bf16.mxu0 %vm386_vm0, %v18055_v28  ;;  %v6501_v9 = vld [vmem:[#allocation2 + $0x12] sm:$0xff]  ;;  %v6502_v41 = vld [vmem:[#allocation2 + $0x1a] sm:$0xff] }
 0x418   : > { %14107 = vmatprep.mubr.msk.bf16.mxu1 %vm386_vm0, %v18051_v19  ;;  %v5978_v44 = vsel %vm16992_vm14, %v5917_v34, 0.0  ;;  %v6079_v39 = vld [vmem:[#allocation2 + $0xc9] sm:$0xff] }
 0x419   : > { %v5915_v42 = vmax.f32 %v5887_v54, 0.0  ;;  %6006 = vst.msk [vmem:[#allocation2 + $0xe9] sm:$0xff] %vm386_vm0, %v5978_v44  ;;  %v6032_v61 = vld [vmem:[#allocation2 + $0xc8] sm:$0xff]  ;;  %v18079_v14 = vpack.c.bf16 %v6079_v39, %v6078_v32  ;;  %v18100_v54 = vpack.c.bf16 %v6502_v41, %v6501_v9  ;;  %v6505_v39 = vld [vmem:[#allocation2 + $0x32] sm:$0xff] }
 0x41a   : > { %v6077_v47 = vld [vmem:[#allocation2 + $0xb9] sm:$0xff]  ;;  %v6504_v34 = vld [vmem:[#allocation2 + $0x2a] sm:$0xff]  ;;  %v6503_v44 = vld [vmem:[#allocation2 + $0x22] sm:$0xff] }
 0x41b   : > { %v5976_v30 = vsel %vm17010_vm15, %v5915_v42, 0.0  ;;  %v6030_v6 = vld [vmem:[#allocation2 + $0xb8] sm:$0xff]  ;;  %v6031_v18 = vld [vmem:[#allocation2 + $0xc0] sm:$0xff]  ;;  %v18073_v2 = vpack.c.bf16 %v6077_v47, %v6076_v55  ;;  %v18102_v42 = vpack.c.bf16 %v6504_v34, %v6503_v44  ;;  %v6508_v47 = vld [vmem:[#allocation2 + $0x4a] sm:$0xff] }
 0x41c   : > { %6004 = vst.msk [vmem:[#allocation2 + $0xd9] sm:$0xff] %vm386_vm0, %v5976_v30  ;;  %v18075_v22 = vpack.c.bf16 %v6030_v6, %v6029_v1  ;;  %v18077_v58 = vpack.c.bf16 %v6032_v61, %v6031_v18  ;;  %v14887_v55 = vld [vmem:[#allocation5 + $0x160] sm:$0xff]   ;;  %v14889_v1 = vld [vmem:[#allocation5 + $0x170] sm:$0xff]   ;;  %v18116_v30 = vld [vmem:[#allocation5 + $0x198] sm:$0xff]  }
 0x41d   : > { %v6080_v48 = vld [vmem:[#allocation2 + $0xd1] sm:$0xff]  ;;  %v6506_v61 = vld [vmem:[#allocation2 + $0x3a] sm:$0xff]  ;;  %v6507_v18 = vld [vmem:[#allocation2 + $0x42] sm:$0xff] }
 0x41e   : > { %14076 = vmatmul.mubr.msk.bf16.gmra.mxu0 %vm386_vm0, %v18073_v2  ;;  %v6033_v60 = vld [vmem:[#allocation2 + $0xd0] sm:$0xff]  ;;  %v18118_v6 = vpack.c.bf16 %v6506_v61, %v6505_v39  ;;  %v18120_v32 = vpack.c.bf16 %v6508_v47, %v6507_v18  ;;  %v6515_v41 = vld [vmem:[#allocation2 + $0x82] sm:$0xff] }
 0x41f   : > { %14108 = vmatmul.mubr.msk.bf16.gmra.mxu1 %vm386_vm0, %v18075_v22  ;;  %14079 = vmatprep.mubr.msk.bf16.mxu0 %vm386_vm0, %v18079_v14  ;;  %v6517_v44 = vld [vmem:[#allocation2 + $0x92] sm:$0xff]  ;;  %v6519_v61 = vld [vmem:[#allocation2 + $0xa2] sm:$0xff] }
 0x420   : > { %14111 = vmatprep.mubr.msk.bf16.mxu1 %vm386_vm0, %v18077_v58  ;;  %v6521_v18 = vld [vmem:[#allocation2 + $0xb2] sm:$0xff] }
 0x423   : > { %v6081_v29 = vld [vmem:[#allocation2 + $0xd9] sm:$0xff] }
 0x424   : > { %v6034_v11 = vld [vmem:[#allocation2 + $0xd8] sm:$0xff]  ;;  %v18089_v3 = vpack.c.bf16 %v6081_v29, %v6080_v48  ;;  %v6512_v48 = vld [vmem:[#allocation2 + $0x6a] sm:$0xff] }
 0x425   : > { %v18091_v27 = vpack.c.bf16 %v6034_v11, %v6033_v60  ;;  %v18134_v29 = vpack.c.bf16 %v6512_v48, %v6511_v52  ;;  %v6513_v60 = vld [vmem:[#allocation2 + $0x72] sm:$0xff]  ;;  %v6514_v11 = vld [vmem:[#allocation2 + $0x7a] sm:$0xff]  ;;  %v6523_v52 = vld [vmem:[#allocation2 + $0xc2] sm:$0xff] }
 0x426   : > { %14080 = vmatmul.mubr.msk.bf16.gmra.mxu0 %vm386_vm0, %v18089_v3  ;;  %v18144_v9 = vpack.c.bf16 %v6514_v11, %v6513_v60  ;;  %v6525_v11 = vld [vmem:[#allocation2 + $0xd2] sm:$0xff] }
 0x427   : > { %14112 = vmatmul.mubr.msk.bf16.gmra.mxu1 %vm386_vm0, %v18091_v27  ;;  %14119 = vmatprep.mubr.msk.bf16.mxu0 %vm386_vm0, %v6527_v24  ;;  %v6516_v24 = vld [vmem:[#allocation2 + $0x8a] sm:$0xff] }
 0x428   : > { %14151 = vmatprep.mubr.msk.bf16.mxu1 %vm386_vm0, %v17878_v37  ;;  %v18114_v37 = vld [vmem:[#allocation5 + $0x188] sm:$0xff]   ;;  %v18146_v34 = vpack.c.bf16 %v6516_v24, %v6515_v41  ;;  %v6526_v24 = vld [vmem:[#allocation2 + $0xda] sm:$0xff] }
 0x429   : > { %v6799_v41 = vld [vmem:[#allocation2 + $0xe0] sm:$0xff] }
 0x42e   : > { %14120 = vmatmul.mubr.msk.bf16.vlgmr.msra.gmra.mxu0 %vm386_vm0, %v18100_v54 }
 0x42f   : > { %14152 = vmatmul.mubr.msk.bf16.vlgmr.msra.gmra.mxu1 %vm386_vm0, %v17880_v10  ;;  %14123 = vmatprep.mubr.msk.bf16.mxu0 %vm386_vm0, %v18102_v42 }
 0x430   : > { %14155 = vmatprep.mubr.msk.bf16.mxu1 %vm386_vm0, %v17931_v0  ;;  %14180 = vmatpush3.bf16.msra.mxu0 %v17914_v46  ;;  %v6509_v46 = vld [vmem:[#allocation2 + $0x52] sm:$0xff] }
 0x431   : > { %14212 = vmatpush3.bf16.msra.mxu1 %v17916_v63  ;;  %14181 = vmatprep.subr.bf16.mxu0 %v14887_v55  ;;  %v6510_v63 = vld [vmem:[#allocation2 + $0x5a] sm:$0xff] }
 0x432   : > { %14213 = vmatprep.subr.bf16.mxu1 %v14889_v1  ;;  %v18132_v15 = vpack.c.bf16 %v6510_v63, %v6509_v46  ;;  %v6522_v46 = vld [vmem:[#allocation2 + $0xba] sm:$0xff]  ;;  %v6524_v63 = vld [vmem:[#allocation2 + $0xca] sm:$0xff] }
 0x433   : > { %v18168_v48 = vpack.c.bf16 %v6522_v46, %v6521_v18  ;;  %v18170_v60 = vpack.c.bf16 %v6524_v63, %v6523_v52  ;;  %v14893_v18 = vld [vmem:[#allocation5 + $0x190] sm:$0xff]   ;;  %v7073_v63 = vld [vmem:[#allocation2 + $0xe1] sm:$0xff] }
 0x434   : > { %14182 = vmatpush3.bf16.msra.mxu0 %v14887_v55  ;;  %v6518_v55 = vld [vmem:[#allocation2 + $0x9a] sm:$0xff]  ;;  %v7348_v46 = vld [vmem:[#allocation2 + $0xea] sm:$0xff] }
 0x435   : > { %14214 = vmatpush3.bf16.msra.mxu1 %v14889_v1  ;;  %14243 = vmatprep.subr.bf16.mxu0 %v18114_v37  ;;  %v6520_v1 = vld [vmem:[#allocation2 + $0xaa] sm:$0xff]  ;;  %v18156_v39 = vpack.c.bf16 %v6518_v55, %v6517_v44  ;;  %v18180_v55 = vpack.c.bf16 %v6526_v24, %v6525_v11  ;;  %v14895_v24 = vld [vmem:[#allocation5 + $0x1a0] sm:$0xff]  }
 0x436   : > { %14275 = vmatprep.subr.bf16.mxu1 %v18116_v30  ;;  %14124 = vmatmul.mubr.msk.bf16.gmra.mxu0 %vm386_vm0, %v18118_v6  ;;  %v18158_v47 = vpack.c.bf16 %v6520_v1, %v6519_v61  ;;  %v6800_v44 = vld [vmem:[#allocation2 + $0xe8] sm:$0xff]  ;;  %v14891_v61 = vld [vmem:[#allocation5 + $0x180] sm:$0xff]  }
 0x437   : > { %14156 = vmatmul.mubr.msk.bf16.gmra.mxu1 %vm386_vm0, %v17933_v17  ;;  %14127 = vmatprep.mubr.msk.bf16.mxu0 %vm386_vm0, %v18120_v32  ;;  %v18182_v1 = vpack.c.bf16 %v6800_v44, %v6799_v41 }
 0x438   : > { %14159 = vmatprep.mubr.msk.bf16.mxu1 %vm386_vm0, %v17980_v33 }
 0x43e   : > { %14128 = vmatmul.mubr.msk.bf16.gmra.mxu0 %vm386_vm0, %v18132_v15 }
 0x43f   : > { %14160 = vmatmul.mubr.msk.bf16.gmra.mxu1 %vm386_vm0, %v17982_v13  ;;  %14131 = vmatprep.mubr.msk.bf16.mxu0 %vm386_vm0, %v18134_v29 }
 0x440   : > { %14163 = vmatprep.mubr.msk.bf16.mxu1 %vm386_vm0, %v18020_v25 }
 0x446   : > { %14132 = vmatmul.mubr.msk.bf16.gmra.mxu0 %vm386_vm0, %v18144_v9 }
 0x447   : > { %14164 = vmatmul.mubr.msk.bf16.gmra.mxu1 %vm386_vm0, %v18022_v40  ;;  %14135 = vmatprep.mubr.msk.bf16.mxu0 %vm386_vm0, %v18146_v34 }
 0x448   : > { %14167 = vmatprep.mubr.msk.bf16.mxu1 %vm386_vm0, %v18049_v49 }
 0x44e   : > { %14136 = vmatmul.mubr.msk.bf16.gmra.mxu0 %vm386_vm0, %v18156_v39 }
 0x44f   : > { %14168 = vmatmul.mubr.msk.bf16.gmra.mxu1 %vm386_vm0, %v18051_v19  ;;  %14139 = vmatprep.mubr.msk.bf16.mxu0 %vm386_vm0, %v18158_v47 }
 0x450   : > { %14171 = vmatprep.mubr.msk.bf16.mxu1 %vm386_vm0, %v18075_v22 }
 0x456   : > { %14140 = vmatmul.mubr.msk.bf16.gmra.mxu0 %vm386_vm0, %v18168_v48 }
 0x457   : > { %14172 = vmatmul.mubr.msk.bf16.gmra.mxu1 %vm386_vm0, %v18077_v58  ;;  %14143 = vmatprep.mubr.msk.bf16.mxu0 %vm386_vm0, %v18170_v60 }
 0x458   : > { %14175 = vmatprep.mubr.msk.bf16.mxu1 %vm386_vm0, %v18091_v27 }
 0x45e   : > { %14144 = vmatmul.mubr.msk.bf16.gmra.mxu0 %vm386_vm0, %v18180_v55 }
 0x45f   : > { %14176 = vmatmul.mubr.msk.bf16.gmra.mxu1 %vm386_vm0, %v18182_v1  ;;  %14183 = vmatprep.mubr.msk.bf16.mxu0 %vm386_vm0, %v17876_v16  ;;  %v14894_v16 = vld [vmem:[#allocation5 + $0x1a8] sm:$0xff]  }
 0x460   : > { %14215 = vmatprep.mubr.msk.bf16.mxu1 %vm386_vm0, %v18100_v54  ;;  %v20190_v54 = vmov 0.0  }
 0x466   : > { %14184 = vmatmul.mubr.msk.bf16.vlgmr.msra.gmra.mxu0 %vm386_vm0, %v17886_v20 }
 0x467   : > { %14216 = vmatmul.mubr.msk.bf16.vlgmr.msra.gmra.mxu1 %vm386_vm0, %v18102_v42  ;;  %14187 = vmatprep.mubr.msk.bf16.mxu0 %vm386_vm0, %v17929_v7 }
 0x468   : > { %14219 = vmatprep.mubr.msk.bf16.mxu1 %vm386_vm0, %v18118_v6  ;;  %14244 = vmatpush3.bf16.msra.mxu0 %v18114_v37  ;;  %v7074_v37 = vld [vmem:[#allocation2 + $0xe9] sm:$0xff] }
 0x469   : > { %14276 = vmatpush3.bf16.msra.mxu1 %v18116_v30  ;;  %14245 = vmatprep.subr.bf16.mxu0 %v14891_v61  ;;  %v7347_v30 = vld [vmem:[#allocation2 + $0xe2] sm:$0xff]  ;;  %v7088_v52 = vpack.c.bf16 %v7074_v37, %v7073_v63  ;;  %v7621_v63 = vld [vmem:[#allocation2 + $0xf0] sm:$0xff] }
 0x46a   : > { %14277 = vmatprep.subr.bf16.mxu1 %v14893_v18  ;;  %v18243_v11 = vpack.c.bf16 %v7348_v46, %v7347_v30 }
 0x46c   : > { %14246 = vmatpush3.bf16.msra.mxu0 %v14891_v61 }
 0x46d   : > { %14278 = vmatpush3.bf16.msra.mxu1 %v14893_v18  ;;  %14307 = vmatprep.subr.bf16.mxu0 %v14894_v16 }
 0x46e   : > { %14339 = vmatprep.subr.bf16.mxu1 %v20190_v54  ;;  %14188 = vmatmul.mubr.msk.bf16.gmra.mxu0 %vm386_vm0, %v17939_v50 }
 0x46f   : > { %14220 = vmatmul.mubr.msk.bf16.gmra.mxu1 %vm386_vm0, %v18120_v32  ;;  %14191 = vmatprep.mubr.msk.bf16.mxu0 %vm386_vm0, %v17978_v45 }
 0x470   : > { %14223 = vmatprep.mubr.msk.bf16.mxu1 %vm386_vm0, %v18132_v15 }
 0x476   : > { %14192 = vmatmul.mubr.msk.bf16.gmra.mxu0 %vm386_vm0, %v17986_v36 }
 0x477   : > { %14224 = vmatmul.mubr.msk.bf16.gmra.mxu1 %vm386_vm0, %v18134_v29  ;;  %14195 = vmatprep.mubr.msk.bf16.mxu0 %vm386_vm0, %v18018_v5 }
 0x478   : > { %14227 = vmatprep.mubr.msk.bf16.mxu1 %vm386_vm0, %v18144_v9 }
 0x47e   : > { %14196 = vmatmul.mubr.msk.bf16.gmra.mxu0 %vm386_vm0, %v18026_v57 }
 0x47f   : > { %14228 = vmatmul.mubr.msk.bf16.gmra.mxu1 %vm386_vm0, %v18146_v34  ;;  %14199 = vmatprep.mubr.msk.bf16.mxu0 %vm386_vm0, %v18047_v59 }
 0x480   : > { %14231 = vmatprep.mubr.msk.bf16.mxu1 %vm386_vm0, %v18156_v39 }
 0x486   : > { %14200 = vmatmul.mubr.msk.bf16.gmra.mxu0 %vm386_vm0, %v18055_v28 }
 0x487   : > { %14232 = vmatmul.mubr.msk.bf16.gmra.mxu1 %vm386_vm0, %v18158_v47  ;;  %14203 = vmatprep.mubr.msk.bf16.mxu0 %vm386_vm0, %v18073_v2 }
 0x488   : > { %14235 = vmatprep.mubr.msk.bf16.mxu1 %vm386_vm0, %v18168_v48 }
 0x48e   : > { %14204 = vmatmul.mubr.msk.bf16.gmra.mxu0 %vm386_vm0, %v18079_v14 }
 0x48f   : > { %14236 = vmatmul.mubr.msk.bf16.gmra.mxu1 %vm386_vm0, %v18170_v60  ;;  %14207 = vmatprep.mubr.msk.bf16.mxu0 %vm386_vm0, %v18089_v3 }
 0x490   : > { %14239 = vmatprep.mubr.msk.bf16.mxu1 %vm386_vm0, %v18180_v55 }
 0x496   : > { %14208 = vmatmul.mubr.msk.bf16.gmra.mxu0 %vm386_vm0, %v7088_v52 }
 0x497   : > { %14240 = vmatmul.mubr.msk.bf16.gmra.mxu1 %vm386_vm0, %v18243_v11  ;;  %14247 = vmatprep.mubr.msk.bf16.mxu0 %vm386_vm0, %v17880_v10 }
 0x498   : > { %14279 = vmatprep.mubr.msk.bf16.mxu1 %vm386_vm0, %v17886_v20 }
 0x49e   : > { %14248 = vmatmul.mubr.msk.bf16.vlgmr.msra.gmra.mxu0 %vm386_vm0, %v17931_v0 }
 0x49f   : > { %14280 = vmatmul.mubr.msk.bf16.vlgmr.msra.gmra.mxu1 %vm386_vm0, %v17929_v7  ;;  %14251 = vmatprep.mubr.msk.bf16.mxu0 %vm386_vm0, %v17933_v17 }
 0x4a0   : > { %14283 = vmatprep.mubr.msk.bf16.mxu1 %vm386_vm0, %v17939_v50  ;;  %14308 = vmatpush3.bf16.msra.mxu0 %v14894_v16  ;;  %v7896_v16 = vld [vmem:[#allocation2 + $0xf9] sm:$0xff] }
 0x4a1   : > { %14309 = vmatprep.subr.bf16.mxu0 %v14895_v24 }
 0x4a4   : > { %14310 = vmatpush3.bf16.msra.mxu0 %v14895_v24  ;;  %v7622_v24 = vld [vmem:[#allocation2 + $0xf8] sm:$0xff] }
 0x4a5   : > { %14395 = vmatprep.subr.bf16.mxu0 %v20190_v54 }
 0x4a6   : > { %14252 = vmatmul.mubr.msk.bf16.gmra.mxu0 %vm386_vm0, %v17980_v33 }
 0x4a7   : > { %14284 = vmatmul.mubr.msk.bf16.gmra.mxu1 %vm386_vm0, %v17978_v45  ;;  %14255 = vmatprep.mubr.msk.bf16.mxu0 %vm386_vm0, %v17982_v13 }
 0x4a8   : > { %14287 = vmatprep.mubr.msk.bf16.mxu1 %vm386_vm0, %v17986_v36 }
 0x4ae   : > { %14256 = vmatmul.mubr.msk.bf16.gmra.mxu0 %vm386_vm0, %v18020_v25 }
 0x4af   : > { %14288 = vmatmul.mubr.msk.bf16.gmra.mxu1 %vm386_vm0, %v18018_v5  ;;  %14259 = vmatprep.mubr.msk.bf16.mxu0 %vm386_vm0, %v18022_v40 }
 0x4b0   : > { %14291 = vmatprep.mubr.msk.bf16.mxu1 %vm386_vm0, %v18026_v57 }
 0x4b5   : > { %v14057_v10 = vpop.f32.mrf.mxu0 }
 0x4b6   : > { %v14089_v20 = vpop.f32.mrf.mxu1  ;;  %14260 = vmatmul.mubr.msk.bf16.gmra.mxu0 %vm386_vm0, %v18049_v49 }
 0x4b7   : > { %14292 = vmatmul.mubr.msk.bf16.gmra.mxu1 %vm386_vm0, %v18047_v59  ;;  %v18281_v7 = vadd.f32 %v14089_v20, %v14057_v10  ;;  %14263 = vmatprep.mubr.msk.bf16.mxu0 %vm386_vm0, %v18051_v19  ;;  %v6189_v0 = vpop.f32.mrf.mxu0 }
 0x4b8   : > { %14295 = vmatprep.mubr.msk.bf16.mxu1 %vm386_vm0, %v18055_v28  ;;  %v6388_v17 = vpop.f32.mrf.mxu1 }
 0x4b9   : > { %v18287_v50 = vadd.f32 %v6388_v17, %v6189_v0  ;;  %v14058_v45 = vpop.f32.mrf.mxu0 }
 0x4ba   : > { %v14090_v33 = vpop.f32.mrf.mxu1 }
 0x4bb   : > { %v18289_v13 = vadd.f32 %v14090_v33, %v14058_v45  ;;  %v18291_v36 = vpop.f32.mrf.mxu0 }
 0x4bc   : > { %v18293_v5 = vpop.f32.mrf.mxu1 }
 0x4bd   : > { %v14061_v25 = vpop.f32.mrf.mxu0 }
 0x4be   : > { %v14093_v40 = vpop.f32.mrf.mxu1  ;;  %14264 = vmatmul.mubr.msk.bf16.gmra.mxu0 %vm386_vm0, %v18075_v22 }
 0x4bf   : > { %14296 = vmatmul.mubr.msk.bf16.gmra.mxu1 %vm386_vm0, %v18073_v2  ;;  %v18299_v57 = vadd.f32 %v14093_v40, %v14061_v25  ;;  %14267 = vmatprep.mubr.msk.bf16.mxu0 %vm386_vm0, %v18077_v58  ;;  %v6205_v59 = vpop.f32.mrf.mxu0 }
 0x4c0   : > { %14299 = vmatprep.mubr.msk.bf16.mxu1 %vm386_vm0, %v18079_v14  ;;  %v6404_v49 = vpop.f32.mrf.mxu1  ;;  %v7895_v14 = vld [vmem:[#allocation2 + $0xf1] sm:$0xff] }
 0x4c1   : > { %v18305_v19 = vadd.f32 %v6404_v49, %v6205_v59  ;;  %v14062_v28 = vpop.f32.mrf.mxu0  ;;  %v7910_v20 = vpack.c.bf16 %v7896_v16, %v7895_v14 }
 0x4c2   : > { %v14094_v41 = vpop.f32.mrf.mxu1 }
 0x4c3   : > { %v18307_v44 = vadd.f32 %v14094_v41, %v14062_v28  ;;  %v18309_v22 = vpop.f32.mrf.mxu0 }
 0x4c4   : > { %v18311_v61 = vpop.f32.mrf.mxu1 }
 0x4c6   : > { %v14065_v2 = vpop.f32.mrf.mxu0  ;;  %14268 = vmatmul.mubr.msk.bf16.gmra.mxu0 %vm386_vm0, %v18091_v27 }
 0x4c7   : > { %v14097_v18 = vpop.f32.mrf.mxu1  ;;  %14300 = vmatmul.mubr.msk.bf16.gmra.mxu1 %vm386_vm0, %v18089_v3  ;;  %14271 = vmatprep.mubr.msk.bf16.mxu0 %vm386_vm0, %v18182_v1  ;;  %v7636_v1 = vpack.c.bf16 %v7622_v24, %v7621_v63 }
 0x4c8   : > { %v18317_v58 = vadd.f32 %v14097_v18, %v14065_v2  ;;  %14303 = vmatprep.mubr.msk.bf16.mxu1 %vm386_vm0, %v7088_v52  ;;  %v6221_v37 = vpop.f32.mrf.mxu0 }
 0x4c9   : > { %v6420_v30 = vpop.f32.mrf.mxu1 }
 0x4ca   : > { %v18322_v46 = vadd.f32 %v6420_v30, %v6221_v37  ;;  %v14066_v10 = vpop.f32.mrf.mxu0 }
 0x4cb   : > { %v14098_v27 = vpop.f32.mrf.mxu1 }
 0x4cc   : > { %v18324_v0 = vadd.f32 %v14098_v27, %v14066_v10  ;;  %v18326_v3 = vpop.f32.mrf.mxu0 }
 0x4cd   : > { %v18328_v17 = vpop.f32.mrf.mxu1 }
 0x4ce   : > { %v14069_v45 = vpop.f32.mrf.mxu0  ;;  %14272 = vmatmul.mubr.msk.bf16.gmra.mxu0 %vm386_vm0, %v7636_v1 }
 0x4cf   : > { %v14101_v52 = vpop.f32.mrf.mxu1  ;;  %14304 = vmatmul.mubr.msk.bf16.gmra.mxu1 %vm386_vm0, %v7910_v20  ;;  %14311 = vmatprep.mubr.msk.bf16.mxu0 %vm386_vm0, %v18102_v42 }
 0x4d0   : > { %v18332_v33 = vadd.f32 %v14101_v52, %v14069_v45  ;;  %v6237_v25 = vpop.f32.mrf.mxu0  ;;  %14343 = vmatprep.mubr.msk.bf16.mxu1 %vm15189_vm1, %v20190_v54 }
 0x4d1   : > { %v6436_v40 = vpop.f32.mrf.mxu1 }
 0x4d2   : > { %v18336_v59 = vadd.f32 %v6436_v40, %v6237_v25  ;;  %v14070_v49 = vpop.f32.mrf.mxu0 }
 0x4d3   : > { %v14102_v28 = vpop.f32.mrf.mxu1 }
 0x4d4   : > { %v18338_v41 = vadd.f32 %v14102_v28, %v14070_v49  ;;  %v18340_v2 = vpop.f32.mrf.mxu0 }
 0x4d5   : > { %v18342_v18 = vpop.f32.mrf.mxu1 }
 0x4d6   : > { %v14073_v14 = vpop.f32.mrf.mxu0  ;;  %14312 = vmatmul.mubr.msk.bf16.vlgmr.msra.gmra.mxu0 %vm386_vm0, %v18118_v6 }
 0x4d7   : > { %v14105_v16 = vpop.f32.mrf.mxu1  ;;  %14315 = vmatprep.mubr.msk.bf16.mxu0 %vm386_vm0, %v18120_v32 }
 0x4d8   : > { %v18346_v37 = vadd.f32 %v14105_v16, %v14073_v14  ;;  %v6253_v42 = vpop.f32.mrf.mxu0 }
 0x4d9   : > { %v6452_v30 = vpop.f32.mrf.mxu1 }
 0x4da   : > { %v18350_v63 = vadd.f32 %v6452_v30, %v6253_v42  ;;  %v14074_v24 = vpop.f32.mrf.mxu0 }
 0x4db   : > { %v14106_v10 = vpop.f32.mrf.mxu1 }
 0x4dc   : > { %v18352_v27 = vadd.f32 %v14106_v10, %v14074_v24  ;;  %v18354_v20 = vpop.f32.mrf.mxu0 }
 0x4dd   : > { %v18356_v1 = vpop.f32.mrf.mxu1 }
 0x4de   : > { %v14077_v45 = vpop.f32.mrf.mxu0  ;;  %14316 = vmatmul.mubr.msk.bf16.gmra.mxu0 %vm386_vm0, %v18132_v15 }
 0x4df   : > { %v14109_v52 = vpop.f32.mrf.mxu1  ;;  %14319 = vmatprep.mubr.msk.bf16.mxu0 %vm386_vm0, %v18134_v29 }
 0x4e0   : > { %v18360_v6 = vadd.f32 %v14109_v52, %v14077_v45  ;;  %v6269_v32 = vpop.f32.mrf.mxu0 }
 0x4e1   : > { %v6468_v25 = vpop.f32.mrf.mxu1 }
 0x4e2   : > { %v18364_v40 = vadd.f32 %v6468_v25, %v6269_v32  ;;  %v14078_v49 = vpop.f32.mrf.mxu0 }
 0x4e3   : > { %v14110_v28 = vpop.f32.mrf.mxu1 }
 0x4e4   : > { %v18366_v14 = vadd.f32 %v14110_v28, %v14078_v49  ;;  %v18368_v16 = vpop.f32.mrf.mxu0 }
 0x4e5   : > { %v18370_v42 = vpop.f32.mrf.mxu1 }
 0x4e6   : > { %v14081_v30 = vpop.f32.mrf.mxu0  ;;  %14320 = vmatmul.mubr.msk.bf16.gmra.mxu0 %vm386_vm0, %v18144_v9 }
 0x4e7   : > { %v14113_v24 = vpop.f32.mrf.mxu1  ;;  %14323 = vmatprep.mubr.msk.bf16.mxu0 %vm386_vm0, %v18146_v34 }
 0x4e8   : > { %v18374_v15 = vadd.f32 %v14113_v24, %v14081_v30  ;;  %v6285_v29 = vpop.f32.mrf.mxu0 }
 0x4e9   : > { %v6484_v10 = vpop.f32.mrf.mxu1 }
 0x4ea   : > { %v18378_v45 = vadd.f32 %v6484_v10, %v6285_v29  ;;  %v14082_v52 = vpop.f32.mrf.mxu0 }
 0x4eb   : > { %v14114_v32 = vpop.f32.mrf.mxu1 }
 0x4ec   : > { %v18380_v25 = vadd.f32 %v14114_v32, %v14082_v52  ;;  %v18382_v49 = vpop.f32.mrf.mxu0 }
 0x4ed   : > { %v18384_v28 = vpop.f32.mrf.mxu1 }
 0x4ee   : > { %v14121_v62 = vpop.f32.mrf.mxu0  ;;  %14324 = vmatmul.mubr.msk.bf16.gmra.mxu0 %vm386_vm0, %v18156_v39 }
 0x4ef   : > { %v14153_v21 = vpop.f32.mrf.mxu1  ;;  %v6747_v9 = vadd.f32 %v14121_v62, %v18281_v7  ;;  %14327 = vmatprep.mubr.msk.bf16.mxu0 %vm386_vm0, %v18158_v47 }
 0x4f0   : > { %v6634_v34 = vpop.f32.mrf.mxu0 }
 0x4f1   : > { %v6908_v30 = vpop.f32.mrf.mxu1  ;;  %v18391_v24 = vadd.f32 %v14153_v21, %v6747_v9  ;;  %v6745_v29 = vadd.f32 %v6634_v34, %v18287_v50 }
 0x4f2   : > { %v14122_v10 = vpop.f32.mrf.mxu0 }
 0x4f3   : > { %v14154_v52 = vpop.f32.mrf.mxu1  ;;  %v18394_v32 = vadd.f32 %v6908_v30, %v6745_v29  ;;  %v6748_v56 = vadd.f32 %v14122_v10, %v18289_v13 }
 0x4f4   : > { %v18397_v4 = vpop.f32.mrf.mxu0 }
 0x4f5   : > { %v18399_v39 = vpop.f32.mrf.mxu1  ;;  %v18401_v62 = vadd.f32 %v14154_v52, %v6748_v56 }
 0x4f6   : > { %v14125_v7 = vpop.f32.mrf.mxu0  ;;  %14328 = vmatmul.mubr.msk.bf16.gmra.mxu0 %vm386_vm0, %v18168_v48 }
 0x4f7   : > { %v14157_v47 = vpop.f32.mrf.mxu1  ;;  %v6751_v21 = vadd.f32 %v14125_v7, %v18299_v57  ;;  %14331 = vmatprep.mubr.msk.bf16.mxu0 %vm386_vm0, %v18170_v60 }
 0x4f8   : > { %v6650_v50 = vpop.f32.mrf.mxu0 }
 0x4f9   : > { %v6924_v9 = vpop.f32.mrf.mxu1  ;;  %v18408_v34 = vadd.f32 %v14157_v47, %v6751_v21  ;;  %v6749_v13 = vadd.f32 %v6650_v50, %v18305_v19  ;;  %v8169_v19 = vld [vmem:[#allocation2 + $0xf2] sm:$0xff]  ;;  %v8170_v21 = vld [vmem:[#allocation2 + $0xfa] sm:$0xff] }
 0x4fa   : > { %v14126_v30 = vpop.f32.mrf.mxu0 }
 0x4fb   : > { %v14158_v29 = vpop.f32.mrf.mxu1  ;;  %v18411_v56 = vadd.f32 %v6924_v9, %v6749_v13  ;;  %v6752_v10 = vadd.f32 %v14126_v30, %v18307_v44 }
 0x4fc   : > { %v18414_v52 = vpop.f32.mrf.mxu0 }
 0x4fd   : > { %v18416_v48 = vpop.f32.mrf.mxu1  ;;  %v18418_v57 = vadd.f32 %v14158_v29, %v6752_v10  ;;  %v8184_v10 = vpack.c.bf16 %v8170_v21, %v8169_v19 }
 0x4fe   : > { %v14129_v7 = vpop.f32.mrf.mxu0  ;;  %14332 = vmatmul.mubr.msk.bf16.gmra.mxu0 %vm386_vm0, %v18180_v55 }
 0x4ff   : > { %v14161_v60 = vpop.f32.mrf.mxu1  ;;  %v6755_v47 = vadd.f32 %v14129_v7, %v18317_v58  ;;  %14335 = vmatprep.mubr.msk.bf16.mxu0 %vm386_vm0, %v18243_v11  ;;  %v14896_v7 = vld [vmem:[%s19773_s3 + $0x18] sm:$0xff]  }
 0x500   : > { %v6666_v50 = vpop.f32.mrf.mxu0  ;;  %14340 = vmatpush3.bf16.msra.mxu1 %v14896_v7 }
 0x501   : > { %v6940_v44 = vpop.f32.mrf.mxu1  ;;  %v18425_v9 = vadd.f32 %v14161_v60, %v6755_v47  ;;  %v6753_v13 = vadd.f32 %v6666_v50, %v18322_v46  ;;  %14341 = vmatprep.subr.bf16.mxu1 %v20190_v54 }
 0x502   : > { %v14130_v30 = vpop.f32.mrf.mxu0 }
 0x503   : > { %v14162_v29 = vpop.f32.mrf.mxu1  ;;  %v18428_v38 = vadd.f32 %v6940_v44, %v6753_v13  ;;  %v6756_v55 = vadd.f32 %v14130_v30, %v18324_v0 }
 0x504   : > { %v18431_v26 = vpop.f32.mrf.mxu0 }
 0x505   : > { %v18433_v58 = vpop.f32.mrf.mxu1  ;;  %v18435_v11 = vadd.f32 %v14162_v29, %v6756_v55 }
 0x506   : > { %v14133_v60 = vpop.f32.mrf.mxu0  ;;  %14336 = vmatmul.mubr.msk.bf16.gmra.mxu0 %vm386_vm0, %v8184_v10 }
 0x507   : > { %v14165_v47 = vpop.f32.mrf.mxu1  ;;  %v6759_v46 = vadd.f32 %v14133_v60, %v18332_v33  ;;  %14399 = vmatprep.mubr.msk.bf16.mxu0 %vm15189_vm1, %v20190_v54 }
 0x508   : > { %v6682_v19 = vpop.f32.mrf.mxu0 }
 0x509   : > { %v6956_v21 = vpop.f32.mrf.mxu1  ;;  %v18443_v0 = vadd.f32 %v14165_v47, %v6759_v46  ;;  %v6757_v50 = vadd.f32 %v6682_v19, %v18336_v59 }
 0x50a   : > { %v14134_v44 = vpop.f32.mrf.mxu0 }
 0x50b   : > { %v14166_v13 = vpop.f32.mrf.mxu1  ;;  %v18446_v30 = vadd.f32 %v6956_v21, %v6757_v50  ;;  %v6760_v29 = vadd.f32 %v14134_v44, %v18338_v41 }
 0x50c   : > { %v18449_v55 = vpop.f32.mrf.mxu0 }
 0x50d   : > { %v18451_v10 = vpop.f32.mrf.mxu1  ;;  %v18453_v33 = vadd.f32 %v14166_v13, %v6760_v29 }
 0x50e   : > { %v14137_v7 = vpop.f32.mrf.mxu0 }
 0x50f   : > { %v14169_v60 = vpop.f32.mrf.mxu1  ;;  %v6763_v31 = vadd.f32 %v14137_v7, %v18346_v37 }
 0x510   : > { %v6698_v47 = vpop.f32.mrf.mxu0 }
 0x511   : > { %v6972_v46 = vpop.f32.mrf.mxu1  ;;  %v18456_v51 = vadd.f32 %v14169_v60, %v6763_v31  ;;  %v6761_v59 = vadd.f32 %v6698_v47, %v18350_v63 }
 0x512   : > { %v14138_v19 = vpop.f32.mrf.mxu0 }
 0x513   : > { %v14170_v21 = vpop.f32.mrf.mxu1  ;;  %v18459_v50 = vadd.f32 %v6972_v46, %v6761_v59  ;;  %v6764_v41 = vadd.f32 %v14138_v19, %v18352_v27 }
 0x514   : > { %v18462_v44 = vpop.f32.mrf.mxu0 }
 0x515   : > { %v18464_v13 = vpop.f32.mrf.mxu1  ;;  %v18466_v29 = vadd.f32 %v14170_v21, %v6764_v41 }
 0x516   : > { %20191 = vst [vmem:[#allocation32_spill] sm:$0xff] %v18464_v13  ;;  %v14141_v8 = vpop.f32.mrf.mxu0 }
 0x517   : > { %v14173_v37 = vpop.f32.mrf.mxu1  ;;  %v6767_v7 = vadd.f32 %v14141_v8, %v18360_v6 }
 0x518   : > { %v6714_v31 = vpop.f32.mrf.mxu0 }
 0x519   : > { %v6988_v60 = vpop.f32.mrf.mxu1  ;;  %v18469_v35 = vadd.f32 %v14173_v37, %v6767_v7  ;;  %v6765_v63 = vadd.f32 %v6714_v31, %v18364_v40 }
 0x51a   : > { %v14142_v47 = vpop.f32.mrf.mxu0 }
 0x51b   : > { %v14174_v46 = vpop.f32.mrf.mxu1  ;;  %v18472_v59 = vadd.f32 %v6988_v60, %v6765_v63  ;;  %v6768_v27 = vadd.f32 %v14142_v47, %v18366_v14 }
 0x51c   : > { %v18475_v19 = vpop.f32.mrf.mxu0 }
 0x51d   : > { %v18477_v21 = vpop.f32.mrf.mxu1  ;;  %v18479_v41 = vadd.f32 %v14174_v46, %v6768_v27 }
 0x51e   : > { %20192 = vst [vmem:[#allocation33_spill] sm:$0xff] %v18477_v21  ;;  %v14145_v12 = vpop.f32.mrf.mxu0 }
 0x51f   : > { %v14177_v8 = vpop.f32.mrf.mxu1  ;;  %v6771_v6 = vadd.f32 %v14145_v12, %v18374_v15  ;;  %v14897_v12 = vld [vmem:[%s19773_s3 + $0x10] sm:$0xff]  }
 0x520   : > { %v6730_v37 = vpop.f32.mrf.mxu0  ;;  %14342 = vmatpush3.bf16.msra.mxu1 %v14897_v12 }
 0x521   : > { %v7004_v7 = vpop.f32.mrf.mxu1  ;;  %v18482_v53 = vadd.f32 %v14177_v8, %v6771_v6  ;;  %v6769_v40 = vadd.f32 %v6730_v37, %v18378_v45  ;;  %14347 = vmatprep.subr.bf16.mxu1 %v20190_v54 }
 0x522   : > { %v14146_v31 = vpop.f32.mrf.mxu0 }
 0x523   : > { %v14178_v60 = vpop.f32.mrf.mxu1  ;;  %v18485_v63 = vadd.f32 %v7004_v7, %v6769_v40  ;;  %v6772_v14 = vadd.f32 %v14146_v31, %v18380_v25 }
 0x524   : > { %v18488_v47 = vpop.f32.mrf.mxu0 }
 0x525   : > { %v18490_v46 = vpop.f32.mrf.mxu1  ;;  %v18492_v27 = vadd.f32 %v14178_v60, %v6772_v14 }
 0x526   : > { %20193 = vst [vmem:[#allocation75_spill] sm:$0xff] %v18490_v46  ;;  %v14185_v15 = vpop.f32.mrf.mxu0 }
 0x527   : > { %v18497_v8 = vpop.f32.mrf.mxu1  ;;  %v18500_v45 = vadd.f32 %v14185_v15, %v18391_v24 }
 0x528   : > { %v7182_v6 = vpop.f32.mrf.mxu0 }
 0x529   : > { %v18502_v37 = vpop.f32.mrf.mxu1  ;;  %v18506_v25 = vadd.f32 %v7182_v6, %v18394_v32 }
 0x52a   : > { %v14186_v7 = vpop.f32.mrf.mxu0 }
 0x52b   : > { %v18508_v40 = vpop.f32.mrf.mxu1  ;;  %v18511_v31 = vadd.f32 %v14186_v7, %v18401_v62 }
 0x52c   : > { %v18513_v60 = vpop.f32.mrf.mxu0 }
 0x52d   : > { %v18515_v14 = vpop.f32.mrf.mxu1 }
 0x52e   : > { %v14189_v24 = vpop.f32.mrf.mxu0 }
 0x52f   : > { %v18517_v12 = vpop.f32.mrf.mxu1  ;;  %v18520_v15 = vadd.f32 %v14189_v24, %v18408_v34 }
 0x530   : > { %20194 = vst [vmem:[#allocation34_spill] sm:$0xff] %v18517_v12  ;;  %v7198_v23 = vpop.f32.mrf.mxu0 }
 0x531   : > { %v18522_v43 = vpop.f32.mrf.mxu1  ;;  %v18525_v32 = vadd.f32 %v7198_v23, %v18411_v56 }
 0x532   : > { %20195 = vst [vmem:[#allocation35_spill] sm:$0xff] %v18522_v43  ;;  %v14190_v6 = vpop.f32.mrf.mxu0 }
 0x533   : > { %v18527_v46 = vpop.f32.mrf.mxu1  ;;  %v18530_v62 = vadd.f32 %v14190_v6, %v18418_v57  ;;  %v14899_v57 = vld [vmem:[%s19773_s3 + $0x88] sm:$0xff]  }
 0x534   : > { %20196 = vst [vmem:[#allocation39_spill] sm:$0xff] %v18527_v46  ;;  %v18532_v7 = vpop.f32.mrf.mxu0  ;;  %14396 = vmatpush3.bf16.msra.mxu0 %v14899_v57 }
 0x535   : > { %v18534_v21 = vpop.f32.mrf.mxu1  ;;  %14397 = vmatprep.subr.bf16.mxu0 %v20190_v54 }
 0x536   : > { %v14193_v12 = vpop.f32.mrf.mxu0 }
 0x537   : > { %v18536_v13 = vpop.f32.mrf.mxu1  ;;  %v18539_v34 = vadd.f32 %v14193_v12, %v18425_v9 }
 0x538   : > { %20197 = vst [vmem:[#allocation37_spill] sm:$0xff] %v18536_v13  ;;  %v7214_v24 = vpop.f32.mrf.mxu0 }
 0x539   : > { %v18541_v43 = vpop.f32.mrf.mxu1  ;;  %v18544_v23 = vadd.f32 %v7214_v24, %v18428_v38 }
 0x53a   : > { %20198 = vst [vmem:[#allocation70_spill] sm:$0xff] %v18541_v43  ;;  %v14194_v56 = vpop.f32.mrf.mxu0 }
 0x53b   : > { %20199 = vst [vmem:[#allocation40_spill] sm:$0xff] %v18544_v23  ;;  %v18546_v46 = vpop.f32.mrf.mxu1  ;;  %v18556_v9 = vadd.f32 %v14194_v56, %v18435_v11 }
 0x53c   : > { %20200 = vst [vmem:[#allocation67_spill] sm:$0xff] %v18546_v46  ;;  %v18558_v12 = vpop.f32.mrf.mxu0  ;;  %v14901_v46 = vld [vmem:[%s19773_s3 + $0x80] sm:$0xff]  }
 0x53d   : > { %20201 = vst [vmem:[#allocation63_spill] sm:$0xff] %v18556_v9  ;;  %v18560_v38 = vpop.f32.mrf.mxu1  ;;  %14398 = vmatpush3.bf16.msra.mxu0 %v14901_v46 }
 0x53e   : > { %20202 = vst [vmem:[#allocation78_spill] sm:$0xff] %v18560_v38  ;;  %v14197_v6 = vpop.f32.mrf.mxu0  ;;  %14411 = vmatprep.subr.bf16.mxu0 %v20190_v54 }
 0x53f   : > { %v18563_v24 = vpop.f32.mrf.mxu1  ;;  %v18569_v43 = vadd.f32 %v14197_v6, %v18443_v0 }
 0x540   : > { %20203 = vst [vmem:[#allocation71_spill] sm:$0xff] %v18563_v24  ;;  %v7230_v23 = vpop.f32.mrf.mxu0 }
 0x541   : > { %20204 = vst [vmem:[#allocation73_spill] sm:$0xff] %v18569_v43  ;;  %v18571_v11 = vpop.f32.mrf.mxu1  ;;  %v18574_v56 = vadd.f32 %v7230_v23, %v18446_v30 }
 0x542   : > { %20205 = vst [vmem:[#allocation20_spill] sm:$0xff] %v18571_v11  ;;  %v14198_v57 = vpop.f32.mrf.mxu0 }
 0x543   : > { %20206 = vst [vmem:[#allocation41_spill] sm:$0xff] %v18574_v56  ;;  %v18577_v38 = vpop.f32.mrf.mxu1  ;;  %v18580_v24 = vadd.f32 %v14198_v57, %v18453_v33 }
 0x544   : > { %20207 = vst [vmem:[#allocation43_spill] sm:$0xff] %v18577_v38  ;;  %v18582_v9 = vpop.f32.mrf.mxu0 }
 0x545   : > { %20208 = vst [vmem:[#allocation42_spill] sm:$0xff] %v18580_v24  ;;  %v18584_v13 = vpop.f32.mrf.mxu1 }
 0x546   : > { %20209 = vst [vmem:[#allocation81_spill] sm:$0xff] %v18584_v13  ;;  %v14201_v0 = vpop.f32.mrf.mxu0 }
 0x547   : > { %v18586_v6 = vpop.f32.mrf.mxu1  ;;  %v18589_v46 = vadd.f32 %v14201_v0, %v18456_v51 }
 0x548   : > { %20210 = vst [vmem:[#allocation46_spill] sm:$0xff] %v18586_v6  ;;  %v7246_v30 = vpop.f32.mrf.mxu0 }
 0x549   : > { %20211 = vst [vmem:[#allocation66_spill] sm:$0xff] %v18589_v46  ;;  %v18591_v23 = vpop.f32.mrf.mxu1  ;;  %v18594_v54 = vadd.f32 %v7246_v30, %v18459_v50 }
 0x54a   : > { %20212 = vst [vmem:[#allocation88_spill] sm:$0xff] %v18591_v23  ;;  %v14202_v38 = vpop.f32.mrf.mxu0 }
 0x54b   : > { %20213 = vst [vmem:[#allocation45_spill] sm:$0xff] %v18594_v54  ;;  %v18596_v11 = vpop.f32.mrf.mxu1  ;;  %v18599_v33 = vadd.f32 %v14202_v38, %v18466_v29 }
 0x54c   : > { %20214 = vst [vmem:[#allocation44_spill] sm:$0xff] %v18596_v11  ;;  %v18601_v57 = vpop.f32.mrf.mxu0 }
 0x54d   : > { %20215 = vst [vmem:[#allocation74_spill] sm:$0xff] %v18599_v33  ;;  %20216 = vst [vmem:[#allocation72_spill] sm:$0xff] %v18601_v57  ;;  %v18603_v13 = vpop.f32.mrf.mxu1 }
 0x54e   : > { %20217 = vst [vmem:[#allocation31_spill] sm:$0xff] %v18603_v13  ;;  %v14205_v6 = vpop.f32.mrf.mxu0 }
 0x54f   : > { %v18605_v24 = vpop.f32.mrf.mxu1  ;;  %v18608_v51 = vadd.f32 %v14205_v6, %v18469_v35 }
 0x550   : > { %20218 = vst [vmem:[#allocation91_spill] sm:$0xff] %v18605_v24  ;;  %v7262_v0 = vpop.f32.mrf.mxu0 }
 0x551   : > { %20219 = vst [vmem:[#allocation76_spill] sm:$0xff] %v18608_v51  ;;  %v18610_v23 = vpop.f32.mrf.mxu1  ;;  %v18613_v50 = vadd.f32 %v7262_v0, %v18472_v59 }
 0x552   : > { %20220 = vst [vmem:[#allocation47_spill] sm:$0xff] %v18610_v23  ;;  %v14206_v30 = vpop.f32.mrf.mxu0 }
 0x553   : > { %20221 = vst [vmem:[#allocation48_spill] sm:$0xff] %v18613_v50  ;;  %v18615_v11 = vpop.f32.mrf.mxu1  ;;  %v18618_v29 = vadd.f32 %v14206_v30, %v18479_v41 }
 0x554   : > { %20222 = vst [vmem:[#allocation77_spill] sm:$0xff] %v18615_v11  ;;  %v18620_v38 = vpop.f32.mrf.mxu0 }
 0x555   : > { %20223 = vst [vmem:[#allocation54_spill] sm:$0xff] %v18618_v29  ;;  %20224 = vst [vmem:[#allocation49_spill] sm:$0xff] %v18620_v38  ;;  %v18622_v13 = vpop.f32.mrf.mxu1 }
 0x556   : > { %20225 = vst [vmem:[#allocation94_spill] sm:$0xff] %v18622_v13  ;;  %v14209_v24 = vpop.f32.mrf.mxu0 }
 0x557   : > { %v18624_v33 = vpop.f32.mrf.mxu1  ;;  %v18627_v35 = vadd.f32 %v14209_v24, %v18482_v53 }
 0x558   : > { %20226 = vst [vmem:[#allocation25_spill] sm:$0xff] %v18624_v33  ;;  %v7278_v6 = vpop.f32.mrf.mxu0 }
 0x559   : > { %20227 = vst [vmem:[#allocation85_spill] sm:$0xff] %v18627_v35  ;;  %v18629_v23 = vpop.f32.mrf.mxu1  ;;  %v18632_v59 = vadd.f32 %v7278_v6, %v18485_v63 }
 0x55a   : > { %20228 = vst [vmem:[#allocation86_spill] sm:$0xff] %v18629_v23  ;;  %v14210_v0 = vpop.f32.mrf.mxu0 }
 0x55b   : > { %20229 = vst [vmem:[#allocation64_spill] sm:$0xff] %v18632_v59  ;;  %v18634_v11 = vpop.f32.mrf.mxu1  ;;  %v18637_v41 = vadd.f32 %v14210_v0, %v18492_v27 }
 0x55c   : > { %20230 = vst [vmem:[#allocation87_spill] sm:$0xff] %v18634_v11  ;;  %v18639_v30 = vpop.f32.mrf.mxu0 }
 0x55d   : > { %20231 = vst [vmem:[#allocation89_spill] sm:$0xff] %v18637_v41  ;;  %20232 = vst [vmem:[#allocation80_spill] sm:$0xff] %v18639_v30  ;;  %v18641_v13 = vpop.f32.mrf.mxu1 }
 0x55e   : > { %20233 = vst [vmem:[#allocation79_spill] sm:$0xff] %v18641_v13  ;;  %v14249_v33 = vpop.f32.mrf.mxu0 }
 0x55f   : > { %v18643_v29 = vpop.f32.mrf.mxu1 }
 0x560   : > { %v7730_v53 = vpop.f32.mrf.mxu0 }
 0x561   : > { %v18645_v24 = vpop.f32.mrf.mxu1 }
 0x562   : > { %v18647_v23 = vpop.f32.mrf.mxu0 }
 0x563   : > { %v18649_v63 = vpop.f32.mrf.mxu1 }
 0x564   : > { %v18651_v6 = vpop.f32.mrf.mxu0 }
 0x565   : > { %v18655_v27 = vpop.f32.mrf.mxu1 }
 0x566   : > { %v18653_v11 = vpop.f32.mrf.mxu0 }
 0x567   : > { %v18661_v13 = vpop.f32.mrf.mxu1 }
 0x568   : > { %v18657_v0 = vpop.f32.mrf.mxu0 }
 0x569   : > { %v18667_v35 = vpop.f32.mrf.mxu1 }
 0x56a   : > { %v18659_v30 = vpop.f32.mrf.mxu0  ;;  %20236 = vst [vmem:[#allocation61_spill] sm:$0xff] %v18667_v35 }
 0x56b   : > { %v18673_v38 = vpop.f32.mrf.mxu1 }
 0x56c   : > { %v18663_v41 = vpop.f32.mrf.mxu0  ;;  %20239 = vst [vmem:[#allocation68_spill] sm:$0xff] %v18673_v38 }
 0x56d   : > { %20234 = vst [vmem:[#allocation52_spill] sm:$0xff] %v18663_v41  ;;  %v18679_v57 = vpop.f32.mrf.mxu1 }
 0x56e   : > { %v18665_v59 = vpop.f32.mrf.mxu0  ;;  %20242 = vst [vmem:[#allocation83_spill] sm:$0xff] %v18679_v57 }
 0x56f   : > { %20235 = vst [vmem:[#allocation36_spill] sm:$0xff] %v18665_v59  ;;  %v18685_v41 = vpop.f32.mrf.mxu1 }
 0x570   : > { %v18669_v50 = vpop.f32.mrf.mxu0 }
 0x571   : > { %20237 = vst [vmem:[#allocation90_spill] sm:$0xff] %v18669_v50  ;;  %v18691_v50 = vpop.f32.mrf.mxu1 }
 0x572   : > { %v18671_v51 = vpop.f32.mrf.mxu0  ;;  %20247 = vst [vmem:[#allocation56_spill] sm:$0xff] %v18691_v50 }
 0x573   : > { %20238 = vst [vmem:[#allocation92_spill] sm:$0xff] %v18671_v51 }
 0x574   : > { %v18675_v54 = vpop.f32.mrf.mxu0 }
 0x575   : > { %20240 = vst [vmem:[#allocation93_spill] sm:$0xff] %v18675_v54  ;;  %v18697_v54 = vpop.f32.mrf.mxu1 }
 0x576   : > { %v18677_v46 = vpop.f32.mrf.mxu0  ;;  %20250 = vst [vmem:[#allocation59_spill] sm:$0xff] %v18697_v54 }
 0x577   : > { %20241 = vst [vmem:[#allocation95_spill] sm:$0xff] %v18677_v46 }
 0x578   : > { %v18681_v56 = vpop.f32.mrf.mxu0 }
 0x579   : > { %20243 = vst [vmem:[#allocation82_spill] sm:$0xff] %v18681_v56  ;;  %v18703_v56 = vpop.f32.mrf.mxu1 }
 0x57a   : > { %v18683_v43 = vpop.f32.mrf.mxu0 }
 0x57b   : > { %20244 = vst [vmem:[#allocation51_spill] sm:$0xff] %v18683_v43  ;;  %v6392_v43 = vadd.f32 %v18293_v5, %v18291_v36  ;;  %v6424_v36 = vadd.f32 %v18328_v17, %v18326_v3  ;;  %v7569_v5 = vadd.f32 %v18497_v8, %v18500_v45  ;;  %v6472_v3 = vadd.f32 %v18370_v42, %v18368_v16 }
 0x57c   : > { %v18687_v59 = vpop.f32.mrf.mxu0  ;;  %v7567_v8 = vadd.f32 %v18502_v37, %v18506_v25  ;;  %v7570_v16 = vadd.f32 %v18508_v40, %v18511_v31  ;;  %v20254_v40 = vld [vmem:[#allocation32_spill] sm:$0xff] }
 0x57d   : > { %20245 = vst [vmem:[#allocation50_spill] sm:$0xff] %v18687_v59  ;;  %v6754_v17 = vadd.f32 %v18431_v26, %v6424_v36  ;;  %v7843_v45 = vadd.f32 %v14249_v33, %v7569_v5  ;;  %v20259_v36 = vld [vmem:[#allocation39_spill] sm:$0xff] }
 0x57e   : > { %v18689_v35 = vpop.f32.mrf.mxu0  ;;  %v7841_v42 = vadd.f32 %v7730_v53, %v7567_v8  ;;  %v7574_v5 = vadd.f32 %v20259_v36, %v18530_v62  ;;  %v20260_v8 = vld [vmem:[#allocation37_spill] sm:$0xff] }
 0x57f   : > { %20246 = vst [vmem:[#allocation53_spill] sm:$0xff] %v18689_v35  ;;  %v6746_v35 = vadd.f32 %v18397_v4, %v6392_v43  ;;  %v6440_v4 = vadd.f32 %v18342_v18, %v18340_v2  ;;  %v6488_v2 = vadd.f32 %v18384_v28, %v18382_v49 }
 0x580   : > { %v18693_v51 = vpop.f32.mrf.mxu0 }
 0x581   : > { %20248 = vst [vmem:[#allocation55_spill] sm:$0xff] %v18693_v51  ;;  %v18712_v51 = vpop.f32.mrf.mxu1  ;;  %v6758_v18 = vadd.f32 %v18449_v55, %v6440_v4  ;;  %v6770_v25 = vadd.f32 %v18488_v47, %v6488_v2  ;;  %v7028_v55 = vadd.f32 %v18433_v58, %v6754_v17  ;;  %v18763_v47 = vld [vmem:[#allocation8 + $0x2] ss:$0 sm:$0xff]  ;;  %v20256_v58 = vld [vmem:[#allocation34_spill] sm:$0xff]  ;;  %v20261_v2 = vld [vmem:[#allocation40_spill] sm:$0xff] }
 0x582   : > { %v18695_v38 = vpop.f32.mrf.mxu0 }
 0x583   : > { %20249 = vst [vmem:[#allocation96_spill] sm:$0xff] %v18695_v38  ;;  %v18725_v43 = vpop.f32.mrf.mxu1  ;;  %v7302_v4 = vadd.f32 %v18558_v12, %v7028_v55  ;;  %v7848_v55 = vadd.f32 %v18659_v30, %v7574_v5  ;;  %v20272_v30 = vld [vmem:[#allocation52_spill] sm:$0xff] }
 0x584   : > { %v18699_v46 = vpop.f32.mrf.mxu0 }
 0x585   : > { %20251 = vst [vmem:[#allocation97_spill] sm:$0xff] %v18699_v46  ;;  %v6408_v46 = vadd.f32 %v18311_v61, %v18309_v22  ;;  %v18749_v26 = vpop.f32.mrf.mxu1 }
 0x586   : > { %v18701_v57 = vpop.f32.mrf.mxu0 }
 0x587   : > { %20252 = vst [vmem:[#allocation62_spill] sm:$0xff] %v18701_v57  ;;  %v7020_v57 = vadd.f32 %v18399_v39, %v6746_v35  ;;  %v6750_v22 = vadd.f32 %v18414_v52, %v6408_v46  ;;  %v6766_v52 = vadd.f32 %v18475_v19, %v6472_v3  ;;  %v7844_v19 = vadd.f32 %v18647_v23, %v7570_v16  ;;  %v18771_v23 = vpop.f32.mrf.mxu1  ;;  %v20257_v35 = vld [vmem:[#allocation75_spill] sm:$0xff] }
 0x588   : > { %v18707_v59 = vpop.f32.mrf.mxu0  ;;  %v18774_v53 = vadd.f32 %v20257_v35, %v6770_v25  ;;  %v20265_v25 = vld [vmem:[#allocation78_spill] sm:$0xff] }
 0x589   : > { %v7294_v61 = vadd.f32 %v18513_v60, %v7020_v57  ;;  %v7024_v37 = vadd.f32 %v18416_v48, %v6750_v22  ;;  %v7032_v60 = vadd.f32 %v18451_v10, %v6758_v18 }
 0x58a   : > { %v18710_v50 = vpop.f32.mrf.mxu0 }
 0x58b   : > { %v7568_v49 = vadd.f32 %v18515_v14, %v7294_v61  ;;  %v7298_v46 = vadd.f32 %v18532_v7, %v7024_v37  ;;  %v20255_v14 = vld [vmem:[#allocation33_spill] sm:$0xff]  ;;  %v20258_v7 = vld [vmem:[#allocation35_spill] sm:$0xff]  ;;  %v8118_v61 = vadd.f32 %v18649_v63, %v7844_v19 }
 0x58c   : > { %v18714_v38 = vpop.f32.mrf.mxu0  ;;  %v18766_v57 = vadd.f32 %v20255_v14, %v6766_v52  ;;  %v18791_v52 = vpop.f32.mrf.mxu1  ;;  %v20264_v37 = vld [vmem:[#allocation67_spill] sm:$0xff]  ;;  %v20268_v14 = vld [vmem:[#allocation41_spill] sm:$0xff] }
 0x58d   : > { %20253 = vst [vmem:[#allocation57_spill] sm:$0xff] %v18714_v38  ;;  %v6456_v38 = vadd.f32 %v18356_v1, %v18354_v20  ;;  %v7842_v48 = vadd.f32 %v18651_v6, %v7568_v49  ;;  %v7571_v6 = vadd.f32 %v20258_v7, %v18525_v32  ;;  %v7572_v17 = vadd.f32 %v18534_v21, %v7298_v46  ;;  %v20262_v32 = vld [vmem:[#allocation70_spill] sm:$0xff]  ;;  %v20266_v46 = vld [vmem:[#allocation73_spill] sm:$0xff] }
 0x58e   : > { %v18719_v54 = vpop.f32.mrf.mxu0  ;;  %v7575_v18 = vadd.f32 %v20262_v32, %v20261_v2  ;;  %v7576_v49 = vadd.f32 %v20265_v25, %v7302_v4  ;;  %v20277_v2 = vld [vmem:[#allocation36_spill] sm:$0xff]  ;;  %v20281_v25 = vld [vmem:[#allocation45_spill] sm:$0xff] }
 0x58f   : > { %v6762_v20 = vadd.f32 %v18462_v44, %v6456_v38  ;;  %v8117_v44 = vadd.f32 %v18643_v29, %v7843_v45  ;;  %v7573_v38 = vadd.f32 %v20256_v58, %v18520_v15  ;;  %v8115_v29 = vadd.f32 %v18645_v24, %v7841_v42  ;;  %v20263_v42 = vld [vmem:[#allocation63_spill] sm:$0xff]  ;;  %v20269_v58 = vld [vmem:[#allocation20_spill] sm:$0xff] }
 0x590   : > { %v18733_v39 = vpop.f32.mrf.mxu0  ;;  %v7577_v45 = vadd.f32 %v20260_v8, %v18539_v34  ;;  %v8116_v62 = vadd.f32 %v18655_v27, %v7842_v48  ;;  %v7845_v12 = vadd.f32 %v18657_v0, %v7571_v6  ;;  %v7578_v21 = vadd.f32 %v20264_v37, %v20263_v42  ;;  %v20267_v48 = vld [vmem:[#allocation71_spill] sm:$0xff]  ;;  %v18812_v6 = vpop.f32.mrf.mxu1  ;;  %v20280_v42 = vld [vmem:[#allocation46_spill] sm:$0xff] }
 0x591   : > { %v7036_v31 = vadd.f32 %v20254_v40, %v6762_v20  ;;  %v7847_v15 = vadd.f32 %v18653_v11, %v7573_v38  ;;  %v7306_v34 = vadd.f32 %v18582_v9, %v7032_v60  ;;  %v7579_v38 = vadd.f32 %v20269_v58, %v20268_v14 }
 0x592   : > { %v18744_v1 = vpop.f32.mrf.mxu0  ;;  %v7846_v60 = vadd.f32 %v20272_v30, %v7572_v17  ;;  %v7851_v17 = vadd.f32 %v20277_v2, %v7577_v45  ;;  %v20292_v2 = vld [vmem:[#allocation91_spill] sm:$0xff] }
 0x593   : > { %v8121_v27 = vadd.f32 %v18661_v13, %v7847_v15  ;;  %v20273_v13 = vld [vmem:[#allocation61_spill] sm:$0xff]  ;;  %v20275_v15 = vld [vmem:[#allocation72_spill] sm:$0xff] }
 0x594   : > { %v18754_v28 = vpop.f32.mrf.mxu0  ;;  %v8119_v7 = vadd.f32 %v20273_v13, %v7845_v12 }
 0x596   : > { %v14313_v33 = vpop.f32.mrf.mxu0 }
 0x597   : > { %v8391_v10 = vadd.f32 %v14313_v33, %v8117_v44  ;;  %v7581_v33 = vadd.f32 %v20267_v48, %v20266_v46 }
 0x598   : > { %v8278_v22 = vpop.f32.mrf.mxu0 }
 0x599   : > { %v8427_v24 = vadd.f32 %v18763_v47, %v8391_v10  ;;  %v8389_v3 = vadd.f32 %v8278_v22, %v8115_v29  ;;  %v20270_v29 = vld [vmem:[#allocation42_spill] sm:$0xff]  ;;  %v20271_v10 = vld [vmem:[#allocation43_spill] sm:$0xff]  ;;  %v20274_v22 = vld [vmem:[#allocation81_spill] sm:$0xff] }
 0x59a   : > { %v14314_v20 = vpop.f32.mrf.mxu0  ;;  %v18808_v9 = vadd.f32 %v20271_v10, %v20270_v29  ;;  %v20286_v29 = vld [vmem:[#allocation74_spill] sm:$0xff]  ;;  %v20287_v10 = vld [vmem:[#allocation44_spill] sm:$0xff] }
 0x59b   : > { %v8455_v63 = vmax.f32 %v8427_v24, 0.0  ;;  %v8425_v11 = vadd.f32 %v18763_v47, %v8389_v3  ;;  %v8392_v16 = vadd.f32 %v14314_v20, %v8118_v61  ;;  %v18817_v61 = vadd.f32 %v20274_v22, %v7306_v34  ;;  %v20276_v3 = vld [vmem:[#allocation68_spill] sm:$0xff] }
 0x59c   : > { %v8281_v44 = vpop.f32.mrf.mxu0  ;;  %v7310_v24 = vadd.f32 %v20275_v15, %v7036_v31  ;;  %v8122_v8 = vadd.f32 %v20276_v3, %v7848_v55  ;;  %v20282_v34 = vld [vmem:[#allocation88_spill] sm:$0xff]  ;;  %v20283_v31 = vld [vmem:[#allocation83_spill] sm:$0xff]  ;;  %v18843_v30 = vadd.f32 %v20287_v10, %v20286_v29 }
 0x59d   : > { %8544 = vst.msk [vmem:[#allocation3 + $0x21] sm:$0xff] %vm386_vm0, %v8455_v63  ;;  %v8453_v0 = vmax.f32 %v8425_v11, 0.0  ;;  %v8428_v19 = vadd.f32 %v18763_v47, %v8392_v16  ;;  %v8390_v40 = vadd.f32 %v8281_v44, %v8116_v62  ;;  %v20279_v16 = vld [vmem:[#allocation66_spill] sm:$0xff]  ;;  %v18831_v44 = vadd.f32 %v20282_v34, %v20281_v25  ;;  %v20294_v62 = vld [vmem:[#allocation47_spill] sm:$0xff] }
 0x59e   : > { %v14317_v35 = vpop.f32.mrf.mxu0  ;;  %v18827_v37 = vadd.f32 %v20280_v42, %v20279_v16  ;;  %v8120_v55 = vadd.f32 %v20283_v31, %v7846_v60 }
 0x59f   : > { %8542 = vst.msk [vmem:[#allocation3 + $0x11] sm:$0xff] %vm386_vm0, %v8453_v0  ;;  %v8456_v36 = vmax.f32 %v8428_v19, 0.0  ;;  %v8426_v5 = vadd.f32 %v18763_v47, %v8390_v40  ;;  %v8395_v4 = vadd.f32 %v14317_v35, %v8121_v27  ;;  %v20284_v27 = vld [vmem:[#allocation90_spill] sm:$0xff]  ;;  %v18836_v19 = vpop.f32.mrf.mxu1  ;;  %v20288_v35 = vld [vmem:[#allocation31_spill] sm:$0xff] }
 0x5a0   : > { %v8294_v32 = vpop.f32.mrf.mxu0  ;;  %v7849_v45 = vadd.f32 %v20284_v27, %v7575_v18  ;;  %v18846_v60 = vadd.f32 %v20288_v35, %v7310_v24  ;;  %v20289_v18 = vld [vmem:[#allocation49_spill] sm:$0xff] }
 0x5a1   : > { %v8517_v20 = vsel %vm16525_vm2, %v8456_v36, 0.0  ;;  %v8454_v12 = vmax.f32 %v8426_v5, 0.0  ;;  %v8431_v63 = vadd.f32 %v18763_v47, %v8395_v4  ;;  %v8393_v11 = vadd.f32 %v8294_v32, %v8119_v7  ;;  %v20290_v7 = vld [vmem:[#allocation92_spill] sm:$0xff]  ;;  %v18869_v42 = vpop.f32.mrf.mxu1 }
 0x5a2   : > { %8545 = vst.msk [vmem:[#allocation3 + $0x29] sm:$0xff] %vm386_vm0, %v8517_v20  ;;  %v14318_v0 = vpop.f32.mrf.mxu0  ;;  %v7314_v13 = vadd.f32 %v20289_v18, %v18766_v57  ;;  %v7852_v36 = vadd.f32 %v20290_v7, %v7578_v21  ;;  %v8125_v4 = vadd.f32 %v18685_v41, %v7851_v17  ;;  %v20293_v32 = vld [vmem:[#allocation48_spill] sm:$0xff]  ;;  %v20295_v21 = vld [vmem:[#allocation54_spill] sm:$0xff]  ;;  %v20296_v20 = vld [vmem:[#allocation77_spill] sm:$0xff]  ;;  %vm11949_vm2 = vcmask 73728  }
 0x5a3   : > { %v8515_v46 = vsel %vm16541_vm3, %v8454_v12, 0.0  ;;  %v8459_v48 = vmax.f32 %v8431_v63, 0.0  ;;  %v8429_v14 = vadd.f32 %v18763_v47, %v8393_v11  ;;  %v8396_v58 = vadd.f32 %v14318_v0, %v8122_v8  ;;  %v20291_v8 = vld [vmem:[#allocation76_spill] sm:$0xff]  ;;  %v20297_v63 = vld [vmem:[#allocation93_spill] sm:$0xff]  ;;  %v20300_v0 = vld [vmem:[#allocation59_spill] sm:$0xff] }
 0x5a4   : > { %8543 = vst.msk [vmem:[#allocation3 + $0x19] sm:$0xff] %vm386_vm0, %v8515_v46  ;;  %v8297_v5 = vpop.f32.mrf.mxu0  ;;  %v18857_v24 = vadd.f32 %v20292_v2, %v20291_v8  ;;  %v18861_v57 = vadd.f32 %v20294_v62, %v20293_v32  ;;  %v18865_v12 = vadd.f32 %v20296_v20, %v20295_v21  ;;  %v7850_v41 = vadd.f32 %v20297_v63, %v7576_v49  ;;  %v20298_v11 = vld [vmem:[#allocation56_spill] sm:$0xff]  ;;  %v20301_v46 = vld [vmem:[#allocation95_spill] sm:$0xff]  ;;  %v18896_v32 = vpop.f32.mrf.mxu1 }
 0x5a5   : > { %8548 = vst.msk [vmem:[#allocation3 + $0x41] sm:$0xff] %vm386_vm0, %v8459_v48  ;;  %v8457_v22 = vmax.f32 %v8429_v14, 0.0  ;;  %v8432_v15 = vadd.f32 %v18763_v47, %v8396_v58  ;;  %v8394_v3 = vadd.f32 %v8297_v5, %v8120_v55  ;;  %v8123_v16 = vadd.f32 %v20298_v11, %v7849_v45  ;;  %v20299_v55 = vld [vmem:[#allocation94_spill] sm:$0xff]  ;;  %v20304_v5 = vld [vmem:[#allocation85_spill] sm:$0xff] }
 0x5a6   : > { %v14321_v17 = vpop.f32.mrf.mxu0  ;;  %v18874_v27 = vadd.f32 %v20299_v55, %v7314_v13  ;;  %v8126_v40 = vadd.f32 %v20300_v0, %v7852_v36  ;;  %v7855_v48 = vadd.f32 %v20301_v46, %v7581_v33  ;;  %v20302_v14 = vld [vmem:[#allocation82_spill] sm:$0xff]  ;;  %v20306_v13 = vld [vmem:[#allocation64_spill] sm:$0xff]  ;;  %v20308_v33 = vld [vmem:[#allocation89_spill] sm:$0xff]  ;;  %v8124_v8 = vadd.f32 %v18703_v56, %v7850_v41 }
 0x5a7   : > { %8546 = vst.msk [vmem:[#allocation3 + $0x31] sm:$0xff] %vm386_vm0, %v8457_v22  ;;  %v8460_v25 = vmax.f32 %v8432_v15, 0.0  ;;  %v8430_v34 = vadd.f32 %v18763_v47, %v8394_v3  ;;  %v8399_v31 = vadd.f32 %v14321_v17, %v8125_v4  ;;  %v7853_v49 = vadd.f32 %v20302_v14, %v7579_v38  ;;  %v20305_v4 = vld [vmem:[#allocation25_spill] sm:$0xff]  ;;  %v20307_v15 = vld [vmem:[#allocation86_spill] sm:$0xff]  ;;  %v20309_v3 = vld [vmem:[#allocation87_spill] sm:$0xff] }
 0x5a8   : > { %v8310_v58 = vpop.f32.mrf.mxu0  ;;  %v18884_v22 = vadd.f32 %v20305_v4, %v20304_v5  ;;  %v18888_v36 = vadd.f32 %v20307_v15, %v20306_v13  ;;  %v18892_v38 = vadd.f32 %v20309_v3, %v20308_v33  ;;  %v8570_v11 = vld [vmem:[#allocation3 + $0x11] sm:$0xff]  ;;  %v18914_v4 = vpop.f32.mrf.mxu1 }
 0x5a9   : > { %v8521_v45 = vsel %vm16577_vm4, %v8460_v25, 0.0  ;;  %v8458_v10 = vmax.f32 %v8430_v34, 0.0  ;;  %v8435_v35 = vadd.f32 %v18763_v47, %v8399_v31  ;;  %v8397_v18 = vadd.f32 %v8310_v58, %v8123_v16  ;;  %v8598_v7 = vld [vmem:[#allocation3 + $0x22] sm:$0xff]  ;;  %v20311_v31 = vld [vmem:[#allocation51_spill] sm:$0xff] }
 0x5aa   : > { %8549 = vst.msk [vmem:[#allocation3 + $0x49] sm:$0xff] %vm386_vm0, %v8521_v45  ;;  %v14322_v2 = vpop.f32.mrf.mxu0  ;;  %v8572_v16 = vld [vmem:[#allocation3 + $0x21] sm:$0xff]  ;;  %v8129_v34 = vadd.f32 %v18712_v51, %v7855_v48  ;;  %v7856_v56 = vadd.f32 %v20311_v31, %v18808_v9  ;;  %v8127_v46 = vadd.f32 %v18725_v43, %v7853_v49  ;;  %v20312_v51 = vld [vmem:[#allocation50_spill] sm:$0xff]  ;;  %v20313_v9 = vld [vmem:[#allocation53_spill] sm:$0xff] }
 0x5ab   : > { %v8519_v21 = vsel %vm16593_vm5, %v8458_v10, 0.0  ;;  %v8463_v20 = vmax.f32 %v8435_v35, 0.0  ;;  %v8433_v63 = vadd.f32 %v18763_v47, %v8397_v18  ;;  %v8400_v17 = vadd.f32 %v14322_v2, %v8126_v40  ;;  %v8596_v25 = vld [vmem:[#allocation3 + $0x12] sm:$0xff]  ;;  %v8597_v45 = vld [vmem:[#allocation3 + $0x1a] sm:$0xff]  ;;  %v8573_v43 = vld [vmem:[#allocation3 + $0x29] sm:$0xff] }
 0x5ac   : > { %8547 = vst.msk [vmem:[#allocation3 + $0x39] sm:$0xff] %vm386_vm0, %v8519_v21  ;;  %v8313_v41 = vpop.f32.mrf.mxu0  ;;  %v8622_v55 = vmax.f32 %v8570_v11, %v8596_v25  ;;  %v8624_v0 = vmax.f32 %v8572_v16, %v8598_v7  ;;  %v8571_v29 = vld [vmem:[#allocation3 + $0x19] sm:$0xff]  ;;  %v7854_v48 = vadd.f32 %v20312_v51, %v18817_v61  ;;  %v7859_v10 = vadd.f32 %v20313_v9, %v18827_v37  ;;  %v20315_v61 = vld [vmem:[#allocation80_spill] sm:$0xff] }
 0x5ad   : > { %8552 = vst.msk [vmem:[#allocation3 + $0x61] sm:$0xff] %vm386_vm0, %v8463_v20  ;;  %v8461_v14 = vmax.f32 %v8433_v63, 0.0  ;;  %v8436_v40 = vadd.f32 %v18763_v47, %v8400_v17  ;;  %v8398_v58 = vadd.f32 %v8313_v41, %v8124_v8  ;;  %v20314_v35 = vld [vmem:[#allocation55_spill] sm:$0xff]  ;;  %v18920_v8 = vadd.f32 %v20315_v61, %v18774_v53  ;;  %v20321_v20 = vld [vmem:[#allocation57_spill] sm:$0xff] }
 0x5ae   : > { %v7857_v18 = vadd.f32 %v20314_v35, %v18831_v44  ;;  %v14325_v7 = vpop.f32.mrf.mxu0  ;;  %v8654_v5 = vmax.f32 %v8622_v55, %v8624_v0  ;;  %v8599_v49 = vld [vmem:[#allocation3 + $0x2a] sm:$0xff]  ;;  %v8130_v37 = vadd.f32 %v18749_v26, %v7856_v56  ;;  %v20316_v44 = vld [vmem:[#allocation96_spill] sm:$0xff]  ;;  %v8623_v21 = vmax.f32 %v8571_v29, %v8597_v45  ;;  %v14302_v55 = vpop.f32.mrf.mxu1 }
 0x5af   : > { %8550 = vst.msk [vmem:[#allocation3 + $0x51] sm:$0xff] %vm386_vm0, %v8461_v14  ;;  %v8464_v13 = vmax.f32 %v8436_v40, 0.0  ;;  %v8434_v15 = vadd.f32 %v18763_v47, %v8398_v58  ;;  %v8403_v33 = vadd.f32 %v14325_v7, %v8129_v34  ;;  %v8625_v3 = vmax.f32 %v8573_v43, %v8599_v49  ;;  %v8574_v31 = vld [vmem:[#allocation3 + $0x31] sm:$0xff]  ;;  %v8576_v56 = vld [vmem:[#allocation3 + $0x41] sm:$0xff] }
 0x5b0   : > { %v7860_v2 = vadd.f32 %v20316_v44, %v18843_v30  ;;  %v8326_v62 = vpop.f32.mrf.mxu0  ;;  %8680 = vst.msk [vmem:[#allocation4] sm:$0xff] %vm386_vm0, %v8654_v5  ;;  %v8128_v53 = vadd.f32 %v18771_v23, %v7854_v48  ;;  %v8133_v34 = vadd.f32 %v18791_v52, %v7859_v10  ;;  %v8131_v26 = vadd.f32 %v18812_v6, %v7857_v18  ;;  %v20319_v10 = vld [vmem:[#allocation97_spill] sm:$0xff]  ;;  %v20320_v43 = vld [vmem:[#allocation62_spill] sm:$0xff] }
 0x5b1   : > { %v8525_v63 = vsel %vm16630_vm6, %v8464_v13, 0.0  ;;  %v8462_v17 = vmax.f32 %v8434_v15, 0.0  ;;  %v8439_v11 = vadd.f32 %v18763_v47, %v8403_v33  ;;  %v8401_v16 = vadd.f32 %v8326_v62, %v8127_v46  ;;  %v8602_v25 = vld [vmem:[#allocation3 + $0x42] sm:$0xff] }
 0x5b2   : > { %8553 = vst.msk [vmem:[#allocation3 + $0x69] sm:$0xff] %vm386_vm0, %v8525_v63  ;;  %v14326_v30 = vpop.f32.mrf.mxu0  ;;  %v8655_v41 = vmax.f32 %v8623_v21, %v8625_v3  ;;  %v8134_v52 = vadd.f32 %v18836_v19, %v7860_v2  ;;  %v8628_v48 = vmax.f32 %v8576_v56, %v8602_v25  ;;  %v7858_v35 = vadd.f32 %v20319_v10, %v18846_v60  ;;  %v8577_v15 = vld [vmem:[#allocation3 + $0x49] sm:$0xff]  ;;  %v8087_v3 = vpop.f32.mrf.mxu1  ;;  %v14898_v2 = vld [vmem:[%s19773_s3 + $0x28] sm:$0xff]  }
 0x5b3   : > { %v8523_v14 = vsel %vm16654_vm7, %v8462_v17, 0.0  ;;  %v8467_v40 = vmax.f32 %v8439_v11, 0.0  ;;  %v8437_v46 = vadd.f32 %v18763_v47, %v8401_v16  ;;  %v8404_v58 = vadd.f32 %v14326_v30, %v8130_v37  ;;  %v8600_v29 = vld [vmem:[#allocation3 + $0x32] sm:$0xff]  ;;  %v8601_v45 = vld [vmem:[#allocation3 + $0x3a] sm:$0xff]  ;;  %v14904_v25 = vld [vmem:[%s19773_s3 + $0x30] sm:$0xff]  }
 0x5b4   : > { %v8575_v23 = vld [vmem:[#allocation3 + $0x39] sm:$0xff]  ;;  %8551 = vst.msk [vmem:[#allocation3 + $0x59] sm:$0xff] %vm386_vm0, %v8523_v14  ;;  %v8329_v6 = vpop.f32.mrf.mxu0  ;;  %v8626_v51 = vmax.f32 %v8574_v31, %v8600_v29  ;;  %8681 = vst.msk [vmem:[#allocation4 + $0x8] sm:$0xff] %vm386_vm0, %v8655_v41  ;;  %v7863_v19 = vadd.f32 %v20320_v43, %v18857_v24  ;;  %v7861_v24 = vadd.f32 %v18707_v59, %v18861_v57  ;;  %v18957_v16 = vpop.f32.mrf.mxu1  ;;  %v14902_v43 = vld [vmem:[%s19773_s3 + $0x38] sm:$0xff]  }
 0x5b5   : > { %v8627_v9 = vmax.f32 %v8575_v23, %v8601_v45  ;;  %8556 = vst.msk [vmem:[#allocation3 + $0x81] sm:$0xff] %vm386_vm0, %v8467_v40  ;;  %v8465_v18 = vmax.f32 %v8437_v46, 0.0  ;;  %v8440_v7 = vadd.f32 %v18763_v47, %v8404_v58  ;;  %v8402_v5 = vadd.f32 %v8329_v6, %v8128_v53  ;;  %v20323_v59 = vld [vmem:[#allocation79_spill] sm:$0xff] }
 0x5b6   : > { %v14329_v49 = vpop.f32.mrf.mxu0  ;;  %v8658_v13 = vmax.f32 %v8626_v51, %v8628_v48  ;;  %v8603_v33 = vld [vmem:[#allocation3 + $0x4a] sm:$0xff]  ;;  %v7864_v21 = vadd.f32 %v18710_v50, %v18865_v12  ;;  %v7862_v63 = vadd.f32 %v20321_v20, %v18874_v27  ;;  %v18964_v57 = vadd.f32 %v20323_v59, %v18920_v8  ;;  %v8100_v48 = vpop.f32.mrf.mxu1 }
 0x5b7   : > { %8554 = vst.msk [vmem:[#allocation3 + $0x71] sm:$0xff] %vm386_vm0, %v8465_v18  ;;  %v8468_v61 = vmax.f32 %v8440_v7, 0.0  ;;  %v8438_v37 = vadd.f32 %v18763_v47, %v8402_v5  ;;  %v8407_v60 = vadd.f32 %v14329_v49, %v8133_v34  ;;  %v8712_v44 = vld [vmem:[#allocation4 + $0x2] sm:$0x1]  ;;  %v8629_v62 = vmax.f32 %v8577_v15, %v8603_v33  ;;  %v8774_v10 = vld [vmem:[#allocation4 + $0x4] sm:$0x1] }
 0x5b8   : > { %v8342_v17 = vpop.f32.mrf.mxu0  ;;  %v8713_v11 = vpack.c.bf16 %v8712_v44, %v8712_v44  ;;  %8684 = vst.msk [vmem:[#allocation4 + $0x20] sm:$0xff] %vm386_vm0, %v8658_v13  ;;  %v8132_v50 = vadd.f32 %v18869_v42, %v7858_v35  ;;  %v8137_v12 = vadd.f32 %v18896_v32, %v7863_v19  ;;  %v14900_v42 = vld [vmem:[%s19773_s3 + $0x20] sm:$0xff]   ;;  %v20325_v8 = vmov 0.0   ;;  %v8580_v35 = vld [vmem:[#allocation3 + $0x61] sm:$0xff] }
 0x5b9   : > { %v8529_v53 = vsel %vm16713_vm8, %v8468_v61, 0.0  ;;  %v8466_v34 = vmax.f32 %v8438_v37, 0.0  ;;  %v8443_v30 = vadd.f32 %v18763_v47, %v8407_v60  ;;  %v8405_v31 = vadd.f32 %v8342_v17, %v8131_v26  ;;  %v8606_v32 = vld [vmem:[#allocation3 + $0x62] sm:$0xff] }
 0x5ba   : > { %8557 = vst.msk [vmem:[#allocation3 + $0x89] sm:$0xff] %vm386_vm0, %v8529_v53  ;;  %v14330_v27 = vpop.f32.mrf.mxu0  ;;  %14344 = vmatmul.mubr.msk.bf16.vlgmr.msra.gmra.mxu1 %vm386_vm0, %v8713_v11  ;;  %v8659_v56 = vmax.f32 %v8627_v9, %v8629_v62  ;;  %v8135_v46 = vadd.f32 %v18914_v4, %v7861_v24  ;;  %v8138_v58 = vadd.f32 %v14302_v55, %v7864_v21  ;;  %v8836_v53 = vld [vmem:[#allocation4 + $0x6] sm:$0x1] }
 0x5bb   : > { %v8527_v0 = vsel %vm16741_vm9, %v8466_v34, 0.0  ;;  %v8471_v14 = vmax.f32 %v8443_v30, 0.0  ;;  %v8441_v26 = vadd.f32 %v18763_v47, %v8405_v31  ;;  %v8408_v40 = vadd.f32 %v14330_v27, %v8134_v52  ;;  %14348 = vmatpush3.bf16.msra.mxu1 %v14898_v2  ;;  %14351 = vmatprep.mubr.msk.bf16.mxu1 %vm15189_vm1, %v20325_v8  ;;  %v8578_v52 = vld [vmem:[#allocation3 + $0x51] sm:$0xff]  ;;  %v8579_v51 = vld [vmem:[#allocation3 + $0x59] sm:$0xff]  ;;  %v14306_v2 = vpop.f32.mrf.mxu1  ;;  %v8898_v62 = vld [vmem:[#allocation4 + $0x8] sm:$0x1] }
 0x5bc   : > { %v18979_v29 = vadd.f32 %v8087_v3, %v7862_v63  ;;  %v7867_v23 = vadd.f32 %v18719_v54, %v18884_v22  ;;  %8555 = vst.msk [vmem:[#allocation3 + $0x79] sm:$0xff] %vm386_vm0, %v8527_v0  ;;  %v8345_v45 = vpop.f32.mrf.mxu0  ;;  %14349 = vmatprep.subr.bf16.mxu1 %v20325_v8  ;;  %8685 = vst.msk [vmem:[#allocation4 + $0x28] sm:$0xff] %vm386_vm0, %v8659_v56  ;;  %v8604_v6 = vld [vmem:[#allocation3 + $0x52] sm:$0xff]  ;;  %v8605_v22 = vld [vmem:[#allocation3 + $0x5a] sm:$0xff]  ;;  %v7865_v18 = vadd.f32 %v18733_v39, %v18888_v36 }
 0x5bd   : > { %8560 = vst.msk [vmem:[#allocation3 + $0xa1] sm:$0xff] %vm386_vm0, %v8471_v14  ;;  %v8469_v4 = vmax.f32 %v8441_v26, 0.0  ;;  %v8444_v55 = vadd.f32 %v18763_v47, %v8408_v40  ;;  %v8406_v9 = vadd.f32 %v8345_v45, %v8132_v50  ;;  %v8630_v54 = vmax.f32 %v8578_v52, %v8604_v6  ;;  %v14903_v39 = vld [vmem:[%s19773_s3 + $0xa8] sm:$0xff]  }
 0x5be   : > { %v7868_v7 = vadd.f32 %v18744_v1, %v18892_v38  ;;  %v14333_v5 = vpop.f32.mrf.mxu0  ;;  %v8632_v19 = vmax.f32 %v8580_v35, %v8606_v32  ;;  %v8607_v49 = vld [vmem:[#allocation3 + $0x6a] sm:$0xff]  ;;  %v8631_v13 = vmax.f32 %v8579_v51, %v8605_v22  ;;  %v8775_v38 = vpack.c.bf16 %v8774_v10, %v8774_v10  ;;  %v14907_v22 = vld [vmem:[%s19773_s3 + $0xc8] sm:$0xff]  }
 0x5bf   : > { %8558 = vst.msk [vmem:[#allocation3 + $0x91] sm:$0xff] %vm386_vm0, %v8469_v4  ;;  %v8472_v15 = vmax.f32 %v8444_v55, 0.0  ;;  %v8442_v33 = vadd.f32 %v18763_v47, %v8406_v9  ;;  %v8411_v3 = vadd.f32 %v14333_v5, %v8137_v12  ;;  %14350 = vmatpush3.bf16.msra.mxu1 %v14900_v42  ;;  %v9146_v61 = vld [vmem:[#allocation4 + $0x22] sm:$0x1]  ;;  %v8141_v17 = vadd.f32 %v18957_v16, %v7867_v23  ;;  %v14905_v12 = vld [vmem:[%s19773_s3 + $0xa0] sm:$0xff]   ;;  %v8103_v9 = vpop.f32.mrf.mxu1 }
 0x5c0   : > { %v8581_v1 = vld [vmem:[#allocation3 + $0x69] sm:$0xff]  ;;  %v8358_v36 = vpop.f32.mrf.mxu0  ;;  %14355 = vmatprep.subr.bf16.mxu1 %v20325_v8  ;;  %v9147_v37 = vpack.c.bf16 %v9146_v61, %v9146_v61  ;;  %v8662_v60 = vmax.f32 %v8630_v54, %v8632_v19  ;;  %v8139_v41 = vadd.f32 %v8100_v48, %v7865_v18  ;;  %v7866_v0 = vadd.f32 %v18754_v28, %v18964_v57  ;;  %v8582_v40 = vld [vmem:[#allocation3 + $0x71] sm:$0xff]  ;;  %v8584_v57 = vld [vmem:[#allocation3 + $0x81] sm:$0xff] }
 0x5c1   : > { %v8633_v44 = vmax.f32 %v8581_v1, %v8607_v49  ;;  %v8533_v24 = vsel %vm16807_vm10, %v8472_v15, 0.0  ;;  %v8470_v21 = vmax.f32 %v8442_v33, 0.0  ;;  %v8447_v20 = vadd.f32 %v18763_v47, %v8411_v3  ;;  %v9270_v27 = vld [vmem:[#allocation4 + $0x26] sm:$0x1]  ;;  %v8610_v56 = vld [vmem:[#allocation3 + $0x82] sm:$0xff] }
 0x5c2   : > { %v8409_v63 = vadd.f32 %v8358_v36, %v8135_v46  ;;  %8561 = vst.msk [vmem:[#allocation3 + $0xa9] sm:$0xff] %vm386_vm0, %v8533_v24  ;;  %v14334_v11 = vpop.f32.mrf.mxu0  ;;  %14352 = vmatmul.mubr.msk.bf16.vlgmr.msra.gmra.mxu1 %vm386_vm0, %v8775_v38  ;;  %14400 = vmatmul.mubr.msk.bf16.vlgmr.msra.gmra.mxu0 %vm386_vm0, %v9147_v37  ;;  %8688 = vst.msk [vmem:[#allocation4 + $0x40] sm:$0xff] %vm386_vm0, %v8662_v60  ;;  %v8142_v14 = vadd.f32 %v14306_v2, %v7868_v7  ;;  %v14906_v54 = vld [vmem:[%s19773_s3 + $0x48] sm:$0xff]   ;;  %v8585_v18 = vld [vmem:[#allocation3 + $0x89] sm:$0xff] }
 0x5c3   : > { %v8663_v34 = vmax.f32 %v8631_v13, %v8633_v44  ;;  %v8531_v31 = vsel %vm16837_vm11, %v8470_v21, 0.0  ;;  %v8475_v59 = vmax.f32 %v8447_v20, 0.0  ;;  %v8412_v50 = vadd.f32 %v14334_v11, %v8138_v58  ;;  %14356 = vmatpush3.bf16.msra.mxu1 %v14902_v43  ;;  %14412 = vmatpush3.bf16.msra.mxu0 %v14903_v39  ;;  %v8608_v42 = vld [vmem:[#allocation3 + $0x72] sm:$0xff]  ;;  %v8609_v45 = vld [vmem:[#allocation3 + $0x7a] sm:$0xff] }
 0x5c4   : > { %v8445_v16 = vadd.f32 %v18763_v47, %v8409_v63  ;;  %8559 = vst.msk [vmem:[#allocation3 + $0x99] sm:$0xff] %vm386_vm0, %v8531_v31  ;;  %v8361_v26 = vpop.f32.mrf.mxu0  ;;  %14357 = vmatprep.subr.bf16.mxu1 %v20325_v8  ;;  %14413 = vmatprep.subr.bf16.mxu0 %v20325_v8  ;;  %v8583_v32 = vld [vmem:[#allocation3 + $0x79] sm:$0xff]  ;;  %v8634_v23 = vmax.f32 %v8582_v40, %v8608_v42  ;;  %v9394_v20 = vld [vmem:[#allocation4 + $0x2a] sm:$0x1]  ;;  %v8588_v30 = vld [vmem:[#allocation3 + $0xa1] sm:$0xff] }
 0x5c5   : > { %8689 = vst.msk [vmem:[#allocation4 + $0x48] sm:$0xff] %vm386_vm0, %v8663_v34  ;;  %8564 = vst.msk [vmem:[#allocation3 + $0xc1] sm:$0xff] %vm386_vm0, %v8475_v59  ;;  %v8448_v58 = vadd.f32 %v18763_v47, %v8412_v50  ;;  %v8410_v28 = vadd.f32 %v8361_v26, %v18979_v29  ;;  %14359 = vmatprep.mubr.msk.bf16.mxu1 %vm15189_vm1, %v20325_v8  ;;  %14415 = vmatprep.mubr.msk.bf16.mxu0 %vm15189_vm1, %v20325_v8  ;;  %v14908_v39 = vld [vmem:[%s19773_s3 + $0x40] sm:$0xff]   ;;  %v14910_v26 = vld [vmem:[%s19773_s3 + $0x58] sm:$0xff]  }
 0x5c6   : > { %v8473_v46 = vmax.f32 %v8445_v16, 0.0  ;;  %v14337_v52 = vpop.f32.mrf.mxu0  ;;  %v8837_v6 = vpack.c.bf16 %v8836_v53, %v8836_v53  ;;  %v9271_v51 = vpack.c.bf16 %v9270_v27, %v9270_v27  ;;  %v8636_v48 = vmax.f32 %v8584_v57, %v8610_v56  ;;  %v8611_v4 = vld [vmem:[#allocation3 + $0x8a] sm:$0xff]  ;;  %v14909_v2 = vld [vmem:[%s19773_s3 + $0xc0] sm:$0xff]   ;;  %v14911_v40 = vld [vmem:[%s19773_s3 + $0xe8] sm:$0xff]  }
 0x5c7   : > { %v8635_v55 = vmax.f32 %v8583_v32, %v8609_v45  ;;  %v8476_v10 = vmax.f32 %v8448_v58, 0.0  ;;  %v8446_v29 = vadd.f32 %v18763_v47, %v8410_v28  ;;  %v8415_v35 = vadd.f32 %v14337_v52, %v8141_v17  ;;  %14358 = vmatpush3.bf16.msra.mxu1 %v14904_v25  ;;  %14414 = vmatpush3.bf16.msra.mxu0 %v14905_v12  ;;  %v8586_v34 = vld [vmem:[#allocation3 + $0x91] sm:$0xff]  ;;  %v14912_v57 = vld [vmem:[%s19773_s3 + $0x50] sm:$0xff]   ;;  %v14915_v19 = vld [vmem:[%s19773_s3 + $0x108] sm:$0xff]  }
 0x5c8   : > { %8562 = vst.msk [vmem:[#allocation3 + $0xb1] sm:$0xff] %vm386_vm0, %v8473_v46  ;;  %v8374_v7 = vpop.f32.mrf.mxu0  ;;  %14363 = vmatprep.subr.bf16.mxu1 %v20325_v8  ;;  %14427 = vmatprep.subr.bf16.mxu0 %v20325_v8  ;;  %v8666_v5 = vmax.f32 %v8634_v23, %v8636_v48  ;;  %v8637_v43 = vmax.f32 %v8585_v18, %v8611_v4  ;;  %v14913_v23 = vld [vmem:[%s19773_s3 + $0xe0] sm:$0xff]   ;;  %v14927_v46 = vld [vmem:[%s19773_s3 + $0x168] sm:$0xff]   ;;  %v14930_v52 = vld [vmem:[%s19773_s3 + $0xd8] sm:$0xff]  }
 0x5c9   : > { %v8537_v49 = vsel %vm16938_vm12, %v8476_v10, 0.0  ;;  %v8474_v13 = vmax.f32 %v8446_v29, 0.0  ;;  %v8451_v15 = vadd.f32 %v18763_v47, %v8415_v35  ;;  %v8413_v33 = vadd.f32 %v8374_v7, %v8139_v41  ;;  %v8614_v24 = vld [vmem:[#allocation3 + $0xa2] sm:$0xff]  ;;  %v8960_v29 = vld [vmem:[#allocation4 + $0xa] sm:$0x1] }
 0x5ca   : > { %v8140_v3 = vadd.f32 %v8103_v9, %v7866_v0  ;;  %8565 = vst.msk [vmem:[#allocation3 + $0xc9] sm:$0xff] %vm386_vm0, %v8537_v49  ;;  %v14338_v61 = vpop.f32.mrf.mxu0  ;;  %14360 = vmatmul.mubr.msk.bf16.vlgmr.msra.gmra.mxu1 %vm386_vm0, %v8837_v6  ;;  %14416 = vmatmul.mubr.msk.bf16.vlgmr.msra.gmra.mxu0 %vm386_vm0, %v9271_v51  ;;  %8692 = vst.msk [vmem:[#allocation4 + $0x60] sm:$0xff] %vm386_vm0, %v8666_v5  ;;  %v8667_v1 = vmax.f32 %v8635_v55, %v8637_v43  ;;  %v8589_v12 = vld [vmem:[#allocation3 + $0xa9] sm:$0xff]  ;;  %v9518_v35 = vld [vmem:[#allocation4 + $0x40] sm:$0x1] }
 0x5cb   : > { %v8535_v38 = vsel %vm16957_vm13, %v8474_v13, 0.0  ;;  %v8479_v37 = vmax.f32 %v8451_v15, 0.0  ;;  %v8449_v60 = vadd.f32 %v18763_v47, %v8413_v33  ;;  %v8416_v44 = vadd.f32 %v14338_v61, %v8142_v14  ;;  %14364 = vmatpush3.bf16.msra.mxu1 %v14906_v54  ;;  %14428 = vmatpush3.bf16.msra.mxu0 %v14907_v22  ;;  %v8612_v63 = vld [vmem:[#allocation3 + $0x92] sm:$0xff]  ;;  %v8613_v31 = vld [vmem:[#allocation3 + $0x9a] sm:$0xff] }
 0x5cc   : > { %8563 = vst.msk [vmem:[#allocation3 + $0xb9] sm:$0xff] %vm386_vm0, %v8535_v38  ;;  %v8377_v21 = vpop.f32.mrf.mxu0  ;;  %14365 = vmatprep.subr.bf16.mxu1 %v20325_v8  ;;  %14429 = vmatprep.subr.bf16.mxu0 %v20325_v8  ;;  %8693 = vst.msk [vmem:[#allocation4 + $0x68] sm:$0xff] %vm386_vm0, %v8667_v1  ;;  %v8587_v17 = vld [vmem:[#allocation3 + $0x99] sm:$0xff]  ;;  %v8899_v59 = vpack.c.bf16 %v8898_v62, %v8898_v62  ;;  %v8638_v16 = vmax.f32 %v8586_v34, %v8612_v63  ;;  %v8592_v48 = vld [vmem:[#allocation3 + $0xc1] sm:$0xff] }
 0x5cd   : > { %8568 = vst.msk [vmem:[#allocation3 + $0xe1] sm:$0xff] %vm386_vm0, %v8479_v37  ;;  %v8477_v11 = vmax.f32 %v8449_v60, 0.0  ;;  %v8452_v25 = vadd.f32 %v18763_v47, %v8416_v44  ;;  %v8414_v53 = vadd.f32 %v8377_v21, %v8140_v3  ;;  %14367 = vmatprep.mubr.msk.bf16.mxu1 %vm15189_vm1, %v20325_v8  ;;  %14431 = vmatprep.mubr.msk.bf16.mxu0 %vm15189_vm1, %v20325_v8  ;;  %v14914_v43 = vld [vmem:[%s19773_s3 + $0x68] sm:$0xff]   ;;  %v14916_v3 = vld [vmem:[%s19773_s3 + $0x60] sm:$0xff]   ;;  %v9642_v21 = vld [vmem:[#allocation4 + $0x44] sm:$0x1] }
 0x5ce   : > { %v8640_v50 = vmax.f32 %v8588_v30, %v8614_v24  ;;  %v8639_v56 = vmax.f32 %v8587_v17, %v8613_v31  ;;  %v9395_v14 = vpack.c.bf16 %v9394_v20, %v9394_v20  ;;  %v8961_v13 = vpack.c.bf16 %v8960_v29, %v8960_v29  ;;  %v14917_v61 = vld [vmem:[%s19773_s3 + $0x100] sm:$0xff]   ;;  %v9022_v24 = vld [vmem:[#allocation4 + $0xc] sm:$0x1] }
 0x5cf   : > { %v8615_v27 = vld [vmem:[#allocation3 + $0xaa] sm:$0xff]  ;;  %8566 = vst.msk [vmem:[#allocation3 + $0xd1] sm:$0xff] %vm386_vm0, %v8477_v11  ;;  %v8480_v41 = vmax.f32 %v8452_v25, 0.0  ;;  %v8450_v0 = vadd.f32 %v18763_v47, %v8414_v53  ;;  %14366 = vmatpush3.bf16.msra.mxu1 %v14908_v39  ;;  %14430 = vmatpush3.bf16.msra.mxu0 %v14909_v2  ;;  %v9519_v15 = vpack.c.bf16 %v9518_v35, %v9518_v35  ;;  %v14919_v25 = vld [vmem:[%s19773_s3 + $0x128] sm:$0xff]  }
 0x5d0   : > { %v8641_v42 = vmax.f32 %v8589_v12, %v8615_v27  ;;  %14371 = vmatprep.subr.bf16.mxu1 %v20325_v8  ;;  %14443 = vmatprep.subr.bf16.mxu0 %v20325_v8  ;;  %v8670_v32 = vmax.f32 %v8638_v16, %v8640_v50  ;;  %v8590_v51 = vld [vmem:[#allocation3 + $0xb1] sm:$0xff]  ;;  %v9023_v34 = vpack.c.bf16 %v9022_v24, %v9022_v24  ;;  %v9084_v50 = vld [vmem:[#allocation4 + $0x20] sm:$0x1]  ;;  %v9766_v12 = vld [vmem:[#allocation4 + $0x48] sm:$0x1] }
 0x5d1   : > { %v8541_v47 = vsel %vm16992_vm14, %v8480_v41, 0.0  ;;  %v8478_v58 = vmax.f32 %v8450_v0, 0.0  ;;  %v8618_v45 = vld [vmem:[#allocation3 + $0xc2] sm:$0xff]  ;;  %v14918_v11 = vld [vmem:[%s19773_s3 + $0x78] sm:$0xff]   ;;  %v9643_v30 = vpack.c.bf16 %v9642_v21, %v9642_v21  ;;  %v14921_v16 = vld [vmem:[%s19773_s3 + $0x120] sm:$0xff]   ;;  %v9085_v41 = vpack.c.bf16 %v9084_v50, %v9084_v50 }
 0x5d2   : > { %v8671_v28 = vmax.f32 %v8639_v56, %v8641_v42  ;;  %8569 = vst.msk [vmem:[#allocation3 + $0xe9] sm:$0xff] %vm386_vm0, %v8541_v47  ;;  %14368 = vmatmul.mubr.msk.bf16.vlgmr.msra.gmra.mxu1 %vm386_vm0, %v8899_v59  ;;  %14432 = vmatmul.mubr.msk.bf16.vlgmr.msra.gmra.mxu0 %vm386_vm0, %v9395_v14  ;;  %8696 = vst.msk [vmem:[#allocation4 + $0x80] sm:$0xff] %vm386_vm0, %v8670_v32  ;;  %v8644_v9 = vmax.f32 %v8592_v48, %v8618_v45  ;;  %v8593_v18 = vld [vmem:[#allocation3 + $0xc9] sm:$0xff]  ;;  %v14923_v56 = vld [vmem:[%s19773_s3 + $0x148] sm:$0xff]  }
 0x5d3   : > { %v8539_v6 = vsel %vm17010_vm15, %v8478_v58, 0.0  ;;  %14372 = vmatpush3.bf16.msra.mxu1 %v14910_v26  ;;  %14444 = vmatpush3.bf16.msra.mxu0 %v14911_v40  ;;  %v8616_v4 = vld [vmem:[#allocation3 + $0xb2] sm:$0xff]  ;;  %v8617_v54 = vld [vmem:[#allocation3 + $0xba] sm:$0xff]  ;;  %v14920_v59 = vld [vmem:[%s19773_s3 + $0x70] sm:$0xff]   ;;  %v9767_v0 = vpack.c.bf16 %v9766_v12, %v9766_v12 }
 0x5d4   : > { %8697 = vst.msk [vmem:[#allocation4 + $0x88] sm:$0xff] %vm386_vm0, %v8671_v28  ;;  %8567 = vst.msk [vmem:[#allocation3 + $0xd9] sm:$0xff] %vm386_vm0, %v8539_v6  ;;  %14373 = vmatprep.subr.bf16.mxu1 %v20325_v8  ;;  %14445 = vmatprep.subr.bf16.mxu0 %v20325_v8  ;;  %v8642_v55 = vmax.f32 %v8590_v51, %v8616_v4  ;;  %v8591_v10 = vld [vmem:[#allocation3 + $0xb9] sm:$0xff]  ;;  %v8648_v39 = vld [vmem:[#allocation3 + $0xe1] sm:$0xff] }
 0x5d5   : > { %14375 = vmatprep.mubr.msk.bf16.mxu1 %vm15189_vm1, %v20325_v8  ;;  %14447 = vmatprep.mubr.msk.bf16.mxu0 %vm15189_vm1, %v20325_v8  ;;  %v8643_v5 = vmax.f32 %v8591_v10, %v8617_v54  ;;  %v14922_v27 = vld [vmem:[%s19773_s3 + $0x98] sm:$0xff]   ;;  %v14924_v14 = vld [vmem:[%s19773_s3 + $0x90] sm:$0xff]   ;;  %v14925_v26 = vld [vmem:[%s19773_s3 + $0x140] sm:$0xff]  }
 0x5d6   : > { %v8674_v22 = vmax.f32 %v8642_v55, %v8644_v9  ;;  %v8619_v7 = vld [vmem:[#allocation3 + $0xca] sm:$0xff]  ;;  %v9890_v42 = vld [vmem:[#allocation4 + $0x4c] sm:$0x1]  ;;  %v14931_v6 = vld [vmem:[%s19773_s3 + $0x188] sm:$0xff]  }
 0x5d7   : > { %14374 = vmatpush3.bf16.msra.mxu1 %v14912_v57  ;;  %14446 = vmatpush3.bf16.msra.mxu0 %v14913_v23  ;;  %v8645_v49 = vmax.f32 %v8593_v18, %v8619_v7  ;;  %v8594_v1 = vld [vmem:[#allocation3 + $0xd1] sm:$0xff]  ;;  %v9208_v40 = vld [vmem:[#allocation4 + $0x24] sm:$0x1]  ;;  %v9891_v58 = vpack.c.bf16 %v9890_v42, %v9890_v42  ;;  %v9332_v23 = vld [vmem:[#allocation4 + $0x28] sm:$0x1] }
 0x5d8   : > { %14379 = vmatprep.subr.bf16.mxu1 %v20325_v8  ;;  %14459 = vmatprep.subr.bf16.mxu0 %v20325_v8  ;;  %8700 = vst.msk [vmem:[#allocation4 + $0xa0] sm:$0xff] %vm386_vm0, %v8674_v22  ;;  %v14926_v32 = vld [vmem:[%s19773_s3 + $0xb8] sm:$0xff]   ;;  %v9209_v47 = vpack.c.bf16 %v9208_v40, %v9208_v40  ;;  %v14928_v28 = vld [vmem:[%s19773_s3 + $0xb0] sm:$0xff]   ;;  %v14929_v57 = vld [vmem:[%s19773_s3 + $0x160] sm:$0xff]   ;;  %v9333_v51 = vpack.c.bf16 %v9332_v23, %v9332_v23 }
 0x5d9   : > { %v8675_v33 = vmax.f32 %v8643_v5, %v8645_v49  ;;  %v8650_v38 = vld [vmem:[#allocation3 + $0xe2] sm:$0xff]  ;;  %v8651_v63 = vld [vmem:[#allocation3 + $0xea] sm:$0xff]  ;;  %v14933_v55 = vld [vmem:[%s19773_s3 + $0x180] sm:$0xff]  }
 0x5da   : > { %14376 = vmatmul.mubr.msk.bf16.vlgmr.msra.gmra.mxu1 %vm386_vm0, %v8961_v13  ;;  %14448 = vmatmul.mubr.msk.bf16.vlgmr.msra.gmra.mxu0 %vm386_vm0, %v9519_v15  ;;  %v8652_v60 = vmax.f32 %v8648_v39, %v8650_v38  ;;  %v8649_v62 = vld [vmem:[#allocation3 + $0xe9] sm:$0xff]  ;;  %v9456_v9 = vld [vmem:[#allocation4 + $0x2c] sm:$0x1]  ;;  %v14935_v35 = vld [vmem:[%s19773_s3 + $0x1a8] sm:$0xff]  }
 0x5db   : > { %14380 = vmatpush3.bf16.msra.mxu1 %v14914_v43  ;;  %14460 = vmatpush3.bf16.msra.mxu0 %v14915_v19  ;;  %8701 = vst.msk [vmem:[#allocation4 + $0xa8] sm:$0xff] %vm386_vm0, %v8675_v33  ;;  %v8620_v36 = vld [vmem:[#allocation3 + $0xd2] sm:$0xff]  ;;  %v8621_v2 = vld [vmem:[#allocation3 + $0xda] sm:$0xff]  ;;  %v8653_v53 = vmax.f32 %v8649_v62, %v8651_v63  ;;  %v10014_v45 = vld [vmem:[#allocation4 + $0x62] sm:$0x1]  ;;  %v9457_v54 = vpack.c.bf16 %v9456_v9, %v9456_v9 }
 0x5dc   : > { %14381 = vmatprep.subr.bf16.mxu1 %v20325_v8  ;;  %14461 = vmatprep.subr.bf16.mxu0 %v20325_v8  ;;  %v8646_v37 = vmax.f32 %v8594_v1, %v8620_v36  ;;  %v8595_v44 = vld [vmem:[#allocation3 + $0xd9] sm:$0xff]  ;;  %v10015_v48 = vpack.c.bf16 %v10014_v45, %v10014_v45  ;;  %v14932_v4 = vld [vmem:[%s19773_s3 + $0xd0] sm:$0xff]   ;;  %v14934_v29 = vld [vmem:[%s19773_s3 + $0xf8] sm:$0xff]  }
 0x5dd   : > { %14383 = vmatprep.mubr.msk.bf16.mxu1 %vm15189_vm1, %v20325_v8  ;;  %14463 = vmatprep.mubr.msk.bf16.mxu0 %vm15189_vm1, %v20325_v8  ;;  %v8647_v20 = vmax.f32 %v8595_v44, %v8621_v2  ;;  %v10138_v10 = vld [vmem:[#allocation4 + $0x66] sm:$0x1]  ;;  %v14937_v7 = vld [vmem:[%s19773_s3 + $0x1a0] sm:$0xff]   ;;  %v9580_v5 = vld [vmem:[#allocation4 + $0x42] sm:$0x1] }
 0x5de   : > { %v8678_v17 = vmax.f32 %v8646_v37, %v8652_v60  ;;  %v10139_v22 = vpack.c.bf16 %v10138_v10, %v10138_v10  ;;  %v14936_v18 = vld [vmem:[%s19773_s3 + $0xf0] sm:$0xff]   ;;  %v10262_v43 = vld [vmem:[#allocation4 + $0x6a] sm:$0x1]  ;;  %v14939_v49 = vld [vmem:[%s19773_s3 + $0x1c8] sm:$0xff]   ;;  %v9581_v13 = vpack.c.bf16 %v9580_v5, %v9580_v5 }
 0x5df   : > { %14382 = vmatpush3.bf16.msra.mxu1 %v14916_v3  ;;  %14462 = vmatpush3.bf16.msra.mxu0 %v14917_v61  ;;  %v8679_v31 = vmax.f32 %v8647_v20, %v8653_v53  ;;  %v14938_v19 = vld [vmem:[%s19773_s3 + $0x118] sm:$0xff]   ;;  %v10263_v15 = vpack.c.bf16 %v10262_v43, %v10262_v43  ;;  %v14940_v33 = vld [vmem:[%s19773_s3 + $0x110] sm:$0xff]   ;;  %v14941_v3 = vld [vmem:[%s19773_s3 + $0x1c0] sm:$0xff]  }
 0x5e0   : > { %14387 = vmatprep.subr.bf16.mxu1 %v20325_v8  ;;  %14475 = vmatprep.subr.bf16.mxu0 %v20325_v8  ;;  %8704 = vst.msk [vmem:[#allocation4 + $0xc0] sm:$0xff] %vm386_vm0, %v8678_v17  ;;  %v9704_v61 = vld [vmem:[#allocation4 + $0x46] sm:$0x1]  ;;  %v10386_v39 = vld [vmem:[#allocation4 + $0x80] sm:$0x1]  ;;  %v14942_v1 = vld [vmem:[%s19773_s3 + $0x138] sm:$0xff]  }
 0x5e1   : > { %8705 = vst.msk [vmem:[#allocation4 + $0xc8] sm:$0xff] %vm386_vm0, %v8679_v31  ;;  %v14943_v36 = vld [vmem:[%s19773_s3 + $0x1e8] sm:$0xff]   ;;  %v9705_v38 = vpack.c.bf16 %v9704_v61, %v9704_v61  ;;  %v10387_v37 = vpack.c.bf16 %v10386_v39, %v10386_v39  ;;  %v14944_v60 = vld [vmem:[%s19773_s3 + $0x130] sm:$0xff]   ;;  %v14945_v44 = vld [vmem:[%s19773_s3 + $0x1e0] sm:$0xff]  }
 0x5e2   : > { %14384 = vmatmul.mubr.msk.bf16.vlgmr.msra.gmra.mxu1 %vm386_vm0, %v9023_v34  ;;  %14464 = vmatmul.mubr.msk.bf16.vlgmr.msra.gmra.mxu0 %vm386_vm0, %v9643_v30  ;;  %v9828_v2 = vld [vmem:[#allocation4 + $0x4a] sm:$0x1]  ;;  %v10510_v62 = vld [vmem:[#allocation4 + $0x84] sm:$0x1]  ;;  %v14947_v21 = vld [vmem:[%s19773_s3 + $0x208] sm:$0xff]  }
 0x5e3   : > { %14388 = vmatpush3.bf16.msra.mxu1 %v14918_v11  ;;  %14476 = vmatpush3.bf16.msra.mxu0 %v14919_v25  ;;  %v14946_v24 = vld [vmem:[%s19773_s3 + $0x158] sm:$0xff]   ;;  %v9829_v20 = vpack.c.bf16 %v9828_v2, %v9828_v2  ;;  %v10511_v63 = vpack.c.bf16 %v10510_v62, %v10510_v62  ;;  %v14948_v17 = vld [vmem:[%s19773_s3 + $0x150] sm:$0xff]   ;;  %v14949_v11 = vld [vmem:[%s19773_s3 + $0x200] sm:$0xff]  }
 0x5e4   : > { %14389 = vmatprep.subr.bf16.mxu1 %v20325_v8  ;;  %14477 = vmatprep.subr.bf16.mxu0 %v20325_v8  ;;  %v9952_v25 = vld [vmem:[#allocation4 + $0x60] sm:$0x1]  ;;  %v10634_v53 = vld [vmem:[#allocation4 + $0x88] sm:$0x1]  ;;  %v14951_v30 = vld [vmem:[%s19773_s3 + $0x228] sm:$0xff]  }
 0x5e5   : > { %14391 = vmatprep.mubr.msk.bf16.mxu1 %vm15189_vm1, %v20325_v8  ;;  %14479 = vmatprep.mubr.msk.bf16.mxu0 %vm15189_vm1, %v20325_v8  ;;  %v14950_v34 = vld [vmem:[%s19773_s3 + $0x178] sm:$0xff]   ;;  %v9953_v31 = vpack.c.bf16 %v9952_v25, %v9952_v25  ;;  %v14953_v50 = vld [vmem:[%s19773_s3 + $0x220] sm:$0xff]   ;;  %v10076_v12 = vld [vmem:[#allocation4 + $0x64] sm:$0x1] }
 0x5e6   : > { %v14957_v40 = vld [vmem:[%s19773_s3 + $0x240] sm:$0xff]   ;;  %v10200_v42 = vld [vmem:[#allocation4 + $0x68] sm:$0x1]  ;;  %v10324_v45 = vld [vmem:[#allocation4 + $0x6c] sm:$0x1] }
 0x5e7   : > { %14390 = vmatpush3.bf16.msra.mxu1 %v14920_v59  ;;  %14478 = vmatpush3.bf16.msra.mxu0 %v14921_v16  ;;  %v10635_v59 = vpack.c.bf16 %v10634_v53, %v10634_v53  ;;  %v14952_v16 = vld [vmem:[%s19773_s3 + $0x170] sm:$0xff]   ;;  %v14961_v23 = vld [vmem:[%s19773_s3 + $0x260] sm:$0xff]   ;;  %v10696_v39 = vld [vmem:[#allocation4 + $0x8a] sm:$0x1] }
 0x5e8   : > { %14403 = vmatprep.subr.bf16.mxu1 %v20325_v8  ;;  %14491 = vmatprep.subr.bf16.mxu0 %v20325_v8  ;;  %v14965_v9 = vld [vmem:[%s19773_s3 + $0x280] sm:$0xff]   ;;  %v10448_v10 = vld [vmem:[#allocation4 + $0x82] sm:$0x1]  ;;  %v10572_v43 = vld [vmem:[#allocation4 + $0x86] sm:$0x1] }
 0x5e9   : > { %v14969_v5 = vld [vmem:[%s19773_s3 + $0x2a0] sm:$0xff]   ;;  %v10820_v62 = vld [vmem:[#allocation4 + $0xa0] sm:$0x1]  ;;  %v10944_v53 = vld [vmem:[#allocation4 + $0xa4] sm:$0x1] }
 0x5ea   : > { %14392 = vmatmul.mubr.msk.bf16.vlgmr.msra.gmra.mxu1 %vm386_vm0, %v9085_v41  ;;  %14480 = vmatmul.mubr.msk.bf16.vlgmr.msra.gmra.mxu0 %vm386_vm0, %v9767_v0  ;;  %v14955_v41 = vld [vmem:[%s19773_s3 + $0x248] sm:$0xff]   ;;  %v10077_v0 = vpack.c.bf16 %v10076_v12, %v10076_v12  ;;  %v14973_v61 = vld [vmem:[%s19773_s3 + $0x2c0] sm:$0xff]   ;;  %v14984_v12 = vld [vmem:[%s19773_s3 + $0x298] sm:$0xff]  }
 0x5eb   : > { %14404 = vmatpush3.bf16.msra.mxu1 %v14922_v27  ;;  %14492 = vmatpush3.bf16.msra.mxu0 %v14923_v56  ;;  %v10758_v27 = vld [vmem:[#allocation4 + $0x8c] sm:$0x1]  ;;  %v14977_v2 = vld [vmem:[%s19773_s3 + $0x2e0] sm:$0xff]  }
 0x5ec   : > { %14405 = vmatprep.subr.bf16.mxu1 %v20325_v8  ;;  %14493 = vmatprep.subr.bf16.mxu0 %v20325_v8  ;;  %v14954_v56 = vld [vmem:[%s19773_s3 + $0x198] sm:$0xff]   ;;  %v14981_v25 = vld [vmem:[%s19773_s3 + $0x300] sm:$0xff]  }
 0x5ed   : > { %14407 = vmatprep.mubr.msk.bf16.mxu1 %vm15189_vm1, %v20325_v8  ;;  %14495 = vmatprep.mubr.msk.bf16.mxu0 %vm15189_vm1, %v20325_v8 }
 0x5ef   : > { %14406 = vmatpush3.bf16.msra.mxu1 %v14924_v14  ;;  %14494 = vmatpush3.bf16.msra.mxu0 %v14925_v26  ;;  %v10759_v14 = vpack.c.bf16 %v10758_v27, %v10758_v27  ;;  %v14956_v26 = vld [vmem:[%s19773_s3 + $0x190] sm:$0xff]  }
 0x5f0   : > { %14419 = vmatprep.subr.bf16.mxu1 %v20325_v8  ;;  %14507 = vmatprep.subr.bf16.mxu0 %v20325_v8 }
 0x5f2   : > { %14408 = vmatmul.mubr.msk.bf16.vlgmr.msra.gmra.mxu1 %vm386_vm0, %v9209_v47  ;;  %14496 = vmatmul.mubr.msk.bf16.vlgmr.msra.gmra.mxu0 %vm386_vm0, %v9891_v58  ;;  %v14959_v47 = vld [vmem:[%s19773_s3 + $0x268] sm:$0xff]   ;;  %v10201_v58 = vpack.c.bf16 %v10200_v42, %v10200_v42  ;;  %v14988_v42 = vld [vmem:[%s19773_s3 + $0x2d8] sm:$0xff]  }
 0x5f3   : > { %14420 = vmatpush3.bf16.msra.mxu1 %v14926_v32  ;;  %14508 = vmatpush3.bf16.msra.mxu0 %v14927_v46  ;;  %v10882_v32 = vld [vmem:[#allocation4 + $0xa2] sm:$0x1]  ;;  %v14958_v46 = vld [vmem:[%s19773_s3 + $0x1b8] sm:$0xff]  }
 0x5f4   : > { %14421 = vmatprep.subr.bf16.mxu1 %v20325_v8  ;;  %14509 = vmatprep.subr.bf16.mxu0 %v20325_v8 }
 0x5f5   : > { %14423 = vmatprep.mubr.msk.bf16.mxu1 %vm15189_vm1, %v20325_v8  ;;  %14511 = vmatprep.mubr.msk.bf16.mxu0 %vm15189_vm1, %v20325_v8 }
 0x5f7   : > { %14422 = vmatpush3.bf16.msra.mxu1 %v14928_v28  ;;  %14510 = vmatpush3.bf16.msra.mxu0 %v14929_v57  ;;  %v10883_v28 = vpack.c.bf16 %v10882_v32, %v10882_v32  ;;  %v14960_v57 = vld [vmem:[%s19773_s3 + $0x1b0] sm:$0xff]  }
 0x5f8   : > { %14435 = vmatprep.subr.bf16.mxu1 %v20325_v8  ;;  %14523 = vmatprep.subr.bf16.mxu0 %v20325_v8 }
 0x5fa   : > { %14424 = vmatmul.mubr.msk.bf16.vlgmr.msra.gmra.mxu1 %vm386_vm0, %v9333_v51  ;;  %14512 = vmatmul.mubr.msk.bf16.vlgmr.msra.gmra.mxu0 %vm386_vm0, %v10015_v48  ;;  %v14963_v51 = vld [vmem:[%s19773_s3 + $0x288] sm:$0xff]   ;;  %v10325_v48 = vpack.c.bf16 %v10324_v45, %v10324_v45 }
 0x5fb   : > { %14436 = vmatpush3.bf16.msra.mxu1 %v14930_v52  ;;  %14524 = vmatpush3.bf16.msra.mxu0 %v14931_v6  ;;  %v11006_v52 = vld [vmem:[#allocation4 + $0xa6] sm:$0x1]  ;;  %v14962_v6 = vld [vmem:[%s19773_s3 + $0x1d8] sm:$0xff]  }
 0x5fc   : > { %14437 = vmatprep.subr.bf16.mxu1 %v20325_v8  ;;  %14525 = vmatprep.subr.bf16.mxu0 %v20325_v8 }
 0x5fd   : > { %14439 = vmatprep.mubr.msk.bf16.mxu1 %vm15189_vm1, %v20325_v8  ;;  %14527 = vmatprep.mubr.msk.bf16.mxu0 %vm15189_vm1, %v20325_v8 }
 0x5ff   : > { %14438 = vmatpush3.bf16.msra.mxu1 %v14932_v4  ;;  %14526 = vmatpush3.bf16.msra.mxu0 %v14933_v55  ;;  %v11007_v4 = vpack.c.bf16 %v11006_v52, %v11006_v52  ;;  %v14964_v55 = vld [vmem:[%s19773_s3 + $0x1d0] sm:$0xff]  }
 0x600   : > { %14451 = vmatprep.subr.bf16.mxu1 %v20325_v8  ;;  %14539 = vmatprep.subr.bf16.mxu0 %v20325_v8 }
 0x602   : > { %14440 = vmatmul.mubr.msk.bf16.vlgmr.msra.gmra.mxu1 %vm386_vm0, %v9457_v54  ;;  %14528 = vmatmul.mubr.msk.bf16.vlgmr.msra.gmra.mxu0 %vm386_vm0, %v10139_v22  ;;  %v14967_v54 = vld [vmem:[%s19773_s3 + $0x2a8] sm:$0xff]   ;;  %v10449_v22 = vpack.c.bf16 %v10448_v10, %v10448_v10 }
 0x603   : > { %14452 = vmatpush3.bf16.msra.mxu1 %v14934_v29  ;;  %14540 = vmatpush3.bf16.msra.mxu0 %v14935_v35  ;;  %v11130_v29 = vld [vmem:[#allocation4 + $0xaa] sm:$0x1] }
 0x604   : > { %14453 = vmatprep.subr.bf16.mxu1 %v20325_v8  ;;  %14541 = vmatprep.subr.bf16.mxu0 %v20325_v8  ;;  %v14966_v35 = vld [vmem:[%s19773_s3 + $0x1f8] sm:$0xff]  }
 0x605   : > { %14455 = vmatprep.mubr.msk.bf16.mxu1 %vm15189_vm1, %v20325_v8  ;;  %14543 = vmatprep.mubr.msk.bf16.mxu0 %vm15189_vm1, %v20325_v8 }
 0x607   : > { %14454 = vmatpush3.bf16.msra.mxu1 %v14936_v18  ;;  %14542 = vmatpush3.bf16.msra.mxu0 %v14937_v7  ;;  %v11131_v18 = vpack.c.bf16 %v11130_v29, %v11130_v29  ;;  %v14968_v7 = vld [vmem:[%s19773_s3 + $0x1f0] sm:$0xff]  }
 0x608   : > { %14467 = vmatprep.subr.bf16.mxu1 %v20325_v8  ;;  %14555 = vmatprep.subr.bf16.mxu0 %v20325_v8 }
 0x60a   : > { %14456 = vmatmul.mubr.msk.bf16.vlgmr.msra.gmra.mxu1 %vm386_vm0, %v9581_v13  ;;  %14544 = vmatmul.mubr.msk.bf16.vlgmr.msra.gmra.mxu0 %vm386_vm0, %v10263_v15  ;;  %v14971_v13 = vld [vmem:[%s19773_s3 + $0x2c8] sm:$0xff]   ;;  %v10573_v15 = vpack.c.bf16 %v10572_v43, %v10572_v43  ;;  %v14993_v43 = vld [vmem:[%s19773_s3] sm:$0xff]  }
 0x60b   : > { %14468 = vmatpush3.bf16.msra.mxu1 %v14938_v19  ;;  %14556 = vmatpush3.bf16.msra.mxu0 %v14939_v49  ;;  %v11254_v19 = vld [vmem:[#allocation4 + $0xc0] sm:$0x1]  ;;  %v14970_v49 = vld [vmem:[%s19773_s3 + $0x218] sm:$0xff]  }
 0x60c   : > { %14469 = vmatprep.subr.bf16.mxu1 %v20325_v8  ;;  %14557 = vmatprep.subr.bf16.mxu0 %v20325_v8 }
 0x60d   : > { %14471 = vmatprep.mubr.msk.bf16.mxu1 %vm15189_vm1, %v20325_v8  ;;  %14559 = vmatprep.mubr.msk.bf16.mxu0 %vm15189_vm1, %v20325_v8 }
 0x60f   : > { %14470 = vmatpush3.bf16.msra.mxu1 %v14940_v33  ;;  %14558 = vmatpush3.bf16.msra.mxu0 %v14941_v3  ;;  %v11255_v33 = vpack.c.bf16 %v11254_v19, %v11254_v19  ;;  %v14972_v3 = vld [vmem:[%s19773_s3 + $0x210] sm:$0xff]  }
 0x610   : > { %14483 = vmatprep.subr.bf16.mxu1 %v20325_v8  ;;  %14571 = vmatprep.subr.bf16.mxu0 %v20325_v8 }
 0x612   : > { %14472 = vmatmul.mubr.msk.bf16.vlgmr.msra.gmra.mxu1 %vm386_vm0, %v9705_v38  ;;  %14560 = vmatmul.mubr.msk.bf16.vlgmr.msra.gmra.mxu0 %vm386_vm0, %v10387_v37  ;;  %v14975_v38 = vld [vmem:[%s19773_s3 + $0x2e8] sm:$0xff]   ;;  %v10697_v37 = vpack.c.bf16 %v10696_v39, %v10696_v39 }
 0x613   : > { %14484 = vmatpush3.bf16.msra.mxu1 %v14942_v1  ;;  %14572 = vmatpush3.bf16.msra.mxu0 %v14943_v36  ;;  %v11378_v1 = vld [vmem:[#allocation4 + $0xc4] sm:$0x1]  ;;  %v14974_v36 = vld [vmem:[%s19773_s3 + $0x238] sm:$0xff]  }
 0x614   : > { %14485 = vmatprep.subr.bf16.mxu1 %v20325_v8  ;;  %14573 = vmatprep.subr.bf16.mxu0 %v20325_v8 }
 0x615   : > { %14487 = vmatprep.mubr.msk.bf16.mxu1 %vm15189_vm1, %v20325_v8  ;;  %14575 = vmatprep.mubr.msk.bf16.mxu0 %vm15189_vm1, %v20325_v8 }
 0x617   : > { %14486 = vmatpush3.bf16.msra.mxu1 %v14944_v60  ;;  %14574 = vmatpush3.bf16.msra.mxu0 %v14945_v44  ;;  %v11379_v60 = vpack.c.bf16 %v11378_v1, %v11378_v1  ;;  %v14976_v44 = vld [vmem:[%s19773_s3 + $0x230] sm:$0xff]  }
 0x618   : > { %14499 = vmatprep.subr.bf16.mxu1 %v20325_v8  ;;  %14587 = vmatprep.subr.bf16.mxu0 %v20325_v8 }
 0x61a   : > { %14488 = vmatmul.mubr.msk.bf16.vlgmr.msra.gmra.mxu1 %vm386_vm0, %v9829_v20  ;;  %14576 = vmatmul.mubr.msk.bf16.vlgmr.msra.gmra.mxu0 %vm386_vm0, %v10511_v63  ;;  %v14979_v20 = vld [vmem:[%s19773_s3 + $0x308] sm:$0xff]   ;;  %v10821_v63 = vpack.c.bf16 %v10820_v62, %v10820_v62 }
 0x61b   : > { %14500 = vmatpush3.bf16.msra.mxu1 %v14946_v24  ;;  %14588 = vmatpush3.bf16.msra.mxu0 %v14947_v21  ;;  %v11502_v24 = vld [vmem:[#allocation4 + $0xc8] sm:$0x1] }
 0x61c   : > { %14501 = vmatprep.subr.bf16.mxu1 %v20325_v8  ;;  %14589 = vmatprep.subr.bf16.mxu0 %v20325_v8  ;;  %v14978_v21 = vld [vmem:[%s19773_s3 + $0x258] sm:$0xff]  }
 0x61d   : > { %14503 = vmatprep.mubr.msk.bf16.mxu1 %vm15189_vm1, %v20325_v8  ;;  %14591 = vmatprep.mubr.msk.bf16.mxu0 %vm15189_vm1, %v20325_v8 }
 0x61f   : > { %14502 = vmatpush3.bf16.msra.mxu1 %v14948_v17  ;;  %14590 = vmatpush3.bf16.msra.mxu0 %v14949_v11  ;;  %v11503_v17 = vpack.c.bf16 %v11502_v24, %v11502_v24  ;;  %v14980_v11 = vld [vmem:[%s19773_s3 + $0x250] sm:$0xff]  }
 0x620   : > { %14515 = vmatprep.subr.bf16.mxu1 %v20325_v8  ;;  %14603 = vmatprep.subr.bf16.mxu0 %v20325_v8 }
 0x622   : > { %14504 = vmatmul.mubr.msk.bf16.vlgmr.msra.gmra.mxu1 %vm386_vm0, %v9953_v31  ;;  %14592 = vmatmul.mubr.msk.bf16.vlgmr.msra.gmra.mxu0 %vm386_vm0, %v10635_v59  ;;  %v10945_v31 = vpack.c.bf16 %v10944_v53, %v10944_v53 }
 0x623   : > { %14516 = vmatpush3.bf16.msra.mxu1 %v14950_v34  ;;  %14604 = vmatpush3.bf16.msra.mxu0 %v14951_v30  ;;  %v11626_v34 = vld [vmem:[#allocation4 + $0xcc] sm:$0x1] }
 0x624   : > { %14517 = vmatprep.subr.bf16.mxu1 %v20325_v8  ;;  %14605 = vmatprep.subr.bf16.mxu0 %v20325_v8  ;;  %v14982_v30 = vld [vmem:[%s19773_s3 + $0x278] sm:$0xff]   ;;  %v11627_v59 = vpack.c.bf16 %v11626_v34, %v11626_v34 }
 0x625   : > { %14519 = vmatprep.mubr.msk.bf16.mxu1 %vm15189_vm1, %v20325_v8  ;;  %14607 = vmatprep.mubr.msk.bf16.mxu0 %vm15189_vm1, %v20325_v8 }
 0x627   : > { %14518 = vmatpush3.bf16.msra.mxu1 %v14952_v16  ;;  %14606 = vmatpush3.bf16.msra.mxu0 %v14953_v50  ;;  %v14983_v16 = vld [vmem:[%s19773_s3 + $0x270] sm:$0xff]   ;;  %v11068_v50 = vld [vmem:[#allocation4 + $0xa8] sm:$0x1] }
 0x628   : > { %14531 = vmatprep.subr.bf16.mxu1 %v20325_v8  ;;  %14619 = vmatprep.subr.bf16.mxu0 %v20325_v8  ;;  %v11069_v27 = vpack.c.bf16 %v11068_v50, %v11068_v50 }
 0x62a   : > { %14520 = vmatmul.mubr.msk.bf16.vlgmr.msra.gmra.mxu1 %vm386_vm0, %v10077_v0  ;;  %14608 = vmatmul.mubr.msk.bf16.vlgmr.msra.gmra.mxu0 %vm386_vm0, %v10759_v14  ;;  %v14986_v0 = vld [vmem:[%s19773_s3 + $0x2b8] sm:$0xff]  }
 0x62b   : > { %14532 = vmatpush3.bf16.msra.mxu1 %v14954_v56  ;;  %14620 = vmatpush3.bf16.msra.mxu0 %v14955_v41  ;;  %v14985_v56 = vld [vmem:[%s19773_s3 + $0x290] sm:$0xff]   ;;  %v11192_v41 = vld [vmem:[#allocation4 + $0xac] sm:$0x1] }
 0x62c   : > { %14533 = vmatprep.subr.bf16.mxu1 %v20325_v8  ;;  %14621 = vmatprep.subr.bf16.mxu0 %v20325_v8  ;;  %v11193_v14 = vpack.c.bf16 %v11192_v41, %v11192_v41 }
 0x62d   : > { %14535 = vmatprep.mubr.msk.bf16.mxu1 %vm15189_vm1, %v20325_v8  ;;  %14623 = vmatprep.mubr.msk.bf16.mxu0 %vm15189_vm1, %v20325_v8 }
 0x62f   : > { %14534 = vmatpush3.bf16.msra.mxu1 %v14956_v26  ;;  %14622 = vmatpush3.bf16.msra.mxu0 %v14957_v40  ;;  %v14987_v26 = vld [vmem:[%s19773_s3 + $0x2b0] sm:$0xff]  }
 0x630   : > { %14547 = vmatprep.subr.bf16.mxu1 %v20325_v8  ;;  %14635 = vmatprep.subr.bf16.mxu0 %v20325_v8  ;;  %v11316_v40 = vld [vmem:[#allocation4 + $0xc2] sm:$0x1] }
 0x631   : > { %v11317_v32 = vpack.c.bf16 %v11316_v40, %v11316_v40 }
 0x632   : > { %14536 = vmatmul.mubr.msk.bf16.vlgmr.msra.gmra.mxu1 %vm386_vm0, %v10201_v58  ;;  %14624 = vmatmul.mubr.msk.bf16.vlgmr.msra.gmra.mxu0 %vm386_vm0, %v10883_v28  ;;  %v11440_v28 = vld [vmem:[#allocation4 + $0xc6] sm:$0x1] }
 0x633   : > { %14548 = vmatpush3.bf16.msra.mxu1 %v14958_v46  ;;  %14636 = vmatpush3.bf16.msra.mxu0 %v14959_v47  ;;  %v14989_v47 = vld [vmem:[%s19773_s3 + $0x2d0] sm:$0xff]   ;;  %v11441_v52 = vpack.c.bf16 %v11440_v28, %v11440_v28 }
 0x634   : > { %14549 = vmatprep.subr.bf16.mxu1 %v20325_v8  ;;  %14637 = vmatprep.subr.bf16.mxu0 %v20325_v8 }
 0x635   : > { %14551 = vmatprep.mubr.msk.bf16.mxu1 %vm15189_vm1, %v20325_v8  ;;  %14639 = vmatprep.mubr.msk.bf16.mxu0 %vm15189_vm1, %v20325_v8 }
 0x637   : > { %14550 = vmatpush3.bf16.msra.mxu1 %v14960_v57  ;;  %14638 = vmatpush3.bf16.msra.mxu0 %v14961_v23  ;;  %v14990_v23 = vld [vmem:[%s19773_s3 + $0x2f8] sm:$0xff]  }
 0x638   : > { %14563 = vmatprep.subr.bf16.mxu1 %v20325_v8  ;;  %14651 = vmatprep.subr.bf16.mxu0 %v20325_v8 }
 0x63a   : > { %14552 = vmatmul.mubr.msk.bf16.vlgmr.msra.gmra.mxu1 %vm386_vm0, %v10325_v48  ;;  %14640 = vmatmul.mubr.msk.bf16.vlgmr.msra.gmra.mxu0 %vm386_vm0, %v11007_v4  ;;  %v14991_v48 = vld [vmem:[%s19773_s3 + $0x2f0] sm:$0xff]  }
 0x63b   : > { %14564 = vmatpush3.bf16.msra.mxu1 %v14962_v6  ;;  %14652 = vmatpush3.bf16.msra.mxu0 %v14963_v51 }
 0x63c   : > { %14565 = vmatprep.subr.bf16.mxu1 %v20325_v8  ;;  %14653 = vmatprep.subr.bf16.mxu0 %v20325_v8 }
 0x63d   : > { %14567 = vmatprep.mubr.msk.bf16.mxu1 %vm15189_vm1, %v20325_v8  ;;  %14655 = vmatprep.mubr.msk.bf16.mxu0 %vm15189_vm1, %v20325_v8 }
 0x63f   : > { %14566 = vmatpush3.bf16.msra.mxu1 %v14964_v55  ;;  %14654 = vmatpush3.bf16.msra.mxu0 %v14965_v9  ;;  %v11564_v9 = vld [vmem:[#allocation4 + $0xca] sm:$0x1] }
 0x640   : > { %14579 = vmatprep.subr.bf16.mxu1 %v20325_v8  ;;  %14667 = vmatprep.subr.bf16.mxu0 %v20325_v8 }
 0x642   : > { %14568 = vmatmul.mubr.msk.bf16.vlgmr.msra.gmra.mxu1 %vm386_vm0, %v10449_v22  ;;  %14656 = vmatmul.mubr.msk.bf16.vlgmr.msra.gmra.mxu0 %vm386_vm0, %v11131_v18  ;;  %v11565_v18 = vpack.c.bf16 %v11564_v9, %v11564_v9 }
 0x643   : > { %14580 = vmatpush3.bf16.msra.mxu1 %v14966_v35  ;;  %14668 = vmatpush3.bf16.msra.mxu0 %v14967_v54  ;;  %v14992_v35 = vld [vmem:[%s19773_s3 + $0x8] sm:$0xff]  }
 0x644   : > { %14581 = vmatprep.subr.bf16.mxu1 %v20325_v8  ;;  %14669 = vmatprep.subr.bf16.mxu0 %v20325_v8 }
 0x645   : > { %14583 = vmatprep.mubr.msk.bf16.mxu1 %vm15189_vm1, %v20325_v8  ;;  %14671 = vmatprep.mubr.msk.bf16.mxu0 %vm15189_vm1, %v20325_v8 }
 0x647   : > { %14582 = vmatpush3.bf16.msra.mxu1 %v14968_v7  ;;  %14670 = vmatpush3.bf16.msra.mxu0 %v14969_v5 }
 0x648   : > { %14595 = vmatprep.subr.bf16.mxu1 %v20325_v8  ;;  %14683 = vmatprep.subr.bf16.mxu0 %v20325_v8 }
 0x64a   : > { %14584 = vmatmul.mubr.msk.bf16.vlgmr.msra.gmra.mxu1 %vm386_vm0, %v10573_v15  ;;  %14672 = vmatmul.mubr.msk.bf16.vlgmr.msra.gmra.mxu0 %vm386_vm0, %v11255_v33 }
 0x64b   : > { %14596 = vmatpush3.bf16.msra.mxu1 %v14970_v49  ;;  %14684 = vmatpush3.bf16.msra.mxu0 %v14971_v13  ;;  %v8706_v13 = vld [vmem:[#allocation4] sm:$0x1] }
 0x64c   : > { %14597 = vmatprep.subr.bf16.mxu1 %v20325_v8  ;;  %14685 = vmatprep.subr.bf16.mxu0 %v20325_v8  ;;  %v8707_v39 = vpack.c.bf16 %v8706_v13, %v8706_v13 }
 0x64d   : > { %14599 = vmatprep.mubr.msk.bf16.mxu1 %vm15189_vm1, %v20325_v8  ;;  %14687 = vmatprep.mubr.msk.bf16.mxu0 %vm15189_vm1, %v20325_v8 }
 0x64f   : > { %14598 = vmatpush3.bf16.msra.mxu1 %v14972_v3  ;;  %14686 = vmatpush3.bf16.msra.mxu0 %v14973_v61 }
 0x650   : > { %14611 = vmatprep.subr.bf16.mxu1 %v20325_v8  ;;  %14699 = vmatprep.subr.bf16.mxu0 %v20325_v8 }
 0x652   : > { %14600 = vmatmul.mubr.msk.bf16.vlgmr.msra.gmra.mxu1 %vm386_vm0, %v10697_v37  ;;  %14688 = vmatmul.mubr.msk.bf16.vlgmr.msra.gmra.mxu0 %vm386_vm0, %v11379_v60 }
 0x653   : > { %14612 = vmatpush3.bf16.msra.mxu1 %v14974_v36  ;;  %14700 = vmatpush3.bf16.msra.mxu0 %v14975_v38 }
 0x654   : > { %14613 = vmatprep.subr.bf16.mxu1 %v20325_v8  ;;  %14701 = vmatprep.subr.bf16.mxu0 %v20325_v8 }
 0x655   : > { %14615 = vmatprep.mubr.msk.bf16.mxu1 %vm15189_vm1, %v20325_v8  ;;  %14703 = vmatprep.mubr.msk.bf16.mxu0 %vm15189_vm1, %v20325_v8 }
 0x657   : > { %14614 = vmatpush3.bf16.msra.mxu1 %v14976_v44  ;;  %14702 = vmatpush3.bf16.msra.mxu0 %v14977_v2 }
 0x658   : > { %14627 = vmatprep.subr.bf16.mxu1 %v20325_v8  ;;  %14715 = vmatprep.subr.bf16.mxu0 %v20325_v8 }
 0x65a   : > { %14616 = vmatmul.mubr.msk.bf16.vlgmr.msra.gmra.mxu1 %vm386_vm0, %v10821_v63  ;;  %14704 = vmatmul.mubr.msk.bf16.vlgmr.msra.gmra.mxu0 %vm386_vm0, %v11503_v17 }
 0x65b   : > { %14628 = vmatpush3.bf16.msra.mxu1 %v14978_v21  ;;  %14716 = vmatpush3.bf16.msra.mxu0 %v14979_v20 }
 0x65c   : > { %14629 = vmatprep.subr.bf16.mxu1 %v20325_v8  ;;  %14717 = vmatprep.subr.bf16.mxu0 %v20325_v8 }
 0x65d   : > { %14631 = vmatprep.mubr.msk.bf16.mxu1 %vm15189_vm1, %v20325_v8  ;;  %14719 = vmatprep.mubr.msk.bf16.mxu0 %vm15189_vm1, %v20325_v8 }
 0x65f   : > { %14630 = vmatpush3.bf16.msra.mxu1 %v14980_v11  ;;  %14718 = vmatpush3.bf16.msra.mxu0 %v14981_v25 }
 0x660   : > { %14643 = vmatprep.subr.bf16.mxu1 %v20325_v8  ;;  %14731 = vmatprep.subr.bf16.mxu0 %v20325_v8 }
 0x662   : > { %14632 = vmatmul.mubr.msk.bf16.vlgmr.msra.gmra.mxu1 %vm386_vm0, %v10945_v31  ;;  %14720 = vmatmul.mubr.msk.bf16.vlgmr.msra.gmra.mxu0 %vm386_vm0, %v11627_v59 }
 0x663   : > { %14644 = vmatpush3.bf16.msra.mxu1 %v14982_v30  ;;  %14647 = vmatprep.mubr.msk.bf16.mxu1 %vm15189_vm1, %v20325_v8 }
 0x664   : > { %14645 = vmatprep.subr.bf16.mxu1 %v20325_v8  ;;  %14739 = vmatprep.mubr.msk.bf16.mxu0 %vm15189_vm1, %v20325_v8 }
 0x667   : > { %14646 = vmatpush3.bf16.msra.mxu1 %v14983_v16 }
 0x668   : > { %14659 = vmatprep.subr.bf16.mxu1 %v20325_v8 }
 0x66a   : > { %14648 = vmatmul.mubr.msk.bf16.vlgmr.msra.gmra.mxu1 %vm386_vm0, %v11069_v27 }
 0x66b   : > { %14660 = vmatpush3.bf16.msra.mxu1 %v14984_v12  ;;  %14663 = vmatprep.mubr.msk.bf16.mxu1 %vm15189_vm1, %v20325_v8 }
 0x66c   : > { %14661 = vmatprep.subr.bf16.mxu1 %v20325_v8 }
 0x66f   : > { %14662 = vmatpush3.bf16.msra.mxu1 %v14985_v56 }
 0x670   : > { %14675 = vmatprep.subr.bf16.mxu1 %v20325_v8 }
 0x672   : > { %14664 = vmatmul.mubr.msk.bf16.vlgmr.msra.gmra.mxu1 %vm386_vm0, %v11193_v14 }
 0x673   : > { %14676 = vmatpush3.bf16.msra.mxu1 %v14986_v0  ;;  %14679 = vmatprep.mubr.msk.bf16.mxu1 %vm15189_vm1, %v20325_v8 }
 0x674   : > { %14677 = vmatprep.subr.bf16.mxu1 %v20325_v8 }
 0x677   : > { %14678 = vmatpush3.bf16.msra.mxu1 %v14987_v26 }
 0x678   : > { %14691 = vmatprep.subr.bf16.mxu1 %v20325_v8 }
 0x67a   : > { %v19518_v46 = vpop.f32.mrf.mxu1  ;;  %14680 = vmatmul.mubr.msk.bf16.vlgmr.msra.gmra.mxu1 %vm386_vm0, %v11317_v32 }
 0x67b   : > { %14692 = vmatpush3.bf16.msra.mxu1 %v14988_v42  ;;  %14695 = vmatprep.mubr.msk.bf16.mxu1 %vm15189_vm1, %v20325_v8 }
 0x67c   : > { %v14345_v58 = vpop.f32.mrf.mxu1  ;;  %14693 = vmatprep.subr.bf16.mxu1 %v20325_v8 }
 0x67e   : > { %v8771_v57 = vpop.f32.mrf.mxu1 }
 0x67f   : > { %14694 = vmatpush3.bf16.msra.mxu1 %v14989_v47 }
 0x680   : > { %v14346_v45 = vpop.f32.mrf.mxu1  ;;  %14707 = vmatprep.subr.bf16.mxu1 %v20325_v8 }
 0x682   : > { %v19531_v6 = vpop.f32.mrf.mxu1  ;;  %v19533_v51 = vpop.f32.mrf.mxu0  ;;  %14696 = vmatmul.mubr.msk.bf16.vlgmr.msra.gmra.mxu1 %vm386_vm0, %v11441_v52 }
 0x683   : > { %14708 = vmatpush3.bf16.msra.mxu1 %v14990_v23  ;;  %14711 = vmatprep.mubr.msk.bf16.mxu1 %vm15189_vm1, %v20325_v8 }
 0x684   : > { %v14353_v4 = vpop.f32.mrf.mxu1  ;;  %v14401_v55 = vpop.f32.mrf.mxu0  ;;  %14709 = vmatprep.subr.bf16.mxu1 %v20325_v8 }
 0x686   : > { %v8833_v10 = vpop.f32.mrf.mxu1  ;;  %v9205_v29 = vpop.f32.mrf.mxu0 }
 0x687   : > { %14710 = vmatpush3.bf16.msra.mxu1 %v14991_v48 }
 0x688   : > { %v14354_v54 = vpop.f32.mrf.mxu1  ;;  %v14402_v22 = vpop.f32.mrf.mxu0  ;;  %14723 = vmatprep.subr.bf16.mxu1 %v20325_v8 }
 0x68a   : > { %v19546_v7 = vpop.f32.mrf.mxu1  ;;  %v19548_v5 = vpop.f32.mrf.mxu0  ;;  %14712 = vmatmul.mubr.msk.bf16.vlgmr.msra.gmra.mxu1 %vm386_vm0, %v11565_v18 }
 0x68b   : > { %14724 = vmatpush3.bf16.msra.mxu1 %v14992_v35  ;;  %14727 = vmatprep.mubr.msk.bf16.mxu1 %vm15189_vm1, %v20325_v8 }
 0x68c   : > { %v14361_v19 = vpop.f32.mrf.mxu1  ;;  %v14417_v49 = vpop.f32.mrf.mxu0  ;;  %14725 = vmatprep.subr.bf16.mxu1 %v20325_v8 }
 0x68e   : > { %v8895_v15 = vpop.f32.mrf.mxu1  ;;  %v9329_v33 = vpop.f32.mrf.mxu0 }
 0x68f   : > { %14726 = vmatpush3.bf16.msra.mxu1 %v14993_v43 }
 0x690   : > { %v14362_v3 = vpop.f32.mrf.mxu1  ;;  %v14418_v61 = vpop.f32.mrf.mxu0  ;;  %14743 = vmatprep.subr.bf16.mxu1 %v20325_v8 }
 0x692   : > { %v19558_v1 = vpop.f32.mrf.mxu1  ;;  %v19560_v36 = vpop.f32.mrf.mxu0  ;;  %14728 = vmatmul.mubr.msk.bf16.vlgmr.msra.gmra.mxu1 %vm386_vm0, %v8707_v39  ;;  %vm11827_vm0 = vcmask 523264  }
 0x693   : > { %14751 = vmatprep.mubr.msk.bf16.mxu1 %vm15189_vm1, %v20325_v8 }
 0x694   : > { %v14369_v38 = vpop.f32.mrf.mxu1  ;;  %v14433_v37 = vpop.f32.mrf.mxu0 }
 0x696   : > { %v8957_v60 = vpop.f32.mrf.mxu1  ;;  %v9453_v44 = vpop.f32.mrf.mxu0 }
 0x698   : > { %v14370_v2 = vpop.f32.mrf.mxu1  ;;  %v14434_v62 = vpop.f32.mrf.mxu0 }
 0x69a   : > { %v19565_v24 = vpop.f32.mrf.mxu1  ;;  %v19567_v21 = vpop.f32.mrf.mxu0 }
 0x69c   : > { %v14377_v20 = vpop.f32.mrf.mxu1  ;;  %v14449_v63 = vpop.f32.mrf.mxu0 }
 0x69e   : > { %v9019_v17 = vpop.f32.mrf.mxu1  ;;  %v9577_v11 = vpop.f32.mrf.mxu0 }
 0x6a0   : > { %v14378_v25 = vpop.f32.mrf.mxu1  ;;  %v14450_v53 = vpop.f32.mrf.mxu0 }
 0x6a2   : > { %v19569_v34 = vpop.f32.mrf.mxu1  ;;  %v19571_v30 = vpop.f32.mrf.mxu0 }
 0x6a4   : > { %v14385_v31 = vpop.f32.mrf.mxu1  ;;  %v14465_v59 = vpop.f32.mrf.mxu0 }
 0x6a6   : > { %v9081_v16 = vpop.f32.mrf.mxu1  ;;  %v9701_v50 = vpop.f32.mrf.mxu0 }
 0x6a8   : > { %v14386_v12 = vpop.f32.mrf.mxu1  ;;  %v14466_v27 = vpop.f32.mrf.mxu0 }
 0x6aa   : > { %v19573_v56 = vpop.f32.mrf.mxu1  ;;  %v19575_v41 = vpop.f32.mrf.mxu0 }
 0x6ac   : > { %v14393_v0 = vpop.f32.mrf.mxu1  ;;  %v14481_v14 = vpop.f32.mrf.mxu0 }
 0x6ae   : > { %v9143_v26 = vpop.f32.mrf.mxu1  ;;  %v9825_v40 = vpop.f32.mrf.mxu0 }
 0x6b0   : > { %v14394_v42 = vpop.f32.mrf.mxu1  ;;  %v14482_v32 = vpop.f32.mrf.mxu0 }
 0x6b2   : > { %v19577_v47 = vpop.f32.mrf.mxu1  ;;  %v19579_v58 = vpop.f32.mrf.mxu0 }
 0x6b4   : > { %v14409_v28 = vpop.f32.mrf.mxu1  ;;  %v14497_v57 = vpop.f32.mrf.mxu0 }
 0x6b6   : > { %v9267_v23 = vpop.f32.mrf.mxu1  ;;  %v9949_v45 = vpop.f32.mrf.mxu0 }
 0x6b8   : > { %v14410_v52 = vpop.f32.mrf.mxu1  ;;  %v14498_v48 = vpop.f32.mrf.mxu0 }
 0x6ba   : > { %v19581_v4 = vpop.f32.mrf.mxu1  ;;  %v19583_v55 = vpop.f32.mrf.mxu0 }
 0x6bc   : > { %v14425_v9 = vpop.f32.mrf.mxu1  ;;  %v14513_v10 = vpop.f32.mrf.mxu0 }
 0x6be   : > { %v9391_v29 = vpop.f32.mrf.mxu1  ;;  %v10073_v35 = vpop.f32.mrf.mxu0 }
 0x6c0   : > { %v14426_v54 = vpop.f32.mrf.mxu1  ;;  %v14514_v22 = vpop.f32.mrf.mxu0 }
 0x6c2   : > { %v19585_v18 = vpop.f32.mrf.mxu1  ;;  %v19587_v43 = vpop.f32.mrf.mxu0 }
 0x6c4   : > { %v14441_v19 = vpop.f32.mrf.mxu1  ;;  %v14529_v49 = vpop.f32.mrf.mxu0 }
 0x6c6   : > { %v9515_v13 = vpop.f32.mrf.mxu1  ;;  %v10197_v15 = vpop.f32.mrf.mxu0 }
 0x6c8   : > { %v14442_v33 = vpop.f32.mrf.mxu1  ;;  %v14530_v3 = vpop.f32.mrf.mxu0 }
 0x6ca   : > { %v19589_v61 = vpop.f32.mrf.mxu1  ;;  %v19591_v39 = vpop.f32.mrf.mxu0 }
 0x6cc   : > { %v14457_v38 = vpop.f32.mrf.mxu1  ;;  %v14545_v37 = vpop.f32.mrf.mxu0 }
 0x6ce   : > { %v9639_v60 = vpop.f32.mrf.mxu1  ;;  %v10321_v44 = vpop.f32.mrf.mxu0 }
 0x6d0   : > { %v14458_v2 = vpop.f32.mrf.mxu1  ;;  %v14546_v62 = vpop.f32.mrf.mxu0 }
 0x6d2   : > { %v19593_v20 = vpop.f32.mrf.mxu1  ;;  %v19595_v63 = vpop.f32.mrf.mxu0 }
 0x6d4   : > { %v14473_v17 = vpop.f32.mrf.mxu1  ;;  %v14561_v11 = vpop.f32.mrf.mxu0 }
 0x6d6   : > { %v9763_v25 = vpop.f32.mrf.mxu1  ;;  %v10445_v53 = vpop.f32.mrf.mxu0 }
 0x6d8   : > { %v14474_v31 = vpop.f32.mrf.mxu1  ;;  %v14562_v59 = vpop.f32.mrf.mxu0 }
 0x6da   : > { %v19597_v16 = vpop.f32.mrf.mxu1  ;;  %v19599_v50 = vpop.f32.mrf.mxu0 }
 0x6dc   : > { %v14489_v12 = vpop.f32.mrf.mxu1  ;;  %v14577_v27 = vpop.f32.mrf.mxu0 }
 0x6de   : > { %v9887_v0 = vpop.f32.mrf.mxu1  ;;  %v10569_v14 = vpop.f32.mrf.mxu0 }
 0x6e0   : > { %v14490_v26 = vpop.f32.mrf.mxu1  ;;  %v14578_v40 = vpop.f32.mrf.mxu0 }
 0x6e2   : > { %v19601_v42 = vpop.f32.mrf.mxu1  ;;  %v19603_v32 = vpop.f32.mrf.mxu0 }
 0x6e4   : > { %v14505_v28 = vpop.f32.mrf.mxu1  ;;  %v14593_v57 = vpop.f32.mrf.mxu0 }
 0x6e6   : > { %v10011_v23 = vpop.f32.mrf.mxu1  ;;  %v10693_v45 = vpop.f32.mrf.mxu0 }
 0x6e8   : > { %v14506_v52 = vpop.f32.mrf.mxu1  ;;  %v14594_v48 = vpop.f32.mrf.mxu0 }
 0x6e9   : > { %v14994_v52 = vld [vmem:[%s19775_s5 + $0x18] sm:$0xff]  }
 0x6ea   : > { %v19605_v9 = vpop.f32.mrf.mxu1  ;;  %v19607_v10 = vpop.f32.mrf.mxu0  ;;  %14732 = vmatpush3.bf16.msra.mxu0 %v14994_v52 }
 0x6eb   : > { %14733 = vmatprep.subr.bf16.mxu0 %v20325_v8 }
 0x6ec   : > { %v14521_v29 = vpop.f32.mrf.mxu1  ;;  %v14609_v35 = vpop.f32.mrf.mxu0 }
 0x6ed   : > { %v14995_v35 = vld [vmem:[%s19775_s5 + $0x10] sm:$0xff]  }
 0x6ee   : > { %v10135_v54 = vpop.f32.mrf.mxu1  ;;  %v10817_v22 = vpop.f32.mrf.mxu0  ;;  %14734 = vmatpush3.bf16.msra.mxu0 %v14995_v35 }
 0x6ef   : > { %14735 = vmatprep.subr.bf16.mxu0 %v20325_v8 }
 0x6f0   : > { %v14522_v19 = vpop.f32.mrf.mxu1  ;;  %v14610_v49 = vpop.f32.mrf.mxu0 }
 0x6f2   : > { %v19609_v13 = vpop.f32.mrf.mxu1  ;;  %v19611_v15 = vpop.f32.mrf.mxu0 }
 0x6f4   : > { %v14537_v33 = vpop.f32.mrf.mxu1  ;;  %v14625_v3 = vpop.f32.mrf.mxu0 }
 0x6f5   : > { %v14996_v33 = vld [vmem:[%s19775_s5 + $0x8] sm:$0xff]  }
 0x6f6   : > { %v10259_v38 = vpop.f32.mrf.mxu1  ;;  %v10941_v37 = vpop.f32.mrf.mxu0  ;;  %14736 = vmatpush3.bf16.msra.mxu0 %v14996_v33 }
 0x6f7   : > { %14737 = vmatprep.subr.bf16.mxu0 %v20325_v8 }
 0x6f8   : > { %v14538_v60 = vpop.f32.mrf.mxu1  ;;  %v14626_v44 = vpop.f32.mrf.mxu0 }
 0x6f9   : > { %v14997_v44 = vld [vmem:[%s19775_s5] sm:$0xff]  }
 0x6fa   : > { %v19613_v2 = vpop.f32.mrf.mxu1  ;;  %v19615_v62 = vpop.f32.mrf.mxu0  ;;  %14738 = vmatpush3.bf16.msra.mxu0 %v14997_v44 }
 0x6fc   : > { %v14553_v17 = vpop.f32.mrf.mxu1  ;;  %v14641_v11 = vpop.f32.mrf.mxu0 }
 0x6fe   : > { %v10383_v25 = vpop.f32.mrf.mxu1  ;;  %v11065_v53 = vpop.f32.mrf.mxu0 }
 0x700   : > { %v14554_v31 = vpop.f32.mrf.mxu1  ;;  %v14642_v59 = vpop.f32.mrf.mxu0 }
 0x702   : > { %v19617_v12 = vpop.f32.mrf.mxu1  ;;  %v19619_v27 = vpop.f32.mrf.mxu0 }
 0x704   : > { %v14569_v0 = vpop.f32.mrf.mxu1  ;;  %v14657_v14 = vpop.f32.mrf.mxu0 }
 0x706   : > { %v10507_v26 = vpop.f32.mrf.mxu1  ;;  %v11189_v40 = vpop.f32.mrf.mxu0 }
 0x708   : > { %v14570_v28 = vpop.f32.mrf.mxu1  ;;  %v14658_v57 = vpop.f32.mrf.mxu0 }
 0x70a   : > { %v19621_v23 = vpop.f32.mrf.mxu1  ;;  %v19623_v45 = vpop.f32.mrf.mxu0 }
 0x70c   : > { %v14585_v48 = vpop.f32.mrf.mxu1  ;;  %v14673_v29 = vpop.f32.mrf.mxu0 }
 0x70e   : > { %v10631_v54 = vpop.f32.mrf.mxu1  ;;  %v11313_v22 = vpop.f32.mrf.mxu0 }
 0x710   : > { %v14586_v19 = vpop.f32.mrf.mxu1  ;;  %v14674_v49 = vpop.f32.mrf.mxu0 }
 0x712   : > { %v19635_v3 = vpop.f32.mrf.mxu1  ;;  %v19637_v38 = vpop.f32.mrf.mxu0 }
 0x714   : > { %v14601_v37 = vpop.f32.mrf.mxu1  ;;  %v14689_v60 = vpop.f32.mrf.mxu0 }
 0x716   : > { %v10755_v17 = vpop.f32.mrf.mxu1  ;;  %v11437_v11 = vpop.f32.mrf.mxu0 }
 0x718   : > { %v14602_v25 = vpop.f32.mrf.mxu1  ;;  %v14690_v53 = vpop.f32.mrf.mxu0 }
 0x71a   : > { %v19644_v31 = vpop.f32.mrf.mxu1  ;;  %v19646_v59 = vpop.f32.mrf.mxu0 }
 0x71c   : > { %v14617_v0 = vpop.f32.mrf.mxu1  ;;  %v14705_v14 = vpop.f32.mrf.mxu0 }
 0x71d   : > { %v14998_v0 = vld [vmem:[%s19777_s7 + $0x18] sm:$0xff]  }
 0x71e   : > { %v10879_v26 = vpop.f32.mrf.mxu1  ;;  %v11561_v40 = vpop.f32.mrf.mxu0  ;;  %14744 = vmatpush3.bf16.msra.mxu1 %v14998_v0 }
 0x71f   : > { %v14999_v26 = vld [vmem:[%s19777_s7 + $0x10] sm:$0xff]   ;;  %14745 = vmatprep.subr.bf16.mxu1 %v20325_v8 }
 0x720   : > { %v14618_v28 = vpop.f32.mrf.mxu1  ;;  %v14706_v57 = vpop.f32.mrf.mxu0 }
 0x722   : > { %v19648_v52 = vpop.f32.mrf.mxu1  ;;  %v19650_v48 = vpop.f32.mrf.mxu0  ;;  %14746 = vmatpush3.bf16.msra.mxu1 %v14999_v26 }
 0x723   : > { %14747 = vmatprep.subr.bf16.mxu1 %v20325_v8 }
 0x724   : > { %v14633_v29 = vpop.f32.mrf.mxu1  ;;  %v14721_v35 = vpop.f32.mrf.mxu0 }
 0x726   : > { %v11003_v54 = vpop.f32.mrf.mxu1  ;;  %v11685_v22 = vpop.f32.mrf.mxu0 }
 0x728   : > { %v14634_v19 = vpop.f32.mrf.mxu1  ;;  %v14722_v49 = vpop.f32.mrf.mxu0 }
 0x72a   : > { %v19652_v33 = vpop.f32.mrf.mxu1 }
 0x72c   : > { %v14649_v37 = vpop.f32.mrf.mxu1 }
 0x72e   : > { %v11127_v60 = vpop.f32.mrf.mxu1 }
 0x730   : > { %v14650_v44 = vpop.f32.mrf.mxu1 }
 0x732   : > { %v19654_v17 = vpop.f32.mrf.mxu1 }
 0x734   : > { %v14665_v11 = vpop.f32.mrf.mxu1 }
 0x736   : > { %v11251_v25 = vpop.f32.mrf.mxu1 }
 0x738   : > { %v14666_v53 = vpop.f32.mrf.mxu1 }
 0x73a   : > { %v19659_v14 = vpop.f32.mrf.mxu1 }
 0x73c   : > { %v14681_v40 = vpop.f32.mrf.mxu1 }
 0x73e   : > { %v11375_v28 = vpop.f32.mrf.mxu1 }
 0x740   : > { %v14682_v57 = vpop.f32.mrf.mxu1 }
 0x742   : > { %v11496_v29 = vpop.f32.mrf.mxu1 }
 0x744   : > { %v14697_v35 = vpop.f32.mrf.mxu1 }
 0x746   : > { %v11499_v54 = vpop.f32.mrf.mxu1 }
 0x748   : > { %v14698_v22 = vpop.f32.mrf.mxu1 }
 0x74a   : > { %v11620_v19 = vpop.f32.mrf.mxu1 }
 0x74c   : > { %v14713_v49 = vpop.f32.mrf.mxu1 }
 0x74e   : > { %v11623_v37 = vpop.f32.mrf.mxu1 }
 0x750   : > { %v14714_v60 = vpop.f32.mrf.mxu1 }
 0x752   : > { %v11737_v44 = vpop.f32.mrf.mxu1 }
 0x753   : > { %v11738_v11 = vadd.f32 %v11737_v44, %v19518_v46  ;;  %v11790_v44 = vld [vmem:[#allocation10] sm:$0x1] }
 0x754   : > { %v14729_v25 = vpop.f32.mrf.mxu1 }
 0x755   : > { %v11743_v53 = vadd.f32 %v11738_v11, %v19531_v6 }
 0x756   : > { %v11740_v0 = vpop.f32.mrf.mxu1 }
 0x757   : > { %v11744_v26 = vadd.f32 %v11743_v53, %v19546_v7  ;;  %v11881_v53 = vld [vmem:[%s19778_s8] sm:$0x1] }
 0x758   : > { %v14730_v40 = vpop.f32.mrf.mxu1 }
 0x759   : > { %v11745_v28 = vadd.f32 %v11744_v26, %v19558_v1 }
 0x75b   : > { %v11746_v57 = vadd.f32 %v11745_v28, %v19565_v24 }
 0x75d   : > { %v11747_v35 = vadd.f32 %v11746_v57, %v19569_v34 }
 0x75f   : > { %v11748_v54 = vadd.f32 %v11747_v35, %v19573_v56 }
 0x761   : > { %v11749_v22 = vadd.f32 %v11748_v54, %v19533_v51 }
 0x763   : > { %v11750_v49 = vadd.f32 %v11749_v22, %v19577_v47 }
 0x765   : > { %v11751_v46 = vadd.f32 %v11750_v49, %v19548_v5 }
 0x767   : > { %v11752_v6 = vadd.f32 %v11751_v46, %v19581_v4 }
 0x769   : > { %v11753_v37 = vadd.f32 %v11752_v6, %v19560_v36 }
 0x76b   : > { %v11754_v7 = vadd.f32 %v11753_v37, %v19585_v18 }
 0x76d   : > { %v11755_v1 = vadd.f32 %v11754_v7, %v19567_v21 }
 0x76f   : > { %v11756_v24 = vadd.f32 %v11755_v1, %v19589_v61 }
 0x771   : > { %v11757_v34 = vadd.f32 %v11756_v24, %v19571_v30 }
 0x773   : > { %v11758_v56 = vadd.f32 %v11757_v34, %v19593_v20 }
 0x775   : > { %v11759_v51 = vadd.f32 %v11758_v56, %v19575_v41 }
 0x777   : > { %v11760_v47 = vadd.f32 %v11759_v51, %v19597_v16 }
 0x779   : > { %v11761_v5 = vadd.f32 %v11760_v47, %v19579_v58 }
 0x77b   : > { %v11762_v4 = vadd.f32 %v11761_v5, %v19601_v42 }
 0x77d   : > { %v11763_v36 = vadd.f32 %v11762_v4, %v19583_v55 }
 0x77f   : > { %v11764_v18 = vadd.f32 %v11763_v36, %v19605_v9 }
 0x781   : > { %v11765_v21 = vadd.f32 %v11764_v18, %v19587_v43 }
 0x783   : > { %v11766_v61 = vadd.f32 %v11765_v21, %v19609_v13 }
 0x785   : > { %v11767_v30 = vadd.f32 %v11766_v61, %v19591_v39 }
 0x787   : > { %v11768_v20 = vadd.f32 %v11767_v30, %v19613_v2 }
 0x789   : > { %v11769_v41 = vadd.f32 %v11768_v20, %v19595_v63 }
 0x78b   : > { %v11770_v16 = vadd.f32 %v11769_v41, %v19617_v12 }
 0x78d   : > { %v11771_v58 = vadd.f32 %v11770_v16, %v19599_v50 }
 0x78f   : > { %v11772_v42 = vadd.f32 %v11771_v58, %v19621_v23 }
 0x791   : > { %v11773_v55 = vadd.f32 %v11772_v42, %v19603_v32 }
 0x793   : > { %v11774_v9 = vadd.f32 %v11773_v55, %v19635_v3 }
 0x795   : > { %v11775_v43 = vadd.f32 %v11774_v9, %v19607_v10 }
 0x797   : > { %v11776_v13 = vadd.f32 %v11775_v43, %v19644_v31 }
 0x799   : > { %v11777_v39 = vadd.f32 %v11776_v13, %v19611_v15 }
 0x79b   : > { %v11778_v2 = vadd.f32 %v11777_v39, %v19648_v52 }
 0x79d   : > { %v11779_v63 = vadd.f32 %v11778_v2, %v19615_v62 }
 0x79f   : > { %v11780_v12 = vadd.f32 %v11779_v63, %v19652_v33 }
 0x7a1   : > { %v11781_v50 = vadd.f32 %v11780_v12, %v19619_v27  ;;  %v15000_v27 = vld [vmem:[%s19777_s7 + $0x8] sm:$0xff]  }
 0x7a2   : > { %14748 = vmatpush3.bf16.msra.mxu1 %v15000_v27 }
 0x7a3   : > { %v11782_v23 = vadd.f32 %v11781_v50, %v19654_v17  ;;  %14749 = vmatprep.subr.bf16.mxu1 %v20325_v8 }
 0x7a5   : > { %v11783_v32 = vadd.f32 %v11782_v23, %v19623_v45  ;;  %v15001_v45 = vld [vmem:[%s19777_s7] sm:$0xff]  }
 0x7a6   : > { %14750 = vmatpush3.bf16.msra.mxu1 %v15001_v45 }
 0x7a7   : > { %v11784_v3 = vadd.f32 %v11783_v32, %v19659_v14 }
 0x7a9   : > { %v11785_v10 = vadd.f32 %v11784_v3, %v19637_v38  ;;  %v11802_v38 = vld [vmem:[#allocation11] sm:$0x1] }
 0x7ab   : > { %v11786_v60 = vadd.f32 %v11785_v10, %v11496_v29 }
 0x7ad   : > { %v11787_v31 = vadd.f32 %v11786_v60, %v19646_v59 }
 0x7af   : > { %v11788_v15 = vadd.f32 %v11787_v31, %v11620_v19 }
 0x7b1   : > { %v11789_v52 = vadd.f32 %v11788_v15, %v19650_v48 }
 0x7b3   : > { %v11791_v62 = vadd.f32 %v11790_v44, %v11789_v52 }
 0x7b5   : > { %v11792_v11 = vmax.f32 %v11791_v62, 0.0 }
 0x7b7   : > { %v11793_v33 = vpack.c.bf16 %v11792_v11, %v11792_v11 }
 0x7b9   : > { %14740 = vmatmul.mubr.msk.bf16.vlgmr.msra.gmra.mxu0 %vm11827_vm0, %v11793_v33 }
 0x879   : > { %v11865_v59 = vpop.f32.mrf.mxu0 }
 0x87a   : > { %v11866_v48 = vadd.f32 %v11865_v59, %v11802_v38 }
 0x87b   : > { %v14741_v17 = vpop.f32.mrf.mxu0 }
 0x87c   : > { %v11871_v14 = vmax.f32 %v11866_v48, 0.0 }
 0x87d   : > { %v11868_v29 = vpop.f32.mrf.mxu0 }
 0x87e   : > { %v11872_v19 = vpack.c.bf16 %v11871_v14, %v11871_v14 }
 0x87f   : > { %v14742_v25 = vpop.f32.mrf.mxu0 }
 0x880   : > { %14752 = vmatmul.mubr.msk.bf16.vlgmr.msra.gmra.mxu1 %vm11827_vm0, %v11872_v19 }
 0x940   : > { %v11943_v8 = vpop.f32.mrf.mxu1 }
 0x941   : > { %v11944_v0 = vadd.f32 %v11943_v8, %v11881_v53 }
 0x942   : > { %v14753_v26 = vpop.f32.mrf.mxu1 }
 0x943   : > { %11950 = vst.msk [vmem:[%s379_s21] sm:$0x1] %vm11949_vm2, %v11944_v0 }
 0x944   : > { %v11946_v40 = vpop.f32.mrf.mxu1 }
 0x945   : > { %15119 = shalt.err (!%p15116_p0)
}
 0x946   : > { %s15120_s28 = scalar_lea.hbm %s19729_s16, 16  ;;  %s15124_s23 = scalar_lea.hbm %s19779_s9, 32 }
 0x947   : > { %p15121_p9 = scmp.ne.s32.totalorder %s19729_s16, %s15120_s28  ;;  %p15125_p6 = scmp.lt.s32.totalorder %s19729_s16, %s19779_s9 }
 0x948   : > { %p15126_p12 = scmp.lt.s32.totalorder %s15124_s23, %s15120_s28 }
 0x949   : > { %p15122_p13 = pnand %p15121_p9, %p20332_p3 }
 0x94a   : > { %p15127_p10 = por %p15126_p12, %p15125_p6 }
 0x94b   : > { %p15123_p5 = pneg %p15122_p13 }
 0x94d   : > { %p15128_p2 = pnand %p15127_p10, %p15123_p5 }
 0x94f   : > { %15131 = shalt.err (!%p15128_p2)
}
 0x950   : > { %14772 = dma.vmem_to_hbm [thread:$0]  (%p20332_p3), %s19731_s24, 16, %s19729_s16, %s11952_s17   ;;  %v14754_v28 = vpop.f32.mrf.mxu1 }
 0x951 PF: > { %p14799_p4 = scmp.ge.s32.totalorder %s15178_s12, 2  ;;  %s11976_s14 = sand.u32 1, %s15166_s30  }
 0x952   : > { %p20333_p7 = scmp.ne.s32.totalorder %s19835_s20, 0  ;;  %s11977_s13 = scalar_lea.sflag [#allocation7], %s11976_s14 }
 0x954   : > { %p14788_p8 = pnand %p14799_p4, %p20333_p7 }
 0x956   : > { %p14789_p11 = pneg %p14788_p8 }
 0x958   : > { %15161 = dma.done.wait (%p14789_p11), %s11977_s13, 16  }
 0x959   : > { %15163 = vsyncadd (%p14789_p11), %s11977_s13, 4294967280  ;;  %p22_p1 = scmp.ge.s32.totalorder %s15266_s15, 4   ;;  %s20334_s30 = smov %s15170_s10 }
 0x95a   : > { %s20335_s10 = smov %s15174_s11  ;;  %s20336_s11 = smov %s15277_s18 }
 0x95b   : > { %s20337_s12 = smov %s15266_s15  ;;  %24 = sbr.rel (!%p22_p1) target bundleno = 8 (0x8), region = 197 }
 0x960   :  { %11981 = vsyncpa [#allocation6], 1 }
 0x961   :  { %11983 = vsyncpa [#allocation6 + $0x1], 1 }
 0x962   :  { %11984 = vsyncpa [#allocation9], 1 }
 0x963   :  { %11985 = vsyncpa [#allocation12], 1 }
 0x964   :  { %11986 = vsyncpa [#allocation7], 1 }
 0x965   :  { %11988 = vsyncpa [#allocation7 + $0x1], 1 }

</bundles_post_ra>
